<compile_context>
chip_gen: v6e
topology: v6e:2x2x1
jax: 0.10.0
libtpu: 0.0.40
codegen_flags: <defaults>
</compile_context>

<pallas_src>
import functools
import math

import jax
import jax.numpy as jnp
from jax.experimental import pallas as pl
from jax.experimental.pallas import tpu as pltpu


# ----------------------------------------------------------------------------
# Core Pallas GEMM kernel (used for every conv)
# ----------------------------------------------------------------------------
def _gemm_kernel(x_ref, w_ref, b_ref, *rest, act, has_res, pool):
    o_ref = rest[-1]
    # MXU in bf16, f32 accumulation; epilogue stays f32 (safe on v5e's f32-only VPU).
    acc = jnp.dot(x_ref[0].astype(jnp.bfloat16), w_ref[0],
                  preferred_element_type=jnp.float32)
    y = acc + b_ref[0]                                   # folded BN / linear bias
    if has_res:
        y = y + rest[0][0].astype(jnp.float32)           # fused residual add
    if act == "relu":
        y = jnp.maximum(y, 0.0)
    elif act == "sigmoid":
        y = jax.nn.sigmoid(y)
    if pool is None:
        o_ref[0] = y.astype(o_ref.dtype)
    else:
        # Fused global spatial sum: rows of y are batch-major B*HW pixels.
        # Cross-sublane reduction (XLU) instead of an iota mask + degenerate matmul.
        bsz, hw = pool
        o_ref[0] = y.reshape(bsz, hw, y.shape[-1]).sum(axis=1).astype(o_ref.dtype)


def gemm(x, w, b, *, act=None, residual=None, pool=None,
         out_dtype=jnp.bfloat16, tm=1024):
    """x:(G,M,K) float; w:(G,K,N) bf16 (BN folded); b:(G,1,N) f32; residual:(G,M,N)|None.

    Returns (G,M,N) out_dtype, or (G,B,N) f32 per-batch spatial sums when
    pool=(B, HW) (requires M == B*HW to fit a single M block)."""
    G, K, N = w.shape
    assert x.ndim == 3 and x.shape[0] == G and x.shape[2] == K, (x.shape, w.shape)
    M = x.shape[1]
    # Full-extent M block when it fits (always legal), else an 8-aligned tile.  tm=1024
    # keeps >=2 parallel grid steps for the one large trunk conv (v7x dual-TC) while
    # everything else runs as a single block (min fixed grid-step overhead).
    tm_eff = M if M <= tm else tm
    nm = pl.cdiv(M, tm_eff)

    in_specs = [
        pl.BlockSpec((1, tm_eff, K), lambda g, m: (g, m, 0)),
        pl.BlockSpec((1, K, N), lambda g, m: (g, 0, 0)),
        pl.BlockSpec((1, 1, N), lambda g, m: (g, 0, 0)),
    ]
    args = [x, w, b]
    if residual is not None:
        in_specs.append(pl.BlockSpec((1, tm_eff, N), lambda g, m: (g, m, 0)))
        args.append(residual)

    if pool is None:
        out_spec = pl.BlockSpec((1, tm_eff, N), lambda g, m: (g, m, 0))
        out_shape = jax.ShapeDtypeStruct((G, M, N), out_dtype)
    else:
        bsz, hw = pool
        assert nm == 1 and M == bsz * hw
        out_spec = pl.BlockSpec((1, bsz, N), lambda g, m: (g, 0, 0))
        out_shape = jax.ShapeDtypeStruct((G, bsz, N), jnp.float32)

    return pl.pallas_call(
        functools.partial(_gemm_kernel, act=act,
                          has_res=residual is not None, pool=pool),
        out_shape=out_shape,
        grid_spec=pltpu.PrefetchScalarGridSpec(
            num_scalar_prefetch=0,
            grid=(G, nm),
            in_specs=in_specs,
            out_specs=out_spec,
        ),
        compiler_params=pltpu.CompilerParams(
            dimension_semantics=("parallel", "parallel"),
            vmem_limit_bytes=32 * 1024 * 1024),
    )(*args)


# ----------------------------------------------------------------------------
# Fused guiding-tail kernels (one Pallas call per stage)
# ----------------------------------------------------------------------------
def _head_kernel(f_ref, w_ref, b_ref, o_ref, *, scale):
    # s = fc(avgpool(f)) with the 1/HW scale folded into the epilogue.
    f = (f_ref[...] * scale).astype(jnp.bfloat16)
    o_ref[...] = (jnp.dot(f, w_ref[...], preferred_element_type=jnp.float32)
                  + b_ref[...])


def head_fc(f_sum, p, scale):
    B = f_sum.shape[0]
    n = p["w"].shape[-1]
    return pl.pallas_call(
        functools.partial(_head_kernel, scale=scale),
        out_shape=jax.ShapeDtypeStruct((B, n), jnp.float32),
    )(f_sum, p["w"], p["b"])


def _stage_kernel(s_ref, fg_ref, fr_ref, wg_ref, bg_ref, wt_ref, wb_ref, bc_ref,
                  o_ref, *, inv_hw):
    # (a) softmax of the (detached) previous-stage scores -- stop_gradient is a no-op
    #     in this forward-only kernel.
    s = s_ref[...]
    e = jnp.exp(s - jnp.max(s, axis=-1, keepdims=True))
    p = e / jnp.sum(e, axis=-1, keepdims=True)
    # (b) channel-wise sigmoid gate from the prior (EmbedGuiding approximation).
    gate = jax.nn.sigmoid(
        jnp.dot(p.astype(jnp.bfloat16), wg_ref[...],
                preferred_element_type=jnp.float32) + bg_ref[...])
    # (c) gate is spatially constant, so sum_hw(gate * f) == gate * sum_hw(f).
    fg = (gate * fg_ref[...]).astype(jnp.bfloat16)           # guided features  (B, C)
    fr = (fr_ref[...] * inv_hw).astype(jnp.bfloat16)         # raw avgpool      (B, C)
    # (d) (fc_raw + fc_guide + fc_cat)/3 folded into two half-matmuls + one bias.
    o_ref[...] = (jnp.dot(fg, wt_ref[...], preferred_element_type=jnp.float32)
                  + jnp.dot(fr, wb_ref[...], preferred_element_type=jnp.float32)
                  + bc_ref[...])


def guided_stage(s_prev, f_g_sum, f_r_sum, gate_p, fc_p, inv_hw):
    B = s_prev.shape[0]
    n_out = fc_p["wt"].shape[-1]
    return pl.pallas_call(
        functools.partial(_stage_kernel, inv_hw=inv_hw),
        out_shape=jax.ShapeDtypeStruct((B, n_out), jnp.float32),
    )(s_prev, f_g_sum, f_r_sum, gate_p["w"], gate_p["b"],
      fc_p["wt"], fc_p["wb"], fc_p["b"])


# ----------------------------------------------------------------------------
# Conv / pool glue (patch extraction in XLA, all math in the Pallas GEMM kernel)
# ----------------------------------------------------------------------------
def _im2col(x, kh, kw, stride, pad):
    # x: (..., H, W, C) -> (..., Ho, Wo, kh*kw*C)
    # TODO(synk): patch extraction stays in XLA; an in-kernel haloed tap loop would avoid
    # re-reading the activation kh*kw times but is unnecessary at width=8 / 64x64 inputs.
    *lead, H, W, C = x.shape
    xp = jnp.pad(x, [(0, 0)] * len(lead) + [(pad, pad), (pad, pad), (0, 0)])
    Ho = (H + 2 * pad - kh) // stride + 1
    Wo = (W + 2 * pad - kw) // stride + 1
    taps = []
    for i in range(kh):
        for j in range(kw):
            taps.append(xp[..., i:i + stride * Ho:stride, j:j + stride * Wo:stride, :])
    return jnp.concatenate(taps, axis=-1), Ho, Wo


def conv_bn(x, p, *, stride=1, pad=0, act=None, residual=None, pool=False,
            out_dtype=jnp.bfloat16):
    """x:(G,B,H,W,Cin). Returns (G,B,Ho,Wo,Cout) bf16, or (G,B,Cout) f32 spatial sums."""
    G, B, H, W, Cin = x.shape
    kh, kw = p["kh"], p["kw"]
    if kh == 1 and kw == 1:
        if stride > 1:
            x = x[:, :, ::stride, ::stride, :]
        Ho, Wo = x.shape[2], x.shape[3]
        cols = x.reshape(G, B * Ho * Wo, Cin)          # 1x1 conv == plain matmul
    else:
        cols, Ho, Wo = _im2col(x, kh, kw, stride, pad)
        cols = cols.reshape(G, B * Ho * Wo, kh * kw * Cin)
    Cout = p["w"].shape[-1]
    res = None
    if residual is not None:
        res = residual.reshape(G, B * Ho * Wo, Cout)
    y = gemm(cols, p["w"], p["b"], act=act, residual=res,
             pool=(B, Ho * Wo) if pool else None, out_dtype=out_dtype)
    if pool:
        return y                                       # (G, B, Cout) f32 spatial sums
    return y.reshape(G, B, Ho, Wo, Cout)


def maxpool3x3_s2(x):
    # XLA maximum-chain over the 9 taps (no stacked 9x HBM copy, fused by XLA).
    *lead, H, W, C = x.shape
    xp = jnp.pad(x, [(0, 0)] * len(lead) + [(1, 1), (1, 1), (0, 0)],
                 constant_values=-jnp.inf)
    Ho = (H - 1) // 2 + 1
    Wo = (W - 1) // 2 + 1
    out = None
    for i in range(3):
        for j in range(3):
            s = xp[..., i:i + 2 * Ho:2, j:j + 2 * Wo:2, :]
            out = s if out is None else jnp.maximum(out, s)
    return out


# ----------------------------------------------------------------------------
# ResNet building blocks
# ----------------------------------------------------------------------------
def bottleneck(x, blk, *, pool=False):
    stride = blk["stride"]
    h = conv_bn(x, blk["conv1"], stride=1, pad=0, act="relu")
    h = conv_bn(h, blk["conv2"], stride=stride, pad=1, act="relu")
    if "down" in blk:
        idn = conv_bn(x, blk["down"], stride=stride, pad=0, act=None)
    else:
        idn = x
    # conv3 + BN + residual add + ReLU fused in one kernel epilogue; when `pool`,
    # the global spatial sum is fused there as well.
    return conv_bn(h, blk["conv3"], stride=1, pad=0, act="relu",
                   residual=idn, pool=pool)


def run_layer(x, layer, *, pool_last=False):
    n = len(layer)
    for i, blk in enumerate(layer):
        x = bottleneck(x, blk, pool=(pool_last and i == n - 1))
    return x


# ----------------------------------------------------------------------------
# Parameter init (deterministic, synthetic — replaces torch.hub pretrained weights).
# Inference-mode BN is folded into the conv weight/bias here, once, at init.
# ----------------------------------------------------------------------------
def _make_conv_bn(key, kh, kw, cin, cout, groups=1):
    w = jax.random.normal(key, (kh, kw, cin, cout), jnp.float32) / math.sqrt(kh * kw * cin)
    gamma = jnp.ones((cout,), jnp.float32)
    beta = jnp.zeros((cout,), jnp.float32)
    mean = jnp.zeros((cout,), jnp.float32)
    var = jnp.ones((cout,), jnp.float32)
    scale = gamma * jax.lax.rsqrt(var + 1e-5)
    wf = (w * scale).reshape(kh * kw * cin, cout)
    bf = beta - mean * scale
    return {"kh": kh, "kw": kw,
            "w": jnp.tile(wf[None], (groups, 1, 1)).astype(jnp.bfloat16),
            "b": jnp.tile(bf[None, None], (groups, 1, 1)).astype(jnp.float32)}


def _make_bottleneck(key, cin, planes, stride, groups=1):
    k1, k2, k3, k4 = jax.random.split(key, 4)
    blk = {"stride": stride,
           "conv1": _make_conv_bn(k1, 1, 1, cin, planes, groups),
           "conv2": _make_conv_bn(k2, 3, 3, planes, planes, groups),
           "conv3": _make_conv_bn(k3, 1, 1, planes, planes * 4, groups)}
    if stride != 1 or cin != planes * 4:
        blk["down"] = _make_conv_bn(k4, 1, 1, cin, planes * 4, groups)
    return blk


def _make_layer(key, cin, planes, nblocks, stride, groups=1):
    keys = jax.random.split(key, nblocks)
    blocks = [_make_bottleneck(keys[0], cin, planes, stride, groups)]
    for i in range(1, nblocks):
        blocks.append(_make_bottleneck(keys[i], planes * 4, planes, 1, groups))
    return blocks


def _raw_linear(key, cin, cout):
    kw, kb = jax.random.split(key)
    W = jax.random.normal(kw, (cin, cout), jnp.float32) / math.sqrt(cin)
    b = jax.random.normal(kb, (cout,), jnp.float32) * 0.01
    return W, b


def _make_linear(key, cin, cout):
    W, b = _raw_linear(key, cin, cout)
    return {"w": W.astype(jnp.bfloat16), "b": b[None].astype(jnp.float32)}


def _make_combined_fc(kg, kr, kc, C, n):
    # (fc_raw + fc_guide + fc_cat)/3 is itself one linear map of cat(f_guided, f_raw_avg);
    # fold the three heads and the /3 into two half-matmul weights + one bias.
    Wg, bg = _raw_linear(kg, C, n)           # fc_*_guide   (applies to guided features)
    Wr, br = _raw_linear(kr, C, n)           # fc_*_raw     (applies to raw avgpool)
    Wc, bc = _raw_linear(kc, 2 * C, n)       # fc_*_cat
    return {"wt": ((Wg + Wc[:C]) / 3.0).astype(jnp.bfloat16),
            "wb": ((Wr + Wc[C:]) / 3.0).astype(jnp.bfloat16),
            "b": ((bg + br + bc) / 3.0)[None].astype(jnp.float32)}


def init_params(key, cdict, width=8):
    w = width
    keys = jax.random.split(key, 16)
    p = {}
    p["conv1"] = _make_conv_bn(keys[0], 7, 7, 3, w)
    p["layer1"] = _make_layer(keys[1], w, w, 3, 1)
    p["layer2"] = _make_layer(keys[2], 4 * w, 2 * w, 4, 2)
    p["layer3"] = _make_layer(keys[3], 8 * w, 4 * w, 6, 2)
    # All 7 branch_* modules of the PyTorch model are deepcopies of trunk.layer4 with
    # identical (pretrained) weights, so a single copy is stored and computed (groups=1).
    # Set groups=7 here (and broadcast f_share in forward) if branches ever diverge.
    p["layer4"] = _make_layer(keys[4], 16 * w, 8 * w, 3, 2, groups=1)
    C = 32 * w   # layer4 output channels (analog of 2048)
    p["fc_L1"] = _make_linear(keys[5], C, cdict["order"])
    p["fc_L2_comb"] = _make_combined_fc(keys[6], keys[7], keys[8], C, cdict["family"])
    p["fc_L3_comb"] = _make_combined_fc(keys[9], keys[10], keys[11], C, cdict["genus"])
    p["fc_L4_comb"] = _make_combined_fc(keys[12], keys[13], keys[14], C, cdict["class"])
    kg = jax.random.split(keys[15], 3)
    # TODO(synk): EmbedGuiding source was not provided; approximated as a channel-wise
    # sigmoid gate computed from an embedding of the (detached, softmaxed) prior scores.
    p["G12"] = _make_linear(kg[0], cdict["order"], C)
    p["G23"] = _make_linear(kg[1], cdict["family"], C)
    p["G34"] = _make_linear(kg[2], cdict["genus"], C)
    return p


# ----------------------------------------------------------------------------
# ResNetEmbed forward
# ----------------------------------------------------------------------------
def forward(params, x_nchw):
    x = jnp.transpose(x_nchw, (0, 2, 3, 1)).astype(jnp.bfloat16)[None]   # (1,B,H,W,3)

    # (1) trunk: conv1 / bn1 / relu / maxpool / layer1 / layer2 / layer3
    f = conv_bn(x, params["conv1"], stride=2, pad=3, act="relu")
    f = maxpool3x3_s2(f)
    f = run_layer(f, params["layer1"])
    f = run_layer(f, params["layer2"])
    f_share = run_layer(f, params["layer3"])             # (1, B, Hs, Ws, 16w)

    # (2) layer4: the 7 logical branches (L1, L2_guide/raw, L3_guide/raw, L4_guide/raw)
    #     are deepcopies with identical weights consuming the same f_share, so their
    #     outputs are bit-identical -> compute once; the final bottleneck emits a fused
    #     per-batch spatial sum, so only a (B, C) f32 result leaves the kernel.
    pooled = run_layer(f_share, params["layer4"], pool_last=True)   # (1, B, C) f32
    f4_sum = pooled[0]                                              # shared by all branches

    Hs, Ws = f_share.shape[2], f_share.shape[3]
    h4 = (Hs + 2 - 3) // 2 + 1
    w4 = (Ws + 2 - 3) // 2 + 1
    inv_hw = 1.0 / float(h4 * w4)                        # spatial sum -> global avgpool

    # (2b) L1 scores  (avgpool scale + fc_L1 fused in one tiny kernel)
    s_l1 = head_fc(f4_sum, params["fc_L1"], inv_hw)

    # (3) L1 guides L2 / (4) L2 guides L3 / (5) L3 guides L4.
    # Each stage = ONE fused kernel: softmax(prev scores) -> sigmoid gate -> gated and
    # raw half-matmuls of the folded fc_raw/fc_guide/fc_cat head (+ /3 and 1/HW folded).
    s_l2_avg = guided_stage(s_l1, f4_sum, f4_sum,
                            params["G12"], params["fc_L2_comb"], inv_hw)
    s_l3_avg = guided_stage(s_l2_avg, f4_sum, f4_sum,
                            params["G23"], params["fc_L3_comb"], inv_hw)
    s_l4_avg = guided_stage(s_l3_avg, f4_sum, f4_sum,
                            params["G34"], params["fc_L4_comb"], inv_hw)

    return s_l1, s_l2_avg, s_l3_avg, s_l4_avg


if __name__ == "__main__":
    cdict = {"order": 4, "family": 6, "genus": 8, "class": 10}
    key = jax.random.PRNGKey(0)
    kp, kx = jax.random.split(key)
    params = init_params(kp, cdict, width=8)
    x = jax.random.normal(kx, (2, 3, 64, 64), jnp.float32)   # NCHW, like PyTorch

    fwd = jax.jit(lambda xx: forward(params, xx))
    out = fwd(x)
    jax.block_until_ready(out)

    s1, s2, s3, s4 = out
    assert s1.shape == (2, cdict["order"])
    assert s2.shape == (2, cdict["family"])
    assert s3.shape == (2, cdict["genus"])
    assert s4.shape == (2, cdict["class"])
    print("KERNEL_OK")
</pallas_src>

<mosaic_0001>
module attributes {stable_mosaic.version = 11 : i64} {
  func.func @_gemm_kernel(%arg0: i32, %arg1: i32, %arg2: memref<1x1024x147xbf16, #tpu.memory_space<vmem>>, %arg3: memref<1x147x8xbf16, #tpu.memory_space<vmem>>, %arg4: memref<1x1x8xf32, #tpu.memory_space<vmem>>, %arg5: memref<1x1024x8xbf16, #tpu.memory_space<vmem>>) attributes {dimension_semantics = [#tpu.dimension_semantics<parallel>, #tpu.dimension_semantics<parallel>], iteration_bounds = array<i64: 1, 2>, scalar_prefetch = 0 : i64, scratch_operands = 0 : i64, tpu.core_type = #tpu.core_type<tc>, window_params = [{transform_indices = @transform_0, window_bounds = array<i64: 1, 1024, 147>}, {transform_indices = @transform_1, window_bounds = array<i64: 1, 147, 8>}, {transform_indices = @transform_2, window_bounds = array<i64: 1, 1, 8>}, {transform_indices = @transform_3, window_bounds = array<i64: 1, 1024, 8>}]} {
    %c0 = arith.constant 0 : index
    %c0_0 = arith.constant 0 : index
    %c0_1 = arith.constant 0 : index
    %0 = vector.load %arg2[%c0, %c0_0, %c0_1] : memref<1x1024x147xbf16, #tpu.memory_space<vmem>>, vector<1x1024x147xbf16>
    %1 = vector.shape_cast %0 : vector<1x1024x147xbf16> to vector<1024x147xbf16>
    %c0_2 = arith.constant 0 : index
    %c0_3 = arith.constant 0 : index
    %c0_4 = arith.constant 0 : index
    %2 = vector.load %arg3[%c0_2, %c0_3, %c0_4] : memref<1x147x8xbf16, #tpu.memory_space<vmem>>, vector<1x147x8xbf16>
    %3 = vector.shape_cast %2 : vector<1x147x8xbf16> to vector<147x8xbf16>
    %cst = arith.constant dense<0.000000e+00> : vector<1024x8xf32>
    %4 = tpu.matmul %1, %3, %cst {dimension_numbers = #tpu.dot_dimension_numbers<[1], [0], [0], [1], [0, 0, 1, 1], [], []>} : vector<1024x147xbf16>, vector<147x8xbf16>, vector<1024x8xf32> -> vector<1024x8xf32>
    %c0_5 = arith.constant 0 : index
    %c0_6 = arith.constant 0 : index
    %c0_7 = arith.constant 0 : index
    %5 = vector.load %arg4[%c0_5, %c0_6, %c0_7] : memref<1x1x8xf32, #tpu.memory_space<vmem>>, vector<1x1x8xf32>
    %6 = vector.shape_cast %5 : vector<1x1x8xf32> to vector<1x8xf32>
    %7 = vector.broadcast %6 : vector<1x8xf32> to vector<1024x8xf32>
    %8 = arith.addf %4, %7 : vector<1024x8xf32>
    %cst_8 = arith.constant 0.000000e+00 : f32
    %9 = vector.broadcast %cst_8 : f32 to vector<1024x8xf32>
    %10 = arith.maximumf %8, %9 : vector<1024x8xf32>
    %11 = arith.truncf %10 : vector<1024x8xf32> to vector<1024x8xbf16>
    %c0_9 = arith.constant 0 : index
    %c0_10 = arith.constant 0 : index
    %c0_11 = arith.constant 0 : index
    %12 = vector.load %arg5[%c0_9, %c0_10, %c0_11] : memref<1x1024x8xbf16, #tpu.memory_space<vmem>>, vector<1x1024x8xbf16>
    %13 = vector.shape_cast %12 : vector<1x1024x8xbf16> to vector<1024x8xbf16>
    %14 = vector.shape_cast %11 : vector<1024x8xbf16> to vector<1x1024x8xbf16>
    tpu.vector_store %arg5[%c0_9, %c0_10, %c0_11], %14 {strides = array<i32>} : memref<1x1024x8xbf16, #tpu.memory_space<vmem>>, vector<1x1024x8xbf16>,
    return
  }
  func.func @transform_0(%arg0: i32, %arg1: i32) -> (i32, i32, i32) {
    %c0_i32 = arith.constant 0 : i32
    %c0_i32_0 = arith.constant 0 : i32
    return %arg0, %arg1, %c0_i32 : i32, i32, i32
  }
  func.func @transform_1(%arg0: i32, %arg1: i32) -> (i32, i32, i32) {
    %c0_i32 = arith.constant 0 : i32
    %c0_i32_0 = arith.constant 0 : i32
    %c0_i32_1 = arith.constant 0 : i32
    return %arg0, %c0_i32, %c0_i32_0 : i32, i32, i32
  }
  func.func @transform_2(%arg0: i32, %arg1: i32) -> (i32, i32, i32) {
    %c0_i32 = arith.constant 0 : i32
    %c0_i32_0 = arith.constant 0 : i32
    %c0_i32_1 = arith.constant 0 : i32
    return %arg0, %c0_i32, %c0_i32_0 : i32, i32, i32
  }
  func.func @transform_3(%arg0: i32, %arg1: i32) -> (i32, i32, i32) {
    %c0_i32 = arith.constant 0 : i32
    %c0_i32_0 = arith.constant 0 : i32
    return %arg0, %arg1, %c0_i32 : i32, i32, i32
  }
}

module attributes {stable_mosaic.version = 11 : i64} {
  func.func @_gemm_kernel(%arg0: i32, %arg1: i32, %arg2: memref<1x512x8xbf16, #tpu.memory_space<vmem>>, %arg3: memref<1x8x8xbf16, #tpu.memory_space<vmem>>, %arg4: memref<1x1x8xf32, #tpu.memory_space<vmem>>, %arg5: memref<1x512x8xbf16, #tpu.memory_space<vmem>>) attributes {dimension_semantics = [#tpu.dimension_semantics<parallel>, #tpu.dimension_semantics<parallel>], iteration_bounds = array<i64: 1, 1>, scalar_prefetch = 0 : i64, scratch_operands = 0 : i64, tpu.core_type = #tpu.core_type<tc>, window_params = [{transform_indices = @transform_0, window_bounds = array<i64: 1, 512, 8>}, {transform_indices = @transform_1, window_bounds = array<i64: 1, 8, 8>}, {transform_indices = @transform_2, window_bounds = array<i64: 1, 1, 8>}, {transform_indices = @transform_3, window_bounds = array<i64: 1, 512, 8>}]} {
    %c0 = arith.constant 0 : index
    %c0_0 = arith.constant 0 : index
    %c0_1 = arith.constant 0 : index
    %0 = vector.load %arg2[%c0, %c0_0, %c0_1] : memref<1x512x8xbf16, #tpu.memory_space<vmem>>, vector<1x512x8xbf16>
    %1 = vector.shape_cast %0 : vector<1x512x8xbf16> to vector<512x8xbf16>
    %c0_2 = arith.constant 0 : index
    %c0_3 = arith.constant 0 : index
    %c0_4 = arith.constant 0 : index
    %2 = vector.load %arg3[%c0_2, %c0_3, %c0_4] : memref<1x8x8xbf16, #tpu.memory_space<vmem>>, vector<1x8x8xbf16>
    %3 = vector.shape_cast %2 : vector<1x8x8xbf16> to vector<8x8xbf16>
    %cst = arith.constant dense<0.000000e+00> : vector<512x8xf32>
    %4 = tpu.matmul %1, %3, %cst {dimension_numbers = #tpu.dot_dimension_numbers<[1], [0], [0], [1], [0, 0, 1, 1], [], []>} : vector<512x8xbf16>, vector<8x8xbf16>, vector<512x8xf32> -> vector<512x8xf32>
    %c0_5 = arith.constant 0 : index
    %c0_6 = arith.constant 0 : index
    %c0_7 = arith.constant 0 : index
    %5 = vector.load %arg4[%c0_5, %c0_6, %c0_7] : memref<1x1x8xf32, #tpu.memory_space<vmem>>, vector<1x1x8xf32>
    %6 = vector.shape_cast %5 : vector<1x1x8xf32> to vector<1x8xf32>
    %7 = vector.broadcast %6 : vector<1x8xf32> to vector<512x8xf32>
    %8 = arith.addf %4, %7 : vector<512x8xf32>
    %cst_8 = arith.constant 0.000000e+00 : f32
    %9 = vector.broadcast %cst_8 : f32 to vector<512x8xf32>
    %10 = arith.maximumf %8, %9 : vector<512x8xf32>
    %11 = arith.truncf %10 : vector<512x8xf32> to vector<512x8xbf16>
    %c0_9 = arith.constant 0 : index
    %c0_10 = arith.constant 0 : index
    %c0_11 = arith.constant 0 : index
    %12 = vector.load %arg5[%c0_9, %c0_10, %c0_11] : memref<1x512x8xbf16, #tpu.memory_space<vmem>>, vector<1x512x8xbf16>
    %13 = vector.shape_cast %12 : vector<1x512x8xbf16> to vector<512x8xbf16>
    %14 = vector.shape_cast %11 : vector<512x8xbf16> to vector<1x512x8xbf16>
    tpu.vector_store %arg5[%c0_9, %c0_10, %c0_11], %14 {strides = array<i32>} : memref<1x512x8xbf16, #tpu.memory_space<vmem>>, vector<1x512x8xbf16>,
    return
  }
  func.func @transform_0(%arg0: i32, %arg1: i32) -> (i32, i32, i32) {
    %c0_i32 = arith.constant 0 : i32
    %c0_i32_0 = arith.constant 0 : i32
    return %arg0, %arg1, %c0_i32 : i32, i32, i32
  }
  func.func @transform_1(%arg0: i32, %arg1: i32) -> (i32, i32, i32) {
    %c0_i32 = arith.constant 0 : i32
    %c0_i32_0 = arith.constant 0 : i32
    %c0_i32_1 = arith.constant 0 : i32
    return %arg0, %c0_i32, %c0_i32_0 : i32, i32, i32
  }
  func.func @transform_2(%arg0: i32, %arg1: i32) -> (i32, i32, i32) {
    %c0_i32 = arith.constant 0 : i32
    %c0_i32_0 = arith.constant 0 : i32
    %c0_i32_1 = arith.constant 0 : i32
    return %arg0, %c0_i32, %c0_i32_0 : i32, i32, i32
  }
  func.func @transform_3(%arg0: i32, %arg1: i32) -> (i32, i32, i32) {
    %c0_i32 = arith.constant 0 : i32
    %c0_i32_0 = arith.constant 0 : i32
    return %arg0, %arg1, %c0_i32 : i32, i32, i32
  }
}

module attributes {stable_mosaic.version = 11 : i64} {
  func.func @_gemm_kernel(%arg0: i32, %arg1: i32, %arg2: memref<1x512x72xbf16, #tpu.memory_space<vmem>>, %arg3: memref<1x72x8xbf16, #tpu.memory_space<vmem>>, %arg4: memref<1x1x8xf32, #tpu.memory_space<vmem>>, %arg5: memref<1x512x8xbf16, #tpu.memory_space<vmem>>) attributes {dimension_semantics = [#tpu.dimension_semantics<parallel>, #tpu.dimension_semantics<parallel>], iteration_bounds = array<i64: 1, 1>, scalar_prefetch = 0 : i64, scratch_operands = 0 : i64, tpu.core_type = #tpu.core_type<tc>, window_params = [{transform_indices = @transform_0, window_bounds = array<i64: 1, 512, 72>}, {transform_indices = @transform_1, window_bounds = array<i64: 1, 72, 8>}, {transform_indices = @transform_2, window_bounds = array<i64: 1, 1, 8>}, {transform_indices = @transform_3, window_bounds = array<i64: 1, 512, 8>}]} {
    %c0 = arith.constant 0 : index
    %c0_0 = arith.constant 0 : index
    %c0_1 = arith.constant 0 : index
    %0 = vector.load %arg2[%c0, %c0_0, %c0_1] : memref<1x512x72xbf16, #tpu.memory_space<vmem>>, vector<1x512x72xbf16>
    %1 = vector.shape_cast %0 : vector<1x512x72xbf16> to vector<512x72xbf16>
    %c0_2 = arith.constant 0 : index
    %c0_3 = arith.constant 0 : index
    %c0_4 = arith.constant 0 : index
    %2 = vector.load %arg3[%c0_2, %c0_3, %c0_4] : memref<1x72x8xbf16, #tpu.memory_space<vmem>>, vector<1x72x8xbf16>
    %3 = vector.shape_cast %2 : vector<1x72x8xbf16> to vector<72x8xbf16>
    %cst = arith.constant dense<0.000000e+00> : vector<512x8xf32>
    %4 = tpu.matmul %1, %3, %cst {dimension_numbers = #tpu.dot_dimension_numbers<[1], [0], [0], [1], [0, 0, 1, 1], [], []>} : vector<512x72xbf16>, vector<72x8xbf16>, vector<512x8xf32> -> vector<512x8xf32>
    %c0_5 = arith.constant 0 : index
    %c0_6 = arith.constant 0 : index
    %c0_7 = arith.constant 0 : index
    %5 = vector.load %arg4[%c0_5, %c0_6, %c0_7] : memref<1x1x8xf32, #tpu.memory_space<vmem>>, vector<1x1x8xf32>
    %6 = vector.shape_cast %5 : vector<1x1x8xf32> to vector<1x8xf32>
    %7 = vector.broadcast %6 : vector<1x8xf32> to vector<512x8xf32>
    %8 = arith.addf %4, %7 : vector<512x8xf32>
    %cst_8 = arith.constant 0.000000e+00 : f32
    %9 = vector.broadcast %cst_8 : f32 to vector<512x8xf32>
    %10 = arith.maximumf %8, %9 : vector<512x8xf32>
    %11 = arith.truncf %10 : vector<512x8xf32> to vector<512x8xbf16>
    %c0_9 = arith.constant 0 : index
    %c0_10 = arith.constant 0 : index
    %c0_11 = arith.constant 0 : index
    %12 = vector.load %arg5[%c0_9, %c0_10, %c0_11] : memref<1x512x8xbf16, #tpu.memory_space<vmem>>, vector<1x512x8xbf16>
    %13 = vector.shape_cast %12 : vector<1x512x8xbf16> to vector<512x8xbf16>
    %14 = vector.shape_cast %11 : vector<512x8xbf16> to vector<1x512x8xbf16>
    tpu.vector_store %arg5[%c0_9, %c0_10, %c0_11], %14 {strides = array<i32>} : memref<1x512x8xbf16, #tpu.memory_space<vmem>>, vector<1x512x8xbf16>,
    return
  }
  func.func @transform_0(%arg0: i32, %arg1: i32) -> (i32, i32, i32) {
    %c0_i32 = arith.constant 0 : i32
    %c0_i32_0 = arith.constant 0 : i32
    return %arg0, %arg1, %c0_i32 : i32, i32, i32
  }
  func.func @transform_1(%arg0: i32, %arg1: i32) -> (i32, i32, i32) {
    %c0_i32 = arith.constant 0 : i32
    %c0_i32_0 = arith.constant 0 : i32
    %c0_i32_1 = arith.constant 0 : i32
    return %arg0, %c0_i32, %c0_i32_0 : i32, i32, i32
  }
  func.func @transform_2(%arg0: i32, %arg1: i32) -> (i32, i32, i32) {
    %c0_i32 = arith.constant 0 : i32
    %c0_i32_0 = arith.constant 0 : i32
    %c0_i32_1 = arith.constant 0 : i32
    return %arg0, %c0_i32, %c0_i32_0 : i32, i32, i32
  }
  func.func @transform_3(%arg0: i32, %arg1: i32) -> (i32, i32, i32) {
    %c0_i32 = arith.constant 0 : i32
    %c0_i32_0 = arith.constant 0 : i32
    return %arg0, %arg1, %c0_i32 : i32, i32, i32
  }
}

module attributes {stable_mosaic.version = 11 : i64} {
  func.func @_gemm_kernel(%arg0: i32, %arg1: i32, %arg2: memref<1x512x8xbf16, #tpu.memory_space<vmem>>, %arg3: memref<1x8x32xbf16, #tpu.memory_space<vmem>>, %arg4: memref<1x1x32xf32, #tpu.memory_space<vmem>>, %arg5: memref<1x512x32xbf16, #tpu.memory_space<vmem>>) attributes {dimension_semantics = [#tpu.dimension_semantics<parallel>, #tpu.dimension_semantics<parallel>], iteration_bounds = array<i64: 1, 1>, scalar_prefetch = 0 : i64, scratch_operands = 0 : i64, tpu.core_type = #tpu.core_type<tc>, window_params = [{transform_indices = @transform_0, window_bounds = array<i64: 1, 512, 8>}, {transform_indices = @transform_1, window_bounds = array<i64: 1, 8, 32>}, {transform_indices = @transform_2, window_bounds = array<i64: 1, 1, 32>}, {transform_indices = @transform_3, window_bounds = array<i64: 1, 512, 32>}]} {
    %c0 = arith.constant 0 : index
    %c0_0 = arith.constant 0 : index
    %c0_1 = arith.constant 0 : index
    %0 = vector.load %arg2[%c0, %c0_0, %c0_1] : memref<1x512x8xbf16, #tpu.memory_space<vmem>>, vector<1x512x8xbf16>
    %1 = vector.shape_cast %0 : vector<1x512x8xbf16> to vector<512x8xbf16>
    %c0_2 = arith.constant 0 : index
    %c0_3 = arith.constant 0 : index
    %c0_4 = arith.constant 0 : index
    %2 = vector.load %arg3[%c0_2, %c0_3, %c0_4] : memref<1x8x32xbf16, #tpu.memory_space<vmem>>, vector<1x8x32xbf16>
    %3 = vector.shape_cast %2 : vector<1x8x32xbf16> to vector<8x32xbf16>
    %cst = arith.constant dense<0.000000e+00> : vector<512x32xf32>
    %4 = tpu.matmul %1, %3, %cst {dimension_numbers = #tpu.dot_dimension_numbers<[1], [0], [0], [1], [0, 0, 1, 1], [], []>} : vector<512x8xbf16>, vector<8x32xbf16>, vector<512x32xf32> -> vector<512x32xf32>
    %c0_5 = arith.constant 0 : index
    %c0_6 = arith.constant 0 : index
    %c0_7 = arith.constant 0 : index
    %5 = vector.load %arg4[%c0_5, %c0_6, %c0_7] : memref<1x1x32xf32, #tpu.memory_space<vmem>>, vector<1x1x32xf32>
    %6 = vector.shape_cast %5 : vector<1x1x32xf32> to vector<1x32xf32>
    %7 = vector.broadcast %6 : vector<1x32xf32> to vector<512x32xf32>
    %8 = arith.addf %4, %7 : vector<512x32xf32>
    %9 = arith.truncf %8 : vector<512x32xf32> to vector<512x32xbf16>
    %c0_8 = arith.constant 0 : index
    %c0_9 = arith.constant 0 : index
    %c0_10 = arith.constant 0 : index
    %10 = vector.load %arg5[%c0_8, %c0_9, %c0_10] : memref<1x512x32xbf16, #tpu.memory_space<vmem>>, vector<1x512x32xbf16>
    %11 = vector.shape_cast %10 : vector<1x512x32xbf16> to vector<512x32xbf16>
    %12 = vector.shape_cast %9 : vector<512x32xbf16> to vector<1x512x32xbf16>
    tpu.vector_store %arg5[%c0_8, %c0_9, %c0_10], %12 {strides = array<i32>} : memref<1x512x32xbf16, #tpu.memory_space<vmem>>, vector<1x512x32xbf16>,
    return
  }
  func.func @transform_0(%arg0: i32, %arg1: i32) -> (i32, i32, i32) {
    %c0_i32 = arith.constant 0 : i32
    %c0_i32_0 = arith.constant 0 : i32
    return %arg0, %arg1, %c0_i32 : i32, i32, i32
  }
  func.func @transform_1(%arg0: i32, %arg1: i32) -> (i32, i32, i32) {
    %c0_i32 = arith.constant 0 : i32
    %c0_i32_0 = arith.constant 0 : i32
    %c0_i32_1 = arith.constant 0 : i32
    return %arg0, %c0_i32, %c0_i32_0 : i32, i32, i32
  }
  func.func @transform_2(%arg0: i32, %arg1: i32) -> (i32, i32, i32) {
    %c0_i32 = arith.constant 0 : i32
    %c0_i32_0 = arith.constant 0 : i32
    %c0_i32_1 = arith.constant 0 : i32
    return %arg0, %c0_i32, %c0_i32_0 : i32, i32, i32
  }
  func.func @transform_3(%arg0: i32, %arg1: i32) -> (i32, i32, i32) {
    %c0_i32 = arith.constant 0 : i32
    %c0_i32_0 = arith.constant 0 : i32
    return %arg0, %arg1, %c0_i32 : i32, i32, i32
  }
}

module attributes {stable_mosaic.version = 11 : i64} {
  func.func @_gemm_kernel(%arg0: i32, %arg1: i32, %arg2: memref<1x512x8xbf16, #tpu.memory_space<vmem>>, %arg3: memref<1x8x32xbf16, #tpu.memory_space<vmem>>, %arg4: memref<1x1x32xf32, #tpu.memory_space<vmem>>, %arg5: memref<1x512x32xbf16, #tpu.memory_space<vmem>>, %arg6: memref<1x512x32xbf16, #tpu.memory_space<vmem>>) attributes {dimension_semantics = [#tpu.dimension_semantics<parallel>, #tpu.dimension_semantics<parallel>], iteration_bounds = array<i64: 1, 1>, scalar_prefetch = 0 : i64, scratch_operands = 0 : i64, tpu.core_type = #tpu.core_type<tc>, window_params = [{transform_indices = @transform_0, window_bounds = array<i64: 1, 512, 8>}, {transform_indices = @transform_1, window_bounds = array<i64: 1, 8, 32>}, {transform_indices = @transform_2, window_bounds = array<i64: 1, 1, 32>}, {transform_indices = @transform_3, window_bounds = array<i64: 1, 512, 32>}, {transform_indices = @transform_4, window_bounds = array<i64: 1, 512, 32>}]} {
    %c0 = arith.constant 0 : index
    %c0_0 = arith.constant 0 : index
    %c0_1 = arith.constant 0 : index
    %0 = vector.load %arg2[%c0, %c0_0, %c0_1] : memref<1x512x8xbf16, #tpu.memory_space<vmem>>, vector<1x512x8xbf16>
    %1 = vector.shape_cast %0 : vector<1x512x8xbf16> to vector<512x8xbf16>
    %c0_2 = arith.constant 0 : index
    %c0_3 = arith.constant 0 : index
    %c0_4 = arith.constant 0 : index
    %2 = vector.load %arg3[%c0_2, %c0_3, %c0_4] : memref<1x8x32xbf16, #tpu.memory_space<vmem>>, vector<1x8x32xbf16>
    %3 = vector.shape_cast %2 : vector<1x8x32xbf16> to vector<8x32xbf16>
    %cst = arith.constant dense<0.000000e+00> : vector<512x32xf32>
    %4 = tpu.matmul %1, %3, %cst {dimension_numbers = #tpu.dot_dimension_numbers<[1], [0], [0], [1], [0, 0, 1, 1], [], []>} : vector<512x8xbf16>, vector<8x32xbf16>, vector<512x32xf32> -> vector<512x32xf32>
    %c0_5 = arith.constant 0 : index
    %c0_6 = arith.constant 0 : index
    %c0_7 = arith.constant 0 : index
    %5 = vector.load %arg4[%c0_5, %c0_6, %c0_7] : memref<1x1x32xf32, #tpu.memory_space<vmem>>, vector<1x1x32xf32>
    %6 = vector.shape_cast %5 : vector<1x1x32xf32> to vector<1x32xf32>
    %7 = vector.broadcast %6 : vector<1x32xf32> to vector<512x32xf32>
    %8 = arith.addf %4, %7 : vector<512x32xf32>
    %c0_8 = arith.constant 0 : index
    %c0_9 = arith.constant 0 : index
    %c0_10 = arith.constant 0 : index
    %9 = vector.load %arg5[%c0_8, %c0_9, %c0_10] : memref<1x512x32xbf16, #tpu.memory_space<vmem>>, vector<1x512x32xbf16>
    %10 = vector.shape_cast %9 : vector<1x512x32xbf16> to vector<512x32xbf16>
    %11 = arith.extf %10 : vector<512x32xbf16> to vector<512x32xf32>
    %12 = arith.addf %8, %11 : vector<512x32xf32>
    %cst_11 = arith.constant 0.000000e+00 : f32
    %13 = vector.broadcast %cst_11 : f32 to vector<512x32xf32>
    %14 = arith.maximumf %12, %13 : vector<512x32xf32>
    %15 = arith.truncf %14 : vector<512x32xf32> to vector<512x32xbf16>
    %c0_12 = arith.constant 0 : index
    %c0_13 = arith.constant 0 : index
    %c0_14 = arith.constant 0 : index
    %16 = vector.load %arg6[%c0_12, %c0_13, %c0_14] : memref<1x512x32xbf16, #tpu.memory_space<vmem>>, vector<1x512x32xbf16>
    %17 = vector.shape_cast %16 : vector<1x512x32xbf16> to vector<512x32xbf16>
    %18 = vector.shape_cast %15 : vector<512x32xbf16> to vector<1x512x32xbf16>
    tpu.vector_store %arg6[%c0_12, %c0_13, %c0_14], %18 {strides = array<i32>} : memref<1x512x32xbf16, #tpu.memory_space<vmem>>, vector<1x512x32xbf16>,
    return
  }
  func.func @transform_0(%arg0: i32, %arg1: i32) -> (i32, i32, i32) {
    %c0_i32 = arith.constant 0 : i32
    %c0_i32_0 = arith.constant 0 : i32
    return %arg0, %arg1, %c0_i32 : i32, i32, i32
  }
  func.func @transform_1(%arg0: i32, %arg1: i32) -> (i32, i32, i32) {
    %c0_i32 = arith.constant 0 : i32
    %c0_i32_0 = arith.constant 0 : i32
    %c0_i32_1 = arith.constant 0 : i32
    return %arg0, %c0_i32, %c0_i32_0 : i32, i32, i32
  }
  func.func @transform_2(%arg0: i32, %arg1: i32) -> (i32, i32, i32) {
    %c0_i32 = arith.constant 0 : i32
    %c0_i32_0 = arith.constant 0 : i32
    %c0_i32_1 = arith.constant 0 : i32
    return %arg0, %c0_i32, %c0_i32_0 : i32, i32, i32
  }
  func.func @transform_3(%arg0: i32, %arg1: i32) -> (i32, i32, i32) {
    %c0_i32 = arith.constant 0 : i32
    %c0_i32_0 = arith.constant 0 : i32
    return %arg0, %arg1, %c0_i32 : i32, i32, i32
  }
  func.func @transform_4(%arg0: i32, %arg1: i32) -> (i32, i32, i32) {
    %c0_i32 = arith.constant 0 : i32
    %c0_i32_0 = arith.constant 0 : i32
    return %arg0, %arg1, %c0_i32 : i32, i32, i32
  }
}

module attributes {stable_mosaic.version = 11 : i64} {
  func.func @_gemm_kernel(%arg0: i32, %arg1: i32, %arg2: memref<1x512x32xbf16, #tpu.memory_space<vmem>>, %arg3: memref<1x32x8xbf16, #tpu.memory_space<vmem>>, %arg4: memref<1x1x8xf32, #tpu.memory_space<vmem>>, %arg5: memref<1x512x8xbf16, #tpu.memory_space<vmem>>) attributes {dimension_semantics = [#tpu.dimension_semantics<parallel>, #tpu.dimension_semantics<parallel>], iteration_bounds = array<i64: 1, 1>, scalar_prefetch = 0 : i64, scratch_operands = 0 : i64, tpu.core_type = #tpu.core_type<tc>, window_params = [{transform_indices = @transform_0, window_bounds = array<i64: 1, 512, 32>}, {transform_indices = @transform_1, window_bounds = array<i64: 1, 32, 8>}, {transform_indices = @transform_2, window_bounds = array<i64: 1, 1, 8>}, {transform_indices = @transform_3, window_bounds = array<i64: 1, 512, 8>}]} {
    %c0 = arith.constant 0 : index
    %c0_0 = arith.constant 0 : index
    %c0_1 = arith.constant 0 : index
    %0 = vector.load %arg2[%c0, %c0_0, %c0_1] : memref<1x512x32xbf16, #tpu.memory_space<vmem>>, vector<1x512x32xbf16>
    %1 = vector.shape_cast %0 : vector<1x512x32xbf16> to vector<512x32xbf16>
    %c0_2 = arith.constant 0 : index
    %c0_3 = arith.constant 0 : index
    %c0_4 = arith.constant 0 : index
    %2 = vector.load %arg3[%c0_2, %c0_3, %c0_4] : memref<1x32x8xbf16, #tpu.memory_space<vmem>>, vector<1x32x8xbf16>
    %3 = vector.shape_cast %2 : vector<1x32x8xbf16> to vector<32x8xbf16>
    %cst = arith.constant dense<0.000000e+00> : vector<512x8xf32>
    %4 = tpu.matmul %1, %3, %cst {dimension_numbers = #tpu.dot_dimension_numbers<[1], [0], [0], [1], [0, 0, 1, 1], [], []>} : vector<512x32xbf16>, vector<32x8xbf16>, vector<512x8xf32> -> vector<512x8xf32>
    %c0_5 = arith.constant 0 : index
    %c0_6 = arith.constant 0 : index
    %c0_7 = arith.constant 0 : index
    %5 = vector.load %arg4[%c0_5, %c0_6, %c0_7] : memref<1x1x8xf32, #tpu.memory_space<vmem>>, vector<1x1x8xf32>
    %6 = vector.shape_cast %5 : vector<1x1x8xf32> to vector<1x8xf32>
    %7 = vector.broadcast %6 : vector<1x8xf32> to vector<512x8xf32>
    %8 = arith.addf %4, %7 : vector<512x8xf32>
    %cst_8 = arith.constant 0.000000e+00 : f32
    %9 = vector.broadcast %cst_8 : f32 to vector<512x8xf32>
    %10 = arith.maximumf %8, %9 : vector<512x8xf32>
    %11 = arith.truncf %10 : vector<512x8xf32> to vector<512x8xbf16>
    %c0_9 = arith.constant 0 : index
    %c0_10 = arith.constant 0 : index
    %c0_11 = arith.constant 0 : index
    %12 = vector.load %arg5[%c0_9, %c0_10, %c0_11] : memref<1x512x8xbf16, #tpu.memory_space<vmem>>, vector<1x512x8xbf16>
    %13 = vector.shape_cast %12 : vector<1x512x8xbf16> to vector<512x8xbf16>
    %14 = vector.shape_cast %11 : vector<512x8xbf16> to vector<1x512x8xbf16>
    tpu.vector_store %arg5[%c0_9, %c0_10, %c0_11], %14 {strides = array<i32>} : memref<1x512x8xbf16, #tpu.memory_space<vmem>>, vector<1x512x8xbf16>,
    return
  }
  func.func @transform_0(%arg0: i32, %arg1: i32) -> (i32, i32, i32) {
    %c0_i32 = arith.constant 0 : i32
    %c0_i32_0 = arith.constant 0 : i32
    return %arg0, %arg1, %c0_i32 : i32, i32, i32
  }
  func.func @transform_1(%arg0: i32, %arg1: i32) -> (i32, i32, i32) {
    %c0_i32 = arith.constant 0 : i32
    %c0_i32_0 = arith.constant 0 : i32
    %c0_i32_1 = arith.constant 0 : i32
    return %arg0, %c0_i32, %c0_i32_0 : i32, i32, i32
  }
  func.func @transform_2(%arg0: i32, %arg1: i32) -> (i32, i32, i32) {
    %c0_i32 = arith.constant 0 : i32
    %c0_i32_0 = arith.constant 0 : i32
    %c0_i32_1 = arith.constant 0 : i32
    return %arg0, %c0_i32, %c0_i32_0 : i32, i32, i32
  }
  func.func @transform_3(%arg0: i32, %arg1: i32) -> (i32, i32, i32) {
    %c0_i32 = arith.constant 0 : i32
    %c0_i32_0 = arith.constant 0 : i32
    return %arg0, %arg1, %c0_i32 : i32, i32, i32
  }
}

module attributes {stable_mosaic.version = 11 : i64} {
  func.func @_gemm_kernel(%arg0: i32, %arg1: i32, %arg2: memref<1x512x32xbf16, #tpu.memory_space<vmem>>, %arg3: memref<1x32x16xbf16, #tpu.memory_space<vmem>>, %arg4: memref<1x1x16xf32, #tpu.memory_space<vmem>>, %arg5: memref<1x512x16xbf16, #tpu.memory_space<vmem>>) attributes {dimension_semantics = [#tpu.dimension_semantics<parallel>, #tpu.dimension_semantics<parallel>], iteration_bounds = array<i64: 1, 1>, scalar_prefetch = 0 : i64, scratch_operands = 0 : i64, tpu.core_type = #tpu.core_type<tc>, window_params = [{transform_indices = @transform_0, window_bounds = array<i64: 1, 512, 32>}, {transform_indices = @transform_1, window_bounds = array<i64: 1, 32, 16>}, {transform_indices = @transform_2, window_bounds = array<i64: 1, 1, 16>}, {transform_indices = @transform_3, window_bounds = array<i64: 1, 512, 16>}]} {
    %c0 = arith.constant 0 : index
    %c0_0 = arith.constant 0 : index
    %c0_1 = arith.constant 0 : index
    %0 = vector.load %arg2[%c0, %c0_0, %c0_1] : memref<1x512x32xbf16, #tpu.memory_space<vmem>>, vector<1x512x32xbf16>
    %1 = vector.shape_cast %0 : vector<1x512x32xbf16> to vector<512x32xbf16>
    %c0_2 = arith.constant 0 : index
    %c0_3 = arith.constant 0 : index
    %c0_4 = arith.constant 0 : index
    %2 = vector.load %arg3[%c0_2, %c0_3, %c0_4] : memref<1x32x16xbf16, #tpu.memory_space<vmem>>, vector<1x32x16xbf16>
    %3 = vector.shape_cast %2 : vector<1x32x16xbf16> to vector<32x16xbf16>
    %cst = arith.constant dense<0.000000e+00> : vector<512x16xf32>
    %4 = tpu.matmul %1, %3, %cst {dimension_numbers = #tpu.dot_dimension_numbers<[1], [0], [0], [1], [0, 0, 1, 1], [], []>} : vector<512x32xbf16>, vector<32x16xbf16>, vector<512x16xf32> -> vector<512x16xf32>
    %c0_5 = arith.constant 0 : index
    %c0_6 = arith.constant 0 : index
    %c0_7 = arith.constant 0 : index
    %5 = vector.load %arg4[%c0_5, %c0_6, %c0_7] : memref<1x1x16xf32, #tpu.memory_space<vmem>>, vector<1x1x16xf32>
    %6 = vector.shape_cast %5 : vector<1x1x16xf32> to vector<1x16xf32>
    %7 = vector.broadcast %6 : vector<1x16xf32> to vector<512x16xf32>
    %8 = arith.addf %4, %7 : vector<512x16xf32>
    %cst_8 = arith.constant 0.000000e+00 : f32
    %9 = vector.broadcast %cst_8 : f32 to vector<512x16xf32>
    %10 = arith.maximumf %8, %9 : vector<512x16xf32>
    %11 = arith.truncf %10 : vector<512x16xf32> to vector<512x16xbf16>
    %c0_9 = arith.constant 0 : index
    %c0_10 = arith.constant 0 : index
    %c0_11 = arith.constant 0 : index
    %12 = vector.load %arg5[%c0_9, %c0_10, %c0_11] : memref<1x512x16xbf16, #tpu.memory_space<vmem>>, vector<1x512x16xbf16>
    %13 = vector.shape_cast %12 : vector<1x512x16xbf16> to vector<512x16xbf16>
    %14 = vector.shape_cast %11 : vector<512x16xbf16> to vector<1x512x16xbf16>
    tpu.vector_store %arg5[%c0_9, %c0_10, %c0_11], %14 {strides = array<i32>} : memref<1x512x16xbf16, #tpu.memory_space<vmem>>, vector<1x512x16xbf16>,
    return
  }
  func.func @transform_0(%arg0: i32, %arg1: i32) -> (i32, i32, i32) {
    %c0_i32 = arith.constant 0 : i32
    %c0_i32_0 = arith.constant 0 : i32
    return %arg0, %arg1, %c0_i32 : i32, i32, i32
  }
  func.func @transform_1(%arg0: i32, %arg1: i32) -> (i32, i32, i32) {
    %c0_i32 = arith.constant 0 : i32
    %c0_i32_0 = arith.constant 0 : i32
    %c0_i32_1 = arith.constant 0 : i32
    return %arg0, %c0_i32, %c0_i32_0 : i32, i32, i32
  }
  func.func @transform_2(%arg0: i32, %arg1: i32) -> (i32, i32, i32) {
    %c0_i32 = arith.constant 0 : i32
    %c0_i32_0 = arith.constant 0 : i32
    %c0_i32_1 = arith.constant 0 : i32
    return %arg0, %c0_i32, %c0_i32_0 : i32, i32, i32
  }
  func.func @transform_3(%arg0: i32, %arg1: i32) -> (i32, i32, i32) {
    %c0_i32 = arith.constant 0 : i32
    %c0_i32_0 = arith.constant 0 : i32
    return %arg0, %arg1, %c0_i32 : i32, i32, i32
  }
}

module attributes {stable_mosaic.version = 11 : i64} {
  func.func @_gemm_kernel(%arg0: i32, %arg1: i32, %arg2: memref<1x128x144xbf16, #tpu.memory_space<vmem>>, %arg3: memref<1x144x16xbf16, #tpu.memory_space<vmem>>, %arg4: memref<1x1x16xf32, #tpu.memory_space<vmem>>, %arg5: memref<1x128x16xbf16, #tpu.memory_space<vmem>>) attributes {dimension_semantics = [#tpu.dimension_semantics<parallel>, #tpu.dimension_semantics<parallel>], iteration_bounds = array<i64: 1, 1>, scalar_prefetch = 0 : i64, scratch_operands = 0 : i64, tpu.core_type = #tpu.core_type<tc>, window_params = [{transform_indices = @transform_0, window_bounds = array<i64: 1, 128, 144>}, {transform_indices = @transform_1, window_bounds = array<i64: 1, 144, 16>}, {transform_indices = @transform_2, window_bounds = array<i64: 1, 1, 16>}, {transform_indices = @transform_3, window_bounds = array<i64: 1, 128, 16>}]} {
    %c0 = arith.constant 0 : index
    %c0_0 = arith.constant 0 : index
    %c0_1 = arith.constant 0 : index
    %0 = vector.load %arg2[%c0, %c0_0, %c0_1] : memref<1x128x144xbf16, #tpu.memory_space<vmem>>, vector<1x128x144xbf16>
    %1 = vector.shape_cast %0 : vector<1x128x144xbf16> to vector<128x144xbf16>
    %c0_2 = arith.constant 0 : index
    %c0_3 = arith.constant 0 : index
    %c0_4 = arith.constant 0 : index
    %2 = vector.load %arg3[%c0_2, %c0_3, %c0_4] : memref<1x144x16xbf16, #tpu.memory_space<vmem>>, vector<1x144x16xbf16>
    %3 = vector.shape_cast %2 : vector<1x144x16xbf16> to vector<144x16xbf16>
    %cst = arith.constant dense<0.000000e+00> : vector<128x16xf32>
    %4 = tpu.matmul %1, %3, %cst {dimension_numbers = #tpu.dot_dimension_numbers<[1], [0], [0], [1], [0, 0, 1, 1], [], []>} : vector<128x144xbf16>, vector<144x16xbf16>, vector<128x16xf32> -> vector<128x16xf32>
    %c0_5 = arith.constant 0 : index
    %c0_6 = arith.constant 0 : index
    %c0_7 = arith.constant 0 : index
    %5 = vector.load %arg4[%c0_5, %c0_6, %c0_7] : memref<1x1x16xf32, #tpu.memory_space<vmem>>, vector<1x1x16xf32>
    %6 = vector.shape_cast %5 : vector<1x1x16xf32> to vector<1x16xf32>
    %7 = vector.broadcast %6 : vector<1x16xf32> to vector<128x16xf32>
    %8 = arith.addf %4, %7 : vector<128x16xf32>
    %cst_8 = arith.constant 0.000000e+00 : f32
    %9 = vector.broadcast %cst_8 : f32 to vector<128x16xf32>
    %10 = arith.maximumf %8, %9 : vector<128x16xf32>
    %11 = arith.truncf %10 : vector<128x16xf32> to vector<128x16xbf16>
    %c0_9 = arith.constant 0 : index
    %c0_10 = arith.constant 0 : index
    %c0_11 = arith.constant 0 : index
    %12 = vector.load %arg5[%c0_9, %c0_10, %c0_11] : memref<1x128x16xbf16, #tpu.memory_space<vmem>>, vector<1x128x16xbf16>
    %13 = vector.shape_cast %12 : vector<1x128x16xbf16> to vector<128x16xbf16>
    %14 = vector.shape_cast %11 : vector<128x16xbf16> to vector<1x128x16xbf16>
    tpu.vector_store %arg5[%c0_9, %c0_10, %c0_11], %14 {strides = array<i32>} : memref<1x128x16xbf16, #tpu.memory_space<vmem>>, vector<1x128x16xbf16>,
    return
  }
  func.func @transform_0(%arg0: i32, %arg1: i32) -> (i32, i32, i32) {
    %c0_i32 = arith.constant 0 : i32
    %c0_i32_0 = arith.constant 0 : i32
    return %arg0, %arg1, %c0_i32 : i32, i32, i32
  }
  func.func @transform_1(%arg0: i32, %arg1: i32) -> (i32, i32, i32) {
    %c0_i32 = arith.constant 0 : i32
    %c0_i32_0 = arith.constant 0 : i32
    %c0_i32_1 = arith.constant 0 : i32
    return %arg0, %c0_i32, %c0_i32_0 : i32, i32, i32
  }
  func.func @transform_2(%arg0: i32, %arg1: i32) -> (i32, i32, i32) {
    %c0_i32 = arith.constant 0 : i32
    %c0_i32_0 = arith.constant 0 : i32
    %c0_i32_1 = arith.constant 0 : i32
    return %arg0, %c0_i32, %c0_i32_0 : i32, i32, i32
  }
  func.func @transform_3(%arg0: i32, %arg1: i32) -> (i32, i32, i32) {
    %c0_i32 = arith.constant 0 : i32
    %c0_i32_0 = arith.constant 0 : i32
    return %arg0, %arg1, %c0_i32 : i32, i32, i32
  }
}

module attributes {stable_mosaic.version = 11 : i64} {
  func.func @_gemm_kernel(%arg0: i32, %arg1: i32, %arg2: memref<1x128x32xbf16, #tpu.memory_space<vmem>>, %arg3: memref<1x32x64xbf16, #tpu.memory_space<vmem>>, %arg4: memref<1x1x64xf32, #tpu.memory_space<vmem>>, %arg5: memref<1x128x64xbf16, #tpu.memory_space<vmem>>) attributes {dimension_semantics = [#tpu.dimension_semantics<parallel>, #tpu.dimension_semantics<parallel>], iteration_bounds = array<i64: 1, 1>, scalar_prefetch = 0 : i64, scratch_operands = 0 : i64, tpu.core_type = #tpu.core_type<tc>, window_params = [{transform_indices = @transform_0, window_bounds = array<i64: 1, 128, 32>}, {transform_indices = @transform_1, window_bounds = array<i64: 1, 32, 64>}, {transform_indices = @transform_2, window_bounds = array<i64: 1, 1, 64>}, {transform_indices = @transform_3, window_bounds = array<i64: 1, 128, 64>}]} {
    %c0 = arith.constant 0 : index
    %c0_0 = arith.constant 0 : index
    %c0_1 = arith.constant 0 : index
    %0 = vector.load %arg2[%c0, %c0_0, %c0_1] : memref<1x128x32xbf16, #tpu.memory_space<vmem>>, vector<1x128x32xbf16>
    %1 = vector.shape_cast %0 : vector<1x128x32xbf16> to vector<128x32xbf16>
    %c0_2 = arith.constant 0 : index
    %c0_3 = arith.constant 0 : index
    %c0_4 = arith.constant 0 : index
    %2 = vector.load %arg3[%c0_2, %c0_3, %c0_4] : memref<1x32x64xbf16, #tpu.memory_space<vmem>>, vector<1x32x64xbf16>
    %3 = vector.shape_cast %2 : vector<1x32x64xbf16> to vector<32x64xbf16>
    %cst = arith.constant dense<0.000000e+00> : vector<128x64xf32>
    %4 = tpu.matmul %1, %3, %cst {dimension_numbers = #tpu.dot_dimension_numbers<[1], [0], [0], [1], [0, 0, 1, 1], [], []>} : vector<128x32xbf16>, vector<32x64xbf16>, vector<128x64xf32> -> vector<128x64xf32>
    %c0_5 = arith.constant 0 : index
    %c0_6 = arith.constant 0 : index
    %c0_7 = arith.constant 0 : index
    %5 = vector.load %arg4[%c0_5, %c0_6, %c0_7] : memref<1x1x64xf32, #tpu.memory_space<vmem>>, vector<1x1x64xf32>
    %6 = vector.shape_cast %5 : vector<1x1x64xf32> to vector<1x64xf32>
    %7 = vector.broadcast %6 : vector<1x64xf32> to vector<128x64xf32>
    %8 = arith.addf %4, %7 : vector<128x64xf32>
    %9 = arith.truncf %8 : vector<128x64xf32> to vector<128x64xbf16>
    %c0_8 = arith.constant 0 : index
    %c0_9 = arith.constant 0 : index
    %c0_10 = arith.constant 0 : index
    %10 = vector.load %arg5[%c0_8, %c0_9, %c0_10] : memref<1x128x64xbf16, #tpu.memory_space<vmem>>, vector<1x128x64xbf16>
    %11 = vector.shape_cast %10 : vector<1x128x64xbf16> to vector<128x64xbf16>
    %12 = vector.shape_cast %9 : vector<128x64xbf16> to vector<1x128x64xbf16>
    tpu.vector_store %arg5[%c0_8, %c0_9, %c0_10], %12 {strides = array<i32>} : memref<1x128x64xbf16, #tpu.memory_space<vmem>>, vector<1x128x64xbf16>,
    return
  }
  func.func @transform_0(%arg0: i32, %arg1: i32) -> (i32, i32, i32) {
    %c0_i32 = arith.constant 0 : i32
    %c0_i32_0 = arith.constant 0 : i32
    return %arg0, %arg1, %c0_i32 : i32, i32, i32
  }
  func.func @transform_1(%arg0: i32, %arg1: i32) -> (i32, i32, i32) {
    %c0_i32 = arith.constant 0 : i32
    %c0_i32_0 = arith.constant 0 : i32
    %c0_i32_1 = arith.constant 0 : i32
    return %arg0, %c0_i32, %c0_i32_0 : i32, i32, i32
  }
  func.func @transform_2(%arg0: i32, %arg1: i32) -> (i32, i32, i32) {
    %c0_i32 = arith.constant 0 : i32
    %c0_i32_0 = arith.constant 0 : i32
    %c0_i32_1 = arith.constant 0 : i32
    return %arg0, %c0_i32, %c0_i32_0 : i32, i32, i32
  }
  func.func @transform_3(%arg0: i32, %arg1: i32) -> (i32, i32, i32) {
    %c0_i32 = arith.constant 0 : i32
    %c0_i32_0 = arith.constant 0 : i32
    return %arg0, %arg1, %c0_i32 : i32, i32, i32
  }
}

module attributes {stable_mosaic.version = 11 : i64} {
  func.func @_gemm_kernel(%arg0: i32, %arg1: i32, %arg2: memref<1x128x16xbf16, #tpu.memory_space<vmem>>, %arg3: memref<1x16x64xbf16, #tpu.memory_space<vmem>>, %arg4: memref<1x1x64xf32, #tpu.memory_space<vmem>>, %arg5: memref<1x128x64xbf16, #tpu.memory_space<vmem>>, %arg6: memref<1x128x64xbf16, #tpu.memory_space<vmem>>) attributes {dimension_semantics = [#tpu.dimension_semantics<parallel>, #tpu.dimension_semantics<parallel>], iteration_bounds = array<i64: 1, 1>, scalar_prefetch = 0 : i64, scratch_operands = 0 : i64, tpu.core_type = #tpu.core_type<tc>, window_params = [{transform_indices = @transform_0, window_bounds = array<i64: 1, 128, 16>}, {transform_indices = @transform_1, window_bounds = array<i64: 1, 16, 64>}, {transform_indices = @transform_2, window_bounds = array<i64: 1, 1, 64>}, {transform_indices = @transform_3, window_bounds = array<i64: 1, 128, 64>}, {transform_indices = @transform_4, window_bounds = array<i64: 1, 128, 64>}]} {
    %c0 = arith.constant 0 : index
    %c0_0 = arith.constant 0 : index
    %c0_1 = arith.constant 0 : index
    %0 = vector.load %arg2[%c0, %c0_0, %c0_1] : memref<1x128x16xbf16, #tpu.memory_space<vmem>>, vector<1x128x16xbf16>
    %1 = vector.shape_cast %0 : vector<1x128x16xbf16> to vector<128x16xbf16>
    %c0_2 = arith.constant 0 : index
    %c0_3 = arith.constant 0 : index
    %c0_4 = arith.constant 0 : index
    %2 = vector.load %arg3[%c0_2, %c0_3, %c0_4] : memref<1x16x64xbf16, #tpu.memory_space<vmem>>, vector<1x16x64xbf16>
    %3 = vector.shape_cast %2 : vector<1x16x64xbf16> to vector<16x64xbf16>
    %cst = arith.constant dense<0.000000e+00> : vector<128x64xf32>
    %4 = tpu.matmul %1, %3, %cst {dimension_numbers = #tpu.dot_dimension_numbers<[1], [0], [0], [1], [0, 0, 1, 1], [], []>} : vector<128x16xbf16>, vector<16x64xbf16>, vector<128x64xf32> -> vector<128x64xf32>
    %c0_5 = arith.constant 0 : index
    %c0_6 = arith.constant 0 : index
    %c0_7 = arith.constant 0 : index
    %5 = vector.load %arg4[%c0_5, %c0_6, %c0_7] : memref<1x1x64xf32, #tpu.memory_space<vmem>>, vector<1x1x64xf32>
    %6 = vector.shape_cast %5 : vector<1x1x64xf32> to vector<1x64xf32>
    %7 = vector.broadcast %6 : vector<1x64xf32> to vector<128x64xf32>
    %8 = arith.addf %4, %7 : vector<128x64xf32>
    %c0_8 = arith.constant 0 : index
    %c0_9 = arith.constant 0 : index
    %c0_10 = arith.constant 0 : index
    %9 = vector.load %arg5[%c0_8, %c0_9, %c0_10] : memref<1x128x64xbf16, #tpu.memory_space<vmem>>, vector<1x128x64xbf16>
    %10 = vector.shape_cast %9 : vector<1x128x64xbf16> to vector<128x64xbf16>
    %11 = arith.extf %10 : vector<128x64xbf16> to vector<128x64xf32>
    %12 = arith.addf %8, %11 : vector<128x64xf32>
    %cst_11 = arith.constant 0.000000e+00 : f32
    %13 = vector.broadcast %cst_11 : f32 to vector<128x64xf32>
    %14 = arith.maximumf %12, %13 : vector<128x64xf32>
    %15 = arith.truncf %14 : vector<128x64xf32> to vector<128x64xbf16>
    %c0_12 = arith.constant 0 : index
    %c0_13 = arith.constant 0 : index
    %c0_14 = arith.constant 0 : index
    %16 = vector.load %arg6[%c0_12, %c0_13, %c0_14] : memref<1x128x64xbf16, #tpu.memory_space<vmem>>, vector<1x128x64xbf16>
    %17 = vector.shape_cast %16 : vector<1x128x64xbf16> to vector<128x64xbf16>
    %18 = vector.shape_cast %15 : vector<128x64xbf16> to vector<1x128x64xbf16>
    tpu.vector_store %arg6[%c0_12, %c0_13, %c0_14], %18 {strides = array<i32>} : memref<1x128x64xbf16, #tpu.memory_space<vmem>>, vector<1x128x64xbf16>,
    return
  }
  func.func @transform_0(%arg0: i32, %arg1: i32) -> (i32, i32, i32) {
    %c0_i32 = arith.constant 0 : i32
    %c0_i32_0 = arith.constant 0 : i32
    return %arg0, %arg1, %c0_i32 : i32, i32, i32
  }
  func.func @transform_1(%arg0: i32, %arg1: i32) -> (i32, i32, i32) {
    %c0_i32 = arith.constant 0 : i32
    %c0_i32_0 = arith.constant 0 : i32
    %c0_i32_1 = arith.constant 0 : i32
    return %arg0, %c0_i32, %c0_i32_0 : i32, i32, i32
  }
  func.func @transform_2(%arg0: i32, %arg1: i32) -> (i32, i32, i32) {
    %c0_i32 = arith.constant 0 : i32
    %c0_i32_0 = arith.constant 0 : i32
    %c0_i32_1 = arith.constant 0 : i32
    return %arg0, %c0_i32, %c0_i32_0 : i32, i32, i32
  }
  func.func @transform_3(%arg0: i32, %arg1: i32) -> (i32, i32, i32) {
    %c0_i32 = arith.constant 0 : i32
    %c0_i32_0 = arith.constant 0 : i32
    return %arg0, %arg1, %c0_i32 : i32, i32, i32
  }
  func.func @transform_4(%arg0: i32, %arg1: i32) -> (i32, i32, i32) {
    %c0_i32 = arith.constant 0 : i32
    %c0_i32_0 = arith.constant 0 : i32
    return %arg0, %arg1, %c0_i32 : i32, i32, i32
  }
}

module attributes {stable_mosaic.version = 11 : i64} {
  func.func @_gemm_kernel(%arg0: i32, %arg1: i32, %arg2: memref<1x128x64xbf16, #tpu.memory_space<vmem>>, %arg3: memref<1x64x16xbf16, #tpu.memory_space<vmem>>, %arg4: memref<1x1x16xf32, #tpu.memory_space<vmem>>, %arg5: memref<1x128x16xbf16, #tpu.memory_space<vmem>>) attributes {dimension_semantics = [#tpu.dimension_semantics<parallel>, #tpu.dimension_semantics<parallel>], iteration_bounds = array<i64: 1, 1>, scalar_prefetch = 0 : i64, scratch_operands = 0 : i64, tpu.core_type = #tpu.core_type<tc>, window_params = [{transform_indices = @transform_0, window_bounds = array<i64: 1, 128, 64>}, {transform_indices = @transform_1, window_bounds = array<i64: 1, 64, 16>}, {transform_indices = @transform_2, window_bounds = array<i64: 1, 1, 16>}, {transform_indices = @transform_3, window_bounds = array<i64: 1, 128, 16>}]} {
    %c0 = arith.constant 0 : index
    %c0_0 = arith.constant 0 : index
    %c0_1 = arith.constant 0 : index
    %0 = vector.load %arg2[%c0, %c0_0, %c0_1] : memref<1x128x64xbf16, #tpu.memory_space<vmem>>, vector<1x128x64xbf16>
    %1 = vector.shape_cast %0 : vector<1x128x64xbf16> to vector<128x64xbf16>
    %c0_2 = arith.constant 0 : index
    %c0_3 = arith.constant 0 : index
    %c0_4 = arith.constant 0 : index
    %2 = vector.load %arg3[%c0_2, %c0_3, %c0_4] : memref<1x64x16xbf16, #tpu.memory_space<vmem>>, vector<1x64x16xbf16>
    %3 = vector.shape_cast %2 : vector<1x64x16xbf16> to vector<64x16xbf16>
    %cst = arith.constant dense<0.000000e+00> : vector<128x16xf32>
    %4 = tpu.matmul %1, %3, %cst {dimension_numbers = #tpu.dot_dimension_numbers<[1], [0], [0], [1], [0, 0, 1, 1], [], []>} : vector<128x64xbf16>, vector<64x16xbf16>, vector<128x16xf32> -> vector<128x16xf32>
    %c0_5 = arith.constant 0 : index
    %c0_6 = arith.constant 0 : index
    %c0_7 = arith.constant 0 : index
    %5 = vector.load %arg4[%c0_5, %c0_6, %c0_7] : memref<1x1x16xf32, #tpu.memory_space<vmem>>, vector<1x1x16xf32>
    %6 = vector.shape_cast %5 : vector<1x1x16xf32> to vector<1x16xf32>
    %7 = vector.broadcast %6 : vector<1x16xf32> to vector<128x16xf32>
    %8 = arith.addf %4, %7 : vector<128x16xf32>
    %cst_8 = arith.constant 0.000000e+00 : f32
    %9 = vector.broadcast %cst_8 : f32 to vector<128x16xf32>
    %10 = arith.maximumf %8, %9 : vector<128x16xf32>
    %11 = arith.truncf %10 : vector<128x16xf32> to vector<128x16xbf16>
    %c0_9 = arith.constant 0 : index
    %c0_10 = arith.constant 0 : index
    %c0_11 = arith.constant 0 : index
    %12 = vector.load %arg5[%c0_9, %c0_10, %c0_11] : memref<1x128x16xbf16, #tpu.memory_space<vmem>>, vector<1x128x16xbf16>
    %13 = vector.shape_cast %12 : vector<1x128x16xbf16> to vector<128x16xbf16>
    %14 = vector.shape_cast %11 : vector<128x16xbf16> to vector<1x128x16xbf16>
    tpu.vector_store %arg5[%c0_9, %c0_10, %c0_11], %14 {strides = array<i32>} : memref<1x128x16xbf16, #tpu.memory_space<vmem>>, vector<1x128x16xbf16>,
    return
  }
  func.func @transform_0(%arg0: i32, %arg1: i32) -> (i32, i32, i32) {
    %c0_i32 = arith.constant 0 : i32
    %c0_i32_0 = arith.constant 0 : i32
    return %arg0, %arg1, %c0_i32 : i32, i32, i32
  }
  func.func @transform_1(%arg0: i32, %arg1: i32) -> (i32, i32, i32) {
    %c0_i32 = arith.constant 0 : i32
    %c0_i32_0 = arith.constant 0 : i32
    %c0_i32_1 = arith.constant 0 : i32
    return %arg0, %c0_i32, %c0_i32_0 : i32, i32, i32
  }
  func.func @transform_2(%arg0: i32, %arg1: i32) -> (i32, i32, i32) {
    %c0_i32 = arith.constant 0 : i32
    %c0_i32_0 = arith.constant 0 : i32
    %c0_i32_1 = arith.constant 0 : i32
    return %arg0, %c0_i32, %c0_i32_0 : i32, i32, i32
  }
  func.func @transform_3(%arg0: i32, %arg1: i32) -> (i32, i32, i32) {
    %c0_i32 = arith.constant 0 : i32
    %c0_i32_0 = arith.constant 0 : i32
    return %arg0, %arg1, %c0_i32 : i32, i32, i32
  }
}

module attributes {stable_mosaic.version = 11 : i64} {
  func.func @_gemm_kernel(%arg0: i32, %arg1: i32, %arg2: memref<1x128x16xbf16, #tpu.memory_space<vmem>>, %arg3: memref<1x16x64xbf16, #tpu.memory_space<vmem>>, %arg4: memref<1x1x64xf32, #tpu.memory_space<vmem>>, %arg5: memref<1x128x64xbf16, #tpu.memory_space<vmem>>, %arg6: memref<1x128x64xbf16, #tpu.memory_space<vmem>>) attributes {dimension_semantics = [#tpu.dimension_semantics<parallel>, #tpu.dimension_semantics<parallel>], iteration_bounds = array<i64: 1, 1>, scalar_prefetch = 0 : i64, scratch_operands = 0 : i64, tpu.core_type = #tpu.core_type<tc>, window_params = [{transform_indices = @transform_0, window_bounds = array<i64: 1, 128, 16>}, {transform_indices = @transform_1, window_bounds = array<i64: 1, 16, 64>}, {transform_indices = @transform_2, window_bounds = array<i64: 1, 1, 64>}, {transform_indices = @transform_3, window_bounds = array<i64: 1, 128, 64>}, {transform_indices = @transform_4, window_bounds = array<i64: 1, 128, 64>}]} {
    %c0 = arith.constant 0 : index
    %c0_0 = arith.constant 0 : index
    %c0_1 = arith.constant 0 : index
    %0 = vector.load %arg2[%c0, %c0_0, %c0_1] : memref<1x128x16xbf16, #tpu.memory_space<vmem>>, vector<1x128x16xbf16>
    %1 = vector.shape_cast %0 : vector<1x128x16xbf16> to vector<128x16xbf16>
    %c0_2 = arith.constant 0 : index
    %c0_3 = arith.constant 0 : index
    %c0_4 = arith.constant 0 : index
    %2 = vector.load %arg3[%c0_2, %c0_3, %c0_4] : memref<1x16x64xbf16, #tpu.memory_space<vmem>>, vector<1x16x64xbf16>
    %3 = vector.shape_cast %2 : vector<1x16x64xbf16> to vector<16x64xbf16>
    %cst = arith.constant dense<0.000000e+00> : vector<128x64xf32>
    %4 = tpu.matmul %1, %3, %cst {dimension_numbers = #tpu.dot_dimension_numbers<[1], [0], [0], [1], [0, 0, 1, 1], [], []>} : vector<128x16xbf16>, vector<16x64xbf16>, vector<128x64xf32> -> vector<128x64xf32>
    %c0_5 = arith.constant 0 : index
    %c0_6 = arith.constant 0 : index
    %c0_7 = arith.constant 0 : index
    %5 = vector.load %arg4[%c0_5, %c0_6, %c0_7] : memref<1x1x64xf32, #tpu.memory_space<vmem>>, vector<1x1x64xf32>
    %6 = vector.shape_cast %5 : vector<1x1x64xf32> to vector<1x64xf32>
    %7 = vector.broadcast %6 : vector<1x64xf32> to vector<128x64xf32>
    %8 = arith.addf %4, %7 : vector<128x64xf32>
    %c0_8 = arith.constant 0 : index
    %c0_9 = arith.constant 0 : index
    %c0_10 = arith.constant 0 : index
    %9 = vector.load %arg5[%c0_8, %c0_9, %c0_10] : memref<1x128x64xbf16, #tpu.memory_space<vmem>>, vector<1x128x64xbf16>
    %10 = vector.shape_cast %9 : vector<1x128x64xbf16> to vector<128x64xbf16>
    %11 = arith.extf %10 : vector<128x64xbf16> to vector<128x64xf32>
    %12 = arith.addf %8, %11 : vector<128x64xf32>
    %cst_11 = arith.constant 0.000000e+00 : f32
    %13 = vector.broadcast %cst_11 : f32 to vector<128x64xf32>
    %14 = arith.maximumf %12, %13 : vector<128x64xf32>
    %15 = arith.truncf %14 : vector<128x64xf32> to vector<128x64xbf16>
    %c0_12 = arith.constant 0 : index
    %c0_13 = arith.constant 0 : index
    %c0_14 = arith.constant 0 : index
    %16 = vector.load %arg6[%c0_12, %c0_13, %c0_14] : memref<1x128x64xbf16, #tpu.memory_space<vmem>>, vector<1x128x64xbf16>
    %17 = vector.shape_cast %16 : vector<1x128x64xbf16> to vector<128x64xbf16>
    %18 = vector.shape_cast %15 : vector<128x64xbf16> to vector<1x128x64xbf16>
    tpu.vector_store %arg6[%c0_12, %c0_13, %c0_14], %18 {strides = array<i32>} : memref<1x128x64xbf16, #tpu.memory_space<vmem>>, vector<1x128x64xbf16>,
    return
  }
  func.func @transform_0(%arg0: i32, %arg1: i32) -> (i32, i32, i32) {
    %c0_i32 = arith.constant 0 : i32
    %c0_i32_0 = arith.constant 0 : i32
    return %arg0, %arg1, %c0_i32 : i32, i32, i32
  }
  func.func @transform_1(%arg0: i32, %arg1: i32) -> (i32, i32, i32) {
    %c0_i32 = arith.constant 0 : i32
    %c0_i32_0 = arith.constant 0 : i32
    %c0_i32_1 = arith.constant 0 : i32
    return %arg0, %c0_i32, %c0_i32_0 : i32, i32, i32
  }
  func.func @transform_2(%arg0: i32, %arg1: i32) -> (i32, i32, i32) {
    %c0_i32 = arith.constant 0 : i32
    %c0_i32_0 = arith.constant 0 : i32
    %c0_i32_1 = arith.constant 0 : i32
    return %arg0, %c0_i32, %c0_i32_0 : i32, i32, i32
  }
  func.func @transform_3(%arg0: i32, %arg1: i32) -> (i32, i32, i32) {
    %c0_i32 = arith.constant 0 : i32
    %c0_i32_0 = arith.constant 0 : i32
    return %arg0, %arg1, %c0_i32 : i32, i32, i32
  }
  func.func @transform_4(%arg0: i32, %arg1: i32) -> (i32, i32, i32) {
    %c0_i32 = arith.constant 0 : i32
    %c0_i32_0 = arith.constant 0 : i32
    return %arg0, %arg1, %c0_i32 : i32, i32, i32
  }
}

module attributes {stable_mosaic.version = 11 : i64} {
  func.func @_gemm_kernel(%arg0: i32, %arg1: i32, %arg2: memref<1x128x64xbf16, #tpu.memory_space<vmem>>, %arg3: memref<1x64x32xbf16, #tpu.memory_space<vmem>>, %arg4: memref<1x1x32xf32, #tpu.memory_space<vmem>>, %arg5: memref<1x128x32xbf16, #tpu.memory_space<vmem>>) attributes {dimension_semantics = [#tpu.dimension_semantics<parallel>, #tpu.dimension_semantics<parallel>], iteration_bounds = array<i64: 1, 1>, scalar_prefetch = 0 : i64, scratch_operands = 0 : i64, tpu.core_type = #tpu.core_type<tc>, window_params = [{transform_indices = @transform_0, window_bounds = array<i64: 1, 128, 64>}, {transform_indices = @transform_1, window_bounds = array<i64: 1, 64, 32>}, {transform_indices = @transform_2, window_bounds = array<i64: 1, 1, 32>}, {transform_indices = @transform_3, window_bounds = array<i64: 1, 128, 32>}]} {
    %c0 = arith.constant 0 : index
    %c0_0 = arith.constant 0 : index
    %c0_1 = arith.constant 0 : index
    %0 = vector.load %arg2[%c0, %c0_0, %c0_1] : memref<1x128x64xbf16, #tpu.memory_space<vmem>>, vector<1x128x64xbf16>
    %1 = vector.shape_cast %0 : vector<1x128x64xbf16> to vector<128x64xbf16>
    %c0_2 = arith.constant 0 : index
    %c0_3 = arith.constant 0 : index
    %c0_4 = arith.constant 0 : index
    %2 = vector.load %arg3[%c0_2, %c0_3, %c0_4] : memref<1x64x32xbf16, #tpu.memory_space<vmem>>, vector<1x64x32xbf16>
    %3 = vector.shape_cast %2 : vector<1x64x32xbf16> to vector<64x32xbf16>
    %cst = arith.constant dense<0.000000e+00> : vector<128x32xf32>
    %4 = tpu.matmul %1, %3, %cst {dimension_numbers = #tpu.dot_dimension_numbers<[1], [0], [0], [1], [0, 0, 1, 1], [], []>} : vector<128x64xbf16>, vector<64x32xbf16>, vector<128x32xf32> -> vector<128x32xf32>
    %c0_5 = arith.constant 0 : index
    %c0_6 = arith.constant 0 : index
    %c0_7 = arith.constant 0 : index
    %5 = vector.load %arg4[%c0_5, %c0_6, %c0_7] : memref<1x1x32xf32, #tpu.memory_space<vmem>>, vector<1x1x32xf32>
    %6 = vector.shape_cast %5 : vector<1x1x32xf32> to vector<1x32xf32>
    %7 = vector.broadcast %6 : vector<1x32xf32> to vector<128x32xf32>
    %8 = arith.addf %4, %7 : vector<128x32xf32>
    %cst_8 = arith.constant 0.000000e+00 : f32
    %9 = vector.broadcast %cst_8 : f32 to vector<128x32xf32>
    %10 = arith.maximumf %8, %9 : vector<128x32xf32>
    %11 = arith.truncf %10 : vector<128x32xf32> to vector<128x32xbf16>
    %c0_9 = arith.constant 0 : index
    %c0_10 = arith.constant 0 : index
    %c0_11 = arith.constant 0 : index
    %12 = vector.load %arg5[%c0_9, %c0_10, %c0_11] : memref<1x128x32xbf16, #tpu.memory_space<vmem>>, vector<1x128x32xbf16>
    %13 = vector.shape_cast %12 : vector<1x128x32xbf16> to vector<128x32xbf16>
    %14 = vector.shape_cast %11 : vector<128x32xbf16> to vector<1x128x32xbf16>
    tpu.vector_store %arg5[%c0_9, %c0_10, %c0_11], %14 {strides = array<i32>} : memref<1x128x32xbf16, #tpu.memory_space<vmem>>, vector<1x128x32xbf16>,
    return
  }
  func.func @transform_0(%arg0: i32, %arg1: i32) -> (i32, i32, i32) {
    %c0_i32 = arith.constant 0 : i32
    %c0_i32_0 = arith.constant 0 : i32
    return %arg0, %arg1, %c0_i32 : i32, i32, i32
  }
  func.func @transform_1(%arg0: i32, %arg1: i32) -> (i32, i32, i32) {
    %c0_i32 = arith.constant 0 : i32
    %c0_i32_0 = arith.constant 0 : i32
    %c0_i32_1 = arith.constant 0 : i32
    return %arg0, %c0_i32, %c0_i32_0 : i32, i32, i32
  }
  func.func @transform_2(%arg0: i32, %arg1: i32) -> (i32, i32, i32) {
    %c0_i32 = arith.constant 0 : i32
    %c0_i32_0 = arith.constant 0 : i32
    %c0_i32_1 = arith.constant 0 : i32
    return %arg0, %c0_i32, %c0_i32_0 : i32, i32, i32
  }
  func.func @transform_3(%arg0: i32, %arg1: i32) -> (i32, i32, i32) {
    %c0_i32 = arith.constant 0 : i32
    %c0_i32_0 = arith.constant 0 : i32
    return %arg0, %arg1, %c0_i32 : i32, i32, i32
  }
}

module attributes {stable_mosaic.version = 11 : i64} {
  func.func @_gemm_kernel(%arg0: i32, %arg1: i32, %arg2: memref<1x32x288xbf16, #tpu.memory_space<vmem>>, %arg3: memref<1x288x32xbf16, #tpu.memory_space<vmem>>, %arg4: memref<1x1x32xf32, #tpu.memory_space<vmem>>, %arg5: memref<1x32x32xbf16, #tpu.memory_space<vmem>>) attributes {dimension_semantics = [#tpu.dimension_semantics<parallel>, #tpu.dimension_semantics<parallel>], iteration_bounds = array<i64: 1, 1>, scalar_prefetch = 0 : i64, scratch_operands = 0 : i64, tpu.core_type = #tpu.core_type<tc>, window_params = [{transform_indices = @transform_0, window_bounds = array<i64: 1, 32, 288>}, {transform_indices = @transform_1, window_bounds = array<i64: 1, 288, 32>}, {transform_indices = @transform_2, window_bounds = array<i64: 1, 1, 32>}, {transform_indices = @transform_3, window_bounds = array<i64: 1, 32, 32>}]} {
    %c0 = arith.constant 0 : index
    %c0_0 = arith.constant 0 : index
    %c0_1 = arith.constant 0 : index
    %0 = vector.load %arg2[%c0, %c0_0, %c0_1] : memref<1x32x288xbf16, #tpu.memory_space<vmem>>, vector<1x32x288xbf16>
    %1 = vector.shape_cast %0 : vector<1x32x288xbf16> to vector<32x288xbf16>
    %c0_2 = arith.constant 0 : index
    %c0_3 = arith.constant 0 : index
    %c0_4 = arith.constant 0 : index
    %2 = vector.load %arg3[%c0_2, %c0_3, %c0_4] : memref<1x288x32xbf16, #tpu.memory_space<vmem>>, vector<1x288x32xbf16>
    %3 = vector.shape_cast %2 : vector<1x288x32xbf16> to vector<288x32xbf16>
    %cst = arith.constant dense<0.000000e+00> : vector<32x32xf32>
    %4 = tpu.matmul %1, %3, %cst {dimension_numbers = #tpu.dot_dimension_numbers<[1], [0], [0], [1], [0, 0, 1, 1], [], []>} : vector<32x288xbf16>, vector<288x32xbf16>, vector<32x32xf32> -> vector<32x32xf32>
    %c0_5 = arith.constant 0 : index
    %c0_6 = arith.constant 0 : index
    %c0_7 = arith.constant 0 : index
    %5 = vector.load %arg4[%c0_5, %c0_6, %c0_7] : memref<1x1x32xf32, #tpu.memory_space<vmem>>, vector<1x1x32xf32>
    %6 = vector.shape_cast %5 : vector<1x1x32xf32> to vector<1x32xf32>
    %7 = vector.broadcast %6 : vector<1x32xf32> to vector<32x32xf32>
    %8 = arith.addf %4, %7 : vector<32x32xf32>
    %cst_8 = arith.constant 0.000000e+00 : f32
    %9 = vector.broadcast %cst_8 : f32 to vector<32x32xf32>
    %10 = arith.maximumf %8, %9 : vector<32x32xf32>
    %11 = arith.truncf %10 : vector<32x32xf32> to vector<32x32xbf16>
    %c0_9 = arith.constant 0 : index
    %c0_10 = arith.constant 0 : index
    %c0_11 = arith.constant 0 : index
    %12 = vector.load %arg5[%c0_9, %c0_10, %c0_11] : memref<1x32x32xbf16, #tpu.memory_space<vmem>>, vector<1x32x32xbf16>
    %13 = vector.shape_cast %12 : vector<1x32x32xbf16> to vector<32x32xbf16>
    %14 = vector.shape_cast %11 : vector<32x32xbf16> to vector<1x32x32xbf16>
    tpu.vector_store %arg5[%c0_9, %c0_10, %c0_11], %14 {strides = array<i32>} : memref<1x32x32xbf16, #tpu.memory_space<vmem>>, vector<1x32x32xbf16>,
    return
  }
  func.func @transform_0(%arg0: i32, %arg1: i32) -> (i32, i32, i32) {
    %c0_i32 = arith.constant 0 : i32
    %c0_i32_0 = arith.constant 0 : i32
    return %arg0, %arg1, %c0_i32 : i32, i32, i32
  }
  func.func @transform_1(%arg0: i32, %arg1: i32) -> (i32, i32, i32) {
    %c0_i32 = arith.constant 0 : i32
    %c0_i32_0 = arith.constant 0 : i32
    %c0_i32_1 = arith.constant 0 : i32
    return %arg0, %c0_i32, %c0_i32_0 : i32, i32, i32
  }
  func.func @transform_2(%arg0: i32, %arg1: i32) -> (i32, i32, i32) {
    %c0_i32 = arith.constant 0 : i32
    %c0_i32_0 = arith.constant 0 : i32
    %c0_i32_1 = arith.constant 0 : i32
    return %arg0, %c0_i32, %c0_i32_0 : i32, i32, i32
  }
  func.func @transform_3(%arg0: i32, %arg1: i32) -> (i32, i32, i32) {
    %c0_i32 = arith.constant 0 : i32
    %c0_i32_0 = arith.constant 0 : i32
    return %arg0, %arg1, %c0_i32 : i32, i32, i32
  }
}

module attributes {stable_mosaic.version = 11 : i64} {
  func.func @_gemm_kernel(%arg0: i32, %arg1: i32, %arg2: memref<1x32x64xbf16, #tpu.memory_space<vmem>>, %arg3: memref<1x64x128xbf16, #tpu.memory_space<vmem>>, %arg4: memref<1x1x128xf32, #tpu.memory_space<vmem>>, %arg5: memref<1x32x128xbf16, #tpu.memory_space<vmem>>) attributes {dimension_semantics = [#tpu.dimension_semantics<parallel>, #tpu.dimension_semantics<parallel>], iteration_bounds = array<i64: 1, 1>, scalar_prefetch = 0 : i64, scratch_operands = 0 : i64, tpu.core_type = #tpu.core_type<tc>, window_params = [{transform_indices = @transform_0, window_bounds = array<i64: 1, 32, 64>}, {transform_indices = @transform_1, window_bounds = array<i64: 1, 64, 128>}, {transform_indices = @transform_2, window_bounds = array<i64: 1, 1, 128>}, {transform_indices = @transform_3, window_bounds = array<i64: 1, 32, 128>}]} {
    %c0 = arith.constant 0 : index
    %c0_0 = arith.constant 0 : index
    %c0_1 = arith.constant 0 : index
    %0 = vector.load %arg2[%c0, %c0_0, %c0_1] : memref<1x32x64xbf16, #tpu.memory_space<vmem>>, vector<1x32x64xbf16>
    %1 = vector.shape_cast %0 : vector<1x32x64xbf16> to vector<32x64xbf16>
    %c0_2 = arith.constant 0 : index
    %c0_3 = arith.constant 0 : index
    %c0_4 = arith.constant 0 : index
    %2 = vector.load %arg3[%c0_2, %c0_3, %c0_4] : memref<1x64x128xbf16, #tpu.memory_space<vmem>>, vector<1x64x128xbf16>
    %3 = vector.shape_cast %2 : vector<1x64x128xbf16> to vector<64x128xbf16>
    %cst = arith.constant dense<0.000000e+00> : vector<32x128xf32>
    %4 = tpu.matmul %1, %3, %cst {dimension_numbers = #tpu.dot_dimension_numbers<[1], [0], [0], [1], [0, 0, 1, 1], [], []>} : vector<32x64xbf16>, vector<64x128xbf16>, vector<32x128xf32> -> vector<32x128xf32>
    %c0_5 = arith.constant 0 : index
    %c0_6 = arith.constant 0 : index
    %c0_7 = arith.constant 0 : index
    %5 = vector.load %arg4[%c0_5, %c0_6, %c0_7] : memref<1x1x128xf32, #tpu.memory_space<vmem>>, vector<1x1x128xf32>
    %6 = vector.shape_cast %5 : vector<1x1x128xf32> to vector<1x128xf32>
    %7 = vector.broadcast %6 : vector<1x128xf32> to vector<32x128xf32>
    %8 = arith.addf %4, %7 : vector<32x128xf32>
    %9 = arith.truncf %8 : vector<32x128xf32> to vector<32x128xbf16>
    %c0_8 = arith.constant 0 : index
    %c0_9 = arith.constant 0 : index
    %c0_10 = arith.constant 0 : index
    %10 = vector.load %arg5[%c0_8, %c0_9, %c0_10] : memref<1x32x128xbf16, #tpu.memory_space<vmem>>, vector<1x32x128xbf16>
    %11 = vector.shape_cast %10 : vector<1x32x128xbf16> to vector<32x128xbf16>
    %12 = vector.shape_cast %9 : vector<32x128xbf16> to vector<1x32x128xbf16>
    tpu.vector_store %arg5[%c0_8, %c0_9, %c0_10], %12 {strides = array<i32>} : memref<1x32x128xbf16, #tpu.memory_space<vmem>>, vector<1x32x128xbf16>,
    return
  }
  func.func @transform_0(%arg0: i32, %arg1: i32) -> (i32, i32, i32) {
    %c0_i32 = arith.constant 0 : i32
    %c0_i32_0 = arith.constant 0 : i32
    return %arg0, %arg1, %c0_i32 : i32, i32, i32
  }
  func.func @transform_1(%arg0: i32, %arg1: i32) -> (i32, i32, i32) {
    %c0_i32 = arith.constant 0 : i32
    %c0_i32_0 = arith.constant 0 : i32
    %c0_i32_1 = arith.constant 0 : i32
    return %arg0, %c0_i32, %c0_i32_0 : i32, i32, i32
  }
  func.func @transform_2(%arg0: i32, %arg1: i32) -> (i32, i32, i32) {
    %c0_i32 = arith.constant 0 : i32
    %c0_i32_0 = arith.constant 0 : i32
    %c0_i32_1 = arith.constant 0 : i32
    return %arg0, %c0_i32, %c0_i32_0 : i32, i32, i32
  }
  func.func @transform_3(%arg0: i32, %arg1: i32) -> (i32, i32, i32) {
    %c0_i32 = arith.constant 0 : i32
    %c0_i32_0 = arith.constant 0 : i32
    return %arg0, %arg1, %c0_i32 : i32, i32, i32
  }
}

module attributes {stable_mosaic.version = 11 : i64} {
  func.func @_gemm_kernel(%arg0: i32, %arg1: i32, %arg2: memref<1x32x32xbf16, #tpu.memory_space<vmem>>, %arg3: memref<1x32x128xbf16, #tpu.memory_space<vmem>>, %arg4: memref<1x1x128xf32, #tpu.memory_space<vmem>>, %arg5: memref<1x32x128xbf16, #tpu.memory_space<vmem>>, %arg6: memref<1x32x128xbf16, #tpu.memory_space<vmem>>) attributes {dimension_semantics = [#tpu.dimension_semantics<parallel>, #tpu.dimension_semantics<parallel>], iteration_bounds = array<i64: 1, 1>, scalar_prefetch = 0 : i64, scratch_operands = 0 : i64, tpu.core_type = #tpu.core_type<tc>, window_params = [{transform_indices = @transform_0, window_bounds = array<i64: 1, 32, 32>}, {transform_indices = @transform_1, window_bounds = array<i64: 1, 32, 128>}, {transform_indices = @transform_2, window_bounds = array<i64: 1, 1, 128>}, {transform_indices = @transform_3, window_bounds = array<i64: 1, 32, 128>}, {transform_indices = @transform_4, window_bounds = array<i64: 1, 32, 128>}]} {
    %c0 = arith.constant 0 : index
    %c0_0 = arith.constant 0 : index
    %c0_1 = arith.constant 0 : index
    %0 = vector.load %arg2[%c0, %c0_0, %c0_1] : memref<1x32x32xbf16, #tpu.memory_space<vmem>>, vector<1x32x32xbf16>
    %1 = vector.shape_cast %0 : vector<1x32x32xbf16> to vector<32x32xbf16>
    %c0_2 = arith.constant 0 : index
    %c0_3 = arith.constant 0 : index
    %c0_4 = arith.constant 0 : index
    %2 = vector.load %arg3[%c0_2, %c0_3, %c0_4] : memref<1x32x128xbf16, #tpu.memory_space<vmem>>, vector<1x32x128xbf16>
    %3 = vector.shape_cast %2 : vector<1x32x128xbf16> to vector<32x128xbf16>
    %cst = arith.constant dense<0.000000e+00> : vector<32x128xf32>
    %4 = tpu.matmul %1, %3, %cst {dimension_numbers = #tpu.dot_dimension_numbers<[1], [0], [0], [1], [0, 0, 1, 1], [], []>} : vector<32x32xbf16>, vector<32x128xbf16>, vector<32x128xf32> -> vector<32x128xf32>
    %c0_5 = arith.constant 0 : index
    %c0_6 = arith.constant 0 : index
    %c0_7 = arith.constant 0 : index
    %5 = vector.load %arg4[%c0_5, %c0_6, %c0_7] : memref<1x1x128xf32, #tpu.memory_space<vmem>>, vector<1x1x128xf32>
    %6 = vector.shape_cast %5 : vector<1x1x128xf32> to vector<1x128xf32>
    %7 = vector.broadcast %6 : vector<1x128xf32> to vector<32x128xf32>
    %8 = arith.addf %4, %7 : vector<32x128xf32>
    %c0_8 = arith.constant 0 : index
    %c0_9 = arith.constant 0 : index
    %c0_10 = arith.constant 0 : index
    %9 = vector.load %arg5[%c0_8, %c0_9, %c0_10] : memref<1x32x128xbf16, #tpu.memory_space<vmem>>, vector<1x32x128xbf16>
    %10 = vector.shape_cast %9 : vector<1x32x128xbf16> to vector<32x128xbf16>
    %11 = arith.extf %10 : vector<32x128xbf16> to vector<32x128xf32>
    %12 = arith.addf %8, %11 : vector<32x128xf32>
    %cst_11 = arith.constant 0.000000e+00 : f32
    %13 = vector.broadcast %cst_11 : f32 to vector<32x128xf32>
    %14 = arith.maximumf %12, %13 : vector<32x128xf32>
    %15 = arith.truncf %14 : vector<32x128xf32> to vector<32x128xbf16>
    %c0_12 = arith.constant 0 : index
    %c0_13 = arith.constant 0 : index
    %c0_14 = arith.constant 0 : index
    %16 = vector.load %arg6[%c0_12, %c0_13, %c0_14] : memref<1x32x128xbf16, #tpu.memory_space<vmem>>, vector<1x32x128xbf16>
    %17 = vector.shape_cast %16 : vector<1x32x128xbf16> to vector<32x128xbf16>
    %18 = vector.shape_cast %15 : vector<32x128xbf16> to vector<1x32x128xbf16>
    tpu.vector_store %arg6[%c0_12, %c0_13, %c0_14], %18 {strides = array<i32>} : memref<1x32x128xbf16, #tpu.memory_space<vmem>>, vector<1x32x128xbf16>,
    return
  }
  func.func @transform_0(%arg0: i32, %arg1: i32) -> (i32, i32, i32) {
    %c0_i32 = arith.constant 0 : i32
    %c0_i32_0 = arith.constant 0 : i32
    return %arg0, %arg1, %c0_i32 : i32, i32, i32
  }
  func.func @transform_1(%arg0: i32, %arg1: i32) -> (i32, i32, i32) {
    %c0_i32 = arith.constant 0 : i32
    %c0_i32_0 = arith.constant 0 : i32
    %c0_i32_1 = arith.constant 0 : i32
    return %arg0, %c0_i32, %c0_i32_0 : i32, i32, i32
  }
  func.func @transform_2(%arg0: i32, %arg1: i32) -> (i32, i32, i32) {
    %c0_i32 = arith.constant 0 : i32
    %c0_i32_0 = arith.constant 0 : i32
    %c0_i32_1 = arith.constant 0 : i32
    return %arg0, %c0_i32, %c0_i32_0 : i32, i32, i32
  }
  func.func @transform_3(%arg0: i32, %arg1: i32) -> (i32, i32, i32) {
    %c0_i32 = arith.constant 0 : i32
    %c0_i32_0 = arith.constant 0 : i32
    return %arg0, %arg1, %c0_i32 : i32, i32, i32
  }
  func.func @transform_4(%arg0: i32, %arg1: i32) -> (i32, i32, i32) {
    %c0_i32 = arith.constant 0 : i32
    %c0_i32_0 = arith.constant 0 : i32
    return %arg0, %arg1, %c0_i32 : i32, i32, i32
  }
}

module attributes {stable_mosaic.version = 11 : i64} {
  func.func @_gemm_kernel(%arg0: i32, %arg1: i32, %arg2: memref<1x32x128xbf16, #tpu.memory_space<vmem>>, %arg3: memref<1x128x32xbf16, #tpu.memory_space<vmem>>, %arg4: memref<1x1x32xf32, #tpu.memory_space<vmem>>, %arg5: memref<1x32x32xbf16, #tpu.memory_space<vmem>>) attributes {dimension_semantics = [#tpu.dimension_semantics<parallel>, #tpu.dimension_semantics<parallel>], iteration_bounds = array<i64: 1, 1>, scalar_prefetch = 0 : i64, scratch_operands = 0 : i64, tpu.core_type = #tpu.core_type<tc>, window_params = [{transform_indices = @transform_0, window_bounds = array<i64: 1, 32, 128>}, {transform_indices = @transform_1, window_bounds = array<i64: 1, 128, 32>}, {transform_indices = @transform_2, window_bounds = array<i64: 1, 1, 32>}, {transform_indices = @transform_3, window_bounds = array<i64: 1, 32, 32>}]} {
    %c0 = arith.constant 0 : index
    %c0_0 = arith.constant 0 : index
    %c0_1 = arith.constant 0 : index
    %0 = vector.load %arg2[%c0, %c0_0, %c0_1] : memref<1x32x128xbf16, #tpu.memory_space<vmem>>, vector<1x32x128xbf16>
    %1 = vector.shape_cast %0 : vector<1x32x128xbf16> to vector<32x128xbf16>
    %c0_2 = arith.constant 0 : index
    %c0_3 = arith.constant 0 : index
    %c0_4 = arith.constant 0 : index
    %2 = vector.load %arg3[%c0_2, %c0_3, %c0_4] : memref<1x128x32xbf16, #tpu.memory_space<vmem>>, vector<1x128x32xbf16>
    %3 = vector.shape_cast %2 : vector<1x128x32xbf16> to vector<128x32xbf16>
    %cst = arith.constant dense<0.000000e+00> : vector<32x32xf32>
    %4 = tpu.matmul %1, %3, %cst {dimension_numbers = #tpu.dot_dimension_numbers<[1], [0], [0], [1], [0, 0, 1, 1], [], []>} : vector<32x128xbf16>, vector<128x32xbf16>, vector<32x32xf32> -> vector<32x32xf32>
    %c0_5 = arith.constant 0 : index
    %c0_6 = arith.constant 0 : index
    %c0_7 = arith.constant 0 : index
    %5 = vector.load %arg4[%c0_5, %c0_6, %c0_7] : memref<1x1x32xf32, #tpu.memory_space<vmem>>, vector<1x1x32xf32>
    %6 = vector.shape_cast %5 : vector<1x1x32xf32> to vector<1x32xf32>
    %7 = vector.broadcast %6 : vector<1x32xf32> to vector<32x32xf32>
    %8 = arith.addf %4, %7 : vector<32x32xf32>
    %cst_8 = arith.constant 0.000000e+00 : f32
    %9 = vector.broadcast %cst_8 : f32 to vector<32x32xf32>
    %10 = arith.maximumf %8, %9 : vector<32x32xf32>
    %11 = arith.truncf %10 : vector<32x32xf32> to vector<32x32xbf16>
    %c0_9 = arith.constant 0 : index
    %c0_10 = arith.constant 0 : index
    %c0_11 = arith.constant 0 : index
    %12 = vector.load %arg5[%c0_9, %c0_10, %c0_11] : memref<1x32x32xbf16, #tpu.memory_space<vmem>>, vector<1x32x32xbf16>
    %13 = vector.shape_cast %12 : vector<1x32x32xbf16> to vector<32x32xbf16>
    %14 = vector.shape_cast %11 : vector<32x32xbf16> to vector<1x32x32xbf16>
    tpu.vector_store %arg5[%c0_9, %c0_10, %c0_11], %14 {strides = array<i32>} : memref<1x32x32xbf16, #tpu.memory_space<vmem>>, vector<1x32x32xbf16>,
    return
  }
  func.func @transform_0(%arg0: i32, %arg1: i32) -> (i32, i32, i32) {
    %c0_i32 = arith.constant 0 : i32
    %c0_i32_0 = arith.constant 0 : i32
    return %arg0, %arg1, %c0_i32 : i32, i32, i32
  }
  func.func @transform_1(%arg0: i32, %arg1: i32) -> (i32, i32, i32) {
    %c0_i32 = arith.constant 0 : i32
    %c0_i32_0 = arith.constant 0 : i32
    %c0_i32_1 = arith.constant 0 : i32
    return %arg0, %c0_i32, %c0_i32_0 : i32, i32, i32
  }
  func.func @transform_2(%arg0: i32, %arg1: i32) -> (i32, i32, i32) {
    %c0_i32 = arith.constant 0 : i32
    %c0_i32_0 = arith.constant 0 : i32
    %c0_i32_1 = arith.constant 0 : i32
    return %arg0, %c0_i32, %c0_i32_0 : i32, i32, i32
  }
  func.func @transform_3(%arg0: i32, %arg1: i32) -> (i32, i32, i32) {
    %c0_i32 = arith.constant 0 : i32
    %c0_i32_0 = arith.constant 0 : i32
    return %arg0, %arg1, %c0_i32 : i32, i32, i32
  }
}

module attributes {stable_mosaic.version = 11 : i64} {
  func.func @_gemm_kernel(%arg0: i32, %arg1: i32, %arg2: memref<1x32x128xbf16, #tpu.memory_space<vmem>>, %arg3: memref<1x128x64xbf16, #tpu.memory_space<vmem>>, %arg4: memref<1x1x64xf32, #tpu.memory_space<vmem>>, %arg5: memref<1x32x64xbf16, #tpu.memory_space<vmem>>) attributes {dimension_semantics = [#tpu.dimension_semantics<parallel>, #tpu.dimension_semantics<parallel>], iteration_bounds = array<i64: 1, 1>, scalar_prefetch = 0 : i64, scratch_operands = 0 : i64, tpu.core_type = #tpu.core_type<tc>, window_params = [{transform_indices = @transform_0, window_bounds = array<i64: 1, 32, 128>}, {transform_indices = @transform_1, window_bounds = array<i64: 1, 128, 64>}, {transform_indices = @transform_2, window_bounds = array<i64: 1, 1, 64>}, {transform_indices = @transform_3, window_bounds = array<i64: 1, 32, 64>}]} {
    %c0 = arith.constant 0 : index
    %c0_0 = arith.constant 0 : index
    %c0_1 = arith.constant 0 : index
    %0 = vector.load %arg2[%c0, %c0_0, %c0_1] : memref<1x32x128xbf16, #tpu.memory_space<vmem>>, vector<1x32x128xbf16>
    %1 = vector.shape_cast %0 : vector<1x32x128xbf16> to vector<32x128xbf16>
    %c0_2 = arith.constant 0 : index
    %c0_3 = arith.constant 0 : index
    %c0_4 = arith.constant 0 : index
    %2 = vector.load %arg3[%c0_2, %c0_3, %c0_4] : memref<1x128x64xbf16, #tpu.memory_space<vmem>>, vector<1x128x64xbf16>
    %3 = vector.shape_cast %2 : vector<1x128x64xbf16> to vector<128x64xbf16>
    %cst = arith.constant dense<0.000000e+00> : vector<32x64xf32>
    %4 = tpu.matmul %1, %3, %cst {dimension_numbers = #tpu.dot_dimension_numbers<[1], [0], [0], [1], [0, 0, 1, 1], [], []>} : vector<32x128xbf16>, vector<128x64xbf16>, vector<32x64xf32> -> vector<32x64xf32>
    %c0_5 = arith.constant 0 : index
    %c0_6 = arith.constant 0 : index
    %c0_7 = arith.constant 0 : index
    %5 = vector.load %arg4[%c0_5, %c0_6, %c0_7] : memref<1x1x64xf32, #tpu.memory_space<vmem>>, vector<1x1x64xf32>
    %6 = vector.shape_cast %5 : vector<1x1x64xf32> to vector<1x64xf32>
    %7 = vector.broadcast %6 : vector<1x64xf32> to vector<32x64xf32>
    %8 = arith.addf %4, %7 : vector<32x64xf32>
    %cst_8 = arith.constant 0.000000e+00 : f32
    %9 = vector.broadcast %cst_8 : f32 to vector<32x64xf32>
    %10 = arith.maximumf %8, %9 : vector<32x64xf32>
    %11 = arith.truncf %10 : vector<32x64xf32> to vector<32x64xbf16>
    %c0_9 = arith.constant 0 : index
    %c0_10 = arith.constant 0 : index
    %c0_11 = arith.constant 0 : index
    %12 = vector.load %arg5[%c0_9, %c0_10, %c0_11] : memref<1x32x64xbf16, #tpu.memory_space<vmem>>, vector<1x32x64xbf16>
    %13 = vector.shape_cast %12 : vector<1x32x64xbf16> to vector<32x64xbf16>
    %14 = vector.shape_cast %11 : vector<32x64xbf16> to vector<1x32x64xbf16>
    tpu.vector_store %arg5[%c0_9, %c0_10, %c0_11], %14 {strides = array<i32>} : memref<1x32x64xbf16, #tpu.memory_space<vmem>>, vector<1x32x64xbf16>,
    return
  }
  func.func @transform_0(%arg0: i32, %arg1: i32) -> (i32, i32, i32) {
    %c0_i32 = arith.constant 0 : i32
    %c0_i32_0 = arith.constant 0 : i32
    return %arg0, %arg1, %c0_i32 : i32, i32, i32
  }
  func.func @transform_1(%arg0: i32, %arg1: i32) -> (i32, i32, i32) {
    %c0_i32 = arith.constant 0 : i32
    %c0_i32_0 = arith.constant 0 : i32
    %c0_i32_1 = arith.constant 0 : i32
    return %arg0, %c0_i32, %c0_i32_0 : i32, i32, i32
  }
  func.func @transform_2(%arg0: i32, %arg1: i32) -> (i32, i32, i32) {
    %c0_i32 = arith.constant 0 : i32
    %c0_i32_0 = arith.constant 0 : i32
    %c0_i32_1 = arith.constant 0 : i32
    return %arg0, %c0_i32, %c0_i32_0 : i32, i32, i32
  }
  func.func @transform_3(%arg0: i32, %arg1: i32) -> (i32, i32, i32) {
    %c0_i32 = arith.constant 0 : i32
    %c0_i32_0 = arith.constant 0 : i32
    return %arg0, %arg1, %c0_i32 : i32, i32, i32
  }
}

module attributes {stable_mosaic.version = 11 : i64} {
  func.func @_gemm_kernel(%arg0: i32, %arg1: i32, %arg2: memref<1x8x576xbf16, #tpu.memory_space<vmem>>, %arg3: memref<1x576x64xbf16, #tpu.memory_space<vmem>>, %arg4: memref<1x1x64xf32, #tpu.memory_space<vmem>>, %arg5: memref<1x8x64xbf16, #tpu.memory_space<vmem>>) attributes {dimension_semantics = [#tpu.dimension_semantics<parallel>, #tpu.dimension_semantics<parallel>], iteration_bounds = array<i64: 1, 1>, scalar_prefetch = 0 : i64, scratch_operands = 0 : i64, tpu.core_type = #tpu.core_type<tc>, window_params = [{transform_indices = @transform_0, window_bounds = array<i64: 1, 8, 576>}, {transform_indices = @transform_1, window_bounds = array<i64: 1, 576, 64>}, {transform_indices = @transform_2, window_bounds = array<i64: 1, 1, 64>}, {transform_indices = @transform_3, window_bounds = array<i64: 1, 8, 64>}]} {
    %c0 = arith.constant 0 : index
    %c0_0 = arith.constant 0 : index
    %c0_1 = arith.constant 0 : index
    %0 = vector.load %arg2[%c0, %c0_0, %c0_1] : memref<1x8x576xbf16, #tpu.memory_space<vmem>>, vector<1x8x576xbf16>
    %1 = vector.shape_cast %0 : vector<1x8x576xbf16> to vector<8x576xbf16>
    %c0_2 = arith.constant 0 : index
    %c0_3 = arith.constant 0 : index
    %c0_4 = arith.constant 0 : index
    %2 = vector.load %arg3[%c0_2, %c0_3, %c0_4] : memref<1x576x64xbf16, #tpu.memory_space<vmem>>, vector<1x576x64xbf16>
    %3 = vector.shape_cast %2 : vector<1x576x64xbf16> to vector<576x64xbf16>
    %cst = arith.constant dense<0.000000e+00> : vector<8x64xf32>
    %4 = tpu.matmul %1, %3, %cst {dimension_numbers = #tpu.dot_dimension_numbers<[1], [0], [0], [1], [0, 0, 1, 1], [], []>} : vector<8x576xbf16>, vector<576x64xbf16>, vector<8x64xf32> -> vector<8x64xf32>
    %c0_5 = arith.constant 0 : index
    %c0_6 = arith.constant 0 : index
    %c0_7 = arith.constant 0 : index
    %5 = vector.load %arg4[%c0_5, %c0_6, %c0_7] : memref<1x1x64xf32, #tpu.memory_space<vmem>>, vector<1x1x64xf32>
    %6 = vector.shape_cast %5 : vector<1x1x64xf32> to vector<1x64xf32>
    %7 = vector.broadcast %6 : vector<1x64xf32> to vector<8x64xf32>
    %8 = arith.addf %4, %7 : vector<8x64xf32>
    %cst_8 = arith.constant 0.000000e+00 : f32
    %9 = vector.broadcast %cst_8 : f32 to vector<8x64xf32>
    %10 = arith.maximumf %8, %9 : vector<8x64xf32>
    %11 = arith.truncf %10 : vector<8x64xf32> to vector<8x64xbf16>
    %c0_9 = arith.constant 0 : index
    %c0_10 = arith.constant 0 : index
    %c0_11 = arith.constant 0 : index
    %12 = vector.load %arg5[%c0_9, %c0_10, %c0_11] : memref<1x8x64xbf16, #tpu.memory_space<vmem>>, vector<1x8x64xbf16>
    %13 = vector.shape_cast %12 : vector<1x8x64xbf16> to vector<8x64xbf16>
    %14 = vector.shape_cast %11 : vector<8x64xbf16> to vector<1x8x64xbf16>
    tpu.vector_store %arg5[%c0_9, %c0_10, %c0_11], %14 {strides = array<i32>} : memref<1x8x64xbf16, #tpu.memory_space<vmem>>, vector<1x8x64xbf16>,
    return
  }
  func.func @transform_0(%arg0: i32, %arg1: i32) -> (i32, i32, i32) {
    %c0_i32 = arith.constant 0 : i32
    %c0_i32_0 = arith.constant 0 : i32
    return %arg0, %arg1, %c0_i32 : i32, i32, i32
  }
  func.func @transform_1(%arg0: i32, %arg1: i32) -> (i32, i32, i32) {
    %c0_i32 = arith.constant 0 : i32
    %c0_i32_0 = arith.constant 0 : i32
    %c0_i32_1 = arith.constant 0 : i32
    return %arg0, %c0_i32, %c0_i32_0 : i32, i32, i32
  }
  func.func @transform_2(%arg0: i32, %arg1: i32) -> (i32, i32, i32) {
    %c0_i32 = arith.constant 0 : i32
    %c0_i32_0 = arith.constant 0 : i32
    %c0_i32_1 = arith.constant 0 : i32
    return %arg0, %c0_i32, %c0_i32_0 : i32, i32, i32
  }
  func.func @transform_3(%arg0: i32, %arg1: i32) -> (i32, i32, i32) {
    %c0_i32 = arith.constant 0 : i32
    %c0_i32_0 = arith.constant 0 : i32
    return %arg0, %arg1, %c0_i32 : i32, i32, i32
  }
}

module attributes {stable_mosaic.version = 11 : i64} {
  func.func @_gemm_kernel(%arg0: i32, %arg1: i32, %arg2: memref<1x8x128xbf16, #tpu.memory_space<vmem>>, %arg3: memref<1x128x256xbf16, #tpu.memory_space<vmem>>, %arg4: memref<1x1x256xf32, #tpu.memory_space<vmem>>, %arg5: memref<1x8x256xbf16, #tpu.memory_space<vmem>>) attributes {dimension_semantics = [#tpu.dimension_semantics<parallel>, #tpu.dimension_semantics<parallel>], iteration_bounds = array<i64: 1, 1>, scalar_prefetch = 0 : i64, scratch_operands = 0 : i64, tpu.core_type = #tpu.core_type<tc>, window_params = [{transform_indices = @transform_0, window_bounds = array<i64: 1, 8, 128>}, {transform_indices = @transform_1, window_bounds = array<i64: 1, 128, 256>}, {transform_indices = @transform_2, window_bounds = array<i64: 1, 1, 256>}, {transform_indices = @transform_3, window_bounds = array<i64: 1, 8, 256>}]} {
    %c0 = arith.constant 0 : index
    %c0_0 = arith.constant 0 : index
    %c0_1 = arith.constant 0 : index
    %0 = vector.load %arg2[%c0, %c0_0, %c0_1] : memref<1x8x128xbf16, #tpu.memory_space<vmem>>, vector<1x8x128xbf16>
    %1 = vector.shape_cast %0 : vector<1x8x128xbf16> to vector<8x128xbf16>
    %c0_2 = arith.constant 0 : index
    %c0_3 = arith.constant 0 : index
    %c0_4 = arith.constant 0 : index
    %2 = vector.load %arg3[%c0_2, %c0_3, %c0_4] : memref<1x128x256xbf16, #tpu.memory_space<vmem>>, vector<1x128x256xbf16>
    %3 = vector.shape_cast %2 : vector<1x128x256xbf16> to vector<128x256xbf16>
    %cst = arith.constant dense<0.000000e+00> : vector<8x256xf32>
    %4 = tpu.matmul %1, %3, %cst {dimension_numbers = #tpu.dot_dimension_numbers<[1], [0], [0], [1], [0, 0, 1, 1], [], []>} : vector<8x128xbf16>, vector<128x256xbf16>, vector<8x256xf32> -> vector<8x256xf32>
    %c0_5 = arith.constant 0 : index
    %c0_6 = arith.constant 0 : index
    %c0_7 = arith.constant 0 : index
    %5 = vector.load %arg4[%c0_5, %c0_6, %c0_7] : memref<1x1x256xf32, #tpu.memory_space<vmem>>, vector<1x1x256xf32>
    %6 = vector.shape_cast %5 : vector<1x1x256xf32> to vector<1x256xf32>
    %7 = vector.broadcast %6 : vector<1x256xf32> to vector<8x256xf32>
    %8 = arith.addf %4, %7 : vector<8x256xf32>
    %9 = arith.truncf %8 : vector<8x256xf32> to vector<8x256xbf16>
    %c0_8 = arith.constant 0 : index
    %c0_9 = arith.constant 0 : index
    %c0_10 = arith.constant 0 : index
    %10 = vector.load %arg5[%c0_8, %c0_9, %c0_10] : memref<1x8x256xbf16, #tpu.memory_space<vmem>>, vector<1x8x256xbf16>
    %11 = vector.shape_cast %10 : vector<1x8x256xbf16> to vector<8x256xbf16>
    %12 = vector.shape_cast %9 : vector<8x256xbf16> to vector<1x8x256xbf16>
    tpu.vector_store %arg5[%c0_8, %c0_9, %c0_10], %12 {strides = array<i32>} : memref<1x8x256xbf16, #tpu.memory_space<vmem>>, vector<1x8x256xbf16>,
    return
  }
  func.func @transform_0(%arg0: i32, %arg1: i32) -> (i32, i32, i32) {
    %c0_i32 = arith.constant 0 : i32
    %c0_i32_0 = arith.constant 0 : i32
    return %arg0, %arg1, %c0_i32 : i32, i32, i32
  }
  func.func @transform_1(%arg0: i32, %arg1: i32) -> (i32, i32, i32) {
    %c0_i32 = arith.constant 0 : i32
    %c0_i32_0 = arith.constant 0 : i32
    %c0_i32_1 = arith.constant 0 : i32
    return %arg0, %c0_i32, %c0_i32_0 : i32, i32, i32
  }
  func.func @transform_2(%arg0: i32, %arg1: i32) -> (i32, i32, i32) {
    %c0_i32 = arith.constant 0 : i32
    %c0_i32_0 = arith.constant 0 : i32
    %c0_i32_1 = arith.constant 0 : i32
    return %arg0, %c0_i32, %c0_i32_0 : i32, i32, i32
  }
  func.func @transform_3(%arg0: i32, %arg1: i32) -> (i32, i32, i32) {
    %c0_i32 = arith.constant 0 : i32
    %c0_i32_0 = arith.constant 0 : i32
    return %arg0, %arg1, %c0_i32 : i32, i32, i32
  }
}

module attributes {stable_mosaic.version = 11 : i64} {
  func.func @_gemm_kernel(%arg0: i32, %arg1: i32, %arg2: memref<1x8x256xbf16, #tpu.memory_space<vmem>>, %arg3: memref<1x256x64xbf16, #tpu.memory_space<vmem>>, %arg4: memref<1x1x64xf32, #tpu.memory_space<vmem>>, %arg5: memref<1x8x64xbf16, #tpu.memory_space<vmem>>) attributes {dimension_semantics = [#tpu.dimension_semantics<parallel>, #tpu.dimension_semantics<parallel>], iteration_bounds = array<i64: 1, 1>, scalar_prefetch = 0 : i64, scratch_operands = 0 : i64, tpu.core_type = #tpu.core_type<tc>, window_params = [{transform_indices = @transform_0, window_bounds = array<i64: 1, 8, 256>}, {transform_indices = @transform_1, window_bounds = array<i64: 1, 256, 64>}, {transform_indices = @transform_2, window_bounds = array<i64: 1, 1, 64>}, {transform_indices = @transform_3, window_bounds = array<i64: 1, 8, 64>}]} {
    %c0 = arith.constant 0 : index
    %c0_0 = arith.constant 0 : index
    %c0_1 = arith.constant 0 : index
    %0 = vector.load %arg2[%c0, %c0_0, %c0_1] : memref<1x8x256xbf16, #tpu.memory_space<vmem>>, vector<1x8x256xbf16>
    %1 = vector.shape_cast %0 : vector<1x8x256xbf16> to vector<8x256xbf16>
    %c0_2 = arith.constant 0 : index
    %c0_3 = arith.constant 0 : index
    %c0_4 = arith.constant 0 : index
    %2 = vector.load %arg3[%c0_2, %c0_3, %c0_4] : memref<1x256x64xbf16, #tpu.memory_space<vmem>>, vector<1x256x64xbf16>
    %3 = vector.shape_cast %2 : vector<1x256x64xbf16> to vector<256x64xbf16>
    %cst = arith.constant dense<0.000000e+00> : vector<8x64xf32>
    %4 = tpu.matmul %1, %3, %cst {dimension_numbers = #tpu.dot_dimension_numbers<[1], [0], [0], [1], [0, 0, 1, 1], [], []>} : vector<8x256xbf16>, vector<256x64xbf16>, vector<8x64xf32> -> vector<8x64xf32>
    %c0_5 = arith.constant 0 : index
    %c0_6 = arith.constant 0 : index
    %c0_7 = arith.constant 0 : index
    %5 = vector.load %arg4[%c0_5, %c0_6, %c0_7] : memref<1x1x64xf32, #tpu.memory_space<vmem>>, vector<1x1x64xf32>
    %6 = vector.shape_cast %5 : vector<1x1x64xf32> to vector<1x64xf32>
    %7 = vector.broadcast %6 : vector<1x64xf32> to vector<8x64xf32>
    %8 = arith.addf %4, %7 : vector<8x64xf32>
    %cst_8 = arith.constant 0.000000e+00 : f32
    %9 = vector.broadcast %cst_8 : f32 to vector<8x64xf32>
    %10 = arith.maximumf %8, %9 : vector<8x64xf32>
    %11 = arith.truncf %10 : vector<8x64xf32> to vector<8x64xbf16>
    %c0_9 = arith.constant 0 : index
    %c0_10 = arith.constant 0 : index
    %c0_11 = arith.constant 0 : index
    %12 = vector.load %arg5[%c0_9, %c0_10, %c0_11] : memref<1x8x64xbf16, #tpu.memory_space<vmem>>, vector<1x8x64xbf16>
    %13 = vector.shape_cast %12 : vector<1x8x64xbf16> to vector<8x64xbf16>
    %14 = vector.shape_cast %11 : vector<8x64xbf16> to vector<1x8x64xbf16>
    tpu.vector_store %arg5[%c0_9, %c0_10, %c0_11], %14 {strides = array<i32>} : memref<1x8x64xbf16, #tpu.memory_space<vmem>>, vector<1x8x64xbf16>,
    return
  }
  func.func @transform_0(%arg0: i32, %arg1: i32) -> (i32, i32, i32) {
    %c0_i32 = arith.constant 0 : i32
    %c0_i32_0 = arith.constant 0 : i32
    return %arg0, %arg1, %c0_i32 : i32, i32, i32
  }
  func.func @transform_1(%arg0: i32, %arg1: i32) -> (i32, i32, i32) {
    %c0_i32 = arith.constant 0 : i32
    %c0_i32_0 = arith.constant 0 : i32
    %c0_i32_1 = arith.constant 0 : i32
    return %arg0, %c0_i32, %c0_i32_0 : i32, i32, i32
  }
  func.func @transform_2(%arg0: i32, %arg1: i32) -> (i32, i32, i32) {
    %c0_i32 = arith.constant 0 : i32
    %c0_i32_0 = arith.constant 0 : i32
    %c0_i32_1 = arith.constant 0 : i32
    return %arg0, %c0_i32, %c0_i32_0 : i32, i32, i32
  }
  func.func @transform_3(%arg0: i32, %arg1: i32) -> (i32, i32, i32) {
    %c0_i32 = arith.constant 0 : i32
    %c0_i32_0 = arith.constant 0 : i32
    return %arg0, %arg1, %c0_i32 : i32, i32, i32
  }
}

module attributes {stable_mosaic.version = 11 : i64} {
  func.func @_gemm_kernel(%arg0: i32, %arg1: i32, %arg2: memref<1x8x64xbf16, #tpu.memory_space<vmem>>, %arg3: memref<1x64x256xbf16, #tpu.memory_space<vmem>>, %arg4: memref<1x1x256xf32, #tpu.memory_space<vmem>>, %arg5: memref<1x8x256xbf16, #tpu.memory_space<vmem>>, %arg6: memref<1x8x256xbf16, #tpu.memory_space<vmem>>) attributes {dimension_semantics = [#tpu.dimension_semantics<parallel>, #tpu.dimension_semantics<parallel>], iteration_bounds = array<i64: 1, 1>, scalar_prefetch = 0 : i64, scratch_operands = 0 : i64, tpu.core_type = #tpu.core_type<tc>, window_params = [{transform_indices = @transform_0, window_bounds = array<i64: 1, 8, 64>}, {transform_indices = @transform_1, window_bounds = array<i64: 1, 64, 256>}, {transform_indices = @transform_2, window_bounds = array<i64: 1, 1, 256>}, {transform_indices = @transform_3, window_bounds = array<i64: 1, 8, 256>}, {transform_indices = @transform_4, window_bounds = array<i64: 1, 8, 256>}]} {
    %c0 = arith.constant 0 : index
    %c0_0 = arith.constant 0 : index
    %c0_1 = arith.constant 0 : index
    %0 = vector.load %arg2[%c0, %c0_0, %c0_1] : memref<1x8x64xbf16, #tpu.memory_space<vmem>>, vector<1x8x64xbf16>
    %1 = vector.shape_cast %0 : vector<1x8x64xbf16> to vector<8x64xbf16>
    %c0_2 = arith.constant 0 : index
    %c0_3 = arith.constant 0 : index
    %c0_4 = arith.constant 0 : index
    %2 = vector.load %arg3[%c0_2, %c0_3, %c0_4] : memref<1x64x256xbf16, #tpu.memory_space<vmem>>, vector<1x64x256xbf16>
    %3 = vector.shape_cast %2 : vector<1x64x256xbf16> to vector<64x256xbf16>
    %cst = arith.constant dense<0.000000e+00> : vector<8x256xf32>
    %4 = tpu.matmul %1, %3, %cst {dimension_numbers = #tpu.dot_dimension_numbers<[1], [0], [0], [1], [0, 0, 1, 1], [], []>} : vector<8x64xbf16>, vector<64x256xbf16>, vector<8x256xf32> -> vector<8x256xf32>
    %c0_5 = arith.constant 0 : index
    %c0_6 = arith.constant 0 : index
    %c0_7 = arith.constant 0 : index
    %5 = vector.load %arg4[%c0_5, %c0_6, %c0_7] : memref<1x1x256xf32, #tpu.memory_space<vmem>>, vector<1x1x256xf32>
    %6 = vector.shape_cast %5 : vector<1x1x256xf32> to vector<1x256xf32>
    %7 = vector.broadcast %6 : vector<1x256xf32> to vector<8x256xf32>
    %8 = arith.addf %4, %7 : vector<8x256xf32>
    %c0_8 = arith.constant 0 : index
    %c0_9 = arith.constant 0 : index
    %c0_10 = arith.constant 0 : index
    %9 = vector.load %arg5[%c0_8, %c0_9, %c0_10] : memref<1x8x256xbf16, #tpu.memory_space<vmem>>, vector<1x8x256xbf16>
    %10 = vector.shape_cast %9 : vector<1x8x256xbf16> to vector<8x256xbf16>
    %11 = arith.extf %10 : vector<8x256xbf16> to vector<8x256xf32>
    %12 = arith.addf %8, %11 : vector<8x256xf32>
    %cst_11 = arith.constant 0.000000e+00 : f32
    %13 = vector.broadcast %cst_11 : f32 to vector<8x256xf32>
    %14 = arith.maximumf %12, %13 : vector<8x256xf32>
    %15 = arith.truncf %14 : vector<8x256xf32> to vector<8x256xbf16>
    %c0_12 = arith.constant 0 : index
    %c0_13 = arith.constant 0 : index
    %c0_14 = arith.constant 0 : index
    %16 = vector.load %arg6[%c0_12, %c0_13, %c0_14] : memref<1x8x256xbf16, #tpu.memory_space<vmem>>, vector<1x8x256xbf16>
    %17 = vector.shape_cast %16 : vector<1x8x256xbf16> to vector<8x256xbf16>
    %18 = vector.shape_cast %15 : vector<8x256xbf16> to vector<1x8x256xbf16>
    tpu.vector_store %arg6[%c0_12, %c0_13, %c0_14], %18 {strides = array<i32>} : memref<1x8x256xbf16, #tpu.memory_space<vmem>>, vector<1x8x256xbf16>,
    return
  }
  func.func @transform_0(%arg0: i32, %arg1: i32) -> (i32, i32, i32) {
    %c0_i32 = arith.constant 0 : i32
    %c0_i32_0 = arith.constant 0 : i32
    return %arg0, %arg1, %c0_i32 : i32, i32, i32
  }
  func.func @transform_1(%arg0: i32, %arg1: i32) -> (i32, i32, i32) {
    %c0_i32 = arith.constant 0 : i32
    %c0_i32_0 = arith.constant 0 : i32
    %c0_i32_1 = arith.constant 0 : i32
    return %arg0, %c0_i32, %c0_i32_0 : i32, i32, i32
  }
  func.func @transform_2(%arg0: i32, %arg1: i32) -> (i32, i32, i32) {
    %c0_i32 = arith.constant 0 : i32
    %c0_i32_0 = arith.constant 0 : i32
    %c0_i32_1 = arith.constant 0 : i32
    return %arg0, %c0_i32, %c0_i32_0 : i32, i32, i32
  }
  func.func @transform_3(%arg0: i32, %arg1: i32) -> (i32, i32, i32) {
    %c0_i32 = arith.constant 0 : i32
    %c0_i32_0 = arith.constant 0 : i32
    return %arg0, %arg1, %c0_i32 : i32, i32, i32
  }
  func.func @transform_4(%arg0: i32, %arg1: i32) -> (i32, i32, i32) {
    %c0_i32 = arith.constant 0 : i32
    %c0_i32_0 = arith.constant 0 : i32
    return %arg0, %arg1, %c0_i32 : i32, i32, i32
  }
}

module attributes {stable_mosaic.version = 11 : i64} {
  func.func @_head_kernel(%arg0: memref<2x256xf32, #tpu.memory_space<vmem>>, %arg1: memref<256x4xbf16, #tpu.memory_space<vmem>>, %arg2: memref<1x4xf32, #tpu.memory_space<vmem>>, %arg3: memref<2x4xf32, #tpu.memory_space<vmem>>) attributes {dimension_semantics = [], scalar_prefetch = 0 : i64, scratch_operands = 0 : i64, tpu.core_type = #tpu.core_type<tc>} {
    %c0 = arith.constant 0 : index
    %c0_0 = arith.constant 0 : index
    %0 = vector.load %arg0[%c0, %c0_0] : memref<2x256xf32, #tpu.memory_space<vmem>>, vector<2x256xf32>
    %cst = arith.constant 2.500000e-01 : f32
    %1 = vector.broadcast %cst : f32 to vector<2x256xf32>
    %2 = arith.mulf %0, %1 : vector<2x256xf32>
    %3 = arith.truncf %2 : vector<2x256xf32> to vector<2x256xbf16>
    %c0_1 = arith.constant 0 : index
    %c0_2 = arith.constant 0 : index
    %4 = vector.load %arg1[%c0_1, %c0_2] : memref<256x4xbf16, #tpu.memory_space<vmem>>, vector<256x4xbf16>
    %cst_3 = arith.constant dense<0.000000e+00> : vector<2x4xf32>
    %5 = tpu.matmul %3, %4, %cst_3 {dimension_numbers = #tpu.dot_dimension_numbers<[1], [0], [0], [1], [0, 0, 1, 1], [], []>} : vector<2x256xbf16>, vector<256x4xbf16>, vector<2x4xf32> -> vector<2x4xf32>
    %c0_4 = arith.constant 0 : index
    %c0_5 = arith.constant 0 : index
    %6 = vector.load %arg2[%c0_4, %c0_5] : memref<1x4xf32, #tpu.memory_space<vmem>>, vector<1x4xf32>
    %7 = vector.broadcast %6 : vector<1x4xf32> to vector<2x4xf32>
    %8 = arith.addf %5, %7 : vector<2x4xf32>
    %c0_6 = arith.constant 0 : index
    %c0_7 = arith.constant 0 : index
    %9 = vector.load %arg3[%c0_6, %c0_7] : memref<2x4xf32, #tpu.memory_space<vmem>>, vector<2x4xf32>
    tpu.vector_store %arg3[%c0_6, %c0_7], %8 {strides = array<i32>} : memref<2x4xf32, #tpu.memory_space<vmem>>, vector<2x4xf32>,
    return
  }
}

module attributes {stable_mosaic.version = 11 : i64} {
  func.func @_gemm_kernel(%arg0: i32, %arg1: i32, %arg2: memref<1x8x64xbf16, #tpu.memory_space<vmem>>, %arg3: memref<1x64x256xbf16, #tpu.memory_space<vmem>>, %arg4: memref<1x1x256xf32, #tpu.memory_space<vmem>>, %arg5: memref<1x8x256xbf16, #tpu.memory_space<vmem>>, %arg6: memref<1x2x256xf32, #tpu.memory_space<vmem>>) attributes {dimension_semantics = [#tpu.dimension_semantics<parallel>, #tpu.dimension_semantics<parallel>], iteration_bounds = array<i64: 1, 1>, scalar_prefetch = 0 : i64, scratch_operands = 0 : i64, tpu.core_type = #tpu.core_type<tc>, window_params = [{transform_indices = @transform_0, window_bounds = array<i64: 1, 8, 64>}, {transform_indices = @transform_1, window_bounds = array<i64: 1, 64, 256>}, {transform_indices = @transform_2, window_bounds = array<i64: 1, 1, 256>}, {transform_indices = @transform_3, window_bounds = array<i64: 1, 8, 256>}, {transform_indices = @transform_4, window_bounds = array<i64: 1, 2, 256>}]} {
    %c0 = arith.constant 0 : index
    %c0_0 = arith.constant 0 : index
    %c0_1 = arith.constant 0 : index
    %0 = vector.load %arg2[%c0, %c0_0, %c0_1] : memref<1x8x64xbf16, #tpu.memory_space<vmem>>, vector<1x8x64xbf16>
    %1 = vector.shape_cast %0 : vector<1x8x64xbf16> to vector<8x64xbf16>
    %c0_2 = arith.constant 0 : index
    %c0_3 = arith.constant 0 : index
    %c0_4 = arith.constant 0 : index
    %2 = vector.load %arg3[%c0_2, %c0_3, %c0_4] : memref<1x64x256xbf16, #tpu.memory_space<vmem>>, vector<1x64x256xbf16>
    %3 = vector.shape_cast %2 : vector<1x64x256xbf16> to vector<64x256xbf16>
    %cst = arith.constant dense<0.000000e+00> : vector<8x256xf32>
    %4 = tpu.matmul %1, %3, %cst {dimension_numbers = #tpu.dot_dimension_numbers<[1], [0], [0], [1], [0, 0, 1, 1], [], []>} : vector<8x64xbf16>, vector<64x256xbf16>, vector<8x256xf32> -> vector<8x256xf32>
    %c0_5 = arith.constant 0 : index
    %c0_6 = arith.constant 0 : index
    %c0_7 = arith.constant 0 : index
    %5 = vector.load %arg4[%c0_5, %c0_6, %c0_7] : memref<1x1x256xf32, #tpu.memory_space<vmem>>, vector<1x1x256xf32>
    %6 = vector.shape_cast %5 : vector<1x1x256xf32> to vector<1x256xf32>
    %7 = vector.broadcast %6 : vector<1x256xf32> to vector<8x256xf32>
    %8 = arith.addf %4, %7 : vector<8x256xf32>
    %c0_8 = arith.constant 0 : index
    %c0_9 = arith.constant 0 : index
    %c0_10 = arith.constant 0 : index
    %9 = vector.load %arg5[%c0_8, %c0_9, %c0_10] : memref<1x8x256xbf16, #tpu.memory_space<vmem>>, vector<1x8x256xbf16>
    %10 = vector.shape_cast %9 : vector<1x8x256xbf16> to vector<8x256xbf16>
    %11 = arith.extf %10 : vector<8x256xbf16> to vector<8x256xf32>
    %12 = arith.addf %8, %11 : vector<8x256xf32>
    %cst_11 = arith.constant 0.000000e+00 : f32
    %13 = vector.broadcast %cst_11 : f32 to vector<8x256xf32>
    %14 = arith.maximumf %12, %13 : vector<8x256xf32>
    %15 = vector.shape_cast %14 : vector<8x256xf32> to vector<2x4x256xf32>
    %cst_12 = arith.constant dense<0.000000e+00> : vector<2x256xf32>
    %16 = vector.multi_reduction <add>, %15, %cst_12 [1] : vector<2x4x256xf32> to vector<2x256xf32>
    %c0_13 = arith.constant 0 : index
    %c0_14 = arith.constant 0 : index
    %c0_15 = arith.constant 0 : index
    %17 = vector.load %arg6[%c0_13, %c0_14, %c0_15] : memref<1x2x256xf32, #tpu.memory_space<vmem>>, vector<1x2x256xf32>
    %18 = vector.shape_cast %17 : vector<1x2x256xf32> to vector<2x256xf32>
    %19 = vector.shape_cast %16 : vector<2x256xf32> to vector<1x2x256xf32>
    tpu.vector_store %arg6[%c0_13, %c0_14, %c0_15], %19 {strides = array<i32>} : memref<1x2x256xf32, #tpu.memory_space<vmem>>, vector<1x2x256xf32>,
    return
  }
  func.func @transform_0(%arg0: i32, %arg1: i32) -> (i32, i32, i32) {
    %c0_i32 = arith.constant 0 : i32
    %c0_i32_0 = arith.constant 0 : i32
    return %arg0, %arg1, %c0_i32 : i32, i32, i32
  }
  func.func @transform_1(%arg0: i32, %arg1: i32) -> (i32, i32, i32) {
    %c0_i32 = arith.constant 0 : i32
    %c0_i32_0 = arith.constant 0 : i32
    %c0_i32_1 = arith.constant 0 : i32
    return %arg0, %c0_i32, %c0_i32_0 : i32, i32, i32
  }
  func.func @transform_2(%arg0: i32, %arg1: i32) -> (i32, i32, i32) {
    %c0_i32 = arith.constant 0 : i32
    %c0_i32_0 = arith.constant 0 : i32
    %c0_i32_1 = arith.constant 0 : i32
    return %arg0, %c0_i32, %c0_i32_0 : i32, i32, i32
  }
  func.func @transform_3(%arg0: i32, %arg1: i32) -> (i32, i32, i32) {
    %c0_i32 = arith.constant 0 : i32
    %c0_i32_0 = arith.constant 0 : i32
    return %arg0, %arg1, %c0_i32 : i32, i32, i32
  }
  func.func @transform_4(%arg0: i32, %arg1: i32) -> (i32, i32, i32) {
    %c0_i32 = arith.constant 0 : i32
    %c0_i32_0 = arith.constant 0 : i32
    %c0_i32_1 = arith.constant 0 : i32
    return %arg0, %c0_i32, %c0_i32_0 : i32, i32, i32
  }
}

module attributes {stable_mosaic.version = 11 : i64} {
  func.func @_stage_kernel(%arg0: memref<2x4xf32, #tpu.memory_space<vmem>>, %arg1: memref<2x256xf32, #tpu.memory_space<vmem>>, %arg2: memref<2x256xf32, #tpu.memory_space<vmem>>, %arg3: memref<4x256xbf16, #tpu.memory_space<vmem>>, %arg4: memref<1x256xf32, #tpu.memory_space<vmem>>, %arg5: memref<256x6xbf16, #tpu.memory_space<vmem>>, %arg6: memref<256x6xbf16, #tpu.memory_space<vmem>>, %arg7: memref<1x6xf32, #tpu.memory_space<vmem>>, %arg8: memref<2x6xf32, #tpu.memory_space<vmem>>) attributes {dimension_semantics = [], scalar_prefetch = 0 : i64, scratch_operands = 0 : i64, tpu.core_type = #tpu.core_type<tc>} {
    %c0 = arith.constant 0 : index
    %c0_0 = arith.constant 0 : index
    %0 = vector.load %arg0[%c0, %c0_0] : memref<2x4xf32, #tpu.memory_space<vmem>>, vector<2x4xf32>
    %cst = arith.constant dense<0xFF800000> : vector<2xf32>
    %1 = vector.multi_reduction <maximumf>, %0, %cst [1] : vector<2x4xf32> to vector<2xf32>
    %2 = vector.shape_cast %1 : vector<2xf32> to vector<2x1xf32>
    %3 = vector.broadcast %2 : vector<2x1xf32> to vector<2x4xf32>
    %4 = arith.subf %0, %3 : vector<2x4xf32>
    %5 = math.exp %4 : vector<2x4xf32>
    %cst_1 = arith.constant dense<0.000000e+00> : vector<2xf32>
    %6 = vector.multi_reduction <add>, %5, %cst_1 [1] : vector<2x4xf32> to vector<2xf32>
    %7 = vector.shape_cast %6 : vector<2xf32> to vector<2x1xf32>
    %8 = vector.broadcast %7 : vector<2x1xf32> to vector<2x4xf32>
    %9 = arith.divf %5, %8 : vector<2x4xf32>
    %10 = arith.truncf %9 : vector<2x4xf32> to vector<2x4xbf16>
    %c0_2 = arith.constant 0 : index
    %c0_3 = arith.constant 0 : index
    %11 = vector.load %arg3[%c0_2, %c0_3] : memref<4x256xbf16, #tpu.memory_space<vmem>>, vector<4x256xbf16>
    %cst_4 = arith.constant dense<0.000000e+00> : vector<2x256xf32>
    %12 = tpu.matmul %10, %11, %cst_4 {dimension_numbers = #tpu.dot_dimension_numbers<[1], [0], [0], [1], [0, 0, 1, 1], [], []>} : vector<2x4xbf16>, vector<4x256xbf16>, vector<2x256xf32> -> vector<2x256xf32>
    %c0_5 = arith.constant 0 : index
    %c0_6 = arith.constant 0 : index
    %13 = vector.load %arg4[%c0_5, %c0_6] : memref<1x256xf32, #tpu.memory_space<vmem>>, vector<1x256xf32>
    %14 = vector.broadcast %13 : vector<1x256xf32> to vector<2x256xf32>
    %15 = arith.addf %12, %14 : vector<2x256xf32>
    %16 = arith.negf %15 : vector<2x256xf32>
    %17 = math.exp %16 : vector<2x256xf32>
    %cst_7 = arith.constant 1.000000e+00 : f32
    %18 = vector.broadcast %cst_7 : f32 to vector<2x256xf32>
    %19 = arith.addf %18, %17 : vector<2x256xf32>
    %20 = arith.divf %18, %19 : vector<2x256xf32>
    %c0_8 = arith.constant 0 : index
    %c0_9 = arith.constant 0 : index
    %21 = vector.load %arg1[%c0_8, %c0_9] : memref<2x256xf32, #tpu.memory_space<vmem>>, vector<2x256xf32>
    %22 = arith.mulf %20, %21 : vector<2x256xf32>
    %23 = arith.truncf %22 : vector<2x256xf32> to vector<2x256xbf16>
    %c0_10 = arith.constant 0 : index
    %c0_11 = arith.constant 0 : index
    %24 = vector.load %arg2[%c0_10, %c0_11] : memref<2x256xf32, #tpu.memory_space<vmem>>, vector<2x256xf32>
    %cst_12 = arith.constant 2.500000e-01 : f32
    %25 = vector.broadcast %cst_12 : f32 to vector<2x256xf32>
    %26 = arith.mulf %24, %25 : vector<2x256xf32>
    %27 = arith.truncf %26 : vector<2x256xf32> to vector<2x256xbf16>
    %c0_13 = arith.constant 0 : index
    %c0_14 = arith.constant 0 : index
    %28 = vector.load %arg5[%c0_13, %c0_14] : memref<256x6xbf16, #tpu.memory_space<vmem>>, vector<256x6xbf16>
    %cst_15 = arith.constant dense<0.000000e+00> : vector<2x6xf32>
    %29 = tpu.matmul %23, %28, %cst_15 {dimension_numbers = #tpu.dot_dimension_numbers<[1], [0], [0], [1], [0, 0, 1, 1], [], []>} : vector<2x256xbf16>, vector<256x6xbf16>, vector<2x6xf32> -> vector<2x6xf32>
    %c0_16 = arith.constant 0 : index
    %c0_17 = arith.constant 0 : index
    %30 = vector.load %arg6[%c0_16, %c0_17] : memref<256x6xbf16, #tpu.memory_space<vmem>>, vector<256x6xbf16>
    %cst_18 = arith.constant dense<0.000000e+00> : vector<2x6xf32>
    %31 = tpu.matmul %27, %30, %cst_18 {dimension_numbers = #tpu.dot_dimension_numbers<[1], [0], [0], [1], [0, 0, 1, 1], [], []>} : vector<2x256xbf16>, vector<256x6xbf16>, vector<2x6xf32> -> vector<2x6xf32>
    %32 = arith.addf %29, %31 : vector<2x6xf32>
    %c0_19 = arith.constant 0 : index
    %c0_20 = arith.constant 0 : index
    %33 = vector.load %arg7[%c0_19, %c0_20] : memref<1x6xf32, #tpu.memory_space<vmem>>, vector<1x6xf32>
    %34 = vector.broadcast %33 : vector<1x6xf32> to vector<2x6xf32>
    %35 = arith.addf %32, %34 : vector<2x6xf32>
    %c0_21 = arith.constant 0 : index
    %c0_22 = arith.constant 0 : index
    %36 = vector.load %arg8[%c0_21, %c0_22] : memref<2x6xf32, #tpu.memory_space<vmem>>, vector<2x6xf32>
    tpu.vector_store %arg8[%c0_21, %c0_22], %35 {strides = array<i32>} : memref<2x6xf32, #tpu.memory_space<vmem>>, vector<2x6xf32>,
    return
  }
}

module attributes {stable_mosaic.version = 11 : i64} {
  func.func @_stage_kernel(%arg0: memref<2x6xf32, #tpu.memory_space<vmem>>, %arg1: memref<2x256xf32, #tpu.memory_space<vmem>>, %arg2: memref<2x256xf32, #tpu.memory_space<vmem>>, %arg3: memref<6x256xbf16, #tpu.memory_space<vmem>>, %arg4: memref<1x256xf32, #tpu.memory_space<vmem>>, %arg5: memref<256x8xbf16, #tpu.memory_space<vmem>>, %arg6: memref<256x8xbf16, #tpu.memory_space<vmem>>, %arg7: memref<1x8xf32, #tpu.memory_space<vmem>>, %arg8: memref<2x8xf32, #tpu.memory_space<vmem>>) attributes {dimension_semantics = [], scalar_prefetch = 0 : i64, scratch_operands = 0 : i64, tpu.core_type = #tpu.core_type<tc>} {
    %c0 = arith.constant 0 : index
    %c0_0 = arith.constant 0 : index
    %0 = vector.load %arg0[%c0, %c0_0] : memref<2x6xf32, #tpu.memory_space<vmem>>, vector<2x6xf32>
    %cst = arith.constant dense<0xFF800000> : vector<2xf32>
    %1 = vector.multi_reduction <maximumf>, %0, %cst [1] : vector<2x6xf32> to vector<2xf32>
    %2 = vector.shape_cast %1 : vector<2xf32> to vector<2x1xf32>
    %3 = vector.broadcast %2 : vector<2x1xf32> to vector<2x6xf32>
    %4 = arith.subf %0, %3 : vector<2x6xf32>
    %5 = math.exp %4 : vector<2x6xf32>
    %cst_1 = arith.constant dense<0.000000e+00> : vector<2xf32>
    %6 = vector.multi_reduction <add>, %5, %cst_1 [1] : vector<2x6xf32> to vector<2xf32>
    %7 = vector.shape_cast %6 : vector<2xf32> to vector<2x1xf32>
    %8 = vector.broadcast %7 : vector<2x1xf32> to vector<2x6xf32>
    %9 = arith.divf %5, %8 : vector<2x6xf32>
    %10 = arith.truncf %9 : vector<2x6xf32> to vector<2x6xbf16>
    %c0_2 = arith.constant 0 : index
    %c0_3 = arith.constant 0 : index
    %11 = vector.load %arg3[%c0_2, %c0_3] : memref<6x256xbf16, #tpu.memory_space<vmem>>, vector<6x256xbf16>
    %cst_4 = arith.constant dense<0.000000e+00> : vector<2x256xf32>
    %12 = tpu.matmul %10, %11, %cst_4 {dimension_numbers = #tpu.dot_dimension_numbers<[1], [0], [0], [1], [0, 0, 1, 1], [], []>} : vector<2x6xbf16>, vector<6x256xbf16>, vector<2x256xf32> -> vector<2x256xf32>
    %c0_5 = arith.constant 0 : index
    %c0_6 = arith.constant 0 : index
    %13 = vector.load %arg4[%c0_5, %c0_6] : memref<1x256xf32, #tpu.memory_space<vmem>>, vector<1x256xf32>
    %14 = vector.broadcast %13 : vector<1x256xf32> to vector<2x256xf32>
    %15 = arith.addf %12, %14 : vector<2x256xf32>
    %16 = arith.negf %15 : vector<2x256xf32>
    %17 = math.exp %16 : vector<2x256xf32>
    %cst_7 = arith.constant 1.000000e+00 : f32
    %18 = vector.broadcast %cst_7 : f32 to vector<2x256xf32>
    %19 = arith.addf %18, %17 : vector<2x256xf32>
    %20 = arith.divf %18, %19 : vector<2x256xf32>
    %c0_8 = arith.constant 0 : index
    %c0_9 = arith.constant 0 : index
    %21 = vector.load %arg1[%c0_8, %c0_9] : memref<2x256xf32, #tpu.memory_space<vmem>>, vector<2x256xf32>
    %22 = arith.mulf %20, %21 : vector<2x256xf32>
    %23 = arith.truncf %22 : vector<2x256xf32> to vector<2x256xbf16>
    %c0_10 = arith.constant 0 : index
    %c0_11 = arith.constant 0 : index
    %24 = vector.load %arg2[%c0_10, %c0_11] : memref<2x256xf32, #tpu.memory_space<vmem>>, vector<2x256xf32>
    %cst_12 = arith.constant 2.500000e-01 : f32
    %25 = vector.broadcast %cst_12 : f32 to vector<2x256xf32>
    %26 = arith.mulf %24, %25 : vector<2x256xf32>
    %27 = arith.truncf %26 : vector<2x256xf32> to vector<2x256xbf16>
    %c0_13 = arith.constant 0 : index
    %c0_14 = arith.constant 0 : index
    %28 = vector.load %arg5[%c0_13, %c0_14] : memref<256x8xbf16, #tpu.memory_space<vmem>>, vector<256x8xbf16>
    %cst_15 = arith.constant dense<0.000000e+00> : vector<2x8xf32>
    %29 = tpu.matmul %23, %28, %cst_15 {dimension_numbers = #tpu.dot_dimension_numbers<[1], [0], [0], [1], [0, 0, 1, 1], [], []>} : vector<2x256xbf16>, vector<256x8xbf16>, vector<2x8xf32> -> vector<2x8xf32>
    %c0_16 = arith.constant 0 : index
    %c0_17 = arith.constant 0 : index
    %30 = vector.load %arg6[%c0_16, %c0_17] : memref<256x8xbf16, #tpu.memory_space<vmem>>, vector<256x8xbf16>
    %cst_18 = arith.constant dense<0.000000e+00> : vector<2x8xf32>
    %31 = tpu.matmul %27, %30, %cst_18 {dimension_numbers = #tpu.dot_dimension_numbers<[1], [0], [0], [1], [0, 0, 1, 1], [], []>} : vector<2x256xbf16>, vector<256x8xbf16>, vector<2x8xf32> -> vector<2x8xf32>
    %32 = arith.addf %29, %31 : vector<2x8xf32>
    %c0_19 = arith.constant 0 : index
    %c0_20 = arith.constant 0 : index
    %33 = vector.load %arg7[%c0_19, %c0_20] : memref<1x8xf32, #tpu.memory_space<vmem>>, vector<1x8xf32>
    %34 = vector.broadcast %33 : vector<1x8xf32> to vector<2x8xf32>
    %35 = arith.addf %32, %34 : vector<2x8xf32>
    %c0_21 = arith.constant 0 : index
    %c0_22 = arith.constant 0 : index
    %36 = vector.load %arg8[%c0_21, %c0_22] : memref<2x8xf32, #tpu.memory_space<vmem>>, vector<2x8xf32>
    tpu.vector_store %arg8[%c0_21, %c0_22], %35 {strides = array<i32>} : memref<2x8xf32, #tpu.memory_space<vmem>>, vector<2x8xf32>,
    return
  }
}

module attributes {stable_mosaic.version = 11 : i64} {
  func.func @_stage_kernel(%arg0: memref<2x8xf32, #tpu.memory_space<vmem>>, %arg1: memref<2x256xf32, #tpu.memory_space<vmem>>, %arg2: memref<2x256xf32, #tpu.memory_space<vmem>>, %arg3: memref<8x256xbf16, #tpu.memory_space<vmem>>, %arg4: memref<1x256xf32, #tpu.memory_space<vmem>>, %arg5: memref<256x10xbf16, #tpu.memory_space<vmem>>, %arg6: memref<256x10xbf16, #tpu.memory_space<vmem>>, %arg7: memref<1x10xf32, #tpu.memory_space<vmem>>, %arg8: memref<2x10xf32, #tpu.memory_space<vmem>>) attributes {dimension_semantics = [], scalar_prefetch = 0 : i64, scratch_operands = 0 : i64, tpu.core_type = #tpu.core_type<tc>} {
    %c0 = arith.constant 0 : index
    %c0_0 = arith.constant 0 : index
    %0 = vector.load %arg0[%c0, %c0_0] : memref<2x8xf32, #tpu.memory_space<vmem>>, vector<2x8xf32>
    %cst = arith.constant dense<0xFF800000> : vector<2xf32>
    %1 = vector.multi_reduction <maximumf>, %0, %cst [1] : vector<2x8xf32> to vector<2xf32>
    %2 = vector.shape_cast %1 : vector<2xf32> to vector<2x1xf32>
    %3 = vector.broadcast %2 : vector<2x1xf32> to vector<2x8xf32>
    %4 = arith.subf %0, %3 : vector<2x8xf32>
    %5 = math.exp %4 : vector<2x8xf32>
    %cst_1 = arith.constant dense<0.000000e+00> : vector<2xf32>
    %6 = vector.multi_reduction <add>, %5, %cst_1 [1] : vector<2x8xf32> to vector<2xf32>
    %7 = vector.shape_cast %6 : vector<2xf32> to vector<2x1xf32>
    %8 = vector.broadcast %7 : vector<2x1xf32> to vector<2x8xf32>
    %9 = arith.divf %5, %8 : vector<2x8xf32>
    %10 = arith.truncf %9 : vector<2x8xf32> to vector<2x8xbf16>
    %c0_2 = arith.constant 0 : index
    %c0_3 = arith.constant 0 : index
    %11 = vector.load %arg3[%c0_2, %c0_3] : memref<8x256xbf16, #tpu.memory_space<vmem>>, vector<8x256xbf16>
    %cst_4 = arith.constant dense<0.000000e+00> : vector<2x256xf32>
    %12 = tpu.matmul %10, %11, %cst_4 {dimension_numbers = #tpu.dot_dimension_numbers<[1], [0], [0], [1], [0, 0, 1, 1], [], []>} : vector<2x8xbf16>, vector<8x256xbf16>, vector<2x256xf32> -> vector<2x256xf32>
    %c0_5 = arith.constant 0 : index
    %c0_6 = arith.constant 0 : index
    %13 = vector.load %arg4[%c0_5, %c0_6] : memref<1x256xf32, #tpu.memory_space<vmem>>, vector<1x256xf32>
    %14 = vector.broadcast %13 : vector<1x256xf32> to vector<2x256xf32>
    %15 = arith.addf %12, %14 : vector<2x256xf32>
    %16 = arith.negf %15 : vector<2x256xf32>
    %17 = math.exp %16 : vector<2x256xf32>
    %cst_7 = arith.constant 1.000000e+00 : f32
    %18 = vector.broadcast %cst_7 : f32 to vector<2x256xf32>
    %19 = arith.addf %18, %17 : vector<2x256xf32>
    %20 = arith.divf %18, %19 : vector<2x256xf32>
    %c0_8 = arith.constant 0 : index
    %c0_9 = arith.constant 0 : index
    %21 = vector.load %arg1[%c0_8, %c0_9] : memref<2x256xf32, #tpu.memory_space<vmem>>, vector<2x256xf32>
    %22 = arith.mulf %20, %21 : vector<2x256xf32>
    %23 = arith.truncf %22 : vector<2x256xf32> to vector<2x256xbf16>
    %c0_10 = arith.constant 0 : index
    %c0_11 = arith.constant 0 : index
    %24 = vector.load %arg2[%c0_10, %c0_11] : memref<2x256xf32, #tpu.memory_space<vmem>>, vector<2x256xf32>
    %cst_12 = arith.constant 2.500000e-01 : f32
    %25 = vector.broadcast %cst_12 : f32 to vector<2x256xf32>
    %26 = arith.mulf %24, %25 : vector<2x256xf32>
    %27 = arith.truncf %26 : vector<2x256xf32> to vector<2x256xbf16>
    %c0_13 = arith.constant 0 : index
    %c0_14 = arith.constant 0 : index
    %28 = vector.load %arg5[%c0_13, %c0_14] : memref<256x10xbf16, #tpu.memory_space<vmem>>, vector<256x10xbf16>
    %cst_15 = arith.constant dense<0.000000e+00> : vector<2x10xf32>
    %29 = tpu.matmul %23, %28, %cst_15 {dimension_numbers = #tpu.dot_dimension_numbers<[1], [0], [0], [1], [0, 0, 1, 1], [], []>} : vector<2x256xbf16>, vector<256x10xbf16>, vector<2x10xf32> -> vector<2x10xf32>
    %c0_16 = arith.constant 0 : index
    %c0_17 = arith.constant 0 : index
    %30 = vector.load %arg6[%c0_16, %c0_17] : memref<256x10xbf16, #tpu.memory_space<vmem>>, vector<256x10xbf16>
    %cst_18 = arith.constant dense<0.000000e+00> : vector<2x10xf32>
    %31 = tpu.matmul %27, %30, %cst_18 {dimension_numbers = #tpu.dot_dimension_numbers<[1], [0], [0], [1], [0, 0, 1, 1], [], []>} : vector<2x256xbf16>, vector<256x10xbf16>, vector<2x10xf32> -> vector<2x10xf32>
    %32 = arith.addf %29, %31 : vector<2x10xf32>
    %c0_19 = arith.constant 0 : index
    %c0_20 = arith.constant 0 : index
    %33 = vector.load %arg7[%c0_19, %c0_20] : memref<1x10xf32, #tpu.memory_space<vmem>>, vector<1x10xf32>
    %34 = vector.broadcast %33 : vector<1x10xf32> to vector<2x10xf32>
    %35 = arith.addf %32, %34 : vector<2x10xf32>
    %c0_21 = arith.constant 0 : index
    %c0_22 = arith.constant 0 : index
    %36 = vector.load %arg8[%c0_21, %c0_22] : memref<2x10xf32, #tpu.memory_space<vmem>>, vector<2x10xf32>
    tpu.vector_store %arg8[%c0_21, %c0_22], %35 {strides = array<i32>} : memref<2x10xf32, #tpu.memory_space<vmem>>, vector<2x10xf32>,
    return
  }
}

</mosaic_0001>

<bundles_post_ra>
// kernel: _lambda_.57
= control target key start
LH: loop header
LB: loop body
LE: loop exit
PB: predicated region body
PF: predicated region fallthrough
CT: control target
= control target key end

     0   :  { %s3419_s12 = smov 0   ;;  %s3421_s13 = smov 0   ;;  %s4092_s0 = inlined_call_operand.vmem [shape: bf16[1,2048,147], index: 0, kind: input, shape index: {}]   ;;  %s4093_s1 = inlined_call_operand.vmem [shape: bf16[1,147,8], index: 1, kind: input, shape index: {}]   ;;  %s4094_s2 = inlined_call_operand.vmem [shape: f32[1,1,8], index: 2, kind: input, shape index: {}]   ;;  %s4095_s3 = inlined_call_operand.vmem [shape: bf16[1,2048,8], index: 3, kind: output, shape index: {}]  }
   0x1   :  { %s3423_s14 = smov 0  }
   0x2 LB: > { %s22_s15 = sadd.s32 1, %s3391_s13  ;;  %p2672_p0 = scmp.ge.s32.totalorder %s3395_s14, 1  ;;  %s3395_s14 = sphi %s3423_s14, %s13_s14   ;;  %s3391_s13 = sphi %s3421_s13, %s4097_s13   ;;  %s3387_s12 = sphi %s3419_s12, %s4096_s12  }
   0x3   : > { %p23_p1 = scmp.ge.s32.totalorder %s22_s15, 2  ;;  %p177_p2 = scmp.lt.s32.totalorder %s3395_s14, 3 }
   0x5   : > { %s4099_s15 = smov (%p23_p1, %s22_s15), 0  ;;  %p178_p3 = pnand %p2672_p0, %p177_p2 }
   0x6   : > { %s2673_s22 = sshll.u32 (!%p178_p3), %s3387_s12, 7 }
   0x7   : > { %181 = sbr.rel (%p178_p3) target bundleno = 505 (0x1f9), region = 32  ;;  %p221_p4 = scmp.lt.s32.totalorder (!%p178_p3), %s2673_s22, 255 }
   0xc   : > { %v3186_v0 = vld [vmem:[%s4093_s1 + $0x38] sm:$0xff]   ;;  %v3397_v1 = vmov 0   ;;  %v3187_v2 = vld [vmem:[%s4093_s1 + $0x30] sm:$0xff]   ;;  %v3188_v3 = vld [vmem:[%s4093_s1 + $0x28] sm:$0xff]   ;;  %s4101_s22 = smov (!%p221_p4, %s2673_s22), 255  ;;  %vm1035_vm0 = vcmask 154624  }
   0xd   : > { %1235 = vmatprep.subr.bf16.mxu0 %v3397_v1  ;;  %3140 = vmatprep.subr.bf16.mxu1 %v3397_v1  ;;  %v3189_v4 = vld [vmem:[%s4093_s1 + $0x20] sm:$0xff]   ;;  %s3011_s25 = sshll.u32 %s4101_s22, 3  ;;  %v3190_v5 = vld [vmem:[%s4093_s1 + $0x18] sm:$0xff]   ;;  %v3191_v8 = vld [vmem:[%s4093_s1 + $0x10] sm:$0xff]   ;;  %vm1228_vm1 = vcmask 1040384   ;;  %vm1229_vm2 = vcmask 1041408  }
   0xe   : > { %1236 = vmatpush1.bf16.msra.mxu0 %v3186_v0  ;;  %3150 = vmatpush1.bf16.msra.mxu1 %v3186_v0  ;;  %s3455_s28 = scalar_lea.vmem %s4092_s0, %s3011_s25  ;;  %v3192_v9 = vld [vmem:[%s4093_s1 + $0x8] sm:$0xff]   ;;  %v3398_v10 = vmov 65535   ;;  %v3193_v12 = vld [vmem:[%s4093_s1] sm:$0xff]   ;;  %s2677_s19 = sshll.u32 %s4101_s22, 2  ;;  %vm2420_vm3 = vcmask 60416  }
   0xf   : > { %1237 = vmatprep.subr.bf16.mxu0 %v3397_v1  ;;  %3141 = vmatprep.subr.bf16.mxu1 %v3397_v1  ;;  %v3198_v6 = vld [vmem:[%s3455_s28 + $0x4] ss:$8 sps:$4 sm:$0xff]   ;;  %v1230_v11 = vsel %vm1228_vm1, 4294967295, %v3398_v10  ;;  %v3194_v13 = vld [vmem:[%s4093_s1 + $0x48] ss:$0 sps:$4 sm:$0x33]   ;;  %s3646_s22 = scalar_lea.vmem %s4095_s3, %s2677_s19 }
  0x10   : > { %v3201_v7 = vld [vmem:[%s3455_s28 + $0x204] ss:$8 sps:$4 sm:$0xff]   ;;  %2817 = vmatprep.mubr.msk.bf16.mxu0 %vm1035_vm0, %v3198_v6  ;;  %v1231_v14 = vsel %vm1229_vm2, %v1230_v11, 0  ;;  %v3196_v17 = vld [vmem:[%s3455_s28] ss:$8 sps:$4 sm:$0xff]  }
  0x11   : > { %2849 = vmatprep.mubr.msk.bf16.mxu1 %vm1035_vm0, %v3201_v7  ;;  %v1233_v15 = vand.u32 %v3194_v13, %v1231_v14  ;;  %v3195_v16 = vld [vmem:[%s4093_s1 + $0x40] sm:$0xff]   ;;  %v3202_v19 = vld [vmem:[%s3455_s28 + $0x14] ss:$8 sps:$4 sm:$0xff]   ;;  %v3206_v21 = vld [vmem:[%s3455_s28 + $0x10] ss:$8 sps:$4 sm:$0xff]  }
  0x12   : > { %1238 = vmatpush1.bf16.msra.mxu0 %v3187_v2  ;;  %3151 = vmatpush1.bf16.msra.mxu1 %v3187_v2  ;;  %v3199_v18 = vld [vmem:[%s3455_s28 + $0x200] ss:$8 sps:$4 sm:$0xff]   ;;  %v3204_v20 = vld [vmem:[%s3455_s28 + $0x214] ss:$8 sps:$4 sm:$0xff]   ;;  %v3207_v22 = vld [vmem:[%s3455_s28 + $0x210] ss:$8 sps:$4 sm:$0xff]  }
  0x13   : > { %1239 = vmatprep.subr.bf16.mxu0 %v3397_v1  ;;  %3142 = vmatprep.subr.bf16.mxu1 %v3397_v1  ;;  %v3208_v23 = vld [vmem:[%s3455_s28 + $0x24] ss:$8 sps:$4 sm:$0xff]   ;;  %v3212_v25 = vld [vmem:[%s3455_s28 + $0x20] ss:$8 sps:$4 sm:$0xff]   ;;  %v3214_v27 = vld [vmem:[%s3455_s28 + $0x34] ss:$8 sps:$4 sm:$0xff]  }
  0x14   : > { %v3210_v24 = vld [vmem:[%s3455_s28 + $0x224] ss:$8 sps:$4 sm:$0xff]   ;;  %v3213_v26 = vld [vmem:[%s3455_s28 + $0x220] ss:$8 sps:$4 sm:$0xff]   ;;  %v3216_v28 = vld [vmem:[%s3455_s28 + $0x234] ss:$8 sps:$4 sm:$0xff]  }
  0x15   : > { %v3218_v29 = vld [vmem:[%s3455_s28 + $0x30] ss:$8 sps:$4 sm:$0xff]   ;;  %v3220_v31 = vld [vmem:[%s3455_s28 + $0x44] ss:$8 sps:$4 sm:$0xff]   ;;  %v3224_v33 = vld [vmem:[%s3455_s28 + $0x40] ss:$8 sps:$4 sm:$0xff]  }
  0x16   : > { %1240 = vmatpush1.bf16.msra.mxu0 %v3188_v3  ;;  %3152 = vmatpush1.bf16.msra.mxu1 %v3188_v3  ;;  %v3219_v30 = vld [vmem:[%s3455_s28 + $0x230] ss:$8 sps:$4 sm:$0xff]   ;;  %v3222_v32 = vld [vmem:[%s3455_s28 + $0x244] ss:$8 sps:$4 sm:$0xff]   ;;  %v3225_v34 = vld [vmem:[%s3455_s28 + $0x240] ss:$8 sps:$4 sm:$0xff]  }
  0x17   : > { %1241 = vmatprep.subr.bf16.mxu0 %v3397_v1  ;;  %3143 = vmatprep.subr.bf16.mxu1 %v3397_v1  ;;  %v3226_v35 = vld [vmem:[%s3455_s28 + $0x54] ss:$8 sps:$4 sm:$0xff]   ;;  %v3230_v37 = vld [vmem:[%s3455_s28 + $0x50] ss:$8 sps:$4 sm:$0xff]   ;;  %v3232_v39 = vld [vmem:[%s3455_s28 + $0x64] ss:$8 sps:$4 sm:$0xff]  }
  0x18   : > { %v3228_v36 = vld [vmem:[%s3455_s28 + $0x254] ss:$8 sps:$4 sm:$0xff]   ;;  %v3231_v38 = vld [vmem:[%s3455_s28 + $0x250] ss:$8 sps:$4 sm:$0xff]   ;;  %v3234_v40 = vld [vmem:[%s3455_s28 + $0x264] ss:$8 sps:$4 sm:$0xff]  }
  0x19   : > { %v3236_v41 = vld [vmem:[%s3455_s28 + $0x60] ss:$8 sps:$4 sm:$0xff]   ;;  %v3238_v43 = vld [vmem:[%s3455_s28 + $0x74] ss:$8 sps:$4 sm:$0xff]   ;;  %v3242_v45 = vld [vmem:[%s3455_s28 + $0x70] ss:$8 sps:$4 sm:$0xff]  }
  0x1a   : > { %1242 = vmatpush1.bf16.msra.mxu0 %v3189_v4  ;;  %3153 = vmatpush1.bf16.msra.mxu1 %v3189_v4  ;;  %v3237_v42 = vld [vmem:[%s3455_s28 + $0x260] ss:$8 sps:$4 sm:$0xff]   ;;  %v3240_v44 = vld [vmem:[%s3455_s28 + $0x274] ss:$8 sps:$4 sm:$0xff]   ;;  %v3243_v46 = vld [vmem:[%s3455_s28 + $0x270] ss:$8 sps:$4 sm:$0xff]  }
  0x1b   : > { %1243 = vmatprep.subr.bf16.mxu0 %v3397_v1  ;;  %3144 = vmatprep.subr.bf16.mxu1 %v3397_v1  ;;  %v3244_v47 = vld [vmem:[%s3455_s28 + $0x84] ss:$8 sps:$4 sm:$0xff]   ;;  %v3248_v49 = vld [vmem:[%s3455_s28 + $0x80] ss:$8 sps:$4 sm:$0xff]   ;;  %v3250_v51 = vld [vmem:[%s3455_s28 + $0x94] ss:$8 sps:$4 sm:$0xff]  }
  0x1c   : > { %v3246_v48 = vld [vmem:[%s3455_s28 + $0x284] ss:$8 sps:$4 sm:$0xff]   ;;  %v3249_v50 = vld [vmem:[%s3455_s28 + $0x280] ss:$8 sps:$4 sm:$0xff]   ;;  %v3252_v52 = vld [vmem:[%s3455_s28 + $0x294] ss:$8 sps:$4 sm:$0xff]  }
  0x1d   : > { %v3254_v53 = vld [vmem:[%s3455_s28 + $0x90] ss:$8 sps:$4 sm:$0xff]   ;;  %v3256_v55 = vld [vmem:[%s3455_s28 + $0xa4] ss:$8 sps:$4 sm:$0xff]   ;;  %v3260_v57 = vld [vmem:[%s3455_s28 + $0xa0] ss:$8 sps:$4 sm:$0xff]  }
  0x1e   : > { %1244 = vmatpush1.bf16.msra.mxu0 %v3190_v5  ;;  %3154 = vmatpush1.bf16.msra.mxu1 %v3190_v5  ;;  %v3255_v54 = vld [vmem:[%s3455_s28 + $0x290] ss:$8 sps:$4 sm:$0xff]   ;;  %v3258_v56 = vld [vmem:[%s3455_s28 + $0x2a4] ss:$8 sps:$4 sm:$0xff]   ;;  %v3261_v58 = vld [vmem:[%s3455_s28 + $0x2a0] ss:$8 sps:$4 sm:$0xff]  }
  0x1f   : > { %1245 = vmatprep.subr.bf16.mxu0 %v3397_v1  ;;  %3145 = vmatprep.subr.bf16.mxu1 %v3397_v1  ;;  %v3262_v59 = vld [vmem:[%s3455_s28 + $0xb4] ss:$8 sps:$4 sm:$0xff]   ;;  %v3266_v61 = vld [vmem:[%s3455_s28 + $0xb0] ss:$8 sps:$4 sm:$0xff]   ;;  %v3268_v63 = vld [vmem:[%s3455_s28 + $0xc4] ss:$8 sps:$4 sm:$0xff]  }
  0x20   : > { %v3264_v60 = vld [vmem:[%s3455_s28 + $0x2b4] ss:$8 sps:$4 sm:$0xff]   ;;  %v3267_v62 = vld [vmem:[%s3455_s28 + $0x2b0] ss:$8 sps:$4 sm:$0xff]   ;;  %v3270_v0 = vld [vmem:[%s3455_s28 + $0x2c4] ss:$8 sps:$4 sm:$0xff]  }
  0x21   : > { %v3273_v2 = vld [vmem:[%s3455_s28 + $0x2c0] ss:$8 sps:$4 sm:$0xff]   ;;  %v3274_v3 = vld [vmem:[%s3455_s28 + $0xd4] ss:$8 sps:$4 sm:$0xff]   ;;  %v3278_v5 = vld [vmem:[%s3455_s28 + $0xd0] ss:$8 sps:$4 sm:$0xff]  }
  0x22   : > { %1246 = vmatpush1.bf16.msra.mxu0 %v3191_v8  ;;  %3155 = vmatpush1.bf16.msra.mxu1 %v3191_v8  ;;  %v3276_v4 = vld [vmem:[%s3455_s28 + $0x2d4] ss:$8 sps:$4 sm:$0xff]   ;;  %v3279_v6 = vld [vmem:[%s3455_s28 + $0x2d0] ss:$8 sps:$4 sm:$0xff]   ;;  %v3280_v7 = vld [vmem:[%s3455_s28 + $0xe4] ss:$8 sps:$4 sm:$0xff]  }
  0x23   : > { %1247 = vmatprep.subr.bf16.mxu0 %v3397_v1  ;;  %3146 = vmatprep.subr.bf16.mxu1 %v3397_v1  ;;  %v3282_v8 = vld [vmem:[%s3455_s28 + $0x2e4] ss:$8 sps:$4 sm:$0xff]   ;;  %v3285_v10 = vld [vmem:[%s3455_s28 + $0x2e0] ss:$8 sps:$4 sm:$0xff]   ;;  %v3286_v11 = vld [vmem:[%s3455_s28 + $0xf4] ss:$8 sps:$4 sm:$0xff]  }
  0x24   : > { %v3290_v13 = vld [vmem:[%s3455_s28 + $0xf0] ss:$8 sps:$4 sm:$0xff]  }
  0x25   : > { %v3291_v14 = vld [vmem:[%s3455_s28 + $0x2f0] ss:$8 sps:$4 sm:$0xff]  }
  0x26   : > { %1248 = vmatpush1.bf16.msra.mxu0 %v3192_v9  ;;  %3156 = vmatpush1.bf16.msra.mxu1 %v3192_v9  ;;  %v3284_v9 = vld [vmem:[%s3455_s28 + $0xe0] ss:$8 sps:$4 sm:$0xff]  }
  0x27   : > { %1249 = vmatprep.subr.bf16.mxu0 %v3397_v1  ;;  %3147 = vmatprep.subr.bf16.mxu1 %v3397_v1 }
  0x2a   : > { %1250 = vmatpush1.bf16.msra.mxu0 %v3193_v12  ;;  %3157 = vmatpush1.bf16.msra.mxu1 %v3193_v12  ;;  %v3288_v12 = vld [vmem:[%s3455_s28 + $0x2f4] ss:$8 sps:$4 sm:$0xff]  }
  0x2b   : > { %1263 = vmatprep.subr.bf16.mxu0 %v3397_v1  ;;  %3148 = vmatprep.subr.bf16.mxu1 %v3397_v1 }
  0x2e   : > { %1264 = vmatpush2.bf16.msra.mxu0 %v1233_v15  ;;  %3158 = vmatpush2.bf16.msra.mxu1 %v1233_v15  ;;  %v3292_v15 = vld [vmem:[%s3455_s28 + $0x104] ss:$8 sps:$4 sm:$0xff]  }
  0x2f   : > { %1265 = vmatprep.subr.bf16.mxu0 %v3397_v1  ;;  %3149 = vmatprep.subr.bf16.mxu1 %v3397_v1  ;;  %v3272_v1 = vld [vmem:[%s3455_s28 + $0xc0] ss:$8 sps:$4 sm:$0xff]  }
  0x32   : > { %1266 = vmatpush2.bf16.msra.mxu0 %v3195_v16  ;;  %3159 = vmatpush2.bf16.msra.mxu1 %v3195_v16  ;;  %v3294_v16 = vld [vmem:[%s3455_s28 + $0x304] ss:$8 sps:$4 sm:$0xff]  }
  0x35   : > { %1268 = vmatmul.mubr.bf16.vlgmr.msra.gmra.mxu0 %v3196_v17  ;;  %1524 = vmatmul.mubr.bf16.vlgmr.msra.gmra.mxu1 %v3199_v18  ;;  %v3296_v17 = vld [vmem:[%s3455_s28 + $0x100] ss:$8 sps:$4 sm:$0xff]  }
  0x36   : > { %2818 = vmatprep.mubr.msk.bf16.mxu0 %vm1035_vm0, %v3202_v19  ;;  %2850 = vmatprep.mubr.msk.bf16.mxu1 %vm1035_vm0, %v3204_v20  ;;  %v3297_v18 = vld [vmem:[%s3455_s28 + $0x300] ss:$8 sps:$4 sm:$0xff]   ;;  %v3298_v19 = vld [vmem:[%s3455_s28 + $0x114] ss:$8 sps:$4 sm:$0xff]  }
  0x37   : > { %v3300_v20 = vld [vmem:[%s3455_s28 + $0x314] ss:$8 sps:$4 sm:$0xff]  }
  0x3d   : > { %1276 = vmatmul.mubr.bf16.gmra.mxu0 %v3206_v21  ;;  %1532 = vmatmul.mubr.bf16.gmra.mxu1 %v3207_v22  ;;  %v3302_v21 = vld [vmem:[%s3455_s28 + $0x110] ss:$8 sps:$4 sm:$0xff]  }
  0x3e   : > { %2819 = vmatprep.mubr.msk.bf16.mxu0 %vm1035_vm0, %v3208_v23  ;;  %2851 = vmatprep.mubr.msk.bf16.mxu1 %vm1035_vm0, %v3210_v24  ;;  %v3303_v22 = vld [vmem:[%s3455_s28 + $0x310] ss:$8 sps:$4 sm:$0xff]   ;;  %v3304_v23 = vld [vmem:[%s3455_s28 + $0x124] ss:$8 sps:$4 sm:$0xff]  }
  0x3f   : > { %v3306_v24 = vld [vmem:[%s3455_s28 + $0x324] ss:$8 sps:$4 sm:$0xff]  }
  0x45   : > { %1284 = vmatmul.mubr.bf16.gmra.mxu0 %v3212_v25  ;;  %1540 = vmatmul.mubr.bf16.gmra.mxu1 %v3213_v26  ;;  %v3308_v25 = vld [vmem:[%s3455_s28 + $0x120] ss:$8 sps:$4 sm:$0xff]  }
  0x46   : > { %2820 = vmatprep.mubr.msk.bf16.mxu0 %vm1035_vm0, %v3214_v27  ;;  %2852 = vmatprep.mubr.msk.bf16.mxu1 %vm1035_vm0, %v3216_v28  ;;  %v3309_v26 = vld [vmem:[%s3455_s28 + $0x320] ss:$8 sps:$4 sm:$0xff]   ;;  %v3310_v27 = vld [vmem:[%s3455_s28 + $0x134] ss:$8 sps:$4 sm:$0xff]  }
  0x47   : > { %v3312_v28 = vld [vmem:[%s3455_s28 + $0x334] ss:$8 sps:$4 sm:$0xff]  }
  0x4d   : > { %1292 = vmatmul.mubr.bf16.gmra.mxu0 %v3218_v29  ;;  %1548 = vmatmul.mubr.bf16.gmra.mxu1 %v3219_v30  ;;  %v3314_v29 = vld [vmem:[%s3455_s28 + $0x130] ss:$8 sps:$4 sm:$0xff]  }
  0x4e   : > { %2821 = vmatprep.mubr.msk.bf16.mxu0 %vm1035_vm0, %v3220_v31  ;;  %2853 = vmatprep.mubr.msk.bf16.mxu1 %vm1035_vm0, %v3222_v32  ;;  %v3315_v30 = vld [vmem:[%s3455_s28 + $0x330] ss:$8 sps:$4 sm:$0xff]   ;;  %v3316_v31 = vld [vmem:[%s3455_s28 + $0x144] ss:$8 sps:$4 sm:$0xff]  }
  0x4f   : > { %v3318_v32 = vld [vmem:[%s3455_s28 + $0x344] ss:$8 sps:$4 sm:$0xff]  }
  0x55   : > { %1300 = vmatmul.mubr.bf16.gmra.mxu0 %v3224_v33  ;;  %1556 = vmatmul.mubr.bf16.gmra.mxu1 %v3225_v34  ;;  %v3320_v33 = vld [vmem:[%s3455_s28 + $0x140] ss:$8 sps:$4 sm:$0xff]  }
  0x56   : > { %2822 = vmatprep.mubr.msk.bf16.mxu0 %vm1035_vm0, %v3226_v35  ;;  %2854 = vmatprep.mubr.msk.bf16.mxu1 %vm1035_vm0, %v3228_v36  ;;  %v3321_v34 = vld [vmem:[%s3455_s28 + $0x340] ss:$8 sps:$4 sm:$0xff]   ;;  %v3322_v35 = vld [vmem:[%s3455_s28 + $0x154] ss:$8 sps:$4 sm:$0xff]  }
  0x57   : > { %v3324_v36 = vld [vmem:[%s3455_s28 + $0x354] ss:$8 sps:$4 sm:$0xff]  }
  0x5d   : > { %1308 = vmatmul.mubr.bf16.gmra.mxu0 %v3230_v37  ;;  %1564 = vmatmul.mubr.bf16.gmra.mxu1 %v3231_v38  ;;  %v3326_v37 = vld [vmem:[%s3455_s28 + $0x150] ss:$8 sps:$4 sm:$0xff]  }
  0x5e   : > { %2823 = vmatprep.mubr.msk.bf16.mxu0 %vm1035_vm0, %v3232_v39  ;;  %2855 = vmatprep.mubr.msk.bf16.mxu1 %vm1035_vm0, %v3234_v40  ;;  %v3327_v38 = vld [vmem:[%s3455_s28 + $0x350] ss:$8 sps:$4 sm:$0xff]   ;;  %v3328_v39 = vld [vmem:[%s3455_s28 + $0x164] ss:$8 sps:$4 sm:$0xff]  }
  0x5f   : > { %v3330_v40 = vld [vmem:[%s3455_s28 + $0x364] ss:$8 sps:$4 sm:$0xff]  }
  0x65   : > { %1316 = vmatmul.mubr.bf16.gmra.mxu0 %v3236_v41  ;;  %1572 = vmatmul.mubr.bf16.gmra.mxu1 %v3237_v42  ;;  %v3332_v41 = vld [vmem:[%s3455_s28 + $0x160] ss:$8 sps:$4 sm:$0xff]  }
  0x66   : > { %2824 = vmatprep.mubr.msk.bf16.mxu0 %vm1035_vm0, %v3238_v43  ;;  %2856 = vmatprep.mubr.msk.bf16.mxu1 %vm1035_vm0, %v3240_v44  ;;  %v3333_v42 = vld [vmem:[%s3455_s28 + $0x360] ss:$8 sps:$4 sm:$0xff]   ;;  %v3334_v43 = vld [vmem:[%s3455_s28 + $0x174] ss:$8 sps:$4 sm:$0xff]  }
  0x67   : > { %v3336_v44 = vld [vmem:[%s3455_s28 + $0x374] ss:$8 sps:$4 sm:$0xff]  }
  0x6d   : > { %1324 = vmatmul.mubr.bf16.gmra.mxu0 %v3242_v45  ;;  %1580 = vmatmul.mubr.bf16.gmra.mxu1 %v3243_v46  ;;  %v3338_v45 = vld [vmem:[%s3455_s28 + $0x170] ss:$8 sps:$4 sm:$0xff]  }
  0x6e   : > { %2825 = vmatprep.mubr.msk.bf16.mxu0 %vm1035_vm0, %v3244_v47  ;;  %2857 = vmatprep.mubr.msk.bf16.mxu1 %vm1035_vm0, %v3246_v48  ;;  %v3339_v46 = vld [vmem:[%s3455_s28 + $0x370] ss:$8 sps:$4 sm:$0xff]   ;;  %v3340_v47 = vld [vmem:[%s3455_s28 + $0x184] ss:$8 sps:$4 sm:$0xff]  }
  0x6f   : > { %v3342_v48 = vld [vmem:[%s3455_s28 + $0x384] ss:$8 sps:$4 sm:$0xff]  }
  0x75   : > { %1332 = vmatmul.mubr.bf16.gmra.mxu0 %v3248_v49  ;;  %1588 = vmatmul.mubr.bf16.gmra.mxu1 %v3249_v50  ;;  %v296_v49 = vld [vmem:[%s3455_s28 + $0x180] sm:$0xff]  ;;  %v297_v50 = vld [vmem:[%s3455_s28 + $0x188] sm:$0xff] }
  0x76   : > { %2826 = vmatprep.mubr.msk.bf16.mxu0 %vm1035_vm0, %v3250_v51  ;;  %2858 = vmatprep.mubr.msk.bf16.mxu1 %vm1035_vm0, %v3252_v52  ;;  %v360_v51 = vld [vmem:[%s3455_s28 + $0x380] sm:$0xff]  ;;  %v361_v52 = vld [vmem:[%s3455_s28 + $0x388] sm:$0xff] }
  0x7d   : > { %1340 = vmatmul.mubr.bf16.gmra.mxu0 %v3254_v53  ;;  %1596 = vmatmul.mubr.bf16.gmra.mxu1 %v3255_v54  ;;  %v2727_v53 = vcombine.low %v296_v49, %v297_v50  ;;  %v2791_v54 = vcombine.low %v360_v51, %v361_v52  ;;  %v302_v50 = vld [vmem:[%s3455_s28 + $0x1b0] sm:$0xff] }
  0x7e   : > { %2827 = vmatprep.mubr.msk.bf16.mxu0 %vm1035_vm0, %v3256_v55  ;;  %2859 = vmatprep.mubr.msk.bf16.mxu1 %vm1035_vm0, %v3258_v56  ;;  %v3344_v55 = vld [vmem:[%s3455_s28 + $0x194] ss:$8 sps:$4 sm:$0xff]  }
  0x7f   : > { %v3346_v56 = vld [vmem:[%s3455_s28 + $0x394] ss:$8 sps:$4 sm:$0xff]  }
  0x85   : > { %1348 = vmatmul.mubr.bf16.gmra.mxu0 %v3260_v57  ;;  %1604 = vmatmul.mubr.bf16.gmra.mxu1 %v3261_v58  ;;  %v3632_v57 = vld [vmem:[%s4094_s2] ss:$0 sm:$0xff] }
  0x86   : > { %2828 = vmatprep.mubr.msk.bf16.mxu0 %vm1035_vm0, %v3262_v59  ;;  %2860 = vmatprep.mubr.msk.bf16.mxu1 %vm1035_vm0, %v3264_v60  ;;  %v298_v60 = vld [vmem:[%s3455_s28 + $0x190] sm:$0xff] }
  0x8d   : > { %1356 = vmatmul.mubr.bf16.gmra.mxu0 %v3266_v61  ;;  %1612 = vmatmul.mubr.bf16.gmra.mxu1 %v3267_v62 }
  0x8e   : > { %2829 = vmatprep.mubr.msk.bf16.mxu0 %vm1035_vm0, %v3268_v63  ;;  %2861 = vmatprep.mubr.msk.bf16.mxu1 %vm1035_vm0, %v3270_v0  ;;  %v299_v63 = vld [vmem:[%s3455_s28 + $0x198] sm:$0xff]  ;;  %v362_v0 = vld [vmem:[%s3455_s28 + $0x390] sm:$0xff] }
  0x95   : > { %1364 = vmatmul.mubr.bf16.gmra.mxu0 %v3272_v1  ;;  %1620 = vmatmul.mubr.bf16.gmra.mxu1 %v3273_v2  ;;  %v363_v1 = vld [vmem:[%s3455_s28 + $0x398] sm:$0xff] }
  0x96   : > { %2830 = vmatprep.mubr.msk.bf16.mxu0 %vm1035_vm0, %v3274_v3  ;;  %2862 = vmatprep.mubr.msk.bf16.mxu1 %vm1035_vm0, %v3276_v4 }
  0x9d   : > { %1372 = vmatmul.mubr.bf16.gmra.mxu0 %v3278_v5  ;;  %1628 = vmatmul.mubr.bf16.gmra.mxu1 %v3279_v6 }
  0x9e   : > { %2831 = vmatprep.mubr.msk.bf16.mxu0 %vm1035_vm0, %v3280_v7  ;;  %2863 = vmatprep.mubr.msk.bf16.mxu1 %vm1035_vm0, %v3282_v8  ;;  %v2729_v8 = vcombine.low %v298_v60, %v299_v63 }
  0xa5   : > { %1380 = vmatmul.mubr.bf16.gmra.mxu0 %v3284_v9  ;;  %1636 = vmatmul.mubr.bf16.gmra.mxu1 %v3285_v10  ;;  %v2793_v9 = vcombine.low %v362_v0, %v363_v1 }
  0xa6   : > { %2832 = vmatprep.mubr.msk.bf16.mxu0 %vm1035_vm0, %v3286_v11  ;;  %2864 = vmatprep.mubr.msk.bf16.mxu1 %vm1035_vm0, %v3288_v12 }
  0xad   : > { %1388 = vmatmul.mubr.bf16.gmra.mxu0 %v3290_v13  ;;  %1644 = vmatmul.mubr.bf16.gmra.mxu1 %v3291_v14  ;;  %v3348_v14 = vld [vmem:[%s3455_s28 + $0x1a4] ss:$8 sps:$4 sm:$0xff]  }
  0xae   : > { %2833 = vmatprep.mubr.msk.bf16.mxu0 %vm1035_vm0, %v3292_v15  ;;  %2865 = vmatprep.mubr.msk.bf16.mxu1 %vm1035_vm0, %v3294_v16 }
  0xb5   : > { %1396 = vmatmul.mubr.bf16.gmra.mxu0 %v3296_v17  ;;  %1652 = vmatmul.mubr.bf16.gmra.mxu1 %v3297_v18  ;;  %v3350_v17 = vld [vmem:[%s3455_s28 + $0x3a4] ss:$8 sps:$4 sm:$0xff]  }
  0xb6   : > { %2834 = vmatprep.mubr.msk.bf16.mxu0 %vm1035_vm0, %v3298_v19  ;;  %2866 = vmatprep.mubr.msk.bf16.mxu1 %vm1035_vm0, %v3300_v20 }
  0xbd   : > { %1404 = vmatmul.mubr.bf16.gmra.mxu0 %v3302_v21  ;;  %1660 = vmatmul.mubr.bf16.gmra.mxu1 %v3303_v22  ;;  %v300_v22 = vld [vmem:[%s3455_s28 + $0x1a0] sm:$0xff] }
  0xbe   : > { %2835 = vmatprep.mubr.msk.bf16.mxu0 %vm1035_vm0, %v3304_v23  ;;  %2867 = vmatprep.mubr.msk.bf16.mxu1 %vm1035_vm0, %v3306_v24 }
  0xc5   : > { %1412 = vmatmul.mubr.bf16.gmra.mxu0 %v3308_v25  ;;  %1668 = vmatmul.mubr.bf16.gmra.mxu1 %v3309_v26 }
  0xc6   : > { %2836 = vmatprep.mubr.msk.bf16.mxu0 %vm1035_vm0, %v3310_v27  ;;  %2868 = vmatprep.mubr.msk.bf16.mxu1 %vm1035_vm0, %v3312_v28  ;;  %v301_v27 = vld [vmem:[%s3455_s28 + $0x1a8] sm:$0xff]  ;;  %v364_v28 = vld [vmem:[%s3455_s28 + $0x3a0] sm:$0xff] }
  0xcd   : > { %1420 = vmatmul.mubr.bf16.gmra.mxu0 %v3314_v29  ;;  %1676 = vmatmul.mubr.bf16.gmra.mxu1 %v3315_v30  ;;  %v365_v29 = vld [vmem:[%s3455_s28 + $0x3a8] sm:$0xff] }
  0xce   : > { %2837 = vmatprep.mubr.msk.bf16.mxu0 %vm1035_vm0, %v3316_v31  ;;  %2869 = vmatprep.mubr.msk.bf16.mxu1 %vm1035_vm0, %v3318_v32 }
  0xd5   : > { %1428 = vmatmul.mubr.bf16.gmra.mxu0 %v3320_v33  ;;  %1684 = vmatmul.mubr.bf16.gmra.mxu1 %v3321_v34 }
  0xd6   : > { %2838 = vmatprep.mubr.msk.bf16.mxu0 %vm1035_vm0, %v3322_v35  ;;  %2870 = vmatprep.mubr.msk.bf16.mxu1 %vm1035_vm0, %v3324_v36  ;;  %v2731_v36 = vcombine.low %v300_v22, %v301_v27  ;;  %v369_v22 = vld [vmem:[%s3455_s28 + $0x3c8] sm:$0xff] }
  0xdd   : > { %1436 = vmatmul.mubr.bf16.gmra.mxu0 %v3326_v37  ;;  %1692 = vmatmul.mubr.bf16.gmra.mxu1 %v3327_v38  ;;  %v2795_v37 = vcombine.low %v364_v28, %v365_v29 }
  0xde   : > { %2839 = vmatprep.mubr.msk.bf16.mxu0 %vm1035_vm0, %v3328_v39  ;;  %2871 = vmatprep.mubr.msk.bf16.mxu1 %vm1035_vm0, %v3330_v40 }
  0xe5   : > { %1444 = vmatmul.mubr.bf16.gmra.mxu0 %v3332_v41  ;;  %1700 = vmatmul.mubr.bf16.gmra.mxu1 %v3333_v42  ;;  %v3352_v42 = vld [vmem:[%s3455_s28 + $0x1b4] ss:$8 sps:$4 sm:$0xff]  }
  0xe6   : > { %2840 = vmatprep.mubr.msk.bf16.mxu0 %vm1035_vm0, %v3334_v43  ;;  %2872 = vmatprep.mubr.msk.bf16.mxu1 %vm1035_vm0, %v3336_v44 }
  0xed   : > { %1452 = vmatmul.mubr.bf16.gmra.mxu0 %v3338_v45  ;;  %1708 = vmatmul.mubr.bf16.gmra.mxu1 %v3339_v46  ;;  %v3354_v45 = vld [vmem:[%s3455_s28 + $0x3b4] ss:$8 sps:$4 sm:$0xff]  }
  0xee   : > { %2841 = vmatprep.mubr.msk.bf16.mxu0 %vm1035_vm0, %v3340_v47  ;;  %2873 = vmatprep.mubr.msk.bf16.mxu1 %vm1035_vm0, %v3342_v48 }
  0xf5   : > { %v1269_v58 = vpop.f32.mrf.mxu0  ;;  %1460 = vmatmul.mubr.bf16.gmra.mxu0 %v2727_v53  ;;  %v1525_v59 = vpop.f32.mrf.mxu1  ;;  %1716 = vmatmul.mubr.bf16.gmra.mxu1 %v2791_v54 }
  0xf6   : > { %v1270_v61 = vadd.f32 %v3632_v57, %v1269_v58  ;;  %v1526_v62 = vadd.f32 %v3632_v57, %v1525_v59  ;;  %2842 = vmatprep.mubr.msk.bf16.mxu0 %vm1035_vm0, %v3344_v55  ;;  %2874 = vmatprep.mubr.msk.bf16.mxu1 %vm1035_vm0, %v3346_v56  ;;  %v303_v55 = vld [vmem:[%s3455_s28 + $0x1b8] sm:$0xff]  ;;  %v366_v56 = vld [vmem:[%s3455_s28 + $0x3b0] sm:$0xff] }
  0xf7   : > { %v1271_v2 = vpop.f32.mrf.mxu0  ;;  %v1527_v3 = vpop.f32.mrf.mxu1  ;;  %v367_v58 = vld [vmem:[%s3455_s28 + $0x3b8] sm:$0xff]  ;;  %v2733_v1 = vcombine.low %v302_v50, %v303_v55 }
  0xf8   : > { %v1780_v4 = vmax.f32 %v1270_v61, 0.0  ;;  %v1844_v5 = vmax.f32 %v1526_v62, 0.0  ;;  %v2797_v2 = vcombine.low %v366_v56, %v367_v58  ;;  %v371_v50 = vld [vmem:[%s3455_s28 + $0x3d8] sm:$0xff] }
  0xf9   : > { %v1272_v6 = vpop.f32.mrf.mxu0  ;;  %v1528_v7 = vpop.f32.mrf.mxu1 }
  0xfa   : > { %v3012_v10 = vpack.c.bf16 %v1780_v4, %v1780_v4  ;;  %v3076_v11 = vpack.c.bf16 %v1844_v5, %v1844_v5  ;;  %v1273_v12 = vadd.f32 %v3632_v57, %v1272_v6  ;;  %v1529_v13 = vadd.f32 %v3632_v57, %v1528_v7  ;;  %v3356_v7 = vld [vmem:[%s3455_s28 + $0x1c4] ss:$8 sps:$4 sm:$0xff]  }
  0xfb   : > { %v1274_v15 = vpop.f32.mrf.mxu0  ;;  %v1530_v16 = vpop.f32.mrf.mxu1 }
  0xfc   : > { %2421 = vst.msk [vmem:[%s3646_s22] sm:$0xf] %vm2420_vm3, %v3012_v10  ;;  %2485 = vst.msk [vmem:[%s3646_s22 + $0x100] sm:$0xf] %vm2420_vm3, %v3076_v11  ;;  %v1781_v18 = vmax.f32 %v1273_v12, 0.0  ;;  %v1845_v19 = vmax.f32 %v1529_v13, 0.0 }
  0xfd   : > { %v1277_v20 = vpop.f32.mrf.mxu0  ;;  %1468 = vmatmul.mubr.bf16.gmra.mxu0 %v2729_v8  ;;  %v1533_v21 = vpop.f32.mrf.mxu1  ;;  %1724 = vmatmul.mubr.bf16.gmra.mxu1 %v2793_v9  ;;  %v3358_v10 = vld [vmem:[%s3455_s28 + $0x3c4] ss:$8 sps:$4 sm:$0xff]  }
  0xfe   : > { %v3013_v23 = vpack.c.bf16 %v1781_v18, %v1781_v18  ;;  %v3077_v24 = vpack.c.bf16 %v1845_v19, %v1845_v19  ;;  %v1278_v25 = vadd.f32 %v3632_v57, %v1277_v20  ;;  %v1534_v26 = vadd.f32 %v3632_v57, %v1533_v21  ;;  %2843 = vmatprep.mubr.msk.bf16.mxu0 %vm1035_vm0, %v3348_v14  ;;  %v304_v15 = vld [vmem:[%s3455_s28 + $0x1c0] sm:$0xff]  ;;  %v305_v20 = vld [vmem:[%s3455_s28 + $0x1c8] sm:$0xff] }
  0xff   : > { %v1279_v30 = vpop.f32.mrf.mxu0  ;;  %v1535_v31 = vpop.f32.mrf.mxu1  ;;  %2875 = vmatprep.mubr.msk.bf16.mxu1 %vm1035_vm0, %v3350_v17  ;;  %v368_v21 = vld [vmem:[%s3455_s28 + $0x3c0] sm:$0xff]  ;;  %v2735_v29 = vcombine.low %v304_v15, %v305_v20  ;;  %v373_v15 = vld [vmem:[%s3455_s28 + $0x3e8] sm:$0xff] }
 0x100   : > { %2422 = vst.msk [vmem:[%s3646_s22 + $0x4] sm:$0xf] %vm2420_vm3, %v3013_v23  ;;  %2486 = vst.msk [vmem:[%s3646_s22 + $0x104] sm:$0xf] %vm2420_vm3, %v3077_v24  ;;  %v1782_v32 = vmax.f32 %v1278_v25, 0.0  ;;  %v1846_v33 = vmax.f32 %v1534_v26, 0.0  ;;  %v2799_v30 = vcombine.low %v368_v21, %v369_v22 }
 0x101   : > { %v1280_v34 = vpop.f32.mrf.mxu0  ;;  %v1536_v35 = vpop.f32.mrf.mxu1 }
 0x102   : > { %v3014_v38 = vpack.c.bf16 %v1782_v32, %v1782_v32  ;;  %v3078_v39 = vpack.c.bf16 %v1846_v33, %v1846_v33  ;;  %v1281_v40 = vadd.f32 %v3632_v57, %v1280_v34  ;;  %v1537_v41 = vadd.f32 %v3632_v57, %v1536_v35  ;;  %v3360_v35 = vld [vmem:[%s3455_s28 + $0x1d4] ss:$8 sps:$4 sm:$0xff]  }
 0x103   : > { %v1282_v43 = vpop.f32.mrf.mxu0  ;;  %v1538_v44 = vpop.f32.mrf.mxu1 }
 0x104   : > { %2423 = vst.msk [vmem:[%s3646_s22 + $0x8] sm:$0xf] %vm2420_vm3, %v3014_v38  ;;  %2487 = vst.msk [vmem:[%s3646_s22 + $0x108] sm:$0xf] %vm2420_vm3, %v3078_v39  ;;  %v1783_v46 = vmax.f32 %v1281_v40, 0.0  ;;  %v1847_v47 = vmax.f32 %v1537_v41, 0.0 }
 0x105   : > { %v1285_v48 = vpop.f32.mrf.mxu0  ;;  %1476 = vmatmul.mubr.bf16.gmra.mxu0 %v2731_v36  ;;  %v1541_v49 = vpop.f32.mrf.mxu1  ;;  %1732 = vmatmul.mubr.bf16.gmra.mxu1 %v2795_v37  ;;  %v3362_v38 = vld [vmem:[%s3455_s28 + $0x3d4] ss:$8 sps:$4 sm:$0xff]  }
 0x106   : > { %v3015_v51 = vpack.c.bf16 %v1783_v46, %v1783_v46  ;;  %v3079_v52 = vpack.c.bf16 %v1847_v47, %v1847_v47  ;;  %v1286_v53 = vadd.f32 %v3632_v57, %v1285_v48  ;;  %v1542_v54 = vadd.f32 %v3632_v57, %v1541_v49  ;;  %2844 = vmatprep.mubr.msk.bf16.mxu0 %vm1035_vm0, %v3352_v42  ;;  %v306_v43 = vld [vmem:[%s3455_s28 + $0x1d0] sm:$0xff]  ;;  %v307_v48 = vld [vmem:[%s3455_s28 + $0x1d8] sm:$0xff] }
 0x107   : > { %v1287_v59 = vpop.f32.mrf.mxu0  ;;  %v1543_v60 = vpop.f32.mrf.mxu1  ;;  %2876 = vmatprep.mubr.msk.bf16.mxu1 %vm1035_vm0, %v3354_v45  ;;  %v370_v49 = vld [vmem:[%s3455_s28 + $0x3d0] sm:$0xff]  ;;  %v2737_v58 = vcombine.low %v306_v43, %v307_v48  ;;  %v375_v43 = vld [vmem:[%s3455_s28 + $0x3f8] sm:$0xff] }
 0x108   : > { %2424 = vst.msk [vmem:[%s3646_s22 + $0xc] sm:$0xf] %vm2420_vm3, %v3015_v51  ;;  %2488 = vst.msk [vmem:[%s3646_s22 + $0x10c] sm:$0xf] %vm2420_vm3, %v3079_v52  ;;  %v1784_v61 = vmax.f32 %v1286_v53, 0.0  ;;  %v1848_v62 = vmax.f32 %v1542_v54, 0.0  ;;  %v2801_v59 = vcombine.low %v370_v49, %v371_v50 }
 0x109   : > { %v1288_v63 = vpop.f32.mrf.mxu0  ;;  %v1544_v0 = vpop.f32.mrf.mxu1 }
 0x10a   : > { %v3016_v3 = vpack.c.bf16 %v1784_v61, %v1784_v61  ;;  %v3080_v4 = vpack.c.bf16 %v1848_v62, %v1848_v62  ;;  %v1289_v5 = vadd.f32 %v3632_v57, %v1288_v63  ;;  %v1545_v6 = vadd.f32 %v3632_v57, %v1544_v0  ;;  %v3364_v0 = vld [vmem:[%s3455_s28 + $0x1e4] ss:$8 sps:$4 sm:$0xff]  }
 0x10b   : > { %v1290_v8 = vpop.f32.mrf.mxu0  ;;  %v1546_v9 = vpop.f32.mrf.mxu1 }
 0x10c   : > { %2425 = vst.msk [vmem:[%s3646_s22 + $0x10] sm:$0xf] %vm2420_vm3, %v3016_v3  ;;  %2489 = vst.msk [vmem:[%s3646_s22 + $0x110] sm:$0xf] %vm2420_vm3, %v3080_v4  ;;  %v1785_v11 = vmax.f32 %v1289_v5, 0.0  ;;  %v1849_v12 = vmax.f32 %v1545_v6, 0.0 }
 0x10d   : > { %v1293_v13 = vpop.f32.mrf.mxu0  ;;  %1484 = vmatmul.mubr.bf16.gmra.mxu0 %v2733_v1  ;;  %v1549_v14 = vpop.f32.mrf.mxu1  ;;  %1740 = vmatmul.mubr.bf16.gmra.mxu1 %v2797_v2  ;;  %v3366_v3 = vld [vmem:[%s3455_s28 + $0x3e4] ss:$8 sps:$4 sm:$0xff]  }
 0x10e   : > { %v3017_v16 = vpack.c.bf16 %v1785_v11, %v1785_v11  ;;  %v3081_v17 = vpack.c.bf16 %v1849_v12, %v1849_v12  ;;  %v1294_v18 = vadd.f32 %v3632_v57, %v1293_v13  ;;  %v1550_v19 = vadd.f32 %v3632_v57, %v1549_v14  ;;  %2845 = vmatprep.mubr.msk.bf16.mxu0 %vm1035_vm0, %v3356_v7  ;;  %v308_v8 = vld [vmem:[%s3455_s28 + $0x1e0] sm:$0xff]  ;;  %v309_v13 = vld [vmem:[%s3455_s28 + $0x1e8] sm:$0xff] }
 0x10f   : > { %v1295_v23 = vpop.f32.mrf.mxu0  ;;  %v1551_v24 = vpop.f32.mrf.mxu1  ;;  %2877 = vmatprep.mubr.msk.bf16.mxu1 %vm1035_vm0, %v3358_v10  ;;  %v372_v14 = vld [vmem:[%s3455_s28 + $0x3e0] sm:$0xff]  ;;  %v2739_v22 = vcombine.low %v308_v8, %v309_v13 }
 0x110   : > { %2426 = vst.msk [vmem:[%s3646_s22 + $0x14] sm:$0xf] %vm2420_vm3, %v3017_v16  ;;  %2490 = vst.msk [vmem:[%s3646_s22 + $0x114] sm:$0xf] %vm2420_vm3, %v3081_v17  ;;  %v1786_v25 = vmax.f32 %v1294_v18, 0.0  ;;  %v1850_v26 = vmax.f32 %v1550_v19, 0.0  ;;  %v2803_v23 = vcombine.low %v372_v14, %v373_v15 }
 0x111   : > { %v1296_v27 = vpop.f32.mrf.mxu0  ;;  %v1552_v28 = vpop.f32.mrf.mxu1 }
 0x112   : > { %v3018_v31 = vpack.c.bf16 %v1786_v25, %v1786_v25  ;;  %v3082_v32 = vpack.c.bf16 %v1850_v26, %v1850_v26  ;;  %v1297_v33 = vadd.f32 %v3632_v57, %v1296_v27  ;;  %v1553_v34 = vadd.f32 %v3632_v57, %v1552_v28  ;;  %v3368_v28 = vld [vmem:[%s3455_s28 + $0x1f4] ss:$8 sps:$4 sm:$0xff]  }
 0x113   : > { %v1298_v36 = vpop.f32.mrf.mxu0  ;;  %v1554_v37 = vpop.f32.mrf.mxu1 }
 0x114   : > { %2427 = vst.msk [vmem:[%s3646_s22 + $0x18] sm:$0xf] %vm2420_vm3, %v3018_v31  ;;  %2491 = vst.msk [vmem:[%s3646_s22 + $0x118] sm:$0xf] %vm2420_vm3, %v3082_v32  ;;  %v1787_v39 = vmax.f32 %v1297_v33, 0.0  ;;  %v1851_v40 = vmax.f32 %v1553_v34, 0.0 }
 0x115   : > { %v1301_v41 = vpop.f32.mrf.mxu0  ;;  %1492 = vmatmul.mubr.bf16.gmra.mxu0 %v2735_v29  ;;  %v1557_v42 = vpop.f32.mrf.mxu1  ;;  %1748 = vmatmul.mubr.bf16.gmra.mxu1 %v2799_v30  ;;  %v3370_v31 = vld [vmem:[%s3455_s28 + $0x3f4] ss:$8 sps:$4 sm:$0xff]  }
 0x116   : > { %v3019_v44 = vpack.c.bf16 %v1787_v39, %v1787_v39  ;;  %v3083_v45 = vpack.c.bf16 %v1851_v40, %v1851_v40  ;;  %v1302_v46 = vadd.f32 %v3632_v57, %v1301_v41  ;;  %v1558_v47 = vadd.f32 %v3632_v57, %v1557_v42  ;;  %2846 = vmatprep.mubr.msk.bf16.mxu0 %vm1035_vm0, %v3360_v35  ;;  %v310_v36 = vld [vmem:[%s3455_s28 + $0x1f0] sm:$0xff]  ;;  %v311_v41 = vld [vmem:[%s3455_s28 + $0x1f8] sm:$0xff] }
 0x117   : > { %v1303_v51 = vpop.f32.mrf.mxu0  ;;  %v1559_v52 = vpop.f32.mrf.mxu1  ;;  %2878 = vmatprep.mubr.msk.bf16.mxu1 %vm1035_vm0, %v3362_v38  ;;  %v374_v42 = vld [vmem:[%s3455_s28 + $0x3f0] sm:$0xff]  ;;  %v2741_v50 = vcombine.low %v310_v36, %v311_v41 }
 0x118   : > { %2428 = vst.msk [vmem:[%s3646_s22 + $0x1c] sm:$0xf] %vm2420_vm3, %v3019_v44  ;;  %2492 = vst.msk [vmem:[%s3646_s22 + $0x11c] sm:$0xf] %vm2420_vm3, %v3083_v45  ;;  %v1788_v53 = vmax.f32 %v1302_v46, 0.0  ;;  %v1852_v54 = vmax.f32 %v1558_v47, 0.0  ;;  %v2805_v51 = vcombine.low %v374_v42, %v375_v43 }
 0x119   : > { %v1304_v55 = vpop.f32.mrf.mxu0  ;;  %v1560_v56 = vpop.f32.mrf.mxu1 }
 0x11a   : > { %v3020_v60 = vpack.c.bf16 %v1788_v53, %v1788_v53  ;;  %v3084_v61 = vpack.c.bf16 %v1852_v54, %v1852_v54  ;;  %v1305_v62 = vadd.f32 %v3632_v57, %v1304_v55  ;;  %v1561_v63 = vadd.f32 %v3632_v57, %v1560_v56 }
 0x11b   : > { %v1306_v1 = vpop.f32.mrf.mxu0  ;;  %v1562_v2 = vpop.f32.mrf.mxu1 }
 0x11c   : > { %2429 = vst.msk [vmem:[%s3646_s22 + $0x20] sm:$0xf] %vm2420_vm3, %v3020_v60  ;;  %2493 = vst.msk [vmem:[%s3646_s22 + $0x120] sm:$0xf] %vm2420_vm3, %v3084_v61  ;;  %v1789_v4 = vmax.f32 %v1305_v62, 0.0  ;;  %v1853_v5 = vmax.f32 %v1561_v63, 0.0 }
 0x11d   : > { %v1309_v6 = vpop.f32.mrf.mxu0  ;;  %1500 = vmatmul.mubr.bf16.gmra.mxu0 %v2737_v58  ;;  %v1565_v7 = vpop.f32.mrf.mxu1  ;;  %1756 = vmatmul.mubr.bf16.gmra.mxu1 %v2801_v59 }
 0x11e   : > { %v3021_v9 = vpack.c.bf16 %v1789_v4, %v1789_v4  ;;  %v3085_v10 = vpack.c.bf16 %v1853_v5, %v1853_v5  ;;  %v1310_v11 = vadd.f32 %v3632_v57, %v1309_v6  ;;  %v1566_v12 = vadd.f32 %v3632_v57, %v1565_v7  ;;  %2847 = vmatprep.mubr.msk.bf16.mxu0 %vm1035_vm0, %v3364_v0 }
 0x11f   : > { %v1311_v16 = vpop.f32.mrf.mxu0  ;;  %v1567_v17 = vpop.f32.mrf.mxu1  ;;  %2879 = vmatprep.mubr.msk.bf16.mxu1 %vm1035_vm0, %v3366_v3 }
 0x120   : > { %2430 = vst.msk [vmem:[%s3646_s22 + $0x24] sm:$0xf] %vm2420_vm3, %v3021_v9  ;;  %2494 = vst.msk [vmem:[%s3646_s22 + $0x124] sm:$0xf] %vm2420_vm3, %v3085_v10  ;;  %v1790_v18 = vmax.f32 %v1310_v11, 0.0  ;;  %v1854_v19 = vmax.f32 %v1566_v12, 0.0 }
 0x121   : > { %v1312_v20 = vpop.f32.mrf.mxu0  ;;  %v1568_v21 = vpop.f32.mrf.mxu1 }
 0x122   : > { %v3022_v24 = vpack.c.bf16 %v1790_v18, %v1790_v18  ;;  %v3086_v25 = vpack.c.bf16 %v1854_v19, %v1854_v19  ;;  %v1313_v26 = vadd.f32 %v3632_v57, %v1312_v20  ;;  %v1569_v27 = vadd.f32 %v3632_v57, %v1568_v21 }
 0x123   : > { %v1314_v29 = vpop.f32.mrf.mxu0  ;;  %v1570_v30 = vpop.f32.mrf.mxu1 }
 0x124   : > { %2431 = vst.msk [vmem:[%s3646_s22 + $0x28] sm:$0xf] %vm2420_vm3, %v3022_v24  ;;  %2495 = vst.msk [vmem:[%s3646_s22 + $0x128] sm:$0xf] %vm2420_vm3, %v3086_v25  ;;  %v1791_v32 = vmax.f32 %v1313_v26, 0.0  ;;  %v1855_v33 = vmax.f32 %v1569_v27, 0.0 }
 0x125   : > { %v1317_v34 = vpop.f32.mrf.mxu0  ;;  %1508 = vmatmul.mubr.bf16.gmra.mxu0 %v2739_v22  ;;  %v1573_v35 = vpop.f32.mrf.mxu1  ;;  %1764 = vmatmul.mubr.bf16.gmra.mxu1 %v2803_v23 }
 0x126   : > { %v3023_v37 = vpack.c.bf16 %v1791_v32, %v1791_v32  ;;  %v3087_v38 = vpack.c.bf16 %v1855_v33, %v1855_v33  ;;  %v1318_v39 = vadd.f32 %v3632_v57, %v1317_v34  ;;  %v1574_v40 = vadd.f32 %v3632_v57, %v1573_v35  ;;  %2848 = vmatprep.mubr.msk.bf16.mxu0 %vm1035_vm0, %v3368_v28 }
 0x127   : > { %v1319_v44 = vpop.f32.mrf.mxu0  ;;  %v1575_v45 = vpop.f32.mrf.mxu1  ;;  %2880 = vmatprep.mubr.msk.bf16.mxu1 %vm1035_vm0, %v3370_v31 }
 0x128   : > { %2432 = vst.msk [vmem:[%s3646_s22 + $0x2c] sm:$0xf] %vm2420_vm3, %v3023_v37  ;;  %2496 = vst.msk [vmem:[%s3646_s22 + $0x12c] sm:$0xf] %vm2420_vm3, %v3087_v38  ;;  %v1792_v46 = vmax.f32 %v1318_v39, 0.0  ;;  %v1856_v47 = vmax.f32 %v1574_v40, 0.0 }
 0x129   : > { %v1320_v48 = vpop.f32.mrf.mxu0  ;;  %v1576_v49 = vpop.f32.mrf.mxu1 }
 0x12a   : > { %v3024_v52 = vpack.c.bf16 %v1792_v46, %v1792_v46  ;;  %v3088_v53 = vpack.c.bf16 %v1856_v47, %v1856_v47  ;;  %v1321_v54 = vadd.f32 %v3632_v57, %v1320_v48  ;;  %v1577_v55 = vadd.f32 %v3632_v57, %v1576_v49 }
 0x12b   : > { %v1322_v56 = vpop.f32.mrf.mxu0  ;;  %v1578_v58 = vpop.f32.mrf.mxu1 }
 0x12c   : > { %2433 = vst.msk [vmem:[%s3646_s22 + $0x30] sm:$0xf] %vm2420_vm3, %v3024_v52  ;;  %2497 = vst.msk [vmem:[%s3646_s22 + $0x130] sm:$0xf] %vm2420_vm3, %v3088_v53  ;;  %v1793_v59 = vmax.f32 %v1321_v54, 0.0  ;;  %v1857_v60 = vmax.f32 %v1577_v55, 0.0 }
 0x12d   : > { %v1325_v61 = vpop.f32.mrf.mxu0  ;;  %1516 = vmatmul.mubr.bf16.gmra.mxu0 %v2741_v50  ;;  %v1581_v62 = vpop.f32.mrf.mxu1  ;;  %1772 = vmatmul.mubr.bf16.gmra.mxu1 %v2805_v51 }
 0x12e   : > { %v3025_v63 = vpack.c.bf16 %v1793_v59, %v1793_v59  ;;  %v3089_v0 = vpack.c.bf16 %v1857_v60, %v1857_v60  ;;  %v1326_v1 = vadd.f32 %v3632_v57, %v1325_v61  ;;  %v1582_v2 = vadd.f32 %v3632_v57, %v1581_v62 }
 0x12f   : > { %v1327_v3 = vpop.f32.mrf.mxu0  ;;  %v1583_v4 = vpop.f32.mrf.mxu1 }
 0x130   : > { %2434 = vst.msk [vmem:[%s3646_s22 + $0x34] sm:$0xf] %vm2420_vm3, %v3025_v63  ;;  %2498 = vst.msk [vmem:[%s3646_s22 + $0x134] sm:$0xf] %vm2420_vm3, %v3089_v0  ;;  %v1794_v5 = vmax.f32 %v1326_v1, 0.0  ;;  %v1858_v6 = vmax.f32 %v1582_v2, 0.0 }
 0x131   : > { %v1328_v7 = vpop.f32.mrf.mxu0  ;;  %v1584_v8 = vpop.f32.mrf.mxu1 }
 0x132   : > { %v3026_v9 = vpack.c.bf16 %v1794_v5, %v1794_v5  ;;  %v3090_v10 = vpack.c.bf16 %v1858_v6, %v1858_v6  ;;  %v1329_v11 = vadd.f32 %v3632_v57, %v1328_v7  ;;  %v1585_v12 = vadd.f32 %v3632_v57, %v1584_v8 }
 0x133   : > { %v1330_v13 = vpop.f32.mrf.mxu0  ;;  %v1586_v14 = vpop.f32.mrf.mxu1 }
 0x134   : > { %2435 = vst.msk [vmem:[%s3646_s22 + $0x38] sm:$0xf] %vm2420_vm3, %v3026_v9  ;;  %2499 = vst.msk [vmem:[%s3646_s22 + $0x138] sm:$0xf] %vm2420_vm3, %v3090_v10  ;;  %v1795_v15 = vmax.f32 %v1329_v11, 0.0  ;;  %v1859_v16 = vmax.f32 %v1585_v12, 0.0 }
 0x135   : > { %v1333_v17 = vpop.f32.mrf.mxu0  ;;  %v1589_v18 = vpop.f32.mrf.mxu1 }
 0x136   : > { %v3027_v19 = vpack.c.bf16 %v1795_v15, %v1795_v15  ;;  %v3091_v20 = vpack.c.bf16 %v1859_v16, %v1859_v16  ;;  %v1334_v21 = vadd.f32 %v3632_v57, %v1333_v17  ;;  %v1590_v22 = vadd.f32 %v3632_v57, %v1589_v18 }
 0x137   : > { %v1335_v23 = vpop.f32.mrf.mxu0  ;;  %v1591_v24 = vpop.f32.mrf.mxu1 }
 0x138   : > { %2436 = vst.msk [vmem:[%s3646_s22 + $0x3c] sm:$0xf] %vm2420_vm3, %v3027_v19  ;;  %2500 = vst.msk [vmem:[%s3646_s22 + $0x13c] sm:$0xf] %vm2420_vm3, %v3091_v20  ;;  %v1796_v25 = vmax.f32 %v1334_v21, 0.0  ;;  %v1860_v26 = vmax.f32 %v1590_v22, 0.0 }
 0x139   : > { %v1336_v27 = vpop.f32.mrf.mxu0  ;;  %v1592_v28 = vpop.f32.mrf.mxu1 }
 0x13a   : > { %v3028_v29 = vpack.c.bf16 %v1796_v25, %v1796_v25  ;;  %v3092_v30 = vpack.c.bf16 %v1860_v26, %v1860_v26  ;;  %v1337_v31 = vadd.f32 %v3632_v57, %v1336_v27  ;;  %v1593_v32 = vadd.f32 %v3632_v57, %v1592_v28 }
 0x13b   : > { %v1338_v33 = vpop.f32.mrf.mxu0  ;;  %v1594_v34 = vpop.f32.mrf.mxu1 }
 0x13c   : > { %2437 = vst.msk [vmem:[%s3646_s22 + $0x40] sm:$0xf] %vm2420_vm3, %v3028_v29  ;;  %2501 = vst.msk [vmem:[%s3646_s22 + $0x140] sm:$0xf] %vm2420_vm3, %v3092_v30  ;;  %v1797_v35 = vmax.f32 %v1337_v31, 0.0  ;;  %v1861_v36 = vmax.f32 %v1593_v32, 0.0 }
 0x13d   : > { %v1341_v37 = vpop.f32.mrf.mxu0  ;;  %v1597_v38 = vpop.f32.mrf.mxu1 }
 0x13e   : > { %v3029_v39 = vpack.c.bf16 %v1797_v35, %v1797_v35  ;;  %v3093_v40 = vpack.c.bf16 %v1861_v36, %v1861_v36  ;;  %v1342_v41 = vadd.f32 %v3632_v57, %v1341_v37  ;;  %v1598_v42 = vadd.f32 %v3632_v57, %v1597_v38 }
 0x13f   : > { %v1343_v43 = vpop.f32.mrf.mxu0  ;;  %v1599_v44 = vpop.f32.mrf.mxu1 }
 0x140   : > { %2438 = vst.msk [vmem:[%s3646_s22 + $0x44] sm:$0xf] %vm2420_vm3, %v3029_v39  ;;  %2502 = vst.msk [vmem:[%s3646_s22 + $0x144] sm:$0xf] %vm2420_vm3, %v3093_v40  ;;  %v1798_v45 = vmax.f32 %v1342_v41, 0.0  ;;  %v1862_v46 = vmax.f32 %v1598_v42, 0.0 }
 0x141   : > { %v1344_v47 = vpop.f32.mrf.mxu0  ;;  %v1600_v48 = vpop.f32.mrf.mxu1 }
 0x142   : > { %v3030_v49 = vpack.c.bf16 %v1798_v45, %v1798_v45  ;;  %v3094_v50 = vpack.c.bf16 %v1862_v46, %v1862_v46  ;;  %v1345_v51 = vadd.f32 %v3632_v57, %v1344_v47  ;;  %v1601_v52 = vadd.f32 %v3632_v57, %v1600_v48 }
 0x143   : > { %v1346_v53 = vpop.f32.mrf.mxu0  ;;  %v1602_v54 = vpop.f32.mrf.mxu1 }
 0x144   : > { %2439 = vst.msk [vmem:[%s3646_s22 + $0x48] sm:$0xf] %vm2420_vm3, %v3030_v49  ;;  %2503 = vst.msk [vmem:[%s3646_s22 + $0x148] sm:$0xf] %vm2420_vm3, %v3094_v50  ;;  %v1799_v55 = vmax.f32 %v1345_v51, 0.0  ;;  %v1863_v56 = vmax.f32 %v1601_v52, 0.0 }
 0x145   : > { %v1349_v58 = vpop.f32.mrf.mxu0  ;;  %v1605_v59 = vpop.f32.mrf.mxu1 }
 0x146   : > { %v3031_v60 = vpack.c.bf16 %v1799_v55, %v1799_v55  ;;  %v3095_v61 = vpack.c.bf16 %v1863_v56, %v1863_v56  ;;  %v1350_v62 = vadd.f32 %v3632_v57, %v1349_v58  ;;  %v1606_v63 = vadd.f32 %v3632_v57, %v1605_v59 }
 0x147   : > { %v1351_v0 = vpop.f32.mrf.mxu0  ;;  %v1607_v1 = vpop.f32.mrf.mxu1 }
 0x148   : > { %2440 = vst.msk [vmem:[%s3646_s22 + $0x4c] sm:$0xf] %vm2420_vm3, %v3031_v60  ;;  %2504 = vst.msk [vmem:[%s3646_s22 + $0x14c] sm:$0xf] %vm2420_vm3, %v3095_v61  ;;  %v1800_v2 = vmax.f32 %v1350_v62, 0.0  ;;  %v1864_v3 = vmax.f32 %v1606_v63, 0.0 }
 0x149   : > { %v1352_v4 = vpop.f32.mrf.mxu0  ;;  %v1608_v5 = vpop.f32.mrf.mxu1 }
 0x14a   : > { %v3032_v6 = vpack.c.bf16 %v1800_v2, %v1800_v2  ;;  %v3096_v7 = vpack.c.bf16 %v1864_v3, %v1864_v3  ;;  %v1353_v8 = vadd.f32 %v3632_v57, %v1352_v4  ;;  %v1609_v9 = vadd.f32 %v3632_v57, %v1608_v5 }
 0x14b   : > { %v1354_v10 = vpop.f32.mrf.mxu0  ;;  %v1610_v11 = vpop.f32.mrf.mxu1 }
 0x14c   : > { %2441 = vst.msk [vmem:[%s3646_s22 + $0x50] sm:$0xf] %vm2420_vm3, %v3032_v6  ;;  %2505 = vst.msk [vmem:[%s3646_s22 + $0x150] sm:$0xf] %vm2420_vm3, %v3096_v7  ;;  %v1801_v12 = vmax.f32 %v1353_v8, 0.0  ;;  %v1865_v13 = vmax.f32 %v1609_v9, 0.0 }
 0x14d   : > { %v1357_v14 = vpop.f32.mrf.mxu0  ;;  %v1613_v15 = vpop.f32.mrf.mxu1 }
 0x14e   : > { %v3033_v16 = vpack.c.bf16 %v1801_v12, %v1801_v12  ;;  %v3097_v17 = vpack.c.bf16 %v1865_v13, %v1865_v13  ;;  %v1358_v18 = vadd.f32 %v3632_v57, %v1357_v14  ;;  %v1614_v19 = vadd.f32 %v3632_v57, %v1613_v15 }
 0x14f   : > { %v1359_v20 = vpop.f32.mrf.mxu0  ;;  %v1615_v21 = vpop.f32.mrf.mxu1 }
 0x150   : > { %2442 = vst.msk [vmem:[%s3646_s22 + $0x54] sm:$0xf] %vm2420_vm3, %v3033_v16  ;;  %2506 = vst.msk [vmem:[%s3646_s22 + $0x154] sm:$0xf] %vm2420_vm3, %v3097_v17  ;;  %v1802_v22 = vmax.f32 %v1358_v18, 0.0  ;;  %v1866_v23 = vmax.f32 %v1614_v19, 0.0 }
 0x151   : > { %v1360_v24 = vpop.f32.mrf.mxu0  ;;  %v1616_v25 = vpop.f32.mrf.mxu1 }
 0x152   : > { %v3034_v26 = vpack.c.bf16 %v1802_v22, %v1802_v22  ;;  %v3098_v27 = vpack.c.bf16 %v1866_v23, %v1866_v23  ;;  %v1361_v28 = vadd.f32 %v3632_v57, %v1360_v24  ;;  %v1617_v29 = vadd.f32 %v3632_v57, %v1616_v25 }
 0x153   : > { %v1362_v30 = vpop.f32.mrf.mxu0  ;;  %v1618_v31 = vpop.f32.mrf.mxu1 }
 0x154   : > { %2443 = vst.msk [vmem:[%s3646_s22 + $0x58] sm:$0xf] %vm2420_vm3, %v3034_v26  ;;  %2507 = vst.msk [vmem:[%s3646_s22 + $0x158] sm:$0xf] %vm2420_vm3, %v3098_v27  ;;  %v1803_v32 = vmax.f32 %v1361_v28, 0.0  ;;  %v1867_v33 = vmax.f32 %v1617_v29, 0.0 }
 0x155   : > { %v1365_v34 = vpop.f32.mrf.mxu0  ;;  %v1621_v35 = vpop.f32.mrf.mxu1 }
 0x156   : > { %v3035_v36 = vpack.c.bf16 %v1803_v32, %v1803_v32  ;;  %v3099_v37 = vpack.c.bf16 %v1867_v33, %v1867_v33  ;;  %v1366_v38 = vadd.f32 %v3632_v57, %v1365_v34  ;;  %v1622_v39 = vadd.f32 %v3632_v57, %v1621_v35 }
 0x157   : > { %v1367_v40 = vpop.f32.mrf.mxu0  ;;  %v1623_v41 = vpop.f32.mrf.mxu1 }
 0x158   : > { %2444 = vst.msk [vmem:[%s3646_s22 + $0x5c] sm:$0xf] %vm2420_vm3, %v3035_v36  ;;  %2508 = vst.msk [vmem:[%s3646_s22 + $0x15c] sm:$0xf] %vm2420_vm3, %v3099_v37  ;;  %v1804_v42 = vmax.f32 %v1366_v38, 0.0  ;;  %v1868_v43 = vmax.f32 %v1622_v39, 0.0 }
 0x159   : > { %v1368_v44 = vpop.f32.mrf.mxu0  ;;  %v1624_v45 = vpop.f32.mrf.mxu1 }
 0x15a   : > { %v3036_v46 = vpack.c.bf16 %v1804_v42, %v1804_v42  ;;  %v3100_v47 = vpack.c.bf16 %v1868_v43, %v1868_v43  ;;  %v1369_v48 = vadd.f32 %v3632_v57, %v1368_v44  ;;  %v1625_v49 = vadd.f32 %v3632_v57, %v1624_v45 }
 0x15b   : > { %v1370_v50 = vpop.f32.mrf.mxu0  ;;  %v1626_v51 = vpop.f32.mrf.mxu1 }
 0x15c   : > { %2445 = vst.msk [vmem:[%s3646_s22 + $0x60] sm:$0xf] %vm2420_vm3, %v3036_v46  ;;  %2509 = vst.msk [vmem:[%s3646_s22 + $0x160] sm:$0xf] %vm2420_vm3, %v3100_v47  ;;  %v1805_v52 = vmax.f32 %v1369_v48, 0.0  ;;  %v1869_v53 = vmax.f32 %v1625_v49, 0.0 }
 0x15d   : > { %v1373_v54 = vpop.f32.mrf.mxu0  ;;  %v1629_v55 = vpop.f32.mrf.mxu1 }
 0x15e   : > { %v3037_v56 = vpack.c.bf16 %v1805_v52, %v1805_v52  ;;  %v3101_v58 = vpack.c.bf16 %v1869_v53, %v1869_v53  ;;  %v1374_v59 = vadd.f32 %v3632_v57, %v1373_v54  ;;  %v1630_v60 = vadd.f32 %v3632_v57, %v1629_v55 }
 0x15f   : > { %v1375_v61 = vpop.f32.mrf.mxu0  ;;  %v1631_v62 = vpop.f32.mrf.mxu1 }
 0x160   : > { %2446 = vst.msk [vmem:[%s3646_s22 + $0x64] sm:$0xf] %vm2420_vm3, %v3037_v56  ;;  %2510 = vst.msk [vmem:[%s3646_s22 + $0x164] sm:$0xf] %vm2420_vm3, %v3101_v58  ;;  %v1806_v63 = vmax.f32 %v1374_v59, 0.0  ;;  %v1870_v0 = vmax.f32 %v1630_v60, 0.0 }
 0x161   : > { %v1376_v1 = vpop.f32.mrf.mxu0  ;;  %v1632_v2 = vpop.f32.mrf.mxu1 }
 0x162   : > { %v3038_v3 = vpack.c.bf16 %v1806_v63, %v1806_v63  ;;  %v3102_v4 = vpack.c.bf16 %v1870_v0, %v1870_v0  ;;  %v1377_v5 = vadd.f32 %v3632_v57, %v1376_v1  ;;  %v1633_v6 = vadd.f32 %v3632_v57, %v1632_v2 }
 0x163   : > { %v1378_v7 = vpop.f32.mrf.mxu0  ;;  %v1634_v8 = vpop.f32.mrf.mxu1 }
 0x164   : > { %2447 = vst.msk [vmem:[%s3646_s22 + $0x68] sm:$0xf] %vm2420_vm3, %v3038_v3  ;;  %2511 = vst.msk [vmem:[%s3646_s22 + $0x168] sm:$0xf] %vm2420_vm3, %v3102_v4  ;;  %v1807_v9 = vmax.f32 %v1377_v5, 0.0  ;;  %v1871_v10 = vmax.f32 %v1633_v6, 0.0 }
 0x165   : > { %v1381_v11 = vpop.f32.mrf.mxu0  ;;  %v1637_v12 = vpop.f32.mrf.mxu1 }
 0x166   : > { %v3039_v13 = vpack.c.bf16 %v1807_v9, %v1807_v9  ;;  %v3103_v14 = vpack.c.bf16 %v1871_v10, %v1871_v10  ;;  %v1382_v15 = vadd.f32 %v3632_v57, %v1381_v11  ;;  %v1638_v16 = vadd.f32 %v3632_v57, %v1637_v12 }
 0x167   : > { %v1383_v17 = vpop.f32.mrf.mxu0  ;;  %v1639_v18 = vpop.f32.mrf.mxu1 }
 0x168   : > { %2448 = vst.msk [vmem:[%s3646_s22 + $0x6c] sm:$0xf] %vm2420_vm3, %v3039_v13  ;;  %2512 = vst.msk [vmem:[%s3646_s22 + $0x16c] sm:$0xf] %vm2420_vm3, %v3103_v14  ;;  %v1808_v19 = vmax.f32 %v1382_v15, 0.0  ;;  %v1872_v20 = vmax.f32 %v1638_v16, 0.0 }
 0x169   : > { %v1384_v21 = vpop.f32.mrf.mxu0  ;;  %v1640_v22 = vpop.f32.mrf.mxu1 }
 0x16a   : > { %v3040_v23 = vpack.c.bf16 %v1808_v19, %v1808_v19  ;;  %v3104_v24 = vpack.c.bf16 %v1872_v20, %v1872_v20  ;;  %v1385_v25 = vadd.f32 %v3632_v57, %v1384_v21  ;;  %v1641_v26 = vadd.f32 %v3632_v57, %v1640_v22 }
 0x16b   : > { %v1386_v27 = vpop.f32.mrf.mxu0  ;;  %v1642_v28 = vpop.f32.mrf.mxu1 }
 0x16c   : > { %2449 = vst.msk [vmem:[%s3646_s22 + $0x70] sm:$0xf] %vm2420_vm3, %v3040_v23  ;;  %2513 = vst.msk [vmem:[%s3646_s22 + $0x170] sm:$0xf] %vm2420_vm3, %v3104_v24  ;;  %v1809_v29 = vmax.f32 %v1385_v25, 0.0  ;;  %v1873_v30 = vmax.f32 %v1641_v26, 0.0 }
 0x16d   : > { %v1389_v31 = vpop.f32.mrf.mxu0  ;;  %v1645_v32 = vpop.f32.mrf.mxu1 }
 0x16e   : > { %v3041_v33 = vpack.c.bf16 %v1809_v29, %v1809_v29  ;;  %v3105_v34 = vpack.c.bf16 %v1873_v30, %v1873_v30  ;;  %v1390_v35 = vadd.f32 %v3632_v57, %v1389_v31  ;;  %v1646_v36 = vadd.f32 %v3632_v57, %v1645_v32  ;;  %v3909_v32 = vld [vmem:[%s4094_s2] ss:$0 sm:$0xff] }
 0x16f   : > { %v1391_v37 = vpop.f32.mrf.mxu0  ;;  %v1647_v38 = vpop.f32.mrf.mxu1 }
 0x170   : > { %2450 = vst.msk [vmem:[%s3646_s22 + $0x74] sm:$0xf] %vm2420_vm3, %v3041_v33  ;;  %2514 = vst.msk [vmem:[%s3646_s22 + $0x174] sm:$0xf] %vm2420_vm3, %v3105_v34  ;;  %v1810_v39 = vmax.f32 %v1390_v35, 0.0  ;;  %v1874_v40 = vmax.f32 %v1646_v36, 0.0 }
 0x171   : > { %v1392_v41 = vpop.f32.mrf.mxu0  ;;  %v1648_v42 = vpop.f32.mrf.mxu1 }
 0x172   : > { %v3042_v43 = vpack.c.bf16 %v1810_v39, %v1810_v39  ;;  %v3106_v44 = vpack.c.bf16 %v1874_v40, %v1874_v40  ;;  %v1393_v45 = vadd.f32 %v3632_v57, %v1392_v41  ;;  %v1649_v46 = vadd.f32 %v3632_v57, %v1648_v42 }
 0x173   : > { %v1394_v47 = vpop.f32.mrf.mxu0  ;;  %v1650_v48 = vpop.f32.mrf.mxu1 }
 0x174   : > { %2451 = vst.msk [vmem:[%s3646_s22 + $0x78] sm:$0xf] %vm2420_vm3, %v3042_v43  ;;  %2515 = vst.msk [vmem:[%s3646_s22 + $0x178] sm:$0xf] %vm2420_vm3, %v3106_v44  ;;  %v1811_v49 = vmax.f32 %v1393_v45, 0.0  ;;  %v1875_v50 = vmax.f32 %v1649_v46, 0.0 }
 0x175   : > { %v1397_v51 = vpop.f32.mrf.mxu0  ;;  %v1653_v52 = vpop.f32.mrf.mxu1 }
 0x176   : > { %v3043_v53 = vpack.c.bf16 %v1811_v49, %v1811_v49  ;;  %v3107_v54 = vpack.c.bf16 %v1875_v50, %v1875_v50  ;;  %v1398_v55 = vadd.f32 %v3632_v57, %v1397_v51  ;;  %v1654_v56 = vadd.f32 %v3632_v57, %v1653_v52 }
 0x177   : > { %v1399_v58 = vpop.f32.mrf.mxu0  ;;  %v1655_v59 = vpop.f32.mrf.mxu1 }
 0x178   : > { %2452 = vst.msk [vmem:[%s3646_s22 + $0x7c] sm:$0xf] %vm2420_vm3, %v3043_v53  ;;  %2516 = vst.msk [vmem:[%s3646_s22 + $0x17c] sm:$0xf] %vm2420_vm3, %v3107_v54  ;;  %v1812_v60 = vmax.f32 %v1398_v55, 0.0  ;;  %v1876_v61 = vmax.f32 %v1654_v56, 0.0 }
 0x179   : > { %v1400_v62 = vpop.f32.mrf.mxu0  ;;  %v1656_v63 = vpop.f32.mrf.mxu1 }
 0x17a   : > { %v3044_v0 = vpack.c.bf16 %v1812_v60, %v1812_v60  ;;  %v3108_v1 = vpack.c.bf16 %v1876_v61, %v1876_v61  ;;  %v1401_v2 = vadd.f32 %v3632_v57, %v1400_v62  ;;  %v1657_v3 = vadd.f32 %v3632_v57, %v1656_v63 }
 0x17b   : > { %v1402_v4 = vpop.f32.mrf.mxu0  ;;  %v1658_v5 = vpop.f32.mrf.mxu1 }
 0x17c   : > { %2453 = vst.msk [vmem:[%s3646_s22 + $0x80] sm:$0xf] %vm2420_vm3, %v3044_v0  ;;  %2517 = vst.msk [vmem:[%s3646_s22 + $0x180] sm:$0xf] %vm2420_vm3, %v3108_v1  ;;  %v1813_v6 = vmax.f32 %v1401_v2, 0.0  ;;  %v1877_v7 = vmax.f32 %v1657_v3, 0.0 }
 0x17d   : > { %v1405_v8 = vpop.f32.mrf.mxu0  ;;  %v1661_v9 = vpop.f32.mrf.mxu1 }
 0x17e   : > { %v3045_v10 = vpack.c.bf16 %v1813_v6, %v1813_v6  ;;  %v3109_v11 = vpack.c.bf16 %v1877_v7, %v1877_v7  ;;  %v1406_v12 = vadd.f32 %v3632_v57, %v1405_v8  ;;  %v1662_v13 = vadd.f32 %v3632_v57, %v1661_v9 }
 0x17f   : > { %v1407_v14 = vpop.f32.mrf.mxu0  ;;  %v1663_v15 = vpop.f32.mrf.mxu1 }
 0x180   : > { %2454 = vst.msk [vmem:[%s3646_s22 + $0x84] sm:$0xf] %vm2420_vm3, %v3045_v10  ;;  %2518 = vst.msk [vmem:[%s3646_s22 + $0x184] sm:$0xf] %vm2420_vm3, %v3109_v11  ;;  %v1814_v16 = vmax.f32 %v1406_v12, 0.0  ;;  %v1878_v17 = vmax.f32 %v1662_v13, 0.0 }
 0x181   : > { %v1408_v18 = vpop.f32.mrf.mxu0  ;;  %v1664_v19 = vpop.f32.mrf.mxu1 }
 0x182   : > { %v3046_v20 = vpack.c.bf16 %v1814_v16, %v1814_v16  ;;  %v3110_v21 = vpack.c.bf16 %v1878_v17, %v1878_v17  ;;  %v1409_v22 = vadd.f32 %v3632_v57, %v1408_v18  ;;  %v1665_v23 = vadd.f32 %v3632_v57, %v1664_v19 }
 0x183   : > { %v1410_v24 = vpop.f32.mrf.mxu0  ;;  %v1666_v25 = vpop.f32.mrf.mxu1 }
 0x184   : > { %2455 = vst.msk [vmem:[%s3646_s22 + $0x88] sm:$0xf] %vm2420_vm3, %v3046_v20  ;;  %2519 = vst.msk [vmem:[%s3646_s22 + $0x188] sm:$0xf] %vm2420_vm3, %v3110_v21  ;;  %v1815_v26 = vmax.f32 %v1409_v22, 0.0  ;;  %v1879_v27 = vmax.f32 %v1665_v23, 0.0 }
 0x185   : > { %v1413_v28 = vpop.f32.mrf.mxu0  ;;  %v1669_v29 = vpop.f32.mrf.mxu1 }
 0x186   : > { %v3047_v30 = vpack.c.bf16 %v1815_v26, %v1815_v26  ;;  %v3111_v31 = vpack.c.bf16 %v1879_v27, %v1879_v27  ;;  %v1414_v57 = vadd.f32 %v3909_v32, %v1413_v28  ;;  %v1670_v33 = vadd.f32 %v3909_v32, %v1669_v29 }
 0x187   : > { %v1415_v34 = vpop.f32.mrf.mxu0  ;;  %v1671_v35 = vpop.f32.mrf.mxu1 }
 0x188   : > { %2456 = vst.msk [vmem:[%s3646_s22 + $0x8c] sm:$0xf] %vm2420_vm3, %v3047_v30  ;;  %2520 = vst.msk [vmem:[%s3646_s22 + $0x18c] sm:$0xf] %vm2420_vm3, %v3111_v31  ;;  %v1816_v36 = vmax.f32 %v1414_v57, 0.0  ;;  %v1880_v37 = vmax.f32 %v1670_v33, 0.0 }
 0x189   : > { %v1416_v38 = vpop.f32.mrf.mxu0  ;;  %v1672_v39 = vpop.f32.mrf.mxu1 }
 0x18a   : > { %v3048_v40 = vpack.c.bf16 %v1816_v36, %v1816_v36  ;;  %v3112_v41 = vpack.c.bf16 %v1880_v37, %v1880_v37  ;;  %v1417_v42 = vadd.f32 %v3909_v32, %v1416_v38  ;;  %v1673_v43 = vadd.f32 %v3909_v32, %v1672_v39 }
 0x18b   : > { %v1418_v44 = vpop.f32.mrf.mxu0  ;;  %v1674_v45 = vpop.f32.mrf.mxu1 }
 0x18c   : > { %2457 = vst.msk [vmem:[%s3646_s22 + $0x90] sm:$0xf] %vm2420_vm3, %v3048_v40  ;;  %2521 = vst.msk [vmem:[%s3646_s22 + $0x190] sm:$0xf] %vm2420_vm3, %v3112_v41  ;;  %v1817_v46 = vmax.f32 %v1417_v42, 0.0  ;;  %v1881_v47 = vmax.f32 %v1673_v43, 0.0 }
 0x18d   : > { %v1421_v48 = vpop.f32.mrf.mxu0  ;;  %v1677_v49 = vpop.f32.mrf.mxu1 }
 0x18e   : > { %v3049_v50 = vpack.c.bf16 %v1817_v46, %v1817_v46  ;;  %v3113_v51 = vpack.c.bf16 %v1881_v47, %v1881_v47  ;;  %v1422_v52 = vadd.f32 %v3909_v32, %v1421_v48  ;;  %v1678_v53 = vadd.f32 %v3909_v32, %v1677_v49 }
 0x18f   : > { %v1423_v54 = vpop.f32.mrf.mxu0  ;;  %v1679_v55 = vpop.f32.mrf.mxu1 }
 0x190   : > { %2458 = vst.msk [vmem:[%s3646_s22 + $0x94] sm:$0xf] %vm2420_vm3, %v3049_v50  ;;  %2522 = vst.msk [vmem:[%s3646_s22 + $0x194] sm:$0xf] %vm2420_vm3, %v3113_v51  ;;  %v1818_v56 = vmax.f32 %v1422_v52, 0.0  ;;  %v1882_v58 = vmax.f32 %v1678_v53, 0.0 }
 0x191   : > { %v1424_v59 = vpop.f32.mrf.mxu0  ;;  %v1680_v60 = vpop.f32.mrf.mxu1 }
 0x192   : > { %v3050_v61 = vpack.c.bf16 %v1818_v56, %v1818_v56  ;;  %v3114_v62 = vpack.c.bf16 %v1882_v58, %v1882_v58  ;;  %v1425_v63 = vadd.f32 %v3909_v32, %v1424_v59  ;;  %v1681_v0 = vadd.f32 %v3909_v32, %v1680_v60 }
 0x193   : > { %v1426_v1 = vpop.f32.mrf.mxu0  ;;  %v1682_v2 = vpop.f32.mrf.mxu1 }
 0x194   : > { %2459 = vst.msk [vmem:[%s3646_s22 + $0x98] sm:$0xf] %vm2420_vm3, %v3050_v61  ;;  %2523 = vst.msk [vmem:[%s3646_s22 + $0x198] sm:$0xf] %vm2420_vm3, %v3114_v62  ;;  %v1819_v3 = vmax.f32 %v1425_v63, 0.0  ;;  %v1883_v4 = vmax.f32 %v1681_v0, 0.0 }
 0x195   : > { %v1429_v5 = vpop.f32.mrf.mxu0  ;;  %v1685_v6 = vpop.f32.mrf.mxu1 }
 0x196   : > { %v3051_v7 = vpack.c.bf16 %v1819_v3, %v1819_v3  ;;  %v3115_v8 = vpack.c.bf16 %v1883_v4, %v1883_v4  ;;  %v1430_v9 = vadd.f32 %v3909_v32, %v1429_v5  ;;  %v1686_v10 = vadd.f32 %v3909_v32, %v1685_v6 }
 0x197   : > { %v1431_v11 = vpop.f32.mrf.mxu0  ;;  %v1687_v12 = vpop.f32.mrf.mxu1 }
 0x198   : > { %2460 = vst.msk [vmem:[%s3646_s22 + $0x9c] sm:$0xf] %vm2420_vm3, %v3051_v7  ;;  %2524 = vst.msk [vmem:[%s3646_s22 + $0x19c] sm:$0xf] %vm2420_vm3, %v3115_v8  ;;  %v1820_v13 = vmax.f32 %v1430_v9, 0.0  ;;  %v1884_v14 = vmax.f32 %v1686_v10, 0.0 }
 0x199   : > { %v1432_v15 = vpop.f32.mrf.mxu0  ;;  %v1688_v16 = vpop.f32.mrf.mxu1 }
 0x19a   : > { %v3052_v17 = vpack.c.bf16 %v1820_v13, %v1820_v13  ;;  %v3116_v18 = vpack.c.bf16 %v1884_v14, %v1884_v14  ;;  %v1433_v19 = vadd.f32 %v3909_v32, %v1432_v15  ;;  %v1689_v20 = vadd.f32 %v3909_v32, %v1688_v16 }
 0x19b   : > { %v1434_v21 = vpop.f32.mrf.mxu0  ;;  %v1690_v22 = vpop.f32.mrf.mxu1 }
 0x19c   : > { %2461 = vst.msk [vmem:[%s3646_s22 + $0xa0] sm:$0xf] %vm2420_vm3, %v3052_v17  ;;  %2525 = vst.msk [vmem:[%s3646_s22 + $0x1a0] sm:$0xf] %vm2420_vm3, %v3116_v18  ;;  %v1821_v23 = vmax.f32 %v1433_v19, 0.0  ;;  %v1885_v24 = vmax.f32 %v1689_v20, 0.0 }
 0x19d   : > { %v1437_v25 = vpop.f32.mrf.mxu0  ;;  %v1693_v26 = vpop.f32.mrf.mxu1 }
 0x19e   : > { %v3053_v27 = vpack.c.bf16 %v1821_v23, %v1821_v23  ;;  %v3117_v28 = vpack.c.bf16 %v1885_v24, %v1885_v24  ;;  %v1438_v29 = vadd.f32 %v3909_v32, %v1437_v25  ;;  %v1694_v30 = vadd.f32 %v3909_v32, %v1693_v26 }
 0x19f   : > { %v1439_v31 = vpop.f32.mrf.mxu0  ;;  %v1695_v57 = vpop.f32.mrf.mxu1 }
 0x1a0   : > { %2462 = vst.msk [vmem:[%s3646_s22 + $0xa4] sm:$0xf] %vm2420_vm3, %v3053_v27  ;;  %2526 = vst.msk [vmem:[%s3646_s22 + $0x1a4] sm:$0xf] %vm2420_vm3, %v3117_v28  ;;  %v1822_v33 = vmax.f32 %v1438_v29, 0.0  ;;  %v1886_v34 = vmax.f32 %v1694_v30, 0.0 }
 0x1a1   : > { %v1440_v35 = vpop.f32.mrf.mxu0  ;;  %v1696_v36 = vpop.f32.mrf.mxu1 }
 0x1a2   : > { %v3054_v37 = vpack.c.bf16 %v1822_v33, %v1822_v33  ;;  %v3118_v38 = vpack.c.bf16 %v1886_v34, %v1886_v34  ;;  %v1441_v39 = vadd.f32 %v3909_v32, %v1440_v35  ;;  %v1697_v40 = vadd.f32 %v3909_v32, %v1696_v36 }
 0x1a3   : > { %v1442_v41 = vpop.f32.mrf.mxu0  ;;  %v1698_v42 = vpop.f32.mrf.mxu1 }
 0x1a4   : > { %2463 = vst.msk [vmem:[%s3646_s22 + $0xa8] sm:$0xf] %vm2420_vm3, %v3054_v37  ;;  %2527 = vst.msk [vmem:[%s3646_s22 + $0x1a8] sm:$0xf] %vm2420_vm3, %v3118_v38  ;;  %v1823_v43 = vmax.f32 %v1441_v39, 0.0  ;;  %v1887_v44 = vmax.f32 %v1697_v40, 0.0 }
 0x1a5   : > { %v1445_v45 = vpop.f32.mrf.mxu0  ;;  %v1701_v46 = vpop.f32.mrf.mxu1 }
 0x1a6   : > { %v3055_v47 = vpack.c.bf16 %v1823_v43, %v1823_v43  ;;  %v3119_v48 = vpack.c.bf16 %v1887_v44, %v1887_v44  ;;  %v1446_v49 = vadd.f32 %v3909_v32, %v1445_v45  ;;  %v1702_v50 = vadd.f32 %v3909_v32, %v1701_v46 }
 0x1a7   : > { %v1447_v51 = vpop.f32.mrf.mxu0  ;;  %v1703_v52 = vpop.f32.mrf.mxu1 }
 0x1a8   : > { %2464 = vst.msk [vmem:[%s3646_s22 + $0xac] sm:$0xf] %vm2420_vm3, %v3055_v47  ;;  %2528 = vst.msk [vmem:[%s3646_s22 + $0x1ac] sm:$0xf] %vm2420_vm3, %v3119_v48  ;;  %v1824_v53 = vmax.f32 %v1446_v49, 0.0  ;;  %v1888_v54 = vmax.f32 %v1702_v50, 0.0 }
 0x1a9   : > { %v1448_v55 = vpop.f32.mrf.mxu0  ;;  %v1704_v56 = vpop.f32.mrf.mxu1 }
 0x1aa   : > { %v3056_v58 = vpack.c.bf16 %v1824_v53, %v1824_v53  ;;  %v3120_v59 = vpack.c.bf16 %v1888_v54, %v1888_v54  ;;  %v1449_v60 = vadd.f32 %v3909_v32, %v1448_v55  ;;  %v1705_v61 = vadd.f32 %v3909_v32, %v1704_v56 }
 0x1ab   : > { %v1450_v62 = vpop.f32.mrf.mxu0  ;;  %v1706_v63 = vpop.f32.mrf.mxu1 }
 0x1ac   : > { %2465 = vst.msk [vmem:[%s3646_s22 + $0xb0] sm:$0xf] %vm2420_vm3, %v3056_v58  ;;  %2529 = vst.msk [vmem:[%s3646_s22 + $0x1b0] sm:$0xf] %vm2420_vm3, %v3120_v59  ;;  %v1825_v0 = vmax.f32 %v1449_v60, 0.0  ;;  %v1889_v1 = vmax.f32 %v1705_v61, 0.0 }
 0x1ad   : > { %v1453_v2 = vpop.f32.mrf.mxu0  ;;  %v1709_v3 = vpop.f32.mrf.mxu1 }
 0x1ae   : > { %v3057_v4 = vpack.c.bf16 %v1825_v0, %v1825_v0  ;;  %v3121_v5 = vpack.c.bf16 %v1889_v1, %v1889_v1  ;;  %v1454_v6 = vadd.f32 %v3909_v32, %v1453_v2  ;;  %v1710_v7 = vadd.f32 %v3909_v32, %v1709_v3 }
 0x1af   : > { %v1455_v8 = vpop.f32.mrf.mxu0  ;;  %v1711_v9 = vpop.f32.mrf.mxu1 }
 0x1b0   : > { %2466 = vst.msk [vmem:[%s3646_s22 + $0xb4] sm:$0xf] %vm2420_vm3, %v3057_v4  ;;  %2530 = vst.msk [vmem:[%s3646_s22 + $0x1b4] sm:$0xf] %vm2420_vm3, %v3121_v5  ;;  %v1826_v10 = vmax.f32 %v1454_v6, 0.0  ;;  %v1890_v11 = vmax.f32 %v1710_v7, 0.0 }
 0x1b1   : > { %v1456_v12 = vpop.f32.mrf.mxu0  ;;  %v1712_v13 = vpop.f32.mrf.mxu1 }
 0x1b2   : > { %v3058_v14 = vpack.c.bf16 %v1826_v10, %v1826_v10  ;;  %v3122_v15 = vpack.c.bf16 %v1890_v11, %v1890_v11  ;;  %v1457_v16 = vadd.f32 %v3909_v32, %v1456_v12  ;;  %v1713_v17 = vadd.f32 %v3909_v32, %v1712_v13 }
 0x1b3   : > { %v1458_v18 = vpop.f32.mrf.mxu0  ;;  %v1714_v19 = vpop.f32.mrf.mxu1 }
 0x1b4   : > { %2467 = vst.msk [vmem:[%s3646_s22 + $0xb8] sm:$0xf] %vm2420_vm3, %v3058_v14  ;;  %2531 = vst.msk [vmem:[%s3646_s22 + $0x1b8] sm:$0xf] %vm2420_vm3, %v3122_v15  ;;  %v1827_v20 = vmax.f32 %v1457_v16, 0.0  ;;  %v1891_v21 = vmax.f32 %v1713_v17, 0.0 }
 0x1b5   : > { %v1461_v22 = vpop.f32.mrf.mxu0  ;;  %v1717_v23 = vpop.f32.mrf.mxu1 }
 0x1b6   : > { %v3059_v24 = vpack.c.bf16 %v1827_v20, %v1827_v20  ;;  %v3123_v25 = vpack.c.bf16 %v1891_v21, %v1891_v21  ;;  %v1462_v26 = vadd.f32 %v3909_v32, %v1461_v22  ;;  %v1718_v27 = vadd.f32 %v3909_v32, %v1717_v23 }
 0x1b7   : > { %v1463_v28 = vpop.f32.mrf.mxu0  ;;  %v1719_v29 = vpop.f32.mrf.mxu1 }
 0x1b8   : > { %2468 = vst.msk [vmem:[%s3646_s22 + $0xbc] sm:$0xf] %vm2420_vm3, %v3059_v24  ;;  %2532 = vst.msk [vmem:[%s3646_s22 + $0x1bc] sm:$0xf] %vm2420_vm3, %v3123_v25  ;;  %v1828_v30 = vmax.f32 %v1462_v26, 0.0  ;;  %v1892_v31 = vmax.f32 %v1718_v27, 0.0 }
 0x1b9   : > { %v1464_v57 = vpop.f32.mrf.mxu0  ;;  %v1720_v33 = vpop.f32.mrf.mxu1 }
 0x1ba   : > { %v3060_v34 = vpack.c.bf16 %v1828_v30, %v1828_v30  ;;  %v3124_v35 = vpack.c.bf16 %v1892_v31, %v1892_v31  ;;  %v1465_v36 = vadd.f32 %v3909_v32, %v1464_v57  ;;  %v1721_v37 = vadd.f32 %v3909_v32, %v1720_v33 }
 0x1bb   : > { %v1466_v38 = vpop.f32.mrf.mxu0  ;;  %v1722_v39 = vpop.f32.mrf.mxu1 }
 0x1bc   : > { %2469 = vst.msk [vmem:[%s3646_s22 + $0xc0] sm:$0xf] %vm2420_vm3, %v3060_v34  ;;  %2533 = vst.msk [vmem:[%s3646_s22 + $0x1c0] sm:$0xf] %vm2420_vm3, %v3124_v35  ;;  %v1829_v40 = vmax.f32 %v1465_v36, 0.0  ;;  %v1893_v41 = vmax.f32 %v1721_v37, 0.0 }
 0x1bd   : > { %v1469_v42 = vpop.f32.mrf.mxu0  ;;  %v1725_v43 = vpop.f32.mrf.mxu1 }
 0x1be   : > { %v3061_v44 = vpack.c.bf16 %v1829_v40, %v1829_v40  ;;  %v3125_v45 = vpack.c.bf16 %v1893_v41, %v1893_v41  ;;  %v1470_v46 = vadd.f32 %v3909_v32, %v1469_v42  ;;  %v1726_v47 = vadd.f32 %v3909_v32, %v1725_v43 }
 0x1bf   : > { %v1471_v48 = vpop.f32.mrf.mxu0  ;;  %v1727_v49 = vpop.f32.mrf.mxu1 }
 0x1c0   : > { %2470 = vst.msk [vmem:[%s3646_s22 + $0xc4] sm:$0xf] %vm2420_vm3, %v3061_v44  ;;  %2534 = vst.msk [vmem:[%s3646_s22 + $0x1c4] sm:$0xf] %vm2420_vm3, %v3125_v45  ;;  %v1830_v50 = vmax.f32 %v1470_v46, 0.0  ;;  %v1894_v51 = vmax.f32 %v1726_v47, 0.0 }
 0x1c1   : > { %v1472_v52 = vpop.f32.mrf.mxu0  ;;  %v1728_v53 = vpop.f32.mrf.mxu1 }
 0x1c2   : > { %v3062_v54 = vpack.c.bf16 %v1830_v50, %v1830_v50  ;;  %v3126_v55 = vpack.c.bf16 %v1894_v51, %v1894_v51  ;;  %v1473_v56 = vadd.f32 %v3909_v32, %v1472_v52  ;;  %v1729_v58 = vadd.f32 %v3909_v32, %v1728_v53 }
 0x1c3   : > { %v1474_v59 = vpop.f32.mrf.mxu0  ;;  %v1730_v60 = vpop.f32.mrf.mxu1 }
 0x1c4   : > { %2471 = vst.msk [vmem:[%s3646_s22 + $0xc8] sm:$0xf] %vm2420_vm3, %v3062_v54  ;;  %2535 = vst.msk [vmem:[%s3646_s22 + $0x1c8] sm:$0xf] %vm2420_vm3, %v3126_v55  ;;  %v1831_v61 = vmax.f32 %v1473_v56, 0.0  ;;  %v1895_v62 = vmax.f32 %v1729_v58, 0.0 }
 0x1c5   : > { %v1477_v63 = vpop.f32.mrf.mxu0  ;;  %v1733_v0 = vpop.f32.mrf.mxu1 }
 0x1c6   : > { %v3063_v1 = vpack.c.bf16 %v1831_v61, %v1831_v61  ;;  %v3127_v2 = vpack.c.bf16 %v1895_v62, %v1895_v62  ;;  %v1478_v3 = vadd.f32 %v3909_v32, %v1477_v63  ;;  %v1734_v4 = vadd.f32 %v3909_v32, %v1733_v0 }
 0x1c7   : > { %v1479_v5 = vpop.f32.mrf.mxu0  ;;  %v1735_v6 = vpop.f32.mrf.mxu1 }
 0x1c8   : > { %2472 = vst.msk [vmem:[%s3646_s22 + $0xcc] sm:$0xf] %vm2420_vm3, %v3063_v1  ;;  %2536 = vst.msk [vmem:[%s3646_s22 + $0x1cc] sm:$0xf] %vm2420_vm3, %v3127_v2  ;;  %v1832_v7 = vmax.f32 %v1478_v3, 0.0  ;;  %v1896_v8 = vmax.f32 %v1734_v4, 0.0 }
 0x1c9   : > { %v1480_v9 = vpop.f32.mrf.mxu0  ;;  %v1736_v10 = vpop.f32.mrf.mxu1 }
 0x1ca   : > { %v3064_v11 = vpack.c.bf16 %v1832_v7, %v1832_v7  ;;  %v3128_v12 = vpack.c.bf16 %v1896_v8, %v1896_v8  ;;  %v1481_v13 = vadd.f32 %v3909_v32, %v1480_v9  ;;  %v1737_v14 = vadd.f32 %v3909_v32, %v1736_v10 }
 0x1cb   : > { %v1482_v15 = vpop.f32.mrf.mxu0  ;;  %v1738_v16 = vpop.f32.mrf.mxu1 }
 0x1cc   : > { %2473 = vst.msk [vmem:[%s3646_s22 + $0xd0] sm:$0xf] %vm2420_vm3, %v3064_v11  ;;  %2537 = vst.msk [vmem:[%s3646_s22 + $0x1d0] sm:$0xf] %vm2420_vm3, %v3128_v12  ;;  %v1833_v17 = vmax.f32 %v1481_v13, 0.0  ;;  %v1897_v18 = vmax.f32 %v1737_v14, 0.0 }
 0x1cd   : > { %v1485_v19 = vpop.f32.mrf.mxu0  ;;  %v1741_v20 = vpop.f32.mrf.mxu1 }
 0x1ce   : > { %v3065_v21 = vpack.c.bf16 %v1833_v17, %v1833_v17  ;;  %v3129_v22 = vpack.c.bf16 %v1897_v18, %v1897_v18  ;;  %v1486_v23 = vadd.f32 %v3909_v32, %v1485_v19  ;;  %v1742_v24 = vadd.f32 %v3909_v32, %v1741_v20 }
 0x1cf   : > { %v1487_v25 = vpop.f32.mrf.mxu0  ;;  %v1743_v26 = vpop.f32.mrf.mxu1 }
 0x1d0   : > { %2474 = vst.msk [vmem:[%s3646_s22 + $0xd4] sm:$0xf] %vm2420_vm3, %v3065_v21  ;;  %2538 = vst.msk [vmem:[%s3646_s22 + $0x1d4] sm:$0xf] %vm2420_vm3, %v3129_v22  ;;  %v1834_v27 = vmax.f32 %v1486_v23, 0.0  ;;  %v1898_v28 = vmax.f32 %v1742_v24, 0.0 }
 0x1d1   : > { %v1488_v29 = vpop.f32.mrf.mxu0  ;;  %v1744_v30 = vpop.f32.mrf.mxu1 }
 0x1d2   : > { %v3066_v31 = vpack.c.bf16 %v1834_v27, %v1834_v27  ;;  %v3130_v57 = vpack.c.bf16 %v1898_v28, %v1898_v28  ;;  %v1489_v33 = vadd.f32 %v3909_v32, %v1488_v29  ;;  %v1745_v34 = vadd.f32 %v3909_v32, %v1744_v30 }
 0x1d3   : > { %v1490_v35 = vpop.f32.mrf.mxu0  ;;  %v1746_v36 = vpop.f32.mrf.mxu1 }
 0x1d4   : > { %2475 = vst.msk [vmem:[%s3646_s22 + $0xd8] sm:$0xf] %vm2420_vm3, %v3066_v31  ;;  %2539 = vst.msk [vmem:[%s3646_s22 + $0x1d8] sm:$0xf] %vm2420_vm3, %v3130_v57  ;;  %v1835_v37 = vmax.f32 %v1489_v33, 0.0  ;;  %v1899_v38 = vmax.f32 %v1745_v34, 0.0 }
 0x1d5   : > { %v1493_v39 = vpop.f32.mrf.mxu0  ;;  %v1749_v40 = vpop.f32.mrf.mxu1 }
 0x1d6   : > { %v3067_v41 = vpack.c.bf16 %v1835_v37, %v1835_v37  ;;  %v3131_v42 = vpack.c.bf16 %v1899_v38, %v1899_v38  ;;  %v1494_v43 = vadd.f32 %v3909_v32, %v1493_v39  ;;  %v1750_v44 = vadd.f32 %v3909_v32, %v1749_v40 }
 0x1d7   : > { %v1495_v45 = vpop.f32.mrf.mxu0  ;;  %v1751_v46 = vpop.f32.mrf.mxu1 }
 0x1d8   : > { %2476 = vst.msk [vmem:[%s3646_s22 + $0xdc] sm:$0xf] %vm2420_vm3, %v3067_v41  ;;  %2540 = vst.msk [vmem:[%s3646_s22 + $0x1dc] sm:$0xf] %vm2420_vm3, %v3131_v42  ;;  %v1836_v47 = vmax.f32 %v1494_v43, 0.0  ;;  %v1900_v48 = vmax.f32 %v1750_v44, 0.0 }
 0x1d9   : > { %v1496_v49 = vpop.f32.mrf.mxu0  ;;  %v1752_v50 = vpop.f32.mrf.mxu1 }
 0x1da   : > { %v3068_v51 = vpack.c.bf16 %v1836_v47, %v1836_v47  ;;  %v3132_v52 = vpack.c.bf16 %v1900_v48, %v1900_v48  ;;  %v1497_v53 = vadd.f32 %v3909_v32, %v1496_v49  ;;  %v1753_v54 = vadd.f32 %v3909_v32, %v1752_v50 }
 0x1db   : > { %v1498_v55 = vpop.f32.mrf.mxu0  ;;  %v1754_v56 = vpop.f32.mrf.mxu1 }
 0x1dc   : > { %2477 = vst.msk [vmem:[%s3646_s22 + $0xe0] sm:$0xf] %vm2420_vm3, %v3068_v51  ;;  %2541 = vst.msk [vmem:[%s3646_s22 + $0x1e0] sm:$0xf] %vm2420_vm3, %v3132_v52  ;;  %v1837_v58 = vmax.f32 %v1497_v53, 0.0  ;;  %v1901_v59 = vmax.f32 %v1753_v54, 0.0 }
 0x1dd   : > { %v1501_v60 = vpop.f32.mrf.mxu0  ;;  %v1757_v61 = vpop.f32.mrf.mxu1 }
 0x1de   : > { %v3069_v62 = vpack.c.bf16 %v1837_v58, %v1837_v58  ;;  %v3133_v63 = vpack.c.bf16 %v1901_v59, %v1901_v59  ;;  %v1502_v0 = vadd.f32 %v3909_v32, %v1501_v60  ;;  %v1758_v1 = vadd.f32 %v3909_v32, %v1757_v61 }
 0x1df   : > { %v1503_v2 = vpop.f32.mrf.mxu0  ;;  %v1759_v3 = vpop.f32.mrf.mxu1 }
 0x1e0   : > { %2478 = vst.msk [vmem:[%s3646_s22 + $0xe4] sm:$0xf] %vm2420_vm3, %v3069_v62  ;;  %2542 = vst.msk [vmem:[%s3646_s22 + $0x1e4] sm:$0xf] %vm2420_vm3, %v3133_v63  ;;  %v1838_v4 = vmax.f32 %v1502_v0, 0.0  ;;  %v1902_v5 = vmax.f32 %v1758_v1, 0.0 }
 0x1e1   : > { %v1504_v6 = vpop.f32.mrf.mxu0  ;;  %v1760_v7 = vpop.f32.mrf.mxu1 }
 0x1e2   : > { %v3070_v8 = vpack.c.bf16 %v1838_v4, %v1838_v4  ;;  %v3134_v9 = vpack.c.bf16 %v1902_v5, %v1902_v5  ;;  %v1505_v10 = vadd.f32 %v3909_v32, %v1504_v6  ;;  %v1761_v11 = vadd.f32 %v3909_v32, %v1760_v7 }
 0x1e3   : > { %v1506_v12 = vpop.f32.mrf.mxu0  ;;  %v1762_v13 = vpop.f32.mrf.mxu1 }
 0x1e4   : > { %2479 = vst.msk [vmem:[%s3646_s22 + $0xe8] sm:$0xf] %vm2420_vm3, %v3070_v8  ;;  %2543 = vst.msk [vmem:[%s3646_s22 + $0x1e8] sm:$0xf] %vm2420_vm3, %v3134_v9  ;;  %v1839_v14 = vmax.f32 %v1505_v10, 0.0  ;;  %v1903_v15 = vmax.f32 %v1761_v11, 0.0 }
 0x1e5   : > { %v1509_v16 = vpop.f32.mrf.mxu0  ;;  %v1765_v17 = vpop.f32.mrf.mxu1 }
 0x1e6   : > { %v3071_v18 = vpack.c.bf16 %v1839_v14, %v1839_v14  ;;  %v3135_v19 = vpack.c.bf16 %v1903_v15, %v1903_v15  ;;  %v1510_v20 = vadd.f32 %v3909_v32, %v1509_v16  ;;  %v1766_v21 = vadd.f32 %v3909_v32, %v1765_v17 }
 0x1e7   : > { %v1511_v22 = vpop.f32.mrf.mxu0  ;;  %v1767_v23 = vpop.f32.mrf.mxu1 }
 0x1e8   : > { %2480 = vst.msk [vmem:[%s3646_s22 + $0xec] sm:$0xf] %vm2420_vm3, %v3071_v18  ;;  %2544 = vst.msk [vmem:[%s3646_s22 + $0x1ec] sm:$0xf] %vm2420_vm3, %v3135_v19  ;;  %v1840_v24 = vmax.f32 %v1510_v20, 0.0  ;;  %v1904_v25 = vmax.f32 %v1766_v21, 0.0 }
 0x1e9   : > { %v1512_v26 = vpop.f32.mrf.mxu0  ;;  %v1768_v27 = vpop.f32.mrf.mxu1 }
 0x1ea   : > { %v3072_v28 = vpack.c.bf16 %v1840_v24, %v1840_v24  ;;  %v3136_v29 = vpack.c.bf16 %v1904_v25, %v1904_v25  ;;  %v1513_v30 = vadd.f32 %v3909_v32, %v1512_v26  ;;  %v1769_v31 = vadd.f32 %v3909_v32, %v1768_v27 }
 0x1eb   : > { %v1514_v57 = vpop.f32.mrf.mxu0  ;;  %v1770_v33 = vpop.f32.mrf.mxu1 }
 0x1ec   : > { %2481 = vst.msk [vmem:[%s3646_s22 + $0xf0] sm:$0xf] %vm2420_vm3, %v3072_v28  ;;  %2545 = vst.msk [vmem:[%s3646_s22 + $0x1f0] sm:$0xf] %vm2420_vm3, %v3136_v29  ;;  %v1841_v34 = vmax.f32 %v1513_v30, 0.0  ;;  %v1905_v35 = vmax.f32 %v1769_v31, 0.0 }
 0x1ed   : > { %v1517_v36 = vpop.f32.mrf.mxu0  ;;  %v1773_v37 = vpop.f32.mrf.mxu1 }
 0x1ee   : > { %v3073_v38 = vpack.c.bf16 %v1841_v34, %v1841_v34  ;;  %v3137_v39 = vpack.c.bf16 %v1905_v35, %v1905_v35  ;;  %v1518_v40 = vadd.f32 %v3909_v32, %v1517_v36  ;;  %v1774_v41 = vadd.f32 %v3909_v32, %v1773_v37 }
 0x1ef   : > { %v1519_v42 = vpop.f32.mrf.mxu0  ;;  %v1775_v43 = vpop.f32.mrf.mxu1 }
 0x1f0   : > { %2482 = vst.msk [vmem:[%s3646_s22 + $0xf4] sm:$0xf] %vm2420_vm3, %v3073_v38  ;;  %2546 = vst.msk [vmem:[%s3646_s22 + $0x1f4] sm:$0xf] %vm2420_vm3, %v3137_v39  ;;  %v1842_v44 = vmax.f32 %v1518_v40, 0.0  ;;  %v1906_v45 = vmax.f32 %v1774_v41, 0.0 }
 0x1f1   : > { %v1520_v46 = vpop.f32.mrf.mxu0  ;;  %v1776_v47 = vpop.f32.mrf.mxu1 }
 0x1f2   : > { %v3074_v48 = vpack.c.bf16 %v1842_v44, %v1842_v44  ;;  %v3138_v49 = vpack.c.bf16 %v1906_v45, %v1906_v45  ;;  %v1521_v50 = vadd.f32 %v3909_v32, %v1520_v46  ;;  %v1777_v51 = vadd.f32 %v3909_v32, %v1776_v47 }
 0x1f3   : > { %v1522_v52 = vpop.f32.mrf.mxu0  ;;  %v1778_v53 = vpop.f32.mrf.mxu1 }
 0x1f4   : > { %2483 = vst.msk [vmem:[%s3646_s22 + $0xf8] sm:$0xf] %vm2420_vm3, %v3074_v48  ;;  %2547 = vst.msk [vmem:[%s3646_s22 + $0x1f8] sm:$0xf] %vm2420_vm3, %v3138_v49  ;;  %v1843_v54 = vmax.f32 %v1521_v50, 0.0  ;;  %v1907_v55 = vmax.f32 %v1777_v51, 0.0 }
 0x1f6   : > { %v3075_v56 = vpack.c.bf16 %v1843_v54, %v1843_v54  ;;  %v3139_v58 = vpack.c.bf16 %v1907_v55, %v1907_v55 }
 0x1f8   : > { %2484 = vst.msk [vmem:[%s3646_s22 + $0xfc] sm:$0xf] %vm2420_vm3, %v3075_v56  ;;  %2548 = vst.msk [vmem:[%s3646_s22 + $0x1fc] sm:$0xf] %vm2420_vm3, %v3139_v58 }
 0x1f9 PF: > { %s13_s14 = sadd.s32 1, %s3395_s14   ;;  %s4096_s12 = smov %s3391_s13 }
 0x1fa   : > { %p10_p5 = scmp.ge.s32.totalorder %s13_s14, 4   ;;  %s4097_s13 = smov %s4099_s15 }
 0x1fc   :  { %12 = sbr.rel (!%p10_p5) target bundleno = 2 (0x2), region = 68 }

// kernel: _lambda_.58
= control target key start
LH: loop header
LB: loop body
LE: loop exit
PB: predicated region body
PF: predicated region fallthrough
CT: control target
= control target key end

     0   :  { %vm344_vm0 = vcmask 1043456   ;;  %vm247_vm1 = vcmask 64512   ;;  %vm957_vm2 = vcmask 60416   ;;  %s1830_s1 = inlined_call_operand.vmem [shape: bf16[1,8,8], index: 1, kind: input, shape index: {}]   ;;  %s1831_s0 = inlined_call_operand.vmem [shape: bf16[1,512,8], index: 0, kind: input, shape index: {}]   ;;  %s1832_s2 = inlined_call_operand.vmem [shape: f32[1,1,8], index: 2, kind: input, shape index: {}]   ;;  %s1833_s3 = inlined_call_operand.vmem [shape: bf16[1,512,8], index: 3, kind: output, shape index: {}]  }
   0x1   :  { %v79_v0 = vld [vmem:[%s1830_s1] sm:$0xf]  ;;  %v1324_v4 = vld [vmem:[%s1831_s0 + $0x8] sm:$0xff]   ;;  %v1326_v6 = vld [vmem:[%s1831_s0 + $0x10] sm:$0xff]  }
   0x2   :  { %1320 = vmatprep.subr.msk.bf16.mxu0 %vm344_vm0, %v79_v0  ;;  %1321 = vmatprep.subr.msk.bf16.mxu1 %vm344_vm0, %v79_v0  ;;  %v346_v1 = vsel %vm344_vm0, %v79_v0, 0  ;;  %v1322_v2 = vld [vmem:[%s1831_s0] sm:$0xff]   ;;  %v1325_v5 = vld [vmem:[%s1831_s0 + $0x88] sm:$0xff]   ;;  %v1327_v7 = vld [vmem:[%s1831_s0 + $0x90] sm:$0xff]  }
   0x3   :  { %1253 = vmatpush3.bf16.msra.mxu0 %v346_v1  ;;  %1319 = vmatpush3.bf16.msra.mxu1 %v346_v1  ;;  %v1323_v3 = vld [vmem:[%s1831_s0 + $0x80] sm:$0xff]   ;;  %v1328_v8 = vld [vmem:[%s1831_s0 + $0x18] sm:$0xff]   ;;  %v1332_v12 = vld [vmem:[%s1831_s0 + $0x28] sm:$0xff]  }
   0x4   :  { %1254 = vmatprep.mubr.msk.bf16.mxu0 %vm247_vm1, %v1322_v2  ;;  %1286 = vmatprep.mubr.msk.bf16.mxu1 %vm247_vm1, %v1323_v3  ;;  %v1329_v9 = vld [vmem:[%s1831_s0 + $0x98] sm:$0xff]   ;;  %v1330_v10 = vld [vmem:[%s1831_s0 + $0x20] sm:$0xff]   ;;  %v1333_v13 = vld [vmem:[%s1831_s0 + $0xa8] sm:$0xff]  }
   0x5   :  { %v1331_v11 = vld [vmem:[%s1831_s0 + $0xa0] sm:$0xff]   ;;  %v1334_v14 = vld [vmem:[%s1831_s0 + $0x30] sm:$0xff]   ;;  %v1336_v16 = vld [vmem:[%s1831_s0 + $0x38] sm:$0xff]  }
   0x6   :  { %1255 = vmatmul.mubr.msk.bf16.vlgmr.msra.gmra.mxu0 %vm247_vm1, %v1324_v4  ;;  %1287 = vmatmul.mubr.msk.bf16.vlgmr.msra.gmra.mxu1 %vm247_vm1, %v1325_v5  ;;  %v1335_v15 = vld [vmem:[%s1831_s0 + $0xb0] sm:$0xff]   ;;  %v1337_v17 = vld [vmem:[%s1831_s0 + $0xb8] sm:$0xff]   ;;  %v1338_v18 = vld [vmem:[%s1831_s0 + $0x40] sm:$0xff]  }
   0x7   :  { %1258 = vmatprep.mubr.msk.bf16.mxu0 %vm247_vm1, %v1326_v6  ;;  %1290 = vmatprep.mubr.msk.bf16.mxu1 %vm247_vm1, %v1327_v7  ;;  %v1339_v19 = vld [vmem:[%s1831_s0 + $0xc0] sm:$0xff]   ;;  %v1340_v20 = vld [vmem:[%s1831_s0 + $0x48] sm:$0xff]   ;;  %v1342_v22 = vld [vmem:[%s1831_s0 + $0x50] sm:$0xff]  }
   0x8   :  { %v1341_v21 = vld [vmem:[%s1831_s0 + $0xc8] sm:$0xff]   ;;  %v1343_v23 = vld [vmem:[%s1831_s0 + $0xd0] sm:$0xff]   ;;  %v1344_v24 = vld [vmem:[%s1831_s0 + $0x58] sm:$0xff]  }
   0x9   :  { %v1345_v25 = vld [vmem:[%s1831_s0 + $0xd8] sm:$0xff]   ;;  %v1346_v26 = vld [vmem:[%s1831_s0 + $0x60] sm:$0xff]   ;;  %v1348_v28 = vld [vmem:[%s1831_s0 + $0x68] sm:$0xff]  }
   0xa   :  { %v1347_v27 = vld [vmem:[%s1831_s0 + $0xe0] sm:$0xff]   ;;  %v1349_v29 = vld [vmem:[%s1831_s0 + $0xe8] sm:$0xff]   ;;  %v1350_v30 = vld [vmem:[%s1831_s0 + $0x70] sm:$0xff]  }
   0xb   :  { %v1351_v31 = vld [vmem:[%s1831_s0 + $0xf0] sm:$0xff]   ;;  %v1352_v32 = vld [vmem:[%s1831_s0 + $0x78] sm:$0xff]   ;;  %v1508_v34 = vld [vmem:[%s1832_s2] ss:$0 sm:$0xff] }
   0xc   :  { %v1353_v33 = vld [vmem:[%s1831_s0 + $0xf8] sm:$0xff]  }
   0xe   :  { %1259 = vmatmul.mubr.msk.bf16.gmra.mxu0 %vm247_vm1, %v1328_v8  ;;  %1291 = vmatmul.mubr.msk.bf16.gmra.mxu1 %vm247_vm1, %v1329_v9 }
   0xf   :  { %1262 = vmatprep.mubr.msk.bf16.mxu0 %vm247_vm1, %v1330_v10  ;;  %1294 = vmatprep.mubr.msk.bf16.mxu1 %vm247_vm1, %v1331_v11 }
  0x16   :  { %1263 = vmatmul.mubr.msk.bf16.gmra.mxu0 %vm247_vm1, %v1332_v12  ;;  %1295 = vmatmul.mubr.msk.bf16.gmra.mxu1 %vm247_vm1, %v1333_v13 }
  0x17   :  { %1266 = vmatprep.mubr.msk.bf16.mxu0 %vm247_vm1, %v1334_v14  ;;  %1298 = vmatprep.mubr.msk.bf16.mxu1 %vm247_vm1, %v1335_v15 }
  0x1e   :  { %1267 = vmatmul.mubr.msk.bf16.gmra.mxu0 %vm247_vm1, %v1336_v16  ;;  %1299 = vmatmul.mubr.msk.bf16.gmra.mxu1 %vm247_vm1, %v1337_v17 }
  0x1f   :  { %1270 = vmatprep.mubr.msk.bf16.mxu0 %vm247_vm1, %v1338_v18  ;;  %1302 = vmatprep.mubr.msk.bf16.mxu1 %vm247_vm1, %v1339_v19 }
  0x26   :  { %1271 = vmatmul.mubr.msk.bf16.gmra.mxu0 %vm247_vm1, %v1340_v20  ;;  %1303 = vmatmul.mubr.msk.bf16.gmra.mxu1 %vm247_vm1, %v1341_v21 }
  0x27   :  { %1274 = vmatprep.mubr.msk.bf16.mxu0 %vm247_vm1, %v1342_v22  ;;  %1306 = vmatprep.mubr.msk.bf16.mxu1 %vm247_vm1, %v1343_v23 }
  0x2e   :  { %1275 = vmatmul.mubr.msk.bf16.gmra.mxu0 %vm247_vm1, %v1344_v24  ;;  %1307 = vmatmul.mubr.msk.bf16.gmra.mxu1 %vm247_vm1, %v1345_v25 }
  0x2f   :  { %1278 = vmatprep.mubr.msk.bf16.mxu0 %vm247_vm1, %v1346_v26  ;;  %1310 = vmatprep.mubr.msk.bf16.mxu1 %vm247_vm1, %v1347_v27 }
  0x36   :  { %1279 = vmatmul.mubr.msk.bf16.gmra.mxu0 %vm247_vm1, %v1348_v28  ;;  %1311 = vmatmul.mubr.msk.bf16.gmra.mxu1 %vm247_vm1, %v1349_v29 }
  0x37   :  { %1282 = vmatprep.mubr.msk.bf16.mxu0 %vm247_vm1, %v1350_v30  ;;  %1314 = vmatprep.mubr.msk.bf16.mxu1 %vm247_vm1, %v1351_v31 }
  0x3e   :  { %1283 = vmatmul.mubr.msk.bf16.gmra.mxu0 %vm247_vm1, %v1352_v32  ;;  %1315 = vmatmul.mubr.msk.bf16.gmra.mxu1 %vm247_vm1, %v1353_v33 }
  0xc6   :  { %v1256_v35 = vpop.f32.mrf.mxu0  ;;  %v1288_v37 = vpop.f32.mrf.mxu1 }
  0xc7   :  { %v391_v36 = vadd.f32 %v1256_v35, %v1508_v34  ;;  %v519_v38 = vadd.f32 %v1288_v37, %v1508_v34 }
  0xc8   :  { %v382_v39 = vpop.f32.mrf.mxu0  ;;  %v510_v42 = vpop.f32.mrf.mxu1 }
  0xc9   :  { %v639_v40 = vmax.f32 %v391_v36, 0.0  ;;  %v383_v41 = vadd.f32 %v1508_v34, %v382_v39  ;;  %v671_v43 = vmax.f32 %v519_v38, 0.0  ;;  %v511_v44 = vadd.f32 %v1508_v34, %v510_v42 }
  0xca   :  { %v1257_v45 = vpop.f32.mrf.mxu0  ;;  %v1289_v49 = vpop.f32.mrf.mxu1 }
  0xcb   :  { %v1157_v46 = vpack.c.bf16 %v639_v40, %v639_v40  ;;  %v637_v47 = vmax.f32 %v383_v41, 0.0  ;;  %v394_v48 = vadd.f32 %v1257_v45, %v1508_v34  ;;  %v1189_v50 = vpack.c.bf16 %v671_v43, %v671_v43 }
  0xcc   :  { %v669_v51 = vmax.f32 %v511_v44, 0.0  ;;  %v522_v52 = vadd.f32 %v1289_v49, %v1508_v34  ;;  %v385_v53 = vpop.f32.mrf.mxu0  ;;  %v513_v57 = vpop.f32.mrf.mxu1 }
  0xcd   :  { %960 = vst.msk [vmem:[%s1833_s3 + $0x8] sm:$0xf] %vm957_vm2, %v1157_v46  ;;  %v1155_v54 = vpack.c.bf16 %v637_v47, %v637_v47  ;;  %v640_v55 = vmax.f32 %v394_v48, 0.0  ;;  %v386_v56 = vadd.f32 %v1508_v34, %v385_v53  ;;  %992 = vst.msk [vmem:[%s1833_s3 + $0x88] sm:$0xf] %vm957_vm2, %v1189_v50  ;;  %v514_v60 = vadd.f32 %v1508_v34, %v513_v57 }
  0xce   :  { %v1187_v58 = vpack.c.bf16 %v669_v51, %v669_v51  ;;  %v672_v59 = vmax.f32 %v522_v52, 0.0  ;;  %v1260_v61 = vpop.f32.mrf.mxu0  ;;  %v1292_v1 = vpop.f32.mrf.mxu1 }
  0xcf   :  { %958 = vst.msk [vmem:[%s1833_s3] sm:$0xf] %vm957_vm2, %v1155_v54  ;;  %v1158_v62 = vpack.c.bf16 %v640_v55, %v640_v55  ;;  %v638_v63 = vmax.f32 %v386_v56, 0.0  ;;  %v407_v0 = vadd.f32 %v1260_v61, %v1508_v34  ;;  %v670_v3 = vmax.f32 %v514_v60, 0.0 }
  0xd0   :  { %990 = vst.msk [vmem:[%s1833_s3 + $0x80] sm:$0xf] %vm957_vm2, %v1187_v58  ;;  %v1190_v2 = vpack.c.bf16 %v672_v59, %v672_v59  ;;  %v535_v4 = vadd.f32 %v1292_v1, %v1508_v34  ;;  %v398_v5 = vpop.f32.mrf.mxu0  ;;  %v526_v9 = vpop.f32.mrf.mxu1 }
  0xd1   :  { %961 = vst.msk [vmem:[%s1833_s3 + $0xc] sm:$0xf] %vm957_vm2, %v1158_v62  ;;  %v1156_v6 = vpack.c.bf16 %v638_v63, %v638_v63  ;;  %v643_v7 = vmax.f32 %v407_v0, 0.0  ;;  %v399_v8 = vadd.f32 %v1508_v34, %v398_v5  ;;  %v1188_v10 = vpack.c.bf16 %v670_v3, %v670_v3 }
  0xd2   :  { %993 = vst.msk [vmem:[%s1833_s3 + $0x8c] sm:$0xf] %vm957_vm2, %v1190_v2  ;;  %v675_v11 = vmax.f32 %v535_v4, 0.0  ;;  %v527_v12 = vadd.f32 %v1508_v34, %v526_v9  ;;  %v1261_v13 = vpop.f32.mrf.mxu0  ;;  %v1293_v17 = vpop.f32.mrf.mxu1 }
  0xd3   :  { %959 = vst.msk [vmem:[%s1833_s3 + $0x4] sm:$0xf] %vm957_vm2, %v1156_v6  ;;  %v1161_v14 = vpack.c.bf16 %v643_v7, %v643_v7  ;;  %v641_v15 = vmax.f32 %v399_v8, 0.0  ;;  %v410_v16 = vadd.f32 %v1261_v13, %v1508_v34  ;;  %991 = vst.msk [vmem:[%s1833_s3 + $0x84] sm:$0xf] %vm957_vm2, %v1188_v10  ;;  %v538_v20 = vadd.f32 %v1293_v17, %v1508_v34 }
  0xd4   :  { %v1193_v18 = vpack.c.bf16 %v675_v11, %v675_v11  ;;  %v673_v19 = vmax.f32 %v527_v12, 0.0  ;;  %v401_v21 = vpop.f32.mrf.mxu0  ;;  %v529_v25 = vpop.f32.mrf.mxu1 }
  0xd5   :  { %964 = vst.msk [vmem:[%s1833_s3 + $0x18] sm:$0xf] %vm957_vm2, %v1161_v14  ;;  %v1159_v22 = vpack.c.bf16 %v641_v15, %v641_v15  ;;  %v644_v23 = vmax.f32 %v410_v16, 0.0  ;;  %v402_v24 = vadd.f32 %v1508_v34, %v401_v21  ;;  %v676_v27 = vmax.f32 %v538_v20, 0.0 }
  0xd6   :  { %996 = vst.msk [vmem:[%s1833_s3 + $0x98] sm:$0xf] %vm957_vm2, %v1193_v18  ;;  %v1191_v26 = vpack.c.bf16 %v673_v19, %v673_v19  ;;  %v530_v28 = vadd.f32 %v1508_v34, %v529_v25  ;;  %v1264_v29 = vpop.f32.mrf.mxu0  ;;  %v1296_v33 = vpop.f32.mrf.mxu1 }
  0xd7   :  { %962 = vst.msk [vmem:[%s1833_s3 + $0x10] sm:$0xf] %vm957_vm2, %v1159_v22  ;;  %v1162_v30 = vpack.c.bf16 %v644_v23, %v644_v23  ;;  %v642_v31 = vmax.f32 %v402_v24, 0.0  ;;  %v423_v32 = vadd.f32 %v1264_v29, %v1508_v34  ;;  %v1194_v35 = vpack.c.bf16 %v676_v27, %v676_v27 }
  0xd8   :  { %994 = vst.msk [vmem:[%s1833_s3 + $0x90] sm:$0xf] %vm957_vm2, %v1191_v26  ;;  %v674_v36 = vmax.f32 %v530_v28, 0.0  ;;  %v551_v37 = vadd.f32 %v1296_v33, %v1508_v34  ;;  %v414_v38 = vpop.f32.mrf.mxu0  ;;  %v542_v42 = vpop.f32.mrf.mxu1 }
  0xd9   :  { %965 = vst.msk [vmem:[%s1833_s3 + $0x1c] sm:$0xf] %vm957_vm2, %v1162_v30  ;;  %v1160_v39 = vpack.c.bf16 %v642_v31, %v642_v31  ;;  %v647_v40 = vmax.f32 %v423_v32, 0.0  ;;  %v415_v41 = vadd.f32 %v1508_v34, %v414_v38  ;;  %997 = vst.msk [vmem:[%s1833_s3 + $0x9c] sm:$0xf] %vm957_vm2, %v1194_v35  ;;  %v543_v45 = vadd.f32 %v1508_v34, %v542_v42 }
  0xda   :  { %v1192_v43 = vpack.c.bf16 %v674_v36, %v674_v36  ;;  %v679_v44 = vmax.f32 %v551_v37, 0.0  ;;  %v1265_v46 = vpop.f32.mrf.mxu0  ;;  %v1297_v50 = vpop.f32.mrf.mxu1 }
  0xdb   :  { %963 = vst.msk [vmem:[%s1833_s3 + $0x14] sm:$0xf] %vm957_vm2, %v1160_v39  ;;  %v1165_v47 = vpack.c.bf16 %v647_v40, %v647_v40  ;;  %v645_v48 = vmax.f32 %v415_v41, 0.0  ;;  %v426_v49 = vadd.f32 %v1265_v46, %v1508_v34  ;;  %v677_v52 = vmax.f32 %v543_v45, 0.0 }
  0xdc   :  { %995 = vst.msk [vmem:[%s1833_s3 + $0x94] sm:$0xf] %vm957_vm2, %v1192_v43  ;;  %v1197_v51 = vpack.c.bf16 %v679_v44, %v679_v44  ;;  %v554_v53 = vadd.f32 %v1297_v50, %v1508_v34  ;;  %v417_v54 = vpop.f32.mrf.mxu0  ;;  %v545_v58 = vpop.f32.mrf.mxu1 }
  0xdd   :  { %968 = vst.msk [vmem:[%s1833_s3 + $0x28] sm:$0xf] %vm957_vm2, %v1165_v47  ;;  %v1163_v55 = vpack.c.bf16 %v645_v48, %v645_v48  ;;  %v648_v56 = vmax.f32 %v426_v49, 0.0  ;;  %v418_v57 = vadd.f32 %v1508_v34, %v417_v54  ;;  %v1195_v59 = vpack.c.bf16 %v677_v52, %v677_v52 }
  0xde   :  { %1000 = vst.msk [vmem:[%s1833_s3 + $0xa8] sm:$0xf] %vm957_vm2, %v1197_v51  ;;  %v680_v60 = vmax.f32 %v554_v53, 0.0  ;;  %v546_v61 = vadd.f32 %v1508_v34, %v545_v58  ;;  %v1268_v62 = vpop.f32.mrf.mxu0  ;;  %v1300_v2 = vpop.f32.mrf.mxu1 }
  0xdf   :  { %966 = vst.msk [vmem:[%s1833_s3 + $0x20] sm:$0xf] %vm957_vm2, %v1163_v55  ;;  %v1166_v63 = vpack.c.bf16 %v648_v56, %v648_v56  ;;  %v646_v0 = vmax.f32 %v418_v57, 0.0  ;;  %v439_v1 = vadd.f32 %v1268_v62, %v1508_v34  ;;  %998 = vst.msk [vmem:[%s1833_s3 + $0xa0] sm:$0xf] %vm957_vm2, %v1195_v59  ;;  %v567_v5 = vadd.f32 %v1300_v2, %v1508_v34 }
  0xe0   :  { %v1198_v3 = vpack.c.bf16 %v680_v60, %v680_v60  ;;  %v678_v4 = vmax.f32 %v546_v61, 0.0  ;;  %v430_v6 = vpop.f32.mrf.mxu0  ;;  %v558_v10 = vpop.f32.mrf.mxu1 }
  0xe1   :  { %969 = vst.msk [vmem:[%s1833_s3 + $0x2c] sm:$0xf] %vm957_vm2, %v1166_v63  ;;  %v1164_v7 = vpack.c.bf16 %v646_v0, %v646_v0  ;;  %v651_v8 = vmax.f32 %v439_v1, 0.0  ;;  %v431_v9 = vadd.f32 %v1508_v34, %v430_v6  ;;  %v683_v12 = vmax.f32 %v567_v5, 0.0 }
  0xe2   :  { %1001 = vst.msk [vmem:[%s1833_s3 + $0xac] sm:$0xf] %vm957_vm2, %v1198_v3  ;;  %v1196_v11 = vpack.c.bf16 %v678_v4, %v678_v4  ;;  %v559_v13 = vadd.f32 %v1508_v34, %v558_v10  ;;  %v1269_v14 = vpop.f32.mrf.mxu0  ;;  %v1301_v18 = vpop.f32.mrf.mxu1 }
  0xe3   :  { %967 = vst.msk [vmem:[%s1833_s3 + $0x24] sm:$0xf] %vm957_vm2, %v1164_v7  ;;  %v1169_v15 = vpack.c.bf16 %v651_v8, %v651_v8  ;;  %v649_v16 = vmax.f32 %v431_v9, 0.0  ;;  %v442_v17 = vadd.f32 %v1269_v14, %v1508_v34  ;;  %v1201_v19 = vpack.c.bf16 %v683_v12, %v683_v12 }
  0xe4   :  { %999 = vst.msk [vmem:[%s1833_s3 + $0xa4] sm:$0xf] %vm957_vm2, %v1196_v11  ;;  %v681_v20 = vmax.f32 %v559_v13, 0.0  ;;  %v570_v21 = vadd.f32 %v1301_v18, %v1508_v34  ;;  %v433_v22 = vpop.f32.mrf.mxu0  ;;  %v561_v26 = vpop.f32.mrf.mxu1 }
  0xe5   :  { %972 = vst.msk [vmem:[%s1833_s3 + $0x38] sm:$0xf] %vm957_vm2, %v1169_v15  ;;  %v1167_v23 = vpack.c.bf16 %v649_v16, %v649_v16  ;;  %v652_v24 = vmax.f32 %v442_v17, 0.0  ;;  %v434_v25 = vadd.f32 %v1508_v34, %v433_v22  ;;  %1004 = vst.msk [vmem:[%s1833_s3 + $0xb8] sm:$0xf] %vm957_vm2, %v1201_v19  ;;  %v562_v29 = vadd.f32 %v1508_v34, %v561_v26 }
  0xe6   :  { %v1199_v27 = vpack.c.bf16 %v681_v20, %v681_v20  ;;  %v684_v28 = vmax.f32 %v570_v21, 0.0  ;;  %v1272_v30 = vpop.f32.mrf.mxu0  ;;  %v1304_v35 = vpop.f32.mrf.mxu1 }
  0xe7   :  { %970 = vst.msk [vmem:[%s1833_s3 + $0x30] sm:$0xf] %vm957_vm2, %v1167_v23  ;;  %v1170_v31 = vpack.c.bf16 %v652_v24, %v652_v24  ;;  %v650_v32 = vmax.f32 %v434_v25, 0.0  ;;  %v455_v33 = vadd.f32 %v1272_v30, %v1508_v34  ;;  %v682_v37 = vmax.f32 %v562_v29, 0.0 }
  0xe8   :  { %1002 = vst.msk [vmem:[%s1833_s3 + $0xb0] sm:$0xf] %vm957_vm2, %v1199_v27  ;;  %v1202_v36 = vpack.c.bf16 %v684_v28, %v684_v28  ;;  %v583_v38 = vadd.f32 %v1304_v35, %v1508_v34  ;;  %v446_v39 = vpop.f32.mrf.mxu0  ;;  %v574_v43 = vpop.f32.mrf.mxu1 }
  0xe9   :  { %973 = vst.msk [vmem:[%s1833_s3 + $0x3c] sm:$0xf] %vm957_vm2, %v1170_v31  ;;  %v1168_v40 = vpack.c.bf16 %v650_v32, %v650_v32  ;;  %v655_v41 = vmax.f32 %v455_v33, 0.0  ;;  %v447_v42 = vadd.f32 %v1508_v34, %v446_v39  ;;  %v1200_v44 = vpack.c.bf16 %v682_v37, %v682_v37 }
  0xea   :  { %1005 = vst.msk [vmem:[%s1833_s3 + $0xbc] sm:$0xf] %vm957_vm2, %v1202_v36  ;;  %v687_v45 = vmax.f32 %v583_v38, 0.0  ;;  %v575_v46 = vadd.f32 %v1508_v34, %v574_v43  ;;  %v1273_v47 = vpop.f32.mrf.mxu0  ;;  %v1305_v51 = vpop.f32.mrf.mxu1 }
  0xeb   :  { %971 = vst.msk [vmem:[%s1833_s3 + $0x34] sm:$0xf] %vm957_vm2, %v1168_v40  ;;  %v1173_v48 = vpack.c.bf16 %v655_v41, %v655_v41  ;;  %v653_v49 = vmax.f32 %v447_v42, 0.0  ;;  %v458_v50 = vadd.f32 %v1273_v47, %v1508_v34  ;;  %1003 = vst.msk [vmem:[%s1833_s3 + $0xb4] sm:$0xf] %vm957_vm2, %v1200_v44  ;;  %v586_v54 = vadd.f32 %v1305_v51, %v1508_v34 }
  0xec   :  { %v1205_v52 = vpack.c.bf16 %v687_v45, %v687_v45  ;;  %v685_v53 = vmax.f32 %v575_v46, 0.0  ;;  %v449_v55 = vpop.f32.mrf.mxu0  ;;  %v577_v59 = vpop.f32.mrf.mxu1 }
  0xed   :  { %976 = vst.msk [vmem:[%s1833_s3 + $0x48] sm:$0xf] %vm957_vm2, %v1173_v48  ;;  %v1171_v56 = vpack.c.bf16 %v653_v49, %v653_v49  ;;  %v656_v57 = vmax.f32 %v458_v50, 0.0  ;;  %v450_v58 = vadd.f32 %v1508_v34, %v449_v55  ;;  %v688_v61 = vmax.f32 %v586_v54, 0.0 }
  0xee   :  { %1008 = vst.msk [vmem:[%s1833_s3 + $0xc8] sm:$0xf] %vm957_vm2, %v1205_v52  ;;  %v1203_v60 = vpack.c.bf16 %v685_v53, %v685_v53  ;;  %v578_v62 = vadd.f32 %v1508_v34, %v577_v59  ;;  %v1276_v63 = vpop.f32.mrf.mxu0  ;;  %v1308_v3 = vpop.f32.mrf.mxu1 }
  0xef   :  { %974 = vst.msk [vmem:[%s1833_s3 + $0x40] sm:$0xf] %vm957_vm2, %v1171_v56  ;;  %v1174_v0 = vpack.c.bf16 %v656_v57, %v656_v57  ;;  %v654_v1 = vmax.f32 %v450_v58, 0.0  ;;  %v471_v2 = vadd.f32 %v1276_v63, %v1508_v34  ;;  %v1206_v4 = vpack.c.bf16 %v688_v61, %v688_v61 }
  0xf0   :  { %1006 = vst.msk [vmem:[%s1833_s3 + $0xc0] sm:$0xf] %vm957_vm2, %v1203_v60  ;;  %v686_v5 = vmax.f32 %v578_v62, 0.0  ;;  %v599_v6 = vadd.f32 %v1308_v3, %v1508_v34  ;;  %v462_v7 = vpop.f32.mrf.mxu0  ;;  %v590_v11 = vpop.f32.mrf.mxu1 }
  0xf1   :  { %977 = vst.msk [vmem:[%s1833_s3 + $0x4c] sm:$0xf] %vm957_vm2, %v1174_v0  ;;  %v1172_v8 = vpack.c.bf16 %v654_v1, %v654_v1  ;;  %v659_v9 = vmax.f32 %v471_v2, 0.0  ;;  %v463_v10 = vadd.f32 %v1508_v34, %v462_v7  ;;  %1009 = vst.msk [vmem:[%s1833_s3 + $0xcc] sm:$0xf] %vm957_vm2, %v1206_v4  ;;  %v591_v14 = vadd.f32 %v1508_v34, %v590_v11 }
  0xf2   :  { %v1204_v12 = vpack.c.bf16 %v686_v5, %v686_v5  ;;  %v691_v13 = vmax.f32 %v599_v6, 0.0  ;;  %v1277_v15 = vpop.f32.mrf.mxu0  ;;  %v1309_v19 = vpop.f32.mrf.mxu1 }
  0xf3   :  { %975 = vst.msk [vmem:[%s1833_s3 + $0x44] sm:$0xf] %vm957_vm2, %v1172_v8  ;;  %v1177_v16 = vpack.c.bf16 %v659_v9, %v659_v9  ;;  %v657_v17 = vmax.f32 %v463_v10, 0.0  ;;  %v474_v18 = vadd.f32 %v1277_v15, %v1508_v34  ;;  %v689_v21 = vmax.f32 %v591_v14, 0.0 }
  0xf4   :  { %1007 = vst.msk [vmem:[%s1833_s3 + $0xc4] sm:$0xf] %vm957_vm2, %v1204_v12  ;;  %v1209_v20 = vpack.c.bf16 %v691_v13, %v691_v13  ;;  %v602_v22 = vadd.f32 %v1309_v19, %v1508_v34  ;;  %v465_v23 = vpop.f32.mrf.mxu0  ;;  %v593_v27 = vpop.f32.mrf.mxu1 }
  0xf5   :  { %980 = vst.msk [vmem:[%s1833_s3 + $0x58] sm:$0xf] %vm957_vm2, %v1177_v16  ;;  %v1175_v24 = vpack.c.bf16 %v657_v17, %v657_v17  ;;  %v660_v25 = vmax.f32 %v474_v18, 0.0  ;;  %v466_v26 = vadd.f32 %v1508_v34, %v465_v23  ;;  %v1207_v28 = vpack.c.bf16 %v689_v21, %v689_v21 }
  0xf6   :  { %1012 = vst.msk [vmem:[%s1833_s3 + $0xd8] sm:$0xf] %vm957_vm2, %v1209_v20  ;;  %v692_v29 = vmax.f32 %v602_v22, 0.0  ;;  %v594_v30 = vadd.f32 %v1508_v34, %v593_v27  ;;  %v1280_v31 = vpop.f32.mrf.mxu0  ;;  %v1312_v36 = vpop.f32.mrf.mxu1 }
  0xf7   :  { %978 = vst.msk [vmem:[%s1833_s3 + $0x50] sm:$0xf] %vm957_vm2, %v1175_v24  ;;  %v1178_v32 = vpack.c.bf16 %v660_v25, %v660_v25  ;;  %v658_v33 = vmax.f32 %v466_v26, 0.0  ;;  %v487_v35 = vadd.f32 %v1280_v31, %v1508_v34  ;;  %1010 = vst.msk [vmem:[%s1833_s3 + $0xd0] sm:$0xf] %vm957_vm2, %v1207_v28  ;;  %v615_v39 = vadd.f32 %v1312_v36, %v1508_v34 }
  0xf8   :  { %v1210_v37 = vpack.c.bf16 %v692_v29, %v692_v29  ;;  %v690_v38 = vmax.f32 %v594_v30, 0.0  ;;  %v478_v40 = vpop.f32.mrf.mxu0  ;;  %v606_v44 = vpop.f32.mrf.mxu1 }
  0xf9   :  { %981 = vst.msk [vmem:[%s1833_s3 + $0x5c] sm:$0xf] %vm957_vm2, %v1178_v32  ;;  %v1176_v41 = vpack.c.bf16 %v658_v33, %v658_v33  ;;  %v663_v42 = vmax.f32 %v487_v35, 0.0  ;;  %v479_v43 = vadd.f32 %v1508_v34, %v478_v40  ;;  %v695_v46 = vmax.f32 %v615_v39, 0.0 }
  0xfa   :  { %1013 = vst.msk [vmem:[%s1833_s3 + $0xdc] sm:$0xf] %vm957_vm2, %v1210_v37  ;;  %v1208_v45 = vpack.c.bf16 %v690_v38, %v690_v38  ;;  %v607_v47 = vadd.f32 %v1508_v34, %v606_v44  ;;  %v1281_v48 = vpop.f32.mrf.mxu0  ;;  %v1313_v52 = vpop.f32.mrf.mxu1 }
  0xfb   :  { %979 = vst.msk [vmem:[%s1833_s3 + $0x54] sm:$0xf] %vm957_vm2, %v1176_v41  ;;  %v1181_v49 = vpack.c.bf16 %v663_v42, %v663_v42  ;;  %v661_v50 = vmax.f32 %v479_v43, 0.0  ;;  %v490_v51 = vadd.f32 %v1281_v48, %v1508_v34  ;;  %v1213_v53 = vpack.c.bf16 %v695_v46, %v695_v46 }
  0xfc   :  { %1011 = vst.msk [vmem:[%s1833_s3 + $0xd4] sm:$0xf] %vm957_vm2, %v1208_v45  ;;  %v693_v54 = vmax.f32 %v607_v47, 0.0  ;;  %v618_v55 = vadd.f32 %v1313_v52, %v1508_v34  ;;  %v481_v56 = vpop.f32.mrf.mxu0  ;;  %v609_v60 = vpop.f32.mrf.mxu1 }
  0xfd   :  { %984 = vst.msk [vmem:[%s1833_s3 + $0x68] sm:$0xf] %vm957_vm2, %v1181_v49  ;;  %v1179_v57 = vpack.c.bf16 %v661_v50, %v661_v50  ;;  %v664_v58 = vmax.f32 %v490_v51, 0.0  ;;  %v482_v59 = vadd.f32 %v1508_v34, %v481_v56  ;;  %1016 = vst.msk [vmem:[%s1833_s3 + $0xe8] sm:$0xf] %vm957_vm2, %v1213_v53  ;;  %v610_v63 = vadd.f32 %v1508_v34, %v609_v60 }
  0xfe   :  { %v1211_v61 = vpack.c.bf16 %v693_v54, %v693_v54  ;;  %v696_v62 = vmax.f32 %v618_v55, 0.0  ;;  %v1284_v0 = vpop.f32.mrf.mxu0  ;;  %v1316_v4 = vpop.f32.mrf.mxu1 }
  0xff   :  { %982 = vst.msk [vmem:[%s1833_s3 + $0x60] sm:$0xf] %vm957_vm2, %v1179_v57  ;;  %v1182_v1 = vpack.c.bf16 %v664_v58, %v664_v58  ;;  %v662_v2 = vmax.f32 %v482_v59, 0.0  ;;  %v503_v3 = vadd.f32 %v1284_v0, %v1508_v34  ;;  %v694_v6 = vmax.f32 %v610_v63, 0.0 }
 0x100   :  { %1014 = vst.msk [vmem:[%s1833_s3 + $0xe0] sm:$0xf] %vm957_vm2, %v1211_v61  ;;  %v1214_v5 = vpack.c.bf16 %v696_v62, %v696_v62  ;;  %v631_v7 = vadd.f32 %v1316_v4, %v1508_v34  ;;  %v494_v8 = vpop.f32.mrf.mxu0  ;;  %v622_v12 = vpop.f32.mrf.mxu1 }
 0x101   :  { %985 = vst.msk [vmem:[%s1833_s3 + $0x6c] sm:$0xf] %vm957_vm2, %v1182_v1  ;;  %v1180_v9 = vpack.c.bf16 %v662_v2, %v662_v2  ;;  %v667_v10 = vmax.f32 %v503_v3, 0.0  ;;  %v495_v11 = vadd.f32 %v1508_v34, %v494_v8  ;;  %v1212_v13 = vpack.c.bf16 %v694_v6, %v694_v6 }
 0x102   :  { %1017 = vst.msk [vmem:[%s1833_s3 + $0xec] sm:$0xf] %vm957_vm2, %v1214_v5  ;;  %v699_v14 = vmax.f32 %v631_v7, 0.0  ;;  %v623_v15 = vadd.f32 %v1508_v34, %v622_v12  ;;  %v1285_v16 = vpop.f32.mrf.mxu0  ;;  %v1317_v20 = vpop.f32.mrf.mxu1 }
 0x103   :  { %983 = vst.msk [vmem:[%s1833_s3 + $0x64] sm:$0xf] %vm957_vm2, %v1180_v9  ;;  %v1185_v17 = vpack.c.bf16 %v667_v10, %v667_v10  ;;  %v665_v18 = vmax.f32 %v495_v11, 0.0  ;;  %v506_v19 = vadd.f32 %v1285_v16, %v1508_v34  ;;  %1015 = vst.msk [vmem:[%s1833_s3 + $0xe4] sm:$0xf] %vm957_vm2, %v1212_v13  ;;  %v634_v23 = vadd.f32 %v1317_v20, %v1508_v34 }
 0x104   :  { %v1217_v21 = vpack.c.bf16 %v699_v14, %v699_v14  ;;  %v697_v22 = vmax.f32 %v623_v15, 0.0  ;;  %v497_v24 = vpop.f32.mrf.mxu0  ;;  %v625_v28 = vpop.f32.mrf.mxu1 }
 0x105   :  { %988 = vst.msk [vmem:[%s1833_s3 + $0x78] sm:$0xf] %vm957_vm2, %v1185_v17  ;;  %v1183_v25 = vpack.c.bf16 %v665_v18, %v665_v18  ;;  %v668_v26 = vmax.f32 %v506_v19, 0.0  ;;  %v498_v27 = vadd.f32 %v1508_v34, %v497_v24  ;;  %v700_v30 = vmax.f32 %v634_v23, 0.0 }
 0x106   :  { %1020 = vst.msk [vmem:[%s1833_s3 + $0xf8] sm:$0xf] %vm957_vm2, %v1217_v21  ;;  %v1215_v29 = vpack.c.bf16 %v697_v22, %v697_v22  ;;  %v626_v31 = vadd.f32 %v1508_v34, %v625_v28 }
 0x107   :  { %986 = vst.msk [vmem:[%s1833_s3 + $0x70] sm:$0xf] %vm957_vm2, %v1183_v25  ;;  %v1186_v32 = vpack.c.bf16 %v668_v26, %v668_v26  ;;  %v666_v33 = vmax.f32 %v498_v27, 0.0  ;;  %v1218_v35 = vpack.c.bf16 %v700_v30, %v700_v30 }
 0x108   :  { %1018 = vst.msk [vmem:[%s1833_s3 + $0xf0] sm:$0xf] %vm957_vm2, %v1215_v29  ;;  %v698_v36 = vmax.f32 %v626_v31, 0.0 }
 0x109   :  { %989 = vst.msk [vmem:[%s1833_s3 + $0x7c] sm:$0xf] %vm957_vm2, %v1186_v32  ;;  %v1184_v34 = vpack.c.bf16 %v666_v33, %v666_v33  ;;  %1021 = vst.msk [vmem:[%s1833_s3 + $0xfc] sm:$0xf] %vm957_vm2, %v1218_v35 }
 0x10a   :  { %v1216_v37 = vpack.c.bf16 %v698_v36, %v698_v36 }
 0x10b   :  { %987 = vst.msk [vmem:[%s1833_s3 + $0x74] sm:$0xf] %vm957_vm2, %v1184_v34 }
 0x10c   :  { %1019 = vst.msk [vmem:[%s1833_s3 + $0xf4] sm:$0xf] %vm957_vm2, %v1216_v37 }

// kernel: _lambda_.59
= control target key start
LH: loop header
LB: loop body
LE: loop exit
PB: predicated region body
PF: predicated region fallthrough
CT: control target
= control target key end

     0   :  { %vm379_vm0 = vcmask 1043456   ;;  %vm282_vm1 = vcmask 588800   ;;  %vm992_vm2 = vcmask 60416   ;;  %s1907_s1 = inlined_call_operand.vmem [shape: bf16[1,72,8], index: 1, kind: input, shape index: {}]   ;;  %s1908_s0 = inlined_call_operand.vmem [shape: bf16[1,512,72], index: 0, kind: input, shape index: {}]   ;;  %s1909_s2 = inlined_call_operand.vmem [shape: f32[1,1,8], index: 2, kind: input, shape index: {}]   ;;  %s1910_s3 = inlined_call_operand.vmem [shape: bf16[1,512,8], index: 3, kind: output, shape index: {}]  }
   0x1   :  { %v1382_v0 = vld [vmem:[%s1907_s1 + $0x20] ss:$0 sps:$4 sm:$0xff]   ;;  %v1383_v1 = vld [vmem:[%s1907_s1 + $0x18] sm:$0xff]   ;;  %v1384_v3 = vld [vmem:[%s1907_s1 + $0x10] sm:$0xff]  }
   0x2   :  { %1380 = vmatprep.subr.msk.bf16.mxu0 %vm379_vm0, %v1382_v0  ;;  %1381 = vmatprep.subr.msk.bf16.mxu1 %vm379_vm0, %v1382_v0  ;;  %v381_v2 = vsel %vm379_vm0, %v1382_v0, 0  ;;  %v1387_v4 = vld [vmem:[%s1908_s0] sm:$0xff]   ;;  %v1385_v6 = vld [vmem:[%s1907_s1 + $0x8] sm:$0xff]   ;;  %v1391_v10 = vld [vmem:[%s1908_s0 + $0x10] sm:$0xff]  }
   0x3   :  { %1297 = vmatpush3.bf16.msra.mxu0 %v381_v2  ;;  %1375 = vmatpush3.bf16.msra.mxu1 %v381_v2  ;;  %v1388_v5 = vld [vmem:[%s1908_s0 + $0x80] sm:$0xff]   ;;  %v1389_v8 = vld [vmem:[%s1908_s0 + $0x8] sm:$0xff]   ;;  %v1392_v11 = vld [vmem:[%s1908_s0 + $0x90] sm:$0xff]  }
   0x4   :  { %1298 = vmatprep.subr.bf16.mxu0 %v1383_v1  ;;  %1371 = vmatprep.subr.bf16.mxu1 %v1383_v1  ;;  %v1386_v7 = vld [vmem:[%s1907_s1] sm:$0xff]   ;;  %v1390_v9 = vld [vmem:[%s1908_s0 + $0x88] sm:$0xff]   ;;  %v1393_v12 = vld [vmem:[%s1908_s0 + $0x18] sm:$0xff]  }
   0x5   :  { %1306 = vmatprep.mubr.msk.bf16.mxu0 %vm282_vm1, %v1387_v4  ;;  %1338 = vmatprep.mubr.msk.bf16.mxu1 %vm282_vm1, %v1388_v5  ;;  %v1394_v13 = vld [vmem:[%s1908_s0 + $0x98] sm:$0xff]   ;;  %v1395_v14 = vld [vmem:[%s1908_s0 + $0x20] sm:$0xff]   ;;  %v1397_v16 = vld [vmem:[%s1908_s0 + $0x28] sm:$0xff]  }
   0x6   :  { %v1396_v15 = vld [vmem:[%s1908_s0 + $0xa0] sm:$0xff]   ;;  %v1398_v17 = vld [vmem:[%s1908_s0 + $0xa8] sm:$0xff]   ;;  %v1399_v18 = vld [vmem:[%s1908_s0 + $0x30] sm:$0xff]  }
   0x7   :  { %1299 = vmatpush3.bf16.msra.mxu0 %v1383_v1  ;;  %1376 = vmatpush3.bf16.msra.mxu1 %v1383_v1  ;;  %v1400_v19 = vld [vmem:[%s1908_s0 + $0xb0] sm:$0xff]   ;;  %v1401_v20 = vld [vmem:[%s1908_s0 + $0x38] sm:$0xff]   ;;  %v1403_v22 = vld [vmem:[%s1908_s0 + $0x40] sm:$0xff]  }
   0x8   :  { %1300 = vmatprep.subr.bf16.mxu0 %v1384_v3  ;;  %1372 = vmatprep.subr.bf16.mxu1 %v1384_v3  ;;  %v1402_v21 = vld [vmem:[%s1908_s0 + $0xb8] sm:$0xff]   ;;  %v1404_v23 = vld [vmem:[%s1908_s0 + $0xc0] sm:$0xff]   ;;  %v1405_v24 = vld [vmem:[%s1908_s0 + $0x48] sm:$0xff]  }
   0x9   :  { %v1406_v25 = vld [vmem:[%s1908_s0 + $0xc8] sm:$0xff]   ;;  %v1407_v26 = vld [vmem:[%s1908_s0 + $0x50] sm:$0xff]   ;;  %v1409_v28 = vld [vmem:[%s1908_s0 + $0x58] sm:$0xff]  }
   0xa   :  { %v1408_v27 = vld [vmem:[%s1908_s0 + $0xd0] sm:$0xff]   ;;  %v1410_v29 = vld [vmem:[%s1908_s0 + $0xd8] sm:$0xff]   ;;  %v1411_v30 = vld [vmem:[%s1908_s0 + $0x60] sm:$0xff]  }
   0xb   :  { %1301 = vmatpush3.bf16.msra.mxu0 %v1384_v3  ;;  %1377 = vmatpush3.bf16.msra.mxu1 %v1384_v3  ;;  %v1412_v31 = vld [vmem:[%s1908_s0 + $0xe0] sm:$0xff]   ;;  %v1413_v32 = vld [vmem:[%s1908_s0 + $0x68] sm:$0xff]   ;;  %v1415_v34 = vld [vmem:[%s1908_s0 + $0x70] sm:$0xff]  }
   0xc   :  { %1302 = vmatprep.subr.bf16.mxu0 %v1385_v6  ;;  %1373 = vmatprep.subr.bf16.mxu1 %v1385_v6  ;;  %v1414_v33 = vld [vmem:[%s1908_s0 + $0xe8] sm:$0xff]   ;;  %v1416_v35 = vld [vmem:[%s1908_s0 + $0xf0] sm:$0xff]   ;;  %v1417_v36 = vld [vmem:[%s1908_s0 + $0x78] sm:$0xff]  }
   0xd   :  { %v1418_v37 = vld [vmem:[%s1908_s0 + $0xf8] sm:$0xff]   ;;  %v1585_v38 = vld [vmem:[%s1909_s2] ss:$0 sm:$0xff] }
   0xf   :  { %1303 = vmatpush3.bf16.msra.mxu0 %v1385_v6  ;;  %1378 = vmatpush3.bf16.msra.mxu1 %v1385_v6 }
  0x10   :  { %1304 = vmatprep.subr.bf16.mxu0 %v1386_v7  ;;  %1374 = vmatprep.subr.bf16.mxu1 %v1386_v7 }
  0x13   :  { %1305 = vmatpush3.bf16.msra.mxu0 %v1386_v7  ;;  %1379 = vmatpush3.bf16.msra.mxu1 %v1386_v7 }
  0x16   :  { %1307 = vmatmul.mubr.msk.bf16.vlgmr.msra.gmra.mxu0 %vm282_vm1, %v1389_v8  ;;  %1339 = vmatmul.mubr.msk.bf16.vlgmr.msra.gmra.mxu1 %vm282_vm1, %v1390_v9 }
  0x17   :  { %1310 = vmatprep.mubr.msk.bf16.mxu0 %vm282_vm1, %v1391_v10  ;;  %1342 = vmatprep.mubr.msk.bf16.mxu1 %vm282_vm1, %v1392_v11 }
  0x1e   :  { %1311 = vmatmul.mubr.msk.bf16.gmra.mxu0 %vm282_vm1, %v1393_v12  ;;  %1343 = vmatmul.mubr.msk.bf16.gmra.mxu1 %vm282_vm1, %v1394_v13 }
  0x1f   :  { %1314 = vmatprep.mubr.msk.bf16.mxu0 %vm282_vm1, %v1395_v14  ;;  %1346 = vmatprep.mubr.msk.bf16.mxu1 %vm282_vm1, %v1396_v15 }
  0x26   :  { %1315 = vmatmul.mubr.msk.bf16.gmra.mxu0 %vm282_vm1, %v1397_v16  ;;  %1347 = vmatmul.mubr.msk.bf16.gmra.mxu1 %vm282_vm1, %v1398_v17 }
  0x27   :  { %1318 = vmatprep.mubr.msk.bf16.mxu0 %vm282_vm1, %v1399_v18  ;;  %1350 = vmatprep.mubr.msk.bf16.mxu1 %vm282_vm1, %v1400_v19 }
  0x2e   :  { %1319 = vmatmul.mubr.msk.bf16.gmra.mxu0 %vm282_vm1, %v1401_v20  ;;  %1351 = vmatmul.mubr.msk.bf16.gmra.mxu1 %vm282_vm1, %v1402_v21 }
  0x2f   :  { %1322 = vmatprep.mubr.msk.bf16.mxu0 %vm282_vm1, %v1403_v22  ;;  %1354 = vmatprep.mubr.msk.bf16.mxu1 %vm282_vm1, %v1404_v23 }
  0x36   :  { %1323 = vmatmul.mubr.msk.bf16.gmra.mxu0 %vm282_vm1, %v1405_v24  ;;  %1355 = vmatmul.mubr.msk.bf16.gmra.mxu1 %vm282_vm1, %v1406_v25 }
  0x37   :  { %1326 = vmatprep.mubr.msk.bf16.mxu0 %vm282_vm1, %v1407_v26  ;;  %1358 = vmatprep.mubr.msk.bf16.mxu1 %vm282_vm1, %v1408_v27 }
  0x3e   :  { %1327 = vmatmul.mubr.msk.bf16.gmra.mxu0 %vm282_vm1, %v1409_v28  ;;  %1359 = vmatmul.mubr.msk.bf16.gmra.mxu1 %vm282_vm1, %v1410_v29 }
  0x3f   :  { %1330 = vmatprep.mubr.msk.bf16.mxu0 %vm282_vm1, %v1411_v30  ;;  %1362 = vmatprep.mubr.msk.bf16.mxu1 %vm282_vm1, %v1412_v31 }
  0x46   :  { %1331 = vmatmul.mubr.msk.bf16.gmra.mxu0 %vm282_vm1, %v1413_v32  ;;  %1363 = vmatmul.mubr.msk.bf16.gmra.mxu1 %vm282_vm1, %v1414_v33 }
  0x47   :  { %1334 = vmatprep.mubr.msk.bf16.mxu0 %vm282_vm1, %v1415_v34  ;;  %1366 = vmatprep.mubr.msk.bf16.mxu1 %vm282_vm1, %v1416_v35 }
  0x4e   :  { %1335 = vmatmul.mubr.msk.bf16.gmra.mxu0 %vm282_vm1, %v1417_v36  ;;  %1367 = vmatmul.mubr.msk.bf16.gmra.mxu1 %vm282_vm1, %v1418_v37 }
  0xd6   :  { %v1308_v39 = vpop.f32.mrf.mxu0  ;;  %v1340_v40 = vpop.f32.mrf.mxu1 }
  0xd7   :  { %v426_v41 = vadd.f32 %v1308_v39, %v1585_v38  ;;  %v554_v42 = vadd.f32 %v1340_v40, %v1585_v38 }
  0xd8   :  { %v417_v43 = vpop.f32.mrf.mxu0  ;;  %v545_v44 = vpop.f32.mrf.mxu1 }
  0xd9   :  { %v674_v45 = vmax.f32 %v426_v41, 0.0  ;;  %v706_v46 = vmax.f32 %v554_v42, 0.0  ;;  %v418_v47 = vadd.f32 %v1585_v38, %v417_v43  ;;  %v546_v48 = vadd.f32 %v1585_v38, %v545_v44 }
  0xda   :  { %v1309_v49 = vpop.f32.mrf.mxu0  ;;  %v1341_v50 = vpop.f32.mrf.mxu1 }
  0xdb   :  { %v1197_v51 = vpack.c.bf16 %v674_v45, %v674_v45  ;;  %v1229_v52 = vpack.c.bf16 %v706_v46, %v706_v46  ;;  %v672_v53 = vmax.f32 %v418_v47, 0.0  ;;  %v704_v54 = vmax.f32 %v546_v48, 0.0 }
  0xdc   :  { %v429_v55 = vadd.f32 %v1309_v49, %v1585_v38  ;;  %v557_v56 = vadd.f32 %v1341_v50, %v1585_v38  ;;  %v420_v57 = vpop.f32.mrf.mxu0  ;;  %v548_v58 = vpop.f32.mrf.mxu1 }
  0xdd   :  { %995 = vst.msk [vmem:[%s1910_s3 + $0x8] sm:$0xf] %vm992_vm2, %v1197_v51  ;;  %1027 = vst.msk [vmem:[%s1910_s3 + $0x88] sm:$0xf] %vm992_vm2, %v1229_v52  ;;  %v1195_v59 = vpack.c.bf16 %v672_v53, %v672_v53  ;;  %v1227_v60 = vpack.c.bf16 %v704_v54, %v704_v54  ;;  %v421_v61 = vadd.f32 %v1585_v38, %v420_v57 }
  0xde   :  { %v549_v62 = vadd.f32 %v1585_v38, %v548_v58  ;;  %v675_v63 = vmax.f32 %v429_v55, 0.0  ;;  %v707_v0 = vmax.f32 %v557_v56, 0.0  ;;  %v1312_v1 = vpop.f32.mrf.mxu0  ;;  %v1344_v2 = vpop.f32.mrf.mxu1 }
  0xdf   :  { %993 = vst.msk [vmem:[%s1910_s3] sm:$0xf] %vm992_vm2, %v1195_v59  ;;  %1025 = vst.msk [vmem:[%s1910_s3 + $0x80] sm:$0xf] %vm992_vm2, %v1227_v60  ;;  %v673_v3 = vmax.f32 %v421_v61, 0.0  ;;  %v442_v5 = vadd.f32 %v1312_v1, %v1585_v38  ;;  %v570_v6 = vadd.f32 %v1344_v2, %v1585_v38 }
  0xe0   :  { %v705_v4 = vmax.f32 %v549_v62, 0.0  ;;  %v1198_v7 = vpack.c.bf16 %v675_v63, %v675_v63  ;;  %v1230_v8 = vpack.c.bf16 %v707_v0, %v707_v0  ;;  %v433_v9 = vpop.f32.mrf.mxu0  ;;  %v561_v10 = vpop.f32.mrf.mxu1 }
  0xe1   :  { %v1196_v11 = vpack.c.bf16 %v673_v3, %v673_v3  ;;  %v678_v13 = vmax.f32 %v442_v5, 0.0  ;;  %v710_v14 = vmax.f32 %v570_v6, 0.0  ;;  %v434_v15 = vadd.f32 %v1585_v38, %v433_v9 }
  0xe2   :  { %v1228_v12 = vpack.c.bf16 %v705_v4, %v705_v4  ;;  %996 = vst.msk [vmem:[%s1910_s3 + $0xc] sm:$0xf] %vm992_vm2, %v1198_v7  ;;  %1028 = vst.msk [vmem:[%s1910_s3 + $0x8c] sm:$0xf] %vm992_vm2, %v1230_v8  ;;  %v562_v16 = vadd.f32 %v1585_v38, %v561_v10  ;;  %v1313_v17 = vpop.f32.mrf.mxu0  ;;  %v1345_v18 = vpop.f32.mrf.mxu1 }
  0xe3   :  { %994 = vst.msk [vmem:[%s1910_s3 + $0x4] sm:$0xf] %vm992_vm2, %v1196_v11  ;;  %v1201_v19 = vpack.c.bf16 %v678_v13, %v678_v13  ;;  %v1233_v20 = vpack.c.bf16 %v710_v14, %v710_v14  ;;  %v445_v21 = vadd.f32 %v1313_v17, %v1585_v38  ;;  %v573_v22 = vadd.f32 %v1345_v18, %v1585_v38 }
  0xe4   :  { %1026 = vst.msk [vmem:[%s1910_s3 + $0x84] sm:$0xf] %vm992_vm2, %v1228_v12  ;;  %v676_v23 = vmax.f32 %v434_v15, 0.0  ;;  %v708_v24 = vmax.f32 %v562_v16, 0.0  ;;  %v436_v25 = vpop.f32.mrf.mxu0  ;;  %v564_v26 = vpop.f32.mrf.mxu1 }
  0xe5   :  { %999 = vst.msk [vmem:[%s1910_s3 + $0x18] sm:$0xf] %vm992_vm2, %v1201_v19  ;;  %1031 = vst.msk [vmem:[%s1910_s3 + $0x98] sm:$0xf] %vm992_vm2, %v1233_v20  ;;  %v679_v27 = vmax.f32 %v445_v21, 0.0  ;;  %v711_v28 = vmax.f32 %v573_v22, 0.0  ;;  %v437_v29 = vadd.f32 %v1585_v38, %v436_v25  ;;  %v565_v30 = vadd.f32 %v1585_v38, %v564_v26 }
  0xe6   :  { %v1199_v31 = vpack.c.bf16 %v676_v23, %v676_v23  ;;  %v1231_v32 = vpack.c.bf16 %v708_v24, %v708_v24  ;;  %v1316_v33 = vpop.f32.mrf.mxu0  ;;  %v1348_v34 = vpop.f32.mrf.mxu1 }
  0xe7   :  { %v1202_v35 = vpack.c.bf16 %v679_v27, %v679_v27  ;;  %v1234_v36 = vpack.c.bf16 %v711_v28, %v711_v28  ;;  %v677_v37 = vmax.f32 %v437_v29, 0.0  ;;  %v709_v39 = vmax.f32 %v565_v30, 0.0 }
  0xe8   :  { %997 = vst.msk [vmem:[%s1910_s3 + $0x10] sm:$0xf] %vm992_vm2, %v1199_v31  ;;  %1029 = vst.msk [vmem:[%s1910_s3 + $0x90] sm:$0xf] %vm992_vm2, %v1231_v32  ;;  %v458_v40 = vadd.f32 %v1316_v33, %v1585_v38  ;;  %v586_v41 = vadd.f32 %v1348_v34, %v1585_v38  ;;  %v449_v42 = vpop.f32.mrf.mxu0  ;;  %v577_v43 = vpop.f32.mrf.mxu1 }
  0xe9   :  { %1000 = vst.msk [vmem:[%s1910_s3 + $0x1c] sm:$0xf] %vm992_vm2, %v1202_v35  ;;  %1032 = vst.msk [vmem:[%s1910_s3 + $0x9c] sm:$0xf] %vm992_vm2, %v1234_v36  ;;  %v1200_v44 = vpack.c.bf16 %v677_v37, %v677_v37  ;;  %v1232_v45 = vpack.c.bf16 %v709_v39, %v709_v39  ;;  %v450_v46 = vadd.f32 %v1585_v38, %v449_v42 }
  0xea   :  { %v578_v47 = vadd.f32 %v1585_v38, %v577_v43  ;;  %v682_v48 = vmax.f32 %v458_v40, 0.0  ;;  %v714_v49 = vmax.f32 %v586_v41, 0.0  ;;  %v1317_v50 = vpop.f32.mrf.mxu0  ;;  %v1349_v51 = vpop.f32.mrf.mxu1 }
  0xeb   :  { %998 = vst.msk [vmem:[%s1910_s3 + $0x14] sm:$0xf] %vm992_vm2, %v1200_v44  ;;  %1030 = vst.msk [vmem:[%s1910_s3 + $0x94] sm:$0xf] %vm992_vm2, %v1232_v45  ;;  %v680_v52 = vmax.f32 %v450_v46, 0.0  ;;  %v461_v54 = vadd.f32 %v1317_v50, %v1585_v38  ;;  %v589_v55 = vadd.f32 %v1349_v51, %v1585_v38 }
  0xec   :  { %v712_v53 = vmax.f32 %v578_v47, 0.0  ;;  %v1205_v56 = vpack.c.bf16 %v682_v48, %v682_v48  ;;  %v1237_v57 = vpack.c.bf16 %v714_v49, %v714_v49  ;;  %v452_v58 = vpop.f32.mrf.mxu0  ;;  %v580_v59 = vpop.f32.mrf.mxu1 }
  0xed   :  { %v1203_v60 = vpack.c.bf16 %v680_v52, %v680_v52  ;;  %v683_v62 = vmax.f32 %v461_v54, 0.0  ;;  %v715_v63 = vmax.f32 %v589_v55, 0.0  ;;  %v453_v0 = vadd.f32 %v1585_v38, %v452_v58 }
  0xee   :  { %v1235_v61 = vpack.c.bf16 %v712_v53, %v712_v53  ;;  %1003 = vst.msk [vmem:[%s1910_s3 + $0x28] sm:$0xf] %vm992_vm2, %v1205_v56  ;;  %1035 = vst.msk [vmem:[%s1910_s3 + $0xa8] sm:$0xf] %vm992_vm2, %v1237_v57  ;;  %v581_v1 = vadd.f32 %v1585_v38, %v580_v59  ;;  %v1320_v2 = vpop.f32.mrf.mxu0  ;;  %v1352_v3 = vpop.f32.mrf.mxu1 }
  0xef   :  { %1001 = vst.msk [vmem:[%s1910_s3 + $0x20] sm:$0xf] %vm992_vm2, %v1203_v60  ;;  %v1206_v4 = vpack.c.bf16 %v683_v62, %v683_v62  ;;  %v1238_v5 = vpack.c.bf16 %v715_v63, %v715_v63  ;;  %v474_v6 = vadd.f32 %v1320_v2, %v1585_v38  ;;  %v602_v7 = vadd.f32 %v1352_v3, %v1585_v38 }
  0xf0   :  { %1033 = vst.msk [vmem:[%s1910_s3 + $0xa0] sm:$0xf] %vm992_vm2, %v1235_v61  ;;  %v681_v8 = vmax.f32 %v453_v0, 0.0  ;;  %v713_v9 = vmax.f32 %v581_v1, 0.0  ;;  %v465_v10 = vpop.f32.mrf.mxu0  ;;  %v593_v11 = vpop.f32.mrf.mxu1 }
  0xf1   :  { %1004 = vst.msk [vmem:[%s1910_s3 + $0x2c] sm:$0xf] %vm992_vm2, %v1206_v4  ;;  %1036 = vst.msk [vmem:[%s1910_s3 + $0xac] sm:$0xf] %vm992_vm2, %v1238_v5  ;;  %v686_v12 = vmax.f32 %v474_v6, 0.0  ;;  %v718_v13 = vmax.f32 %v602_v7, 0.0  ;;  %v466_v14 = vadd.f32 %v1585_v38, %v465_v10  ;;  %v594_v15 = vadd.f32 %v1585_v38, %v593_v11 }
  0xf2   :  { %v1204_v16 = vpack.c.bf16 %v681_v8, %v681_v8  ;;  %v1236_v17 = vpack.c.bf16 %v713_v9, %v713_v9  ;;  %v1321_v18 = vpop.f32.mrf.mxu0  ;;  %v1353_v19 = vpop.f32.mrf.mxu1 }
  0xf3   :  { %v1209_v20 = vpack.c.bf16 %v686_v12, %v686_v12  ;;  %v1241_v21 = vpack.c.bf16 %v718_v13, %v718_v13  ;;  %v684_v22 = vmax.f32 %v466_v14, 0.0  ;;  %v716_v23 = vmax.f32 %v594_v15, 0.0 }
  0xf4   :  { %1002 = vst.msk [vmem:[%s1910_s3 + $0x24] sm:$0xf] %vm992_vm2, %v1204_v16  ;;  %1034 = vst.msk [vmem:[%s1910_s3 + $0xa4] sm:$0xf] %vm992_vm2, %v1236_v17  ;;  %v477_v24 = vadd.f32 %v1321_v18, %v1585_v38  ;;  %v605_v25 = vadd.f32 %v1353_v19, %v1585_v38  ;;  %v468_v26 = vpop.f32.mrf.mxu0  ;;  %v596_v27 = vpop.f32.mrf.mxu1 }
  0xf5   :  { %1007 = vst.msk [vmem:[%s1910_s3 + $0x38] sm:$0xf] %vm992_vm2, %v1209_v20  ;;  %1039 = vst.msk [vmem:[%s1910_s3 + $0xb8] sm:$0xf] %vm992_vm2, %v1241_v21  ;;  %v1207_v28 = vpack.c.bf16 %v684_v22, %v684_v22  ;;  %v1239_v29 = vpack.c.bf16 %v716_v23, %v716_v23  ;;  %v469_v30 = vadd.f32 %v1585_v38, %v468_v26 }
  0xf6   :  { %v597_v31 = vadd.f32 %v1585_v38, %v596_v27  ;;  %v687_v32 = vmax.f32 %v477_v24, 0.0  ;;  %v719_v33 = vmax.f32 %v605_v25, 0.0  ;;  %v1324_v34 = vpop.f32.mrf.mxu0  ;;  %v1356_v35 = vpop.f32.mrf.mxu1 }
  0xf7   :  { %1005 = vst.msk [vmem:[%s1910_s3 + $0x30] sm:$0xf] %vm992_vm2, %v1207_v28  ;;  %1037 = vst.msk [vmem:[%s1910_s3 + $0xb0] sm:$0xf] %vm992_vm2, %v1239_v29  ;;  %v685_v36 = vmax.f32 %v469_v30, 0.0  ;;  %v490_v39 = vadd.f32 %v1324_v34, %v1585_v38  ;;  %v618_v40 = vadd.f32 %v1356_v35, %v1585_v38 }
  0xf8   :  { %v717_v37 = vmax.f32 %v597_v31, 0.0  ;;  %v1210_v41 = vpack.c.bf16 %v687_v32, %v687_v32  ;;  %v1242_v42 = vpack.c.bf16 %v719_v33, %v719_v33  ;;  %v481_v43 = vpop.f32.mrf.mxu0  ;;  %v609_v44 = vpop.f32.mrf.mxu1 }
  0xf9   :  { %v1208_v45 = vpack.c.bf16 %v685_v36, %v685_v36  ;;  %v690_v47 = vmax.f32 %v490_v39, 0.0  ;;  %v722_v48 = vmax.f32 %v618_v40, 0.0  ;;  %v482_v49 = vadd.f32 %v1585_v38, %v481_v43 }
  0xfa   :  { %v1240_v46 = vpack.c.bf16 %v717_v37, %v717_v37  ;;  %1008 = vst.msk [vmem:[%s1910_s3 + $0x3c] sm:$0xf] %vm992_vm2, %v1210_v41  ;;  %1040 = vst.msk [vmem:[%s1910_s3 + $0xbc] sm:$0xf] %vm992_vm2, %v1242_v42  ;;  %v610_v50 = vadd.f32 %v1585_v38, %v609_v44  ;;  %v1325_v51 = vpop.f32.mrf.mxu0  ;;  %v1357_v52 = vpop.f32.mrf.mxu1 }
  0xfb   :  { %1006 = vst.msk [vmem:[%s1910_s3 + $0x34] sm:$0xf] %vm992_vm2, %v1208_v45  ;;  %v1213_v53 = vpack.c.bf16 %v690_v47, %v690_v47  ;;  %v1245_v54 = vpack.c.bf16 %v722_v48, %v722_v48  ;;  %v493_v55 = vadd.f32 %v1325_v51, %v1585_v38  ;;  %v621_v56 = vadd.f32 %v1357_v52, %v1585_v38 }
  0xfc   :  { %1038 = vst.msk [vmem:[%s1910_s3 + $0xb4] sm:$0xf] %vm992_vm2, %v1240_v46  ;;  %v688_v57 = vmax.f32 %v482_v49, 0.0  ;;  %v720_v58 = vmax.f32 %v610_v50, 0.0  ;;  %v484_v59 = vpop.f32.mrf.mxu0  ;;  %v612_v60 = vpop.f32.mrf.mxu1 }
  0xfd   :  { %1011 = vst.msk [vmem:[%s1910_s3 + $0x48] sm:$0xf] %vm992_vm2, %v1213_v53  ;;  %1043 = vst.msk [vmem:[%s1910_s3 + $0xc8] sm:$0xf] %vm992_vm2, %v1245_v54  ;;  %v691_v61 = vmax.f32 %v493_v55, 0.0  ;;  %v723_v62 = vmax.f32 %v621_v56, 0.0  ;;  %v485_v63 = vadd.f32 %v1585_v38, %v484_v59  ;;  %v613_v0 = vadd.f32 %v1585_v38, %v612_v60 }
  0xfe   :  { %v1211_v1 = vpack.c.bf16 %v688_v57, %v688_v57  ;;  %v1243_v2 = vpack.c.bf16 %v720_v58, %v720_v58  ;;  %v1328_v3 = vpop.f32.mrf.mxu0  ;;  %v1360_v4 = vpop.f32.mrf.mxu1 }
  0xff   :  { %v1214_v5 = vpack.c.bf16 %v691_v61, %v691_v61  ;;  %v1246_v6 = vpack.c.bf16 %v723_v62, %v723_v62  ;;  %v689_v7 = vmax.f32 %v485_v63, 0.0  ;;  %v721_v8 = vmax.f32 %v613_v0, 0.0 }
 0x100   :  { %1009 = vst.msk [vmem:[%s1910_s3 + $0x40] sm:$0xf] %vm992_vm2, %v1211_v1  ;;  %1041 = vst.msk [vmem:[%s1910_s3 + $0xc0] sm:$0xf] %vm992_vm2, %v1243_v2  ;;  %v506_v9 = vadd.f32 %v1328_v3, %v1585_v38  ;;  %v634_v10 = vadd.f32 %v1360_v4, %v1585_v38  ;;  %v497_v11 = vpop.f32.mrf.mxu0  ;;  %v625_v12 = vpop.f32.mrf.mxu1 }
 0x101   :  { %1012 = vst.msk [vmem:[%s1910_s3 + $0x4c] sm:$0xf] %vm992_vm2, %v1214_v5  ;;  %1044 = vst.msk [vmem:[%s1910_s3 + $0xcc] sm:$0xf] %vm992_vm2, %v1246_v6  ;;  %v1212_v13 = vpack.c.bf16 %v689_v7, %v689_v7  ;;  %v1244_v14 = vpack.c.bf16 %v721_v8, %v721_v8  ;;  %v498_v15 = vadd.f32 %v1585_v38, %v497_v11 }
 0x102   :  { %v626_v16 = vadd.f32 %v1585_v38, %v625_v12  ;;  %v694_v17 = vmax.f32 %v506_v9, 0.0  ;;  %v726_v18 = vmax.f32 %v634_v10, 0.0  ;;  %v1329_v19 = vpop.f32.mrf.mxu0  ;;  %v1361_v20 = vpop.f32.mrf.mxu1 }
 0x103   :  { %1010 = vst.msk [vmem:[%s1910_s3 + $0x44] sm:$0xf] %vm992_vm2, %v1212_v13  ;;  %1042 = vst.msk [vmem:[%s1910_s3 + $0xc4] sm:$0xf] %vm992_vm2, %v1244_v14  ;;  %v692_v21 = vmax.f32 %v498_v15, 0.0  ;;  %v509_v23 = vadd.f32 %v1329_v19, %v1585_v38  ;;  %v637_v24 = vadd.f32 %v1361_v20, %v1585_v38 }
 0x104   :  { %v724_v22 = vmax.f32 %v626_v16, 0.0  ;;  %v1217_v25 = vpack.c.bf16 %v694_v17, %v694_v17  ;;  %v1249_v26 = vpack.c.bf16 %v726_v18, %v726_v18  ;;  %v500_v27 = vpop.f32.mrf.mxu0  ;;  %v628_v28 = vpop.f32.mrf.mxu1 }
 0x105   :  { %v1215_v29 = vpack.c.bf16 %v692_v21, %v692_v21  ;;  %v695_v31 = vmax.f32 %v509_v23, 0.0  ;;  %v727_v32 = vmax.f32 %v637_v24, 0.0  ;;  %v501_v33 = vadd.f32 %v1585_v38, %v500_v27 }
 0x106   :  { %v1247_v30 = vpack.c.bf16 %v724_v22, %v724_v22  ;;  %1015 = vst.msk [vmem:[%s1910_s3 + $0x58] sm:$0xf] %vm992_vm2, %v1217_v25  ;;  %1047 = vst.msk [vmem:[%s1910_s3 + $0xd8] sm:$0xf] %vm992_vm2, %v1249_v26  ;;  %v629_v34 = vadd.f32 %v1585_v38, %v628_v28  ;;  %v1332_v35 = vpop.f32.mrf.mxu0  ;;  %v1364_v36 = vpop.f32.mrf.mxu1 }
 0x107   :  { %1013 = vst.msk [vmem:[%s1910_s3 + $0x50] sm:$0xf] %vm992_vm2, %v1215_v29  ;;  %v1218_v37 = vpack.c.bf16 %v695_v31, %v695_v31  ;;  %v1250_v39 = vpack.c.bf16 %v727_v32, %v727_v32  ;;  %v522_v40 = vadd.f32 %v1332_v35, %v1585_v38  ;;  %v650_v41 = vadd.f32 %v1364_v36, %v1585_v38 }
 0x108   :  { %1045 = vst.msk [vmem:[%s1910_s3 + $0xd0] sm:$0xf] %vm992_vm2, %v1247_v30  ;;  %v693_v42 = vmax.f32 %v501_v33, 0.0  ;;  %v725_v43 = vmax.f32 %v629_v34, 0.0  ;;  %v513_v44 = vpop.f32.mrf.mxu0  ;;  %v641_v45 = vpop.f32.mrf.mxu1 }
 0x109   :  { %1016 = vst.msk [vmem:[%s1910_s3 + $0x5c] sm:$0xf] %vm992_vm2, %v1218_v37  ;;  %1048 = vst.msk [vmem:[%s1910_s3 + $0xdc] sm:$0xf] %vm992_vm2, %v1250_v39  ;;  %v698_v46 = vmax.f32 %v522_v40, 0.0  ;;  %v730_v47 = vmax.f32 %v650_v41, 0.0  ;;  %v514_v48 = vadd.f32 %v1585_v38, %v513_v44  ;;  %v642_v49 = vadd.f32 %v1585_v38, %v641_v45 }
 0x10a   :  { %v1216_v50 = vpack.c.bf16 %v693_v42, %v693_v42  ;;  %v1248_v51 = vpack.c.bf16 %v725_v43, %v725_v43  ;;  %v1333_v52 = vpop.f32.mrf.mxu0  ;;  %v1365_v53 = vpop.f32.mrf.mxu1 }
 0x10b   :  { %v1221_v54 = vpack.c.bf16 %v698_v46, %v698_v46  ;;  %v1253_v55 = vpack.c.bf16 %v730_v47, %v730_v47  ;;  %v696_v56 = vmax.f32 %v514_v48, 0.0  ;;  %v728_v57 = vmax.f32 %v642_v49, 0.0 }
 0x10c   :  { %1014 = vst.msk [vmem:[%s1910_s3 + $0x54] sm:$0xf] %vm992_vm2, %v1216_v50  ;;  %1046 = vst.msk [vmem:[%s1910_s3 + $0xd4] sm:$0xf] %vm992_vm2, %v1248_v51  ;;  %v525_v58 = vadd.f32 %v1333_v52, %v1585_v38  ;;  %v653_v59 = vadd.f32 %v1365_v53, %v1585_v38  ;;  %v516_v60 = vpop.f32.mrf.mxu0  ;;  %v644_v61 = vpop.f32.mrf.mxu1 }
 0x10d   :  { %1019 = vst.msk [vmem:[%s1910_s3 + $0x68] sm:$0xf] %vm992_vm2, %v1221_v54  ;;  %1051 = vst.msk [vmem:[%s1910_s3 + $0xe8] sm:$0xf] %vm992_vm2, %v1253_v55  ;;  %v1219_v62 = vpack.c.bf16 %v696_v56, %v696_v56  ;;  %v1251_v63 = vpack.c.bf16 %v728_v57, %v728_v57  ;;  %v517_v0 = vadd.f32 %v1585_v38, %v516_v60 }
 0x10e   :  { %v645_v1 = vadd.f32 %v1585_v38, %v644_v61  ;;  %v699_v2 = vmax.f32 %v525_v58, 0.0  ;;  %v731_v3 = vmax.f32 %v653_v59, 0.0  ;;  %v1336_v4 = vpop.f32.mrf.mxu0  ;;  %v1368_v5 = vpop.f32.mrf.mxu1 }
 0x10f   :  { %1017 = vst.msk [vmem:[%s1910_s3 + $0x60] sm:$0xf] %vm992_vm2, %v1219_v62  ;;  %1049 = vst.msk [vmem:[%s1910_s3 + $0xe0] sm:$0xf] %vm992_vm2, %v1251_v63  ;;  %v697_v6 = vmax.f32 %v517_v0, 0.0  ;;  %v538_v8 = vadd.f32 %v1336_v4, %v1585_v38  ;;  %v666_v9 = vadd.f32 %v1368_v5, %v1585_v38 }
 0x110   :  { %v729_v7 = vmax.f32 %v645_v1, 0.0  ;;  %v1222_v10 = vpack.c.bf16 %v699_v2, %v699_v2  ;;  %v1254_v11 = vpack.c.bf16 %v731_v3, %v731_v3  ;;  %v529_v12 = vpop.f32.mrf.mxu0  ;;  %v657_v13 = vpop.f32.mrf.mxu1 }
 0x111   :  { %v1220_v14 = vpack.c.bf16 %v697_v6, %v697_v6  ;;  %v702_v16 = vmax.f32 %v538_v8, 0.0  ;;  %v734_v17 = vmax.f32 %v666_v9, 0.0  ;;  %v530_v18 = vadd.f32 %v1585_v38, %v529_v12 }
 0x112   :  { %v1252_v15 = vpack.c.bf16 %v729_v7, %v729_v7  ;;  %1020 = vst.msk [vmem:[%s1910_s3 + $0x6c] sm:$0xf] %vm992_vm2, %v1222_v10  ;;  %1052 = vst.msk [vmem:[%s1910_s3 + $0xec] sm:$0xf] %vm992_vm2, %v1254_v11  ;;  %v658_v19 = vadd.f32 %v1585_v38, %v657_v13  ;;  %v1337_v20 = vpop.f32.mrf.mxu0  ;;  %v1369_v21 = vpop.f32.mrf.mxu1 }
 0x113   :  { %1018 = vst.msk [vmem:[%s1910_s3 + $0x64] sm:$0xf] %vm992_vm2, %v1220_v14  ;;  %v1225_v22 = vpack.c.bf16 %v702_v16, %v702_v16  ;;  %v1257_v23 = vpack.c.bf16 %v734_v17, %v734_v17  ;;  %v541_v24 = vadd.f32 %v1337_v20, %v1585_v38  ;;  %v669_v25 = vadd.f32 %v1369_v21, %v1585_v38 }
 0x114   :  { %1050 = vst.msk [vmem:[%s1910_s3 + $0xe4] sm:$0xf] %vm992_vm2, %v1252_v15  ;;  %v700_v26 = vmax.f32 %v530_v18, 0.0  ;;  %v732_v27 = vmax.f32 %v658_v19, 0.0  ;;  %v532_v28 = vpop.f32.mrf.mxu0  ;;  %v660_v29 = vpop.f32.mrf.mxu1 }
 0x115   :  { %1023 = vst.msk [vmem:[%s1910_s3 + $0x78] sm:$0xf] %vm992_vm2, %v1225_v22  ;;  %1055 = vst.msk [vmem:[%s1910_s3 + $0xf8] sm:$0xf] %vm992_vm2, %v1257_v23  ;;  %v703_v30 = vmax.f32 %v541_v24, 0.0  ;;  %v735_v31 = vmax.f32 %v669_v25, 0.0  ;;  %v533_v32 = vadd.f32 %v1585_v38, %v532_v28  ;;  %v661_v33 = vadd.f32 %v1585_v38, %v660_v29 }
 0x116   :  { %v1223_v34 = vpack.c.bf16 %v700_v26, %v700_v26  ;;  %v1255_v35 = vpack.c.bf16 %v732_v27, %v732_v27 }
 0x117   :  { %v1226_v36 = vpack.c.bf16 %v703_v30, %v703_v30  ;;  %v1258_v37 = vpack.c.bf16 %v735_v31, %v735_v31  ;;  %v701_v39 = vmax.f32 %v533_v32, 0.0  ;;  %v733_v40 = vmax.f32 %v661_v33, 0.0 }
 0x118   :  { %1021 = vst.msk [vmem:[%s1910_s3 + $0x70] sm:$0xf] %vm992_vm2, %v1223_v34  ;;  %1053 = vst.msk [vmem:[%s1910_s3 + $0xf0] sm:$0xf] %vm992_vm2, %v1255_v35 }
 0x119   :  { %1024 = vst.msk [vmem:[%s1910_s3 + $0x7c] sm:$0xf] %vm992_vm2, %v1226_v36  ;;  %1056 = vst.msk [vmem:[%s1910_s3 + $0xfc] sm:$0xf] %vm992_vm2, %v1258_v37  ;;  %v1224_v38 = vpack.c.bf16 %v701_v39, %v701_v39  ;;  %v1256_v41 = vpack.c.bf16 %v733_v40, %v733_v40 }
 0x11b   :  { %1022 = vst.msk [vmem:[%s1910_s3 + $0x74] sm:$0xf] %vm992_vm2, %v1224_v38  ;;  %1054 = vst.msk [vmem:[%s1910_s3 + $0xf4] sm:$0xf] %vm992_vm2, %v1256_v41 }

// kernel: _lambda_.60
= control target key start
LH: loop header
LB: loop body
LE: loop exit
PB: predicated region body
PF: predicated region fallthrough
CT: control target
= control target key end

     0   :  { %vm344_vm0 = vcmask 1043456   ;;  %vm247_vm1 = vcmask 64512   ;;  %vm893_vm2 = vcmask 257024   ;;  %s1766_s1 = inlined_call_operand.vmem [shape: bf16[1,8,32], index: 1, kind: input, shape index: {}]   ;;  %s1767_s0 = inlined_call_operand.vmem [shape: bf16[1,512,8], index: 0, kind: input, shape index: {}]   ;;  %s1768_s2 = inlined_call_operand.vmem [shape: f32[1,1,32], index: 2, kind: input, shape index: {}]   ;;  %s1769_s3 = inlined_call_operand.vmem [shape: bf16[1,512,32], index: 3, kind: output, shape index: {}]  }
   0x1   :  { %v79_v0 = vld [vmem:[%s1766_s1] sm:$0xf]  ;;  %v1260_v4 = vld [vmem:[%s1767_s0 + $0x8] sm:$0xff]   ;;  %v1262_v6 = vld [vmem:[%s1767_s0 + $0x10] sm:$0xff]  }
   0x2   :  { %1256 = vmatprep.subr.msk.bf16.mxu0 %vm344_vm0, %v79_v0  ;;  %1257 = vmatprep.subr.msk.bf16.mxu1 %vm344_vm0, %v79_v0  ;;  %v346_v1 = vsel %vm344_vm0, %v79_v0, 0  ;;  %v1258_v2 = vld [vmem:[%s1767_s0] sm:$0xff]   ;;  %v1261_v5 = vld [vmem:[%s1767_s0 + $0x88] sm:$0xff]   ;;  %v1263_v7 = vld [vmem:[%s1767_s0 + $0x90] sm:$0xff]  }
   0x3   :  { %1189 = vmatpush3.bf16.msra.mxu0 %v346_v1  ;;  %1255 = vmatpush3.bf16.msra.mxu1 %v346_v1  ;;  %v1259_v3 = vld [vmem:[%s1767_s0 + $0x80] sm:$0xff]   ;;  %v1264_v8 = vld [vmem:[%s1767_s0 + $0x18] sm:$0xff]   ;;  %v1268_v12 = vld [vmem:[%s1767_s0 + $0x28] sm:$0xff]  }
   0x4   :  { %1190 = vmatprep.mubr.msk.bf16.mxu0 %vm247_vm1, %v1258_v2  ;;  %1222 = vmatprep.mubr.msk.bf16.mxu1 %vm247_vm1, %v1259_v3  ;;  %v1265_v9 = vld [vmem:[%s1767_s0 + $0x98] sm:$0xff]   ;;  %v1266_v10 = vld [vmem:[%s1767_s0 + $0x20] sm:$0xff]   ;;  %v1269_v13 = vld [vmem:[%s1767_s0 + $0xa8] sm:$0xff]  }
   0x5   :  { %v1267_v11 = vld [vmem:[%s1767_s0 + $0xa0] sm:$0xff]   ;;  %v1270_v14 = vld [vmem:[%s1767_s0 + $0x30] sm:$0xff]   ;;  %v1272_v16 = vld [vmem:[%s1767_s0 + $0x38] sm:$0xff]  }
   0x6   :  { %1191 = vmatmul.mubr.msk.bf16.vlgmr.msra.gmra.mxu0 %vm247_vm1, %v1260_v4  ;;  %1223 = vmatmul.mubr.msk.bf16.vlgmr.msra.gmra.mxu1 %vm247_vm1, %v1261_v5  ;;  %v1271_v15 = vld [vmem:[%s1767_s0 + $0xb0] sm:$0xff]   ;;  %v1273_v17 = vld [vmem:[%s1767_s0 + $0xb8] sm:$0xff]   ;;  %v1274_v18 = vld [vmem:[%s1767_s0 + $0x40] sm:$0xff]  }
   0x7   :  { %1194 = vmatprep.mubr.msk.bf16.mxu0 %vm247_vm1, %v1262_v6  ;;  %1226 = vmatprep.mubr.msk.bf16.mxu1 %vm247_vm1, %v1263_v7  ;;  %v1275_v19 = vld [vmem:[%s1767_s0 + $0xc0] sm:$0xff]   ;;  %v1276_v20 = vld [vmem:[%s1767_s0 + $0x48] sm:$0xff]   ;;  %v1278_v22 = vld [vmem:[%s1767_s0 + $0x50] sm:$0xff]  }
   0x8   :  { %v1277_v21 = vld [vmem:[%s1767_s0 + $0xc8] sm:$0xff]   ;;  %v1279_v23 = vld [vmem:[%s1767_s0 + $0xd0] sm:$0xff]   ;;  %v1280_v24 = vld [vmem:[%s1767_s0 + $0x58] sm:$0xff]  }
   0x9   :  { %v1281_v25 = vld [vmem:[%s1767_s0 + $0xd8] sm:$0xff]   ;;  %v1282_v26 = vld [vmem:[%s1767_s0 + $0x60] sm:$0xff]   ;;  %v1284_v28 = vld [vmem:[%s1767_s0 + $0x68] sm:$0xff]  }
   0xa   :  { %v1283_v27 = vld [vmem:[%s1767_s0 + $0xe0] sm:$0xff]   ;;  %v1285_v29 = vld [vmem:[%s1767_s0 + $0xe8] sm:$0xff]   ;;  %v1286_v30 = vld [vmem:[%s1767_s0 + $0x70] sm:$0xff]  }
   0xb   :  { %v1287_v31 = vld [vmem:[%s1767_s0 + $0xf0] sm:$0xff]   ;;  %v1288_v32 = vld [vmem:[%s1767_s0 + $0x78] sm:$0xff]   ;;  %v1444_v34 = vld [vmem:[%s1768_s2] ss:$0 sm:$0xff] }
   0xc   :  { %v1289_v33 = vld [vmem:[%s1767_s0 + $0xf8] sm:$0xff]  }
   0xe   :  { %1195 = vmatmul.mubr.msk.bf16.gmra.mxu0 %vm247_vm1, %v1264_v8  ;;  %1227 = vmatmul.mubr.msk.bf16.gmra.mxu1 %vm247_vm1, %v1265_v9 }
   0xf   :  { %1198 = vmatprep.mubr.msk.bf16.mxu0 %vm247_vm1, %v1266_v10  ;;  %1230 = vmatprep.mubr.msk.bf16.mxu1 %vm247_vm1, %v1267_v11 }
  0x16   :  { %1199 = vmatmul.mubr.msk.bf16.gmra.mxu0 %vm247_vm1, %v1268_v12  ;;  %1231 = vmatmul.mubr.msk.bf16.gmra.mxu1 %vm247_vm1, %v1269_v13 }
  0x17   :  { %1202 = vmatprep.mubr.msk.bf16.mxu0 %vm247_vm1, %v1270_v14  ;;  %1234 = vmatprep.mubr.msk.bf16.mxu1 %vm247_vm1, %v1271_v15 }
  0x1e   :  { %1203 = vmatmul.mubr.msk.bf16.gmra.mxu0 %vm247_vm1, %v1272_v16  ;;  %1235 = vmatmul.mubr.msk.bf16.gmra.mxu1 %vm247_vm1, %v1273_v17 }
  0x1f   :  { %1206 = vmatprep.mubr.msk.bf16.mxu0 %vm247_vm1, %v1274_v18  ;;  %1238 = vmatprep.mubr.msk.bf16.mxu1 %vm247_vm1, %v1275_v19 }
  0x26   :  { %1207 = vmatmul.mubr.msk.bf16.gmra.mxu0 %vm247_vm1, %v1276_v20  ;;  %1239 = vmatmul.mubr.msk.bf16.gmra.mxu1 %vm247_vm1, %v1277_v21 }
  0x27   :  { %1210 = vmatprep.mubr.msk.bf16.mxu0 %vm247_vm1, %v1278_v22  ;;  %1242 = vmatprep.mubr.msk.bf16.mxu1 %vm247_vm1, %v1279_v23 }
  0x2e   :  { %1211 = vmatmul.mubr.msk.bf16.gmra.mxu0 %vm247_vm1, %v1280_v24  ;;  %1243 = vmatmul.mubr.msk.bf16.gmra.mxu1 %vm247_vm1, %v1281_v25 }
  0x2f   :  { %1214 = vmatprep.mubr.msk.bf16.mxu0 %vm247_vm1, %v1282_v26  ;;  %1246 = vmatprep.mubr.msk.bf16.mxu1 %vm247_vm1, %v1283_v27 }
  0x36   :  { %1215 = vmatmul.mubr.msk.bf16.gmra.mxu0 %vm247_vm1, %v1284_v28  ;;  %1247 = vmatmul.mubr.msk.bf16.gmra.mxu1 %vm247_vm1, %v1285_v29 }
  0x37   :  { %1218 = vmatprep.mubr.msk.bf16.mxu0 %vm247_vm1, %v1286_v30  ;;  %1250 = vmatprep.mubr.msk.bf16.mxu1 %vm247_vm1, %v1287_v31 }
  0x3e   :  { %1219 = vmatmul.mubr.msk.bf16.gmra.mxu0 %vm247_vm1, %v1288_v32  ;;  %1251 = vmatmul.mubr.msk.bf16.gmra.mxu1 %vm247_vm1, %v1289_v33 }
  0xc6   :  { %v1192_v35 = vpop.f32.mrf.mxu0  ;;  %v1224_v37 = vpop.f32.mrf.mxu1 }
  0xc7   :  { %v391_v36 = vadd.f32 %v1192_v35, %v1444_v34  ;;  %v519_v38 = vadd.f32 %v1224_v37, %v1444_v34 }
  0xc8   :  { %v382_v39 = vpop.f32.mrf.mxu0  ;;  %v510_v42 = vpop.f32.mrf.mxu1 }
  0xc9   :  { %v1093_v40 = vpack.c.bf16 %v391_v36, %v391_v36  ;;  %v383_v41 = vadd.f32 %v1444_v34, %v382_v39  ;;  %v1125_v43 = vpack.c.bf16 %v519_v38, %v519_v38  ;;  %v511_v44 = vadd.f32 %v1444_v34, %v510_v42 }
  0xca   :  { %v1193_v45 = vpop.f32.mrf.mxu0  ;;  %v1225_v48 = vpop.f32.mrf.mxu1 }
  0xcb   :  { %896 = vst.msk [vmem:[%s1769_s3 + $0x8] sm:$0xf] %vm893_vm2, %v1093_v40  ;;  %v1091_v46 = vpack.c.bf16 %v383_v41, %v383_v41  ;;  %v394_v47 = vadd.f32 %v1193_v45, %v1444_v34  ;;  %928 = vst.msk [vmem:[%s1769_s3 + $0x88] sm:$0xf] %vm893_vm2, %v1125_v43  ;;  %v1123_v49 = vpack.c.bf16 %v511_v44, %v511_v44 }
  0xcc   :  { %v522_v50 = vadd.f32 %v1225_v48, %v1444_v34  ;;  %v385_v51 = vpop.f32.mrf.mxu0  ;;  %v513_v54 = vpop.f32.mrf.mxu1 }
  0xcd   :  { %894 = vst.msk [vmem:[%s1769_s3] sm:$0xf] %vm893_vm2, %v1091_v46  ;;  %v1094_v52 = vpack.c.bf16 %v394_v47, %v394_v47  ;;  %v386_v53 = vadd.f32 %v1444_v34, %v385_v51  ;;  %926 = vst.msk [vmem:[%s1769_s3 + $0x80] sm:$0xf] %vm893_vm2, %v1123_v49  ;;  %v514_v56 = vadd.f32 %v1444_v34, %v513_v54 }
  0xce   :  { %v1126_v55 = vpack.c.bf16 %v522_v50, %v522_v50  ;;  %v1196_v57 = vpop.f32.mrf.mxu0  ;;  %v1228_v60 = vpop.f32.mrf.mxu1 }
  0xcf   :  { %897 = vst.msk [vmem:[%s1769_s3 + $0xc] sm:$0xf] %vm893_vm2, %v1094_v52  ;;  %v1092_v58 = vpack.c.bf16 %v386_v53, %v386_v53  ;;  %v407_v59 = vadd.f32 %v1196_v57, %v1444_v34  ;;  %v1124_v61 = vpack.c.bf16 %v514_v56, %v514_v56  ;;  %v535_v62 = vadd.f32 %v1228_v60, %v1444_v34 }
  0xd0   :  { %929 = vst.msk [vmem:[%s1769_s3 + $0x8c] sm:$0xf] %vm893_vm2, %v1126_v55  ;;  %v398_v63 = vpop.f32.mrf.mxu0  ;;  %v526_v2 = vpop.f32.mrf.mxu1 }
  0xd1   :  { %895 = vst.msk [vmem:[%s1769_s3 + $0x4] sm:$0xf] %vm893_vm2, %v1092_v58  ;;  %v1097_v0 = vpack.c.bf16 %v407_v59, %v407_v59  ;;  %v399_v1 = vadd.f32 %v1444_v34, %v398_v63  ;;  %927 = vst.msk [vmem:[%s1769_s3 + $0x84] sm:$0xf] %vm893_vm2, %v1124_v61  ;;  %v1129_v3 = vpack.c.bf16 %v535_v62, %v535_v62 }
  0xd2   :  { %v527_v4 = vadd.f32 %v1444_v34, %v526_v2  ;;  %v1197_v5 = vpop.f32.mrf.mxu0  ;;  %v1229_v8 = vpop.f32.mrf.mxu1 }
  0xd3   :  { %900 = vst.msk [vmem:[%s1769_s3 + $0x18] sm:$0xf] %vm893_vm2, %v1097_v0  ;;  %v1095_v6 = vpack.c.bf16 %v399_v1, %v399_v1  ;;  %v410_v7 = vadd.f32 %v1197_v5, %v1444_v34  ;;  %932 = vst.msk [vmem:[%s1769_s3 + $0x98] sm:$0xf] %vm893_vm2, %v1129_v3  ;;  %v538_v10 = vadd.f32 %v1229_v8, %v1444_v34 }
  0xd4   :  { %v1127_v9 = vpack.c.bf16 %v527_v4, %v527_v4  ;;  %v401_v11 = vpop.f32.mrf.mxu0  ;;  %v529_v14 = vpop.f32.mrf.mxu1 }
  0xd5   :  { %898 = vst.msk [vmem:[%s1769_s3 + $0x10] sm:$0xf] %vm893_vm2, %v1095_v6  ;;  %v1098_v12 = vpack.c.bf16 %v410_v7, %v410_v7  ;;  %v402_v13 = vadd.f32 %v1444_v34, %v401_v11  ;;  %v1130_v15 = vpack.c.bf16 %v538_v10, %v538_v10  ;;  %v530_v16 = vadd.f32 %v1444_v34, %v529_v14 }
  0xd6   :  { %930 = vst.msk [vmem:[%s1769_s3 + $0x90] sm:$0xf] %vm893_vm2, %v1127_v9  ;;  %v1200_v17 = vpop.f32.mrf.mxu0  ;;  %v1232_v20 = vpop.f32.mrf.mxu1 }
  0xd7   :  { %901 = vst.msk [vmem:[%s1769_s3 + $0x1c] sm:$0xf] %vm893_vm2, %v1098_v12  ;;  %v1096_v18 = vpack.c.bf16 %v402_v13, %v402_v13  ;;  %v423_v19 = vadd.f32 %v1200_v17, %v1444_v34  ;;  %933 = vst.msk [vmem:[%s1769_s3 + $0x9c] sm:$0xf] %vm893_vm2, %v1130_v15  ;;  %v1128_v21 = vpack.c.bf16 %v530_v16, %v530_v16 }
  0xd8   :  { %v551_v22 = vadd.f32 %v1232_v20, %v1444_v34  ;;  %v414_v23 = vpop.f32.mrf.mxu0  ;;  %v542_v26 = vpop.f32.mrf.mxu1 }
  0xd9   :  { %899 = vst.msk [vmem:[%s1769_s3 + $0x14] sm:$0xf] %vm893_vm2, %v1096_v18  ;;  %v1101_v24 = vpack.c.bf16 %v423_v19, %v423_v19  ;;  %v415_v25 = vadd.f32 %v1444_v34, %v414_v23  ;;  %931 = vst.msk [vmem:[%s1769_s3 + $0x94] sm:$0xf] %vm893_vm2, %v1128_v21  ;;  %v543_v28 = vadd.f32 %v1444_v34, %v542_v26 }
  0xda   :  { %v1133_v27 = vpack.c.bf16 %v551_v22, %v551_v22  ;;  %v1201_v29 = vpop.f32.mrf.mxu0  ;;  %v1233_v32 = vpop.f32.mrf.mxu1 }
  0xdb   :  { %904 = vst.msk [vmem:[%s1769_s3 + $0x28] sm:$0xf] %vm893_vm2, %v1101_v24  ;;  %v1099_v30 = vpack.c.bf16 %v415_v25, %v415_v25  ;;  %v426_v31 = vadd.f32 %v1201_v29, %v1444_v34  ;;  %v1131_v33 = vpack.c.bf16 %v543_v28, %v543_v28  ;;  %v554_v35 = vadd.f32 %v1233_v32, %v1444_v34 }
  0xdc   :  { %936 = vst.msk [vmem:[%s1769_s3 + $0xa8] sm:$0xf] %vm893_vm2, %v1133_v27  ;;  %v417_v36 = vpop.f32.mrf.mxu0  ;;  %v545_v39 = vpop.f32.mrf.mxu1 }
  0xdd   :  { %902 = vst.msk [vmem:[%s1769_s3 + $0x20] sm:$0xf] %vm893_vm2, %v1099_v30  ;;  %v1102_v37 = vpack.c.bf16 %v426_v31, %v426_v31  ;;  %v418_v38 = vadd.f32 %v1444_v34, %v417_v36  ;;  %934 = vst.msk [vmem:[%s1769_s3 + $0xa0] sm:$0xf] %vm893_vm2, %v1131_v33  ;;  %v1134_v40 = vpack.c.bf16 %v554_v35, %v554_v35 }
  0xde   :  { %v546_v41 = vadd.f32 %v1444_v34, %v545_v39  ;;  %v1204_v42 = vpop.f32.mrf.mxu0  ;;  %v1236_v45 = vpop.f32.mrf.mxu1 }
  0xdf   :  { %905 = vst.msk [vmem:[%s1769_s3 + $0x2c] sm:$0xf] %vm893_vm2, %v1102_v37  ;;  %v1100_v43 = vpack.c.bf16 %v418_v38, %v418_v38  ;;  %v439_v44 = vadd.f32 %v1204_v42, %v1444_v34  ;;  %937 = vst.msk [vmem:[%s1769_s3 + $0xac] sm:$0xf] %vm893_vm2, %v1134_v40  ;;  %v567_v47 = vadd.f32 %v1236_v45, %v1444_v34 }
  0xe0   :  { %v1132_v46 = vpack.c.bf16 %v546_v41, %v546_v41  ;;  %v430_v48 = vpop.f32.mrf.mxu0  ;;  %v558_v51 = vpop.f32.mrf.mxu1 }
  0xe1   :  { %903 = vst.msk [vmem:[%s1769_s3 + $0x24] sm:$0xf] %vm893_vm2, %v1100_v43  ;;  %v1105_v49 = vpack.c.bf16 %v439_v44, %v439_v44  ;;  %v431_v50 = vadd.f32 %v1444_v34, %v430_v48  ;;  %v1137_v52 = vpack.c.bf16 %v567_v47, %v567_v47  ;;  %v559_v53 = vadd.f32 %v1444_v34, %v558_v51 }
  0xe2   :  { %935 = vst.msk [vmem:[%s1769_s3 + $0xa4] sm:$0xf] %vm893_vm2, %v1132_v46  ;;  %v1205_v54 = vpop.f32.mrf.mxu0  ;;  %v1237_v57 = vpop.f32.mrf.mxu1 }
  0xe3   :  { %908 = vst.msk [vmem:[%s1769_s3 + $0x38] sm:$0xf] %vm893_vm2, %v1105_v49  ;;  %v1103_v55 = vpack.c.bf16 %v431_v50, %v431_v50  ;;  %v442_v56 = vadd.f32 %v1205_v54, %v1444_v34  ;;  %940 = vst.msk [vmem:[%s1769_s3 + $0xb8] sm:$0xf] %vm893_vm2, %v1137_v52  ;;  %v1135_v58 = vpack.c.bf16 %v559_v53, %v559_v53 }
  0xe4   :  { %v570_v59 = vadd.f32 %v1237_v57, %v1444_v34  ;;  %v433_v60 = vpop.f32.mrf.mxu0  ;;  %v561_v63 = vpop.f32.mrf.mxu1 }
  0xe5   :  { %906 = vst.msk [vmem:[%s1769_s3 + $0x30] sm:$0xf] %vm893_vm2, %v1103_v55  ;;  %v1106_v61 = vpack.c.bf16 %v442_v56, %v442_v56  ;;  %v434_v62 = vadd.f32 %v1444_v34, %v433_v60  ;;  %938 = vst.msk [vmem:[%s1769_s3 + $0xb0] sm:$0xf] %vm893_vm2, %v1135_v58  ;;  %v562_v1 = vadd.f32 %v1444_v34, %v561_v63 }
  0xe6   :  { %v1138_v0 = vpack.c.bf16 %v570_v59, %v570_v59  ;;  %v1208_v2 = vpop.f32.mrf.mxu0  ;;  %v1240_v5 = vpop.f32.mrf.mxu1 }
  0xe7   :  { %909 = vst.msk [vmem:[%s1769_s3 + $0x3c] sm:$0xf] %vm893_vm2, %v1106_v61  ;;  %v1104_v3 = vpack.c.bf16 %v434_v62, %v434_v62  ;;  %v455_v4 = vadd.f32 %v1208_v2, %v1444_v34  ;;  %v1136_v6 = vpack.c.bf16 %v562_v1, %v562_v1  ;;  %v583_v7 = vadd.f32 %v1240_v5, %v1444_v34 }
  0xe8   :  { %941 = vst.msk [vmem:[%s1769_s3 + $0xbc] sm:$0xf] %vm893_vm2, %v1138_v0  ;;  %v446_v8 = vpop.f32.mrf.mxu0  ;;  %v574_v11 = vpop.f32.mrf.mxu1 }
  0xe9   :  { %907 = vst.msk [vmem:[%s1769_s3 + $0x34] sm:$0xf] %vm893_vm2, %v1104_v3  ;;  %v1109_v9 = vpack.c.bf16 %v455_v4, %v455_v4  ;;  %v447_v10 = vadd.f32 %v1444_v34, %v446_v8  ;;  %939 = vst.msk [vmem:[%s1769_s3 + $0xb4] sm:$0xf] %vm893_vm2, %v1136_v6  ;;  %v1141_v12 = vpack.c.bf16 %v583_v7, %v583_v7 }
  0xea   :  { %v575_v13 = vadd.f32 %v1444_v34, %v574_v11  ;;  %v1209_v14 = vpop.f32.mrf.mxu0  ;;  %v1241_v17 = vpop.f32.mrf.mxu1 }
  0xeb   :  { %912 = vst.msk [vmem:[%s1769_s3 + $0x48] sm:$0xf] %vm893_vm2, %v1109_v9  ;;  %v1107_v15 = vpack.c.bf16 %v447_v10, %v447_v10  ;;  %v458_v16 = vadd.f32 %v1209_v14, %v1444_v34  ;;  %944 = vst.msk [vmem:[%s1769_s3 + $0xc8] sm:$0xf] %vm893_vm2, %v1141_v12  ;;  %v586_v19 = vadd.f32 %v1241_v17, %v1444_v34 }
  0xec   :  { %v1139_v18 = vpack.c.bf16 %v575_v13, %v575_v13  ;;  %v449_v20 = vpop.f32.mrf.mxu0  ;;  %v577_v23 = vpop.f32.mrf.mxu1 }
  0xed   :  { %910 = vst.msk [vmem:[%s1769_s3 + $0x40] sm:$0xf] %vm893_vm2, %v1107_v15  ;;  %v1110_v21 = vpack.c.bf16 %v458_v16, %v458_v16  ;;  %v450_v22 = vadd.f32 %v1444_v34, %v449_v20  ;;  %v1142_v24 = vpack.c.bf16 %v586_v19, %v586_v19  ;;  %v578_v25 = vadd.f32 %v1444_v34, %v577_v23 }
  0xee   :  { %942 = vst.msk [vmem:[%s1769_s3 + $0xc0] sm:$0xf] %vm893_vm2, %v1139_v18  ;;  %v1212_v26 = vpop.f32.mrf.mxu0  ;;  %v1244_v29 = vpop.f32.mrf.mxu1 }
  0xef   :  { %913 = vst.msk [vmem:[%s1769_s3 + $0x4c] sm:$0xf] %vm893_vm2, %v1110_v21  ;;  %v1108_v27 = vpack.c.bf16 %v450_v22, %v450_v22  ;;  %v471_v28 = vadd.f32 %v1212_v26, %v1444_v34  ;;  %945 = vst.msk [vmem:[%s1769_s3 + $0xcc] sm:$0xf] %vm893_vm2, %v1142_v24  ;;  %v1140_v30 = vpack.c.bf16 %v578_v25, %v578_v25 }
  0xf0   :  { %v599_v31 = vadd.f32 %v1244_v29, %v1444_v34  ;;  %v462_v32 = vpop.f32.mrf.mxu0  ;;  %v590_v36 = vpop.f32.mrf.mxu1 }
  0xf1   :  { %911 = vst.msk [vmem:[%s1769_s3 + $0x44] sm:$0xf] %vm893_vm2, %v1108_v27  ;;  %v1113_v33 = vpack.c.bf16 %v471_v28, %v471_v28  ;;  %v463_v35 = vadd.f32 %v1444_v34, %v462_v32  ;;  %943 = vst.msk [vmem:[%s1769_s3 + $0xc4] sm:$0xf] %vm893_vm2, %v1140_v30  ;;  %v591_v38 = vadd.f32 %v1444_v34, %v590_v36 }
  0xf2   :  { %v1145_v37 = vpack.c.bf16 %v599_v31, %v599_v31  ;;  %v1213_v39 = vpop.f32.mrf.mxu0  ;;  %v1245_v42 = vpop.f32.mrf.mxu1 }
  0xf3   :  { %916 = vst.msk [vmem:[%s1769_s3 + $0x58] sm:$0xf] %vm893_vm2, %v1113_v33  ;;  %v1111_v40 = vpack.c.bf16 %v463_v35, %v463_v35  ;;  %v474_v41 = vadd.f32 %v1213_v39, %v1444_v34  ;;  %v1143_v43 = vpack.c.bf16 %v591_v38, %v591_v38  ;;  %v602_v44 = vadd.f32 %v1245_v42, %v1444_v34 }
  0xf4   :  { %948 = vst.msk [vmem:[%s1769_s3 + $0xd8] sm:$0xf] %vm893_vm2, %v1145_v37  ;;  %v465_v45 = vpop.f32.mrf.mxu0  ;;  %v593_v48 = vpop.f32.mrf.mxu1 }
  0xf5   :  { %914 = vst.msk [vmem:[%s1769_s3 + $0x50] sm:$0xf] %vm893_vm2, %v1111_v40  ;;  %v1114_v46 = vpack.c.bf16 %v474_v41, %v474_v41  ;;  %v466_v47 = vadd.f32 %v1444_v34, %v465_v45  ;;  %946 = vst.msk [vmem:[%s1769_s3 + $0xd0] sm:$0xf] %vm893_vm2, %v1143_v43  ;;  %v1146_v49 = vpack.c.bf16 %v602_v44, %v602_v44 }
  0xf6   :  { %v594_v50 = vadd.f32 %v1444_v34, %v593_v48  ;;  %v1216_v51 = vpop.f32.mrf.mxu0  ;;  %v1248_v54 = vpop.f32.mrf.mxu1 }
  0xf7   :  { %917 = vst.msk [vmem:[%s1769_s3 + $0x5c] sm:$0xf] %vm893_vm2, %v1114_v46  ;;  %v1112_v52 = vpack.c.bf16 %v466_v47, %v466_v47  ;;  %v487_v53 = vadd.f32 %v1216_v51, %v1444_v34  ;;  %949 = vst.msk [vmem:[%s1769_s3 + $0xdc] sm:$0xf] %vm893_vm2, %v1146_v49  ;;  %v615_v56 = vadd.f32 %v1248_v54, %v1444_v34 }
  0xf8   :  { %v1144_v55 = vpack.c.bf16 %v594_v50, %v594_v50  ;;  %v478_v57 = vpop.f32.mrf.mxu0  ;;  %v606_v60 = vpop.f32.mrf.mxu1 }
  0xf9   :  { %915 = vst.msk [vmem:[%s1769_s3 + $0x54] sm:$0xf] %vm893_vm2, %v1112_v52  ;;  %v1117_v58 = vpack.c.bf16 %v487_v53, %v487_v53  ;;  %v479_v59 = vadd.f32 %v1444_v34, %v478_v57  ;;  %v1149_v61 = vpack.c.bf16 %v615_v56, %v615_v56  ;;  %v607_v62 = vadd.f32 %v1444_v34, %v606_v60 }
  0xfa   :  { %947 = vst.msk [vmem:[%s1769_s3 + $0xd4] sm:$0xf] %vm893_vm2, %v1144_v55  ;;  %v1217_v63 = vpop.f32.mrf.mxu0  ;;  %v1249_v2 = vpop.f32.mrf.mxu1 }
  0xfb   :  { %920 = vst.msk [vmem:[%s1769_s3 + $0x68] sm:$0xf] %vm893_vm2, %v1117_v58  ;;  %v1115_v0 = vpack.c.bf16 %v479_v59, %v479_v59  ;;  %v490_v1 = vadd.f32 %v1217_v63, %v1444_v34  ;;  %952 = vst.msk [vmem:[%s1769_s3 + $0xe8] sm:$0xf] %vm893_vm2, %v1149_v61  ;;  %v1147_v3 = vpack.c.bf16 %v607_v62, %v607_v62 }
  0xfc   :  { %v618_v4 = vadd.f32 %v1249_v2, %v1444_v34  ;;  %v481_v5 = vpop.f32.mrf.mxu0  ;;  %v609_v8 = vpop.f32.mrf.mxu1 }
  0xfd   :  { %918 = vst.msk [vmem:[%s1769_s3 + $0x60] sm:$0xf] %vm893_vm2, %v1115_v0  ;;  %v1118_v6 = vpack.c.bf16 %v490_v1, %v490_v1  ;;  %v482_v7 = vadd.f32 %v1444_v34, %v481_v5  ;;  %950 = vst.msk [vmem:[%s1769_s3 + $0xe0] sm:$0xf] %vm893_vm2, %v1147_v3  ;;  %v610_v10 = vadd.f32 %v1444_v34, %v609_v8 }
  0xfe   :  { %v1150_v9 = vpack.c.bf16 %v618_v4, %v618_v4  ;;  %v1220_v11 = vpop.f32.mrf.mxu0  ;;  %v1252_v14 = vpop.f32.mrf.mxu1 }
  0xff   :  { %921 = vst.msk [vmem:[%s1769_s3 + $0x6c] sm:$0xf] %vm893_vm2, %v1118_v6  ;;  %v1116_v12 = vpack.c.bf16 %v482_v7, %v482_v7  ;;  %v503_v13 = vadd.f32 %v1220_v11, %v1444_v34  ;;  %v1148_v15 = vpack.c.bf16 %v610_v10, %v610_v10  ;;  %v631_v16 = vadd.f32 %v1252_v14, %v1444_v34 }
 0x100   :  { %953 = vst.msk [vmem:[%s1769_s3 + $0xec] sm:$0xf] %vm893_vm2, %v1150_v9  ;;  %v494_v17 = vpop.f32.mrf.mxu0  ;;  %v622_v20 = vpop.f32.mrf.mxu1 }
 0x101   :  { %919 = vst.msk [vmem:[%s1769_s3 + $0x64] sm:$0xf] %vm893_vm2, %v1116_v12  ;;  %v1121_v18 = vpack.c.bf16 %v503_v13, %v503_v13  ;;  %v495_v19 = vadd.f32 %v1444_v34, %v494_v17  ;;  %951 = vst.msk [vmem:[%s1769_s3 + $0xe4] sm:$0xf] %vm893_vm2, %v1148_v15  ;;  %v1153_v21 = vpack.c.bf16 %v631_v16, %v631_v16 }
 0x102   :  { %v623_v22 = vadd.f32 %v1444_v34, %v622_v20  ;;  %v1221_v23 = vpop.f32.mrf.mxu0  ;;  %v1253_v26 = vpop.f32.mrf.mxu1 }
 0x103   :  { %924 = vst.msk [vmem:[%s1769_s3 + $0x78] sm:$0xf] %vm893_vm2, %v1121_v18  ;;  %v1119_v24 = vpack.c.bf16 %v495_v19, %v495_v19  ;;  %v506_v25 = vadd.f32 %v1221_v23, %v1444_v34  ;;  %956 = vst.msk [vmem:[%s1769_s3 + $0xf8] sm:$0xf] %vm893_vm2, %v1153_v21  ;;  %v634_v28 = vadd.f32 %v1253_v26, %v1444_v34 }
 0x104   :  { %v1151_v27 = vpack.c.bf16 %v623_v22, %v623_v22  ;;  %v497_v29 = vpop.f32.mrf.mxu0  ;;  %v625_v32 = vpop.f32.mrf.mxu1 }
 0x105   :  { %922 = vst.msk [vmem:[%s1769_s3 + $0x70] sm:$0xf] %vm893_vm2, %v1119_v24  ;;  %v1122_v30 = vpack.c.bf16 %v506_v25, %v506_v25  ;;  %v498_v31 = vadd.f32 %v1444_v34, %v497_v29  ;;  %v1154_v33 = vpack.c.bf16 %v634_v28, %v634_v28  ;;  %v626_v35 = vadd.f32 %v1444_v34, %v625_v32 }
 0x106   :  { %954 = vst.msk [vmem:[%s1769_s3 + $0xf0] sm:$0xf] %vm893_vm2, %v1151_v27 }
 0x107   :  { %925 = vst.msk [vmem:[%s1769_s3 + $0x7c] sm:$0xf] %vm893_vm2, %v1122_v30  ;;  %v1120_v36 = vpack.c.bf16 %v498_v31, %v498_v31  ;;  %957 = vst.msk [vmem:[%s1769_s3 + $0xfc] sm:$0xf] %vm893_vm2, %v1154_v33  ;;  %v1152_v37 = vpack.c.bf16 %v626_v35, %v626_v35 }
 0x109   :  { %923 = vst.msk [vmem:[%s1769_s3 + $0x74] sm:$0xf] %vm893_vm2, %v1120_v36  ;;  %955 = vst.msk [vmem:[%s1769_s3 + $0xf4] sm:$0xf] %vm893_vm2, %v1152_v37 }

// kernel: _lambda_.61
= control target key start
LH: loop header
LB: loop body
LE: loop exit
PB: predicated region body
PF: predicated region fallthrough
CT: control target
= control target key end

     0   :  { %vm347_vm0 = vcmask 1043456   ;;  %vm250_vm1 = vcmask 64512   ;;  %vm1152_vm2 = vcmask 257024   ;;  %s2541_s1 = inlined_call_operand.vmem [shape: bf16[1,8,32], index: 1, kind: input, shape index: {}]   ;;  %s2542_s0 = inlined_call_operand.vmem [shape: bf16[1,512,8], index: 0, kind: input, shape index: {}]   ;;  %s2543_s3 = inlined_call_operand.vmem [shape: bf16[1,512,32], index: 3, kind: input, shape index: {}]   ;;  %s2544_s2 = inlined_call_operand.vmem [shape: f32[1,1,32], index: 2, kind: input, shape index: {}]   ;;  %s2545_s4 = inlined_call_operand.vmem [shape: bf16[1,512,32], index: 4, kind: output, shape index: {}]  }
   0x1   :  { %v82_v0 = vld [vmem:[%s2541_s1] sm:$0xf]  ;;  %v1678_v4 = vld [vmem:[%s2542_s0 + $0x8] sm:$0xff]   ;;  %v1680_v6 = vld [vmem:[%s2542_s0 + $0x10] sm:$0xff]  }
   0x2   :  { %1674 = vmatprep.subr.msk.bf16.mxu0 %vm347_vm0, %v82_v0  ;;  %1675 = vmatprep.subr.msk.bf16.mxu1 %vm347_vm0, %v82_v0  ;;  %v349_v1 = vsel %vm347_vm0, %v82_v0, 0  ;;  %v1676_v2 = vld [vmem:[%s2542_s0] sm:$0xff]   ;;  %v1679_v5 = vld [vmem:[%s2542_s0 + $0x88] sm:$0xff]   ;;  %v1681_v7 = vld [vmem:[%s2542_s0 + $0x90] sm:$0xff]  }
   0x3   :  { %1607 = vmatpush3.bf16.msra.mxu0 %v349_v1  ;;  %1673 = vmatpush3.bf16.msra.mxu1 %v349_v1  ;;  %v1677_v3 = vld [vmem:[%s2542_s0 + $0x80] sm:$0xff]   ;;  %v1682_v8 = vld [vmem:[%s2542_s0 + $0x18] sm:$0xff]   ;;  %v1686_v12 = vld [vmem:[%s2542_s0 + $0x28] sm:$0xff]  }
   0x4   :  { %1608 = vmatprep.mubr.msk.bf16.mxu0 %vm250_vm1, %v1676_v2  ;;  %1640 = vmatprep.mubr.msk.bf16.mxu1 %vm250_vm1, %v1677_v3  ;;  %v1683_v9 = vld [vmem:[%s2542_s0 + $0x98] sm:$0xff]   ;;  %v1684_v10 = vld [vmem:[%s2542_s0 + $0x20] sm:$0xff]   ;;  %v1687_v13 = vld [vmem:[%s2542_s0 + $0xa8] sm:$0xff]  }
   0x5   :  { %v1685_v11 = vld [vmem:[%s2542_s0 + $0xa0] sm:$0xff]   ;;  %v1688_v14 = vld [vmem:[%s2542_s0 + $0x30] sm:$0xff]   ;;  %v1690_v16 = vld [vmem:[%s2542_s0 + $0x38] sm:$0xff]  }
   0x6   :  { %1609 = vmatmul.mubr.msk.bf16.vlgmr.msra.gmra.mxu0 %vm250_vm1, %v1678_v4  ;;  %1641 = vmatmul.mubr.msk.bf16.vlgmr.msra.gmra.mxu1 %vm250_vm1, %v1679_v5  ;;  %v1689_v15 = vld [vmem:[%s2542_s0 + $0xb0] sm:$0xff]   ;;  %v1691_v17 = vld [vmem:[%s2542_s0 + $0xb8] sm:$0xff]   ;;  %v1692_v18 = vld [vmem:[%s2542_s0 + $0x40] sm:$0xff]  }
   0x7   :  { %1612 = vmatprep.mubr.msk.bf16.mxu0 %vm250_vm1, %v1680_v6  ;;  %1644 = vmatprep.mubr.msk.bf16.mxu1 %vm250_vm1, %v1681_v7  ;;  %v1693_v19 = vld [vmem:[%s2542_s0 + $0xc0] sm:$0xff]   ;;  %v1694_v20 = vld [vmem:[%s2542_s0 + $0x48] sm:$0xff]   ;;  %v1696_v22 = vld [vmem:[%s2542_s0 + $0x50] sm:$0xff]  }
   0x8   :  { %v1695_v21 = vld [vmem:[%s2542_s0 + $0xc8] sm:$0xff]   ;;  %v1697_v23 = vld [vmem:[%s2542_s0 + $0xd0] sm:$0xff]   ;;  %v1698_v24 = vld [vmem:[%s2542_s0 + $0x58] sm:$0xff]  }
   0x9   :  { %v1699_v25 = vld [vmem:[%s2542_s0 + $0xd8] sm:$0xff]   ;;  %v1700_v26 = vld [vmem:[%s2542_s0 + $0x60] sm:$0xff]   ;;  %v1702_v28 = vld [vmem:[%s2542_s0 + $0x68] sm:$0xff]  }
   0xa   :  { %v1701_v27 = vld [vmem:[%s2542_s0 + $0xe0] sm:$0xff]   ;;  %v1703_v29 = vld [vmem:[%s2542_s0 + $0xe8] sm:$0xff]   ;;  %v1704_v30 = vld [vmem:[%s2542_s0 + $0x70] sm:$0xff]  }
   0xb   :  { %v1705_v31 = vld [vmem:[%s2542_s0 + $0xf0] sm:$0xff]   ;;  %v1706_v32 = vld [vmem:[%s2542_s0 + $0x78] sm:$0xff]   ;;  %v1867_v34 = vld [vmem:[%s2543_s3 + $0x8] sm:$0xff]  }
   0xc   :  { %v1707_v33 = vld [vmem:[%s2542_s0 + $0xf8] sm:$0xff]   ;;  %v1872_v35 = vld [vmem:[%s2543_s3 + $0x88] sm:$0xff]   ;;  %v1877_v36 = vld [vmem:[%s2543_s3] sm:$0xff]   ;;  %v1420_v42 = vunpack.c.l.bf16 %v1867_v34  ;;  %v1421_v47 = vunpack.c.h.bf16 %v1867_v34 }
   0xd   :  { %v1882_v37 = vld [vmem:[%s2543_s3 + $0x80] sm:$0xff]   ;;  %v1887_v38 = vld [vmem:[%s2543_s3 + $0x18] sm:$0xff]   ;;  %v1897_v40 = vld [vmem:[%s2543_s3 + $0x10] sm:$0xff]   ;;  %v1484_v43 = vunpack.c.l.bf16 %v1872_v35  ;;  %v1416_v44 = vunpack.c.l.bf16 %v1877_v36  ;;  %v1485_v48 = vunpack.c.h.bf16 %v1872_v35  ;;  %v1417_v49 = vunpack.c.h.bf16 %v1877_v36 }
   0xe   :  { %1613 = vmatmul.mubr.msk.bf16.gmra.mxu0 %vm250_vm1, %v1682_v8  ;;  %1645 = vmatmul.mubr.msk.bf16.gmra.mxu1 %vm250_vm1, %v1683_v9  ;;  %v1892_v39 = vld [vmem:[%s2543_s3 + $0x98] sm:$0xff]   ;;  %v1902_v41 = vld [vmem:[%s2543_s3 + $0x90] sm:$0xff]   ;;  %v1480_v45 = vunpack.c.l.bf16 %v1882_v37  ;;  %v1911_v46 = vld [vmem:[%s2543_s3 + $0x28] sm:$0xff]   ;;  %v1481_v50 = vunpack.c.h.bf16 %v1882_v37  ;;  %v1428_v54 = vunpack.c.l.bf16 %v1887_v38  ;;  %v1424_v56 = vunpack.c.l.bf16 %v1897_v40 }
   0xf   :  { %1616 = vmatprep.mubr.msk.bf16.mxu0 %vm250_vm1, %v1684_v10  ;;  %1648 = vmatprep.mubr.msk.bf16.mxu1 %vm250_vm1, %v1685_v11  ;;  %v1920_v51 = vld [vmem:[%s2543_s3 + $0xa8] sm:$0xff]   ;;  %v1925_v52 = vld [vmem:[%s2543_s3 + $0x20] sm:$0xff]   ;;  %v1492_v55 = vunpack.c.l.bf16 %v1892_v39  ;;  %v1488_v57 = vunpack.c.l.bf16 %v1902_v41  ;;  %v1939_v58 = vld [vmem:[%s2543_s3 + $0x38] sm:$0xff]   ;;  %v1429_v59 = vunpack.c.h.bf16 %v1887_v38  ;;  %v1493_v60 = vunpack.c.h.bf16 %v1892_v39 }
  0x10   :  { %v1930_v53 = vld [vmem:[%s2543_s3 + $0xa0] sm:$0xff]   ;;  %v1425_v61 = vunpack.c.h.bf16 %v1897_v40  ;;  %v1948_v63 = vld [vmem:[%s2543_s3 + $0xb8] sm:$0xff]   ;;  %v1953_v0 = vld [vmem:[%s2543_s3 + $0x30] sm:$0xff]  }
  0x11   :  { %v1958_v1 = vld [vmem:[%s2543_s3 + $0xb0] sm:$0xff]   ;;  %v1967_v6 = vld [vmem:[%s2543_s3 + $0x48] sm:$0xff]  }
  0x12   :  { %v1976_v11 = vld [vmem:[%s2543_s3 + $0xc8] sm:$0xff]  }
  0x16   :  { %1617 = vmatmul.mubr.msk.bf16.gmra.mxu0 %vm250_vm1, %v1686_v12  ;;  %1649 = vmatmul.mubr.msk.bf16.gmra.mxu1 %vm250_vm1, %v1687_v13  ;;  %v1981_v12 = vld [vmem:[%s2543_s3 + $0x40] sm:$0xff]  }
  0x17   :  { %1620 = vmatprep.mubr.msk.bf16.mxu0 %vm250_vm1, %v1688_v14  ;;  %1652 = vmatprep.mubr.msk.bf16.mxu1 %vm250_vm1, %v1689_v15  ;;  %v1986_v13 = vld [vmem:[%s2543_s3 + $0xc0] sm:$0xff]  }
  0x1e   :  { %1621 = vmatmul.mubr.msk.bf16.gmra.mxu0 %vm250_vm1, %v1690_v16  ;;  %1653 = vmatmul.mubr.msk.bf16.gmra.mxu1 %vm250_vm1, %v1691_v17  ;;  %v2060_v16 = vld [vmem:[%s2543_s3 + $0x78] sm:$0xff]   ;;  %v2074_v17 = vld [vmem:[%s2543_s3 + $0x70] sm:$0xff]  }
  0x1f   :  { %1624 = vmatprep.mubr.msk.bf16.mxu0 %vm250_vm1, %v1692_v18  ;;  %1656 = vmatprep.mubr.msk.bf16.mxu1 %vm250_vm1, %v1693_v19  ;;  %v1995_v18 = vld [vmem:[%s2543_s3 + $0x58] sm:$0xff]  }
  0x26   :  { %1625 = vmatmul.mubr.msk.bf16.gmra.mxu0 %vm250_vm1, %v1694_v20  ;;  %1657 = vmatmul.mubr.msk.bf16.gmra.mxu1 %vm250_vm1, %v1695_v21 }
  0x27   :  { %1628 = vmatprep.mubr.msk.bf16.mxu0 %vm250_vm1, %v1696_v22  ;;  %1660 = vmatprep.mubr.msk.bf16.mxu1 %vm250_vm1, %v1697_v23  ;;  %v2004_v23 = vld [vmem:[%s2543_s3 + $0xd8] sm:$0xff]   ;;  %v2079_v22 = vld [vmem:[%s2543_s3 + $0xf0] sm:$0xff]  }
  0x28   :  { %v1537_v8 = vunpack.c.h.bf16 %v2079_v22 }
  0x2e   :  { %1629 = vmatmul.mubr.msk.bf16.gmra.mxu0 %vm250_vm1, %v1698_v24  ;;  %1661 = vmatmul.mubr.msk.bf16.gmra.mxu1 %vm250_vm1, %v1699_v25  ;;  %v2009_v24 = vld [vmem:[%s2543_s3 + $0x50] sm:$0xff]  }
  0x2f   :  { %1632 = vmatprep.mubr.msk.bf16.mxu0 %vm250_vm1, %v1700_v26  ;;  %1664 = vmatprep.mubr.msk.bf16.mxu1 %vm250_vm1, %v1701_v27  ;;  %v2014_v25 = vld [vmem:[%s2543_s3 + $0xd0] sm:$0xff]   ;;  %v2032_v27 = vld [vmem:[%s2543_s3 + $0xe8] sm:$0xff]   ;;  %v1473_v26 = vunpack.c.h.bf16 %v2074_v17 }
  0x36   :  { %1633 = vmatmul.mubr.msk.bf16.gmra.mxu0 %vm250_vm1, %v1702_v28  ;;  %1665 = vmatmul.mubr.msk.bf16.gmra.mxu1 %vm250_vm1, %v1703_v29  ;;  %v2037_v29 = vld [vmem:[%s2543_s3 + $0x60] sm:$0xff]  }
  0x37   :  { %1636 = vmatprep.mubr.msk.bf16.mxu0 %vm250_vm1, %v1704_v30  ;;  %1668 = vmatprep.mubr.msk.bf16.mxu1 %vm250_vm1, %v1705_v31  ;;  %v2023_v30 = vld [vmem:[%s2543_s3 + $0x68] sm:$0xff]   ;;  %v2042_v31 = vld [vmem:[%s2543_s3 + $0xe0] sm:$0xff]  }
  0x3e   :  { %1637 = vmatmul.mubr.msk.bf16.gmra.mxu0 %vm250_vm1, %v1706_v32  ;;  %1669 = vmatmul.mubr.msk.bf16.gmra.mxu1 %vm250_vm1, %v1707_v33  ;;  %v2047_v33 = vld [vmem:[%s2544_s2] ss:$0 sm:$0xff]  ;;  %v2065_v32 = vld [vmem:[%s2543_s3 + $0xf8] sm:$0xff]  }
  0xc6   :  { %v1610_v28 = vpop.f32.mrf.mxu0  ;;  %v1642_v14 = vpop.f32.mrf.mxu1 }
  0xc7   :  { %v394_v15 = vadd.f32 %v1610_v28, %v2047_v33  ;;  %v522_v19 = vadd.f32 %v1642_v14, %v2047_v33 }
  0xc8   :  { %v385_v10 = vpop.f32.mrf.mxu0  ;;  %v513_v4 = vpop.f32.mrf.mxu1 }
  0xc9   :  { %v770_v5 = vadd.f32 %v1420_v42, %v394_v15  ;;  %v386_v28 = vadd.f32 %v2047_v33, %v385_v10  ;;  %v802_v14 = vadd.f32 %v1484_v43, %v522_v19  ;;  %v514_v20 = vadd.f32 %v2047_v33, %v513_v4 }
  0xca   :  { %v1611_v9 = vpop.f32.mrf.mxu0  ;;  %v1643_v15 = vpop.f32.mrf.mxu1 }
  0xcb   :  { %v834_v3 = vmax.f32 %v770_v5, 0.0  ;;  %v768_v42 = vadd.f32 %v1416_v44, %v386_v28  ;;  %v397_v10 = vadd.f32 %v1611_v9, %v2047_v33  ;;  %v866_v21 = vmax.f32 %v802_v14, 0.0 }
  0xcc   :  { %v800_v43 = vadd.f32 %v1480_v45, %v514_v20  ;;  %v525_v4 = vadd.f32 %v1643_v15, %v2047_v33  ;;  %v388_v19 = vpop.f32.mrf.mxu0  ;;  %v516_v9 = vpop.f32.mrf.mxu1 }
  0xcd   :  { %v1352_v2 = vpack.c.bf16 %v834_v3, %v834_v3  ;;  %v832_v7 = vmax.f32 %v768_v42, 0.0  ;;  %v771_v5 = vadd.f32 %v1421_v47, %v397_v10  ;;  %v389_v44 = vadd.f32 %v2047_v33, %v388_v19 }
  0xce   :  { %v1384_v28 = vpack.c.bf16 %v866_v21, %v866_v21  ;;  %v864_v62 = vmax.f32 %v800_v43, 0.0  ;;  %v803_v14 = vadd.f32 %v1485_v48, %v525_v4  ;;  %v517_v45 = vadd.f32 %v2047_v33, %v516_v9  ;;  %v1614_v20 = vpop.f32.mrf.mxu0  ;;  %v1646_v21 = vpop.f32.mrf.mxu1 }
  0xcf   :  { %1155 = vst.msk [vmem:[%s2545_s4 + $0x8] sm:$0xf] %vm1152_vm2, %v1352_v2  ;;  %v1350_v3 = vpack.c.bf16 %v832_v7, %v832_v7  ;;  %v835_v42 = vmax.f32 %v771_v5, 0.0  ;;  %v769_v34 = vadd.f32 %v1417_v49, %v389_v44  ;;  %v410_v47 = vadd.f32 %v1614_v20, %v2047_v33 }
  0xd0   :  { %1187 = vst.msk [vmem:[%s2545_s4 + $0x88] sm:$0xf] %vm1152_vm2, %v1384_v28  ;;  %v1382_v35 = vpack.c.bf16 %v864_v62, %v864_v62  ;;  %v867_v48 = vmax.f32 %v803_v14, 0.0  ;;  %v801_v10 = vadd.f32 %v1481_v50, %v517_v45  ;;  %v538_v2 = vadd.f32 %v1646_v21, %v2047_v33  ;;  %v401_v7 = vpop.f32.mrf.mxu0  ;;  %v529_v62 = vpop.f32.mrf.mxu1 }
  0xd1   :  { %1153 = vst.msk [vmem:[%s2545_s4] sm:$0xf] %vm1152_vm2, %v1350_v3  ;;  %v1353_v36 = vpack.c.bf16 %v835_v42, %v835_v42  ;;  %v833_v49 = vmax.f32 %v769_v34, 0.0  ;;  %v774_v15 = vadd.f32 %v1428_v54, %v410_v47  ;;  %v402_v43 = vadd.f32 %v2047_v33, %v401_v7 }
  0xd2   :  { %1185 = vst.msk [vmem:[%s2545_s4 + $0x80] sm:$0xf] %vm1152_vm2, %v1382_v35  ;;  %v1385_v37 = vpack.c.bf16 %v867_v48, %v867_v48  ;;  %v865_v50 = vmax.f32 %v801_v10, 0.0  ;;  %v806_v4 = vadd.f32 %v1492_v55, %v538_v2  ;;  %v530_v19 = vadd.f32 %v2047_v33, %v529_v62  ;;  %v1615_v5 = vpop.f32.mrf.mxu0  ;;  %v1647_v14 = vpop.f32.mrf.mxu1 }
  0xd3   :  { %1156 = vst.msk [vmem:[%s2545_s4 + $0xc] sm:$0xf] %vm1152_vm2, %v1353_v36  ;;  %v1351_v54 = vpack.c.bf16 %v833_v49, %v833_v49  ;;  %v838_v44 = vmax.f32 %v774_v15, 0.0  ;;  %v772_v9 = vadd.f32 %v1424_v56, %v402_v43  ;;  %v413_v28 = vadd.f32 %v1615_v5, %v2047_v33 }
  0xd4   :  { %1188 = vst.msk [vmem:[%s2545_s4 + $0x8c] sm:$0xf] %vm1152_vm2, %v1385_v37  ;;  %v1383_v55 = vpack.c.bf16 %v865_v50, %v865_v50  ;;  %v870_v45 = vmax.f32 %v806_v4, 0.0  ;;  %v804_v20 = vadd.f32 %v1488_v57, %v530_v19  ;;  %v541_v3 = vadd.f32 %v1647_v14, %v2047_v33  ;;  %v404_v42 = vpop.f32.mrf.mxu0  ;;  %v532_v35 = vpop.f32.mrf.mxu1 }
  0xd5   :  { %1154 = vst.msk [vmem:[%s2545_s4 + $0x4] sm:$0xf] %vm1152_vm2, %v1351_v54  ;;  %v1356_v56 = vpack.c.bf16 %v838_v44, %v838_v44  ;;  %v836_v34 = vmax.f32 %v772_v9, 0.0  ;;  %v775_v47 = vadd.f32 %v1429_v59, %v413_v28  ;;  %v405_v21 = vadd.f32 %v2047_v33, %v404_v42 }
  0xd6   :  { %1186 = vst.msk [vmem:[%s2545_s4 + $0x84] sm:$0xf] %vm1152_vm2, %v1383_v55  ;;  %v1388_v57 = vpack.c.bf16 %v870_v45, %v870_v45  ;;  %v868_v48 = vmax.f32 %v804_v20, 0.0  ;;  %v807_v10 = vadd.f32 %v1493_v60, %v541_v3  ;;  %v533_v2 = vadd.f32 %v2047_v33, %v532_v35  ;;  %v1618_v7 = vpop.f32.mrf.mxu0  ;;  %v1650_v15 = vpop.f32.mrf.mxu1 }
  0xd7   :  { %1159 = vst.msk [vmem:[%s2545_s4 + $0x18] sm:$0xf] %vm1152_vm2, %v1356_v56  ;;  %v1354_v38 = vpack.c.bf16 %v836_v34, %v836_v34  ;;  %v839_v59 = vmax.f32 %v775_v47, 0.0  ;;  %v773_v36 = vadd.f32 %v1425_v61, %v405_v21  ;;  %v426_v49 = vadd.f32 %v1618_v7, %v2047_v33 }
  0xd8   :  { %1191 = vst.msk [vmem:[%s2545_s4 + $0x98] sm:$0xf] %vm1152_vm2, %v1388_v57  ;;  %v1386_v39 = vpack.c.bf16 %v868_v48, %v868_v48  ;;  %v871_v60 = vmax.f32 %v807_v10, 0.0  ;;  %v2546_v43 = vunpack.c.h.bf16 %v1902_v41  ;;  %v554_v37 = vadd.f32 %v1650_v15, %v2047_v33  ;;  %v417_v50 = vpop.f32.mrf.mxu0  ;;  %v545_v54 = vpop.f32.mrf.mxu1 }
  0xd9   :  { %1157 = vst.msk [vmem:[%s2545_s4 + $0x10] sm:$0xf] %vm1152_vm2, %v1354_v38  ;;  %v1357_v40 = vpack.c.bf16 %v839_v59, %v839_v59  ;;  %v837_v61 = vmax.f32 %v773_v36, 0.0  ;;  %v2547_v4 = vunpack.c.l.bf16 %v1911_v46  ;;  %v418_v5 = vadd.f32 %v2047_v33, %v417_v50 }
  0xda   :  { %v805_v62 = vadd.f32 %v2546_v43, %v533_v2  ;;  %1189 = vst.msk [vmem:[%s2545_s4 + $0x90] sm:$0xf] %vm1152_vm2, %v1386_v39  ;;  %v1389_v41 = vpack.c.bf16 %v871_v60, %v871_v60  ;;  %v2548_v9 = vunpack.c.l.bf16 %v1920_v51  ;;  %v546_v14 = vadd.f32 %v2047_v33, %v545_v54  ;;  %v1619_v55 = vpop.f32.mrf.mxu0  ;;  %v1651_v34 = vpop.f32.mrf.mxu1 }
  0xdb   :  { %v778_v19 = vadd.f32 %v2547_v4, %v426_v49  ;;  %1160 = vst.msk [vmem:[%s2545_s4 + $0x1c] sm:$0xf] %vm1152_vm2, %v1357_v40  ;;  %v1355_v45 = vpack.c.bf16 %v837_v61, %v837_v61  ;;  %v2549_v3 = vunpack.c.l.bf16 %v1925_v52  ;;  %v429_v56 = vadd.f32 %v1619_v55, %v2047_v33 }
  0xdc   :  { %v869_v44 = vmax.f32 %v805_v62, 0.0  ;;  %v810_v28 = vadd.f32 %v2548_v9, %v554_v37  ;;  %1192 = vst.msk [vmem:[%s2545_s4 + $0x9c] sm:$0xf] %vm1152_vm2, %v1389_v41  ;;  %v2550_v35 = vunpack.c.l.bf16 %v1930_v53  ;;  %v557_v48 = vadd.f32 %v1651_v34, %v2047_v33  ;;  %v420_v10 = vpop.f32.mrf.mxu0  ;;  %v548_v49 = vpop.f32.mrf.mxu1 }
  0xdd   :  { %v842_v20 = vmax.f32 %v778_v19, 0.0  ;;  %v776_v42 = vadd.f32 %v2549_v3, %v418_v5  ;;  %1158 = vst.msk [vmem:[%s2545_s4 + $0x14] sm:$0xf] %vm1152_vm2, %v1355_v45  ;;  %v2551_v38 = vunpack.c.h.bf16 %v1911_v46  ;;  %v421_v36 = vadd.f32 %v2047_v33, %v420_v10 }
  0xde   :  { %v1387_v47 = vpack.c.bf16 %v869_v44, %v869_v44  ;;  %v874_v21 = vmax.f32 %v810_v28, 0.0  ;;  %v808_v57 = vadd.f32 %v2550_v35, %v546_v14  ;;  %v2552_v60 = vunpack.c.h.bf16 %v1920_v51  ;;  %v1622_v37 = vpop.f32.mrf.mxu0  ;;  %v1654_v19 = vpop.f32.mrf.mxu1 }
  0xdf   :  { %v1360_v2 = vpack.c.bf16 %v842_v20, %v842_v20  ;;  %v840_v7 = vmax.f32 %v776_v42, 0.0  ;;  %v779_v59 = vadd.f32 %v2551_v38, %v429_v56  ;;  %v549_v62 = vadd.f32 %v2047_v33, %v548_v49 }
  0xe0   :  { %1190 = vst.msk [vmem:[%s2545_s4 + $0x94] sm:$0xf] %vm1152_vm2, %v1387_v47  ;;  %v1392_v15 = vpack.c.bf16 %v874_v21, %v874_v21  ;;  %v872_v39 = vmax.f32 %v808_v57, 0.0  ;;  %v811_v43 = vadd.f32 %v2552_v60, %v557_v48  ;;  %v2553_v40 = vunpack.c.h.bf16 %v1925_v52  ;;  %v433_v9 = vpop.f32.mrf.mxu0  ;;  %v561_v20 = vpop.f32.mrf.mxu1 }
  0xe1   :  { %1163 = vst.msk [vmem:[%s2545_s4 + $0x28] sm:$0xf] %vm1152_vm2, %v1360_v2  ;;  %v1358_v46 = vpack.c.bf16 %v840_v7, %v840_v7  ;;  %v843_v50 = vmax.f32 %v779_v59, 0.0  ;;  %v442_v4 = vadd.f32 %v1622_v37, %v2047_v33  ;;  %v2554_v54 = vunpack.c.h.bf16 %v1930_v53 }
  0xe2   :  { %v777_v61 = vadd.f32 %v2553_v40, %v421_v36  ;;  %1195 = vst.msk [vmem:[%s2545_s4 + $0xa8] sm:$0xf] %vm1152_vm2, %v1392_v15  ;;  %v1390_v51 = vpack.c.bf16 %v872_v39, %v872_v39  ;;  %v875_v5 = vmax.f32 %v811_v43, 0.0  ;;  %v570_v44 = vadd.f32 %v1654_v19, %v2047_v33  ;;  %v1623_v47 = vpop.f32.mrf.mxu0  ;;  %v1655_v2 = vpop.f32.mrf.mxu1 }
  0xe3   :  { %v809_v41 = vadd.f32 %v2554_v54, %v549_v62  ;;  %1161 = vst.msk [vmem:[%s2545_s4 + $0x20] sm:$0xf] %vm1152_vm2, %v1358_v46  ;;  %v1361_v52 = vpack.c.bf16 %v843_v50, %v843_v50  ;;  %v2555_v14 = vunpack.c.l.bf16 %v1939_v58  ;;  %v434_v45 = vadd.f32 %v2047_v33, %v433_v9 }
  0xe4   :  { %v841_v28 = vmax.f32 %v777_v61, 0.0  ;;  %1193 = vst.msk [vmem:[%s2545_s4 + $0xa0] sm:$0xf] %vm1152_vm2, %v1390_v51  ;;  %v1393_v53 = vpack.c.bf16 %v875_v5, %v875_v5  ;;  %v2556_v42 = vunpack.c.l.bf16 %v1948_v63  ;;  %v562_v34 = vadd.f32 %v2047_v33, %v561_v20  ;;  %v436_v15 = vpop.f32.mrf.mxu0  ;;  %v564_v46 = vpop.f32.mrf.mxu1 }
  0xe5   :  { %v782_v55 = vadd.f32 %v2555_v14, %v442_v4  ;;  %v873_v3 = vmax.f32 %v809_v41, 0.0  ;;  %1164 = vst.msk [vmem:[%s2545_s4 + $0x2c] sm:$0xf] %vm1152_vm2, %v1361_v52  ;;  %v2557_v57 = vunpack.c.l.bf16 %v1953_v0  ;;  %v445_v10 = vadd.f32 %v1623_v47, %v2047_v33 }
  0xe6   :  { %v814_v56 = vadd.f32 %v2556_v42, %v570_v44  ;;  %v1359_v21 = vpack.c.bf16 %v841_v28, %v841_v28  ;;  %1196 = vst.msk [vmem:[%s2545_s4 + $0xac] sm:$0xf] %vm1152_vm2, %v1393_v53  ;;  %v2558_v59 = vunpack.c.l.bf16 %v1958_v1  ;;  %v573_v49 = vadd.f32 %v1655_v2, %v2047_v33  ;;  %v1626_v51 = vpop.f32.mrf.mxu0  ;;  %v1658_v9 = vpop.f32.mrf.mxu1 }
  0xe7   :  { %v846_v35 = vmax.f32 %v782_v55, 0.0  ;;  %v780_v48 = vadd.f32 %v2557_v57, %v434_v45  ;;  %v1391_v7 = vpack.c.bf16 %v873_v3, %v873_v3  ;;  %v2559_v43 = vunpack.c.h.bf16 %v1939_v58 }
  0xe8   :  { %v878_v38 = vmax.f32 %v814_v56, 0.0  ;;  %v812_v36 = vadd.f32 %v2558_v59, %v562_v34  ;;  %1162 = vst.msk [vmem:[%s2545_s4 + $0x24] sm:$0xf] %vm1152_vm2, %v1359_v21  ;;  %v437_v37 = vadd.f32 %v2047_v33, %v436_v15  ;;  %v2560_v61 = vunpack.c.h.bf16 %v1948_v63  ;;  %v449_v45 = vpop.f32.mrf.mxu0  ;;  %v577_v56 = vpop.f32.mrf.mxu1 }
  0xe9   :  { %v1364_v39 = vpack.c.bf16 %v846_v35, %v846_v35  ;;  %v844_v60 = vmax.f32 %v780_v48, 0.0  ;;  %v783_v62 = vadd.f32 %v2559_v43, %v445_v10  ;;  %1194 = vst.msk [vmem:[%s2545_s4 + $0xa4] sm:$0xf] %vm1152_vm2, %v1391_v7  ;;  %v565_v19 = vadd.f32 %v2047_v33, %v564_v46 }
  0xea   :  { %v1396_v50 = vpack.c.bf16 %v878_v38, %v878_v38  ;;  %v876_v40 = vmax.f32 %v812_v36, 0.0  ;;  %v815_v4 = vadd.f32 %v2560_v61, %v573_v49  ;;  %v2561_v54 = vunpack.c.h.bf16 %v1953_v0  ;;  %v1627_v57 = vpop.f32.mrf.mxu0  ;;  %v1659_v59 = vpop.f32.mrf.mxu1 }
  0xeb   :  { %1167 = vst.msk [vmem:[%s2545_s4 + $0x38] sm:$0xf] %vm1152_vm2, %v1364_v39  ;;  %v1362_v58 = vpack.c.bf16 %v844_v60, %v844_v60  ;;  %v847_v5 = vmax.f32 %v783_v62, 0.0  ;;  %v458_v44 = vadd.f32 %v1626_v51, %v2047_v33  ;;  %v2562_v28 = vunpack.c.h.bf16 %v1958_v1 }
  0xec   :  { %v781_v41 = vadd.f32 %v2561_v54, %v437_v37  ;;  %1199 = vst.msk [vmem:[%s2545_s4 + $0xb8] sm:$0xf] %vm1152_vm2, %v1396_v50  ;;  %v1394_v63 = vpack.c.bf16 %v876_v40, %v876_v40  ;;  %v879_v52 = vmax.f32 %v815_v4, 0.0  ;;  %v586_v55 = vadd.f32 %v1658_v9, %v2047_v33  ;;  %v452_v43 = vpop.f32.mrf.mxu0  ;;  %v580_v61 = vpop.f32.mrf.mxu1 }
  0xed   :  { %v813_v14 = vadd.f32 %v2562_v28, %v565_v19  ;;  %1165 = vst.msk [vmem:[%s2545_s4 + $0x30] sm:$0xf] %vm1152_vm2, %v1362_v58  ;;  %v1365_v0 = vpack.c.bf16 %v847_v5, %v847_v5  ;;  %v2563_v53 = vunpack.c.l.bf16 %v1967_v6  ;;  %v450_v42 = vadd.f32 %v2047_v33, %v449_v45 }
  0xee   :  { %v845_v20 = vmax.f32 %v781_v41, 0.0  ;;  %1197 = vst.msk [vmem:[%s2545_s4 + $0xb0] sm:$0xf] %vm1152_vm2, %v1394_v63  ;;  %v1397_v1 = vpack.c.bf16 %v879_v52, %v879_v52  ;;  %v2564_v47 = vunpack.c.l.bf16 %v1976_v11  ;;  %v578_v35 = vadd.f32 %v2047_v33, %v577_v56  ;;  %v1630_v54 = vpop.f32.mrf.mxu0  ;;  %v1662_v52 = vpop.f32.mrf.mxu1 }
  0xef   :  { %v786_v3 = vadd.f32 %v2563_v53, %v458_v44  ;;  %v877_v34 = vmax.f32 %v813_v14, 0.0  ;;  %1168 = vst.msk [vmem:[%s2545_s4 + $0x3c] sm:$0xf] %vm1152_vm2, %v1365_v0  ;;  %v2565_v2 = vunpack.c.l.bf16 %v1981_v12  ;;  %v461_v38 = vadd.f32 %v1627_v57, %v2047_v33 }
  0xf0   :  { %v818_v21 = vadd.f32 %v2564_v47, %v586_v55  ;;  %v1363_v48 = vpack.c.bf16 %v845_v20, %v845_v20  ;;  %1200 = vst.msk [vmem:[%s2545_s4 + $0xbc] sm:$0xf] %vm1152_vm2, %v1397_v1  ;;  %v2566_v15 = vunpack.c.l.bf16 %v1986_v13  ;;  %v589_v60 = vadd.f32 %v1659_v59, %v2047_v33  ;;  %v465_v0 = vpop.f32.mrf.mxu0  ;;  %v593_v56 = vpop.f32.mrf.mxu1 }
  0xf1   :  { %v850_v10 = vmax.f32 %v786_v3, 0.0  ;;  %v784_v7 = vadd.f32 %v2565_v2, %v450_v42  ;;  %v1395_v36 = vpack.c.bf16 %v877_v34, %v877_v34  ;;  %v2567_v46 = vunpack.c.h.bf16 %v1967_v6 }
  0xf2   :  { %v882_v49 = vmax.f32 %v818_v21, 0.0  ;;  %v816_v39 = vadd.f32 %v2566_v15, %v578_v35  ;;  %1166 = vst.msk [vmem:[%s2545_s4 + $0x34] sm:$0xf] %vm1152_vm2, %v1363_v48  ;;  %v453_v40 = vadd.f32 %v2047_v33, %v452_v43  ;;  %v2568_v51 = vunpack.c.h.bf16 %v1976_v11  ;;  %v1631_v35 = vpop.f32.mrf.mxu0 }
  0xf3   :  { %v1368_v62 = vpack.c.bf16 %v850_v10, %v850_v10  ;;  %v848_v37 = vmax.f32 %v784_v7, 0.0  ;;  %v787_v50 = vadd.f32 %v2567_v46, %v461_v38  ;;  %1198 = vst.msk [vmem:[%s2545_s4 + $0xb4] sm:$0xf] %vm1152_vm2, %v1395_v36  ;;  %v581_v5 = vadd.f32 %v2047_v33, %v580_v61  ;;  %v1663_v38 = vpop.f32.mrf.mxu1 }
  0xf4   :  { %v1400_v4 = vpack.c.bf16 %v882_v49, %v882_v49  ;;  %v880_v19 = vmax.f32 %v816_v39, 0.0  ;;  %v819_v58 = vadd.f32 %v2568_v51, %v589_v60  ;;  %v2569_v44 = vunpack.c.h.bf16 %v1981_v12  ;;  %v468_v60 = vpop.f32.mrf.mxu0 }
  0xf5   :  { %1171 = vst.msk [vmem:[%s2545_s4 + $0x48] sm:$0xf] %vm1152_vm2, %v1368_v62  ;;  %v1366_v6 = vpack.c.bf16 %v848_v37, %v848_v37  ;;  %v851_v41 = vmax.f32 %v787_v50, 0.0  ;;  %v474_v63 = vadd.f32 %v1630_v54, %v2047_v33  ;;  %v2570_v14 = vunpack.c.h.bf16 %v1986_v13 }
  0xf6   :  { %v785_v9 = vadd.f32 %v2569_v44, %v453_v40  ;;  %1203 = vst.msk [vmem:[%s2545_s4 + $0xc8] sm:$0xf] %vm1152_vm2, %v1400_v4  ;;  %v1398_v11 = vpack.c.bf16 %v880_v19, %v880_v19  ;;  %v883_v28 = vmax.f32 %v819_v58, 0.0  ;;  %v602_v45 = vadd.f32 %v1662_v52, %v2047_v33  ;;  %v596_v40 = vpop.f32.mrf.mxu1 }
  0xf7   :  { %v817_v55 = vadd.f32 %v2570_v14, %v581_v5  ;;  %1169 = vst.msk [vmem:[%s2545_s4 + $0x40] sm:$0xf] %vm1152_vm2, %v1366_v6  ;;  %v1369_v12 = vpack.c.bf16 %v851_v41, %v851_v41  ;;  %v2571_v53 = vunpack.c.l.bf16 %v1995_v18  ;;  %v466_v42 = vadd.f32 %v2047_v33, %v465_v0  ;;  %v1634_v5 = vpop.f32.mrf.mxu0 }
  0xf8   :  { %v849_v20 = vmax.f32 %v785_v9, 0.0  ;;  %1201 = vst.msk [vmem:[%s2545_s4 + $0xc0] sm:$0xf] %vm1152_vm2, %v1398_v11  ;;  %v1401_v13 = vpack.c.bf16 %v883_v28, %v883_v28  ;;  %v2572_v34 = vunpack.c.l.bf16 %v2004_v23  ;;  %v594_v21 = vadd.f32 %v2047_v33, %v593_v56  ;;  %v1666_v9 = vpop.f32.mrf.mxu1 }
  0xf9   :  { %v790_v3 = vadd.f32 %v2571_v53, %v474_v63  ;;  %v881_v1 = vmax.f32 %v817_v55, 0.0  ;;  %1172 = vst.msk [vmem:[%s2545_s4 + $0x4c] sm:$0xf] %vm1152_vm2, %v1369_v12  ;;  %v2573_v10 = vunpack.c.l.bf16 %v2009_v24  ;;  %v477_v7 = vadd.f32 %v1631_v35, %v2047_v33  ;;  %v481_v14 = vpop.f32.mrf.mxu0 }
  0xfa   :  { %v822_v47 = vadd.f32 %v2572_v34, %v602_v45  ;;  %v1367_v57 = vpack.c.bf16 %v849_v20, %v849_v20  ;;  %1204 = vst.msk [vmem:[%s2545_s4 + $0xcc] sm:$0xf] %vm1152_vm2, %v1401_v13  ;;  %v2574_v49 = vunpack.c.l.bf16 %v2014_v25  ;;  %v605_v39 = vadd.f32 %v1663_v38, %v2047_v33  ;;  %v609_v20 = vpop.f32.mrf.mxu1 }
  0xfb   :  { %v854_v48 = vmax.f32 %v790_v3, 0.0  ;;  %v788_v2 = vadd.f32 %v2573_v10, %v466_v42  ;;  %v1399_v59 = vpack.c.bf16 %v881_v1, %v881_v1  ;;  %v2575_v37 = vunpack.c.h.bf16 %v1995_v18  ;;  %v1635_v13 = vpop.f32.mrf.mxu0 }
  0xfc   :  { %v886_v36 = vmax.f32 %v822_v47, 0.0  ;;  %v820_v15 = vadd.f32 %v2574_v49, %v594_v21  ;;  %1170 = vst.msk [vmem:[%s2545_s4 + $0x44] sm:$0xf] %vm1152_vm2, %v1367_v57  ;;  %v469_v50 = vadd.f32 %v2047_v33, %v468_v60  ;;  %v2576_v19 = vunpack.c.h.bf16 %v2004_v23  ;;  %v1667_v57 = vpop.f32.mrf.mxu1 }
  0xfd   :  { %v1372_v43 = vpack.c.bf16 %v854_v48, %v854_v48  ;;  %v852_v62 = vmax.f32 %v788_v2, 0.0  ;;  %v791_v46 = vadd.f32 %v2575_v37, %v477_v7  ;;  %1202 = vst.msk [vmem:[%s2545_s4 + $0xc4] sm:$0xf] %vm1152_vm2, %v1399_v59  ;;  %v597_v58 = vadd.f32 %v2047_v33, %v596_v40  ;;  %v484_v59 = vpop.f32.mrf.mxu0 }
  0xfe   :  { %v1404_v61 = vpack.c.bf16 %v886_v36, %v886_v36  ;;  %v884_v4 = vmax.f32 %v820_v15, 0.0  ;;  %v823_v51 = vadd.f32 %v2576_v19, %v605_v39  ;;  %v2577_v6 = vunpack.c.h.bf16 %v2009_v24 }
  0xff   :  { %1175 = vst.msk [vmem:[%s2545_s4 + $0x58] sm:$0xf] %vm1152_vm2, %v1372_v43  ;;  %v1370_v18 = vpack.c.bf16 %v852_v62, %v852_v62  ;;  %v855_v54 = vmax.f32 %v791_v46, 0.0  ;;  %v490_v44 = vadd.f32 %v1634_v5, %v2047_v33  ;;  %v2578_v52 = vunpack.c.h.bf16 %v2014_v25  ;;  %v612_v43 = vpop.f32.mrf.mxu1 }
 0x100   :  { %v789_v41 = vadd.f32 %v2577_v6, %v469_v50  ;;  %1207 = vst.msk [vmem:[%s2545_s4 + $0xd8] sm:$0xf] %vm1152_vm2, %v1404_v61  ;;  %v1402_v23 = vpack.c.bf16 %v884_v4, %v884_v4  ;;  %v887_v63 = vmax.f32 %v823_v51, 0.0  ;;  %v618_v28 = vadd.f32 %v1666_v9, %v2047_v33  ;;  %v1638_v61 = vpop.f32.mrf.mxu0 }
 0x101   :  { %v821_v11 = vadd.f32 %v2578_v52, %v597_v58  ;;  %1173 = vst.msk [vmem:[%s2545_s4 + $0x50] sm:$0xf] %vm1152_vm2, %v1370_v18  ;;  %v1373_v24 = vpack.c.bf16 %v855_v54, %v855_v54  ;;  %v2579_v45 = vunpack.c.l.bf16 %v2023_v30  ;;  %v482_v12 = vadd.f32 %v2047_v33, %v481_v14  ;;  %v1670_v5 = vpop.f32.mrf.mxu1 }
 0x102   :  { %v853_v55 = vmax.f32 %v789_v41, 0.0  ;;  %1205 = vst.msk [vmem:[%s2545_s4 + $0xd0] sm:$0xf] %vm1152_vm2, %v1402_v23  ;;  %v1405_v25 = vpack.c.bf16 %v887_v63, %v887_v63  ;;  %v2580_v3 = vunpack.c.l.bf16 %v2032_v27  ;;  %v610_v56 = vadd.f32 %v2047_v33, %v609_v20 }
 0x103   :  { %v794_v0 = vadd.f32 %v2579_v45, %v490_v44  ;;  %v885_v53 = vmax.f32 %v821_v11, 0.0  ;;  %1176 = vst.msk [vmem:[%s2545_s4 + $0x5c] sm:$0xf] %vm1152_vm2, %v1373_v24  ;;  %v2581_v47 = vunpack.c.l.bf16 %v2037_v29  ;;  %v493_v35 = vadd.f32 %v1635_v13, %v2047_v33  ;;  %v497_v44 = vpop.f32.mrf.mxu0  ;;  %v625_v11 = vpop.f32.mrf.mxu1 }
 0x104   :  { %v826_v42 = vadd.f32 %v2580_v3, %v618_v28  ;;  %v1371_v1 = vpack.c.bf16 %v853_v55, %v853_v55  ;;  %1208 = vst.msk [vmem:[%s2545_s4 + $0xdc] sm:$0xf] %vm1152_vm2, %v1405_v25  ;;  %v2582_v2 = vunpack.c.l.bf16 %v2042_v31  ;;  %v621_v38 = vadd.f32 %v1667_v57, %v2047_v33 }
 0x105   :  { %v858_v34 = vmax.f32 %v794_v0, 0.0  ;;  %v792_v21 = vadd.f32 %v2581_v47, %v482_v12  ;;  %v1403_v48 = vpack.c.bf16 %v885_v53, %v885_v53  ;;  %v2583_v15 = vunpack.c.h.bf16 %v2023_v30  ;;  %v1639_v45 = vpop.f32.mrf.mxu0  ;;  %v1671_v3 = vpop.f32.mrf.mxu1 }
 0x106   :  { %v890_v10 = vmax.f32 %v826_v42, 0.0  ;;  %v824_v7 = vadd.f32 %v2582_v2, %v610_v56  ;;  %1174 = vst.msk [vmem:[%s2545_s4 + $0x54] sm:$0xf] %vm1152_vm2, %v1371_v1  ;;  %v485_v60 = vadd.f32 %v2047_v33, %v484_v59  ;;  %v2584_v46 = vunpack.c.h.bf16 %v2032_v27 }
 0x107   :  { %v1376_v36 = vpack.c.bf16 %v858_v34, %v858_v34  ;;  %v856_v49 = vmax.f32 %v792_v21, 0.0  ;;  %v795_v39 = vadd.f32 %v2583_v15, %v493_v35  ;;  %1206 = vst.msk [vmem:[%s2545_s4 + $0xd4] sm:$0xf] %vm1152_vm2, %v1403_v48  ;;  %v613_v40 = vadd.f32 %v2047_v33, %v612_v43  ;;  %v500_v47 = vpop.f32.mrf.mxu0  ;;  %v628_v2 = vpop.f32.mrf.mxu1 }
 0x108   :  { %v1408_v62 = vpack.c.bf16 %v890_v10, %v890_v10  ;;  %v888_v37 = vmax.f32 %v824_v7, 0.0  ;;  %v827_v50 = vadd.f32 %v2584_v46, %v621_v38  ;;  %v2585_v19 = vunpack.c.h.bf16 %v2037_v29 }
 0x109   :  { %1179 = vst.msk [vmem:[%s2545_s4 + $0x68] sm:$0xf] %vm1152_vm2, %v1376_v36  ;;  %v1374_v30 = vpack.c.bf16 %v856_v49, %v856_v49  ;;  %v859_v4 = vmax.f32 %v795_v39, 0.0  ;;  %v506_v58 = vadd.f32 %v1638_v61, %v2047_v33  ;;  %v2586_v54 = vunpack.c.h.bf16 %v2042_v31 }
 0x10a   :  { %v793_v51 = vadd.f32 %v2585_v19, %v485_v60  ;;  %1211 = vst.msk [vmem:[%s2545_s4 + $0xe8] sm:$0xf] %vm1152_vm2, %v1408_v62  ;;  %v1406_v27 = vpack.c.bf16 %v888_v37, %v888_v37  ;;  %v891_v18 = vmax.f32 %v827_v50, 0.0  ;;  %v634_v41 = vadd.f32 %v1670_v5, %v2047_v33 }
 0x10b   :  { %v825_v6 = vadd.f32 %v2586_v54, %v613_v40  ;;  %1177 = vst.msk [vmem:[%s2545_s4 + $0x60] sm:$0xf] %vm1152_vm2, %v1374_v30  ;;  %v1377_v29 = vpack.c.bf16 %v859_v4, %v859_v4  ;;  %v2587_v23 = vunpack.c.l.bf16 %v2060_v16  ;;  %v498_v52 = vadd.f32 %v2047_v33, %v497_v44 }
 0x10c   :  { %v857_v9 = vmax.f32 %v793_v51, 0.0  ;;  %1209 = vst.msk [vmem:[%s2545_s4 + $0xe0] sm:$0xf] %vm1152_vm2, %v1406_v27  ;;  %v1409_v31 = vpack.c.bf16 %v891_v18, %v891_v18  ;;  %v2588_v14 = vunpack.c.l.bf16 %v2065_v32  ;;  %v626_v55 = vadd.f32 %v2047_v33, %v625_v11 }
 0x10d   :  { %v798_v63 = vadd.f32 %v2587_v23, %v506_v58  ;;  %v889_v28 = vmax.f32 %v825_v6, 0.0  ;;  %1180 = vst.msk [vmem:[%s2545_s4 + $0x6c] sm:$0xf] %vm1152_vm2, %v1377_v29  ;;  %v2589_v20 = vunpack.c.l.bf16 %v2074_v17  ;;  %v509_v53 = vadd.f32 %v1639_v45, %v2047_v33 }
 0x10e   :  { %v830_v24 = vadd.f32 %v2588_v14, %v634_v41  ;;  %v1375_v0 = vpack.c.bf16 %v857_v9, %v857_v9  ;;  %1212 = vst.msk [vmem:[%s2545_s4 + $0xec] sm:$0xf] %vm1152_vm2, %v1409_v31  ;;  %v2590_v13 = vunpack.c.l.bf16 %v2079_v22  ;;  %v637_v34 = vadd.f32 %v1671_v3, %v2047_v33 }
 0x10f   :  { %v862_v12 = vmax.f32 %v798_v63, 0.0  ;;  %v796_v25 = vadd.f32 %v2589_v20, %v498_v52  ;;  %v1407_v42 = vpack.c.bf16 %v889_v28, %v889_v28  ;;  %v2591_v57 = vunpack.c.h.bf16 %v2060_v16 }
 0x110   :  { %v894_v56 = vmax.f32 %v830_v24, 0.0  ;;  %v828_v1 = vadd.f32 %v2590_v13, %v626_v55  ;;  %1178 = vst.msk [vmem:[%s2545_s4 + $0x64] sm:$0xf] %vm1152_vm2, %v1375_v0  ;;  %v501_v10 = vadd.f32 %v2047_v33, %v500_v47  ;;  %v2592_v59 = vunpack.c.h.bf16 %v2065_v32 }
 0x111   :  { %v1380_v21 = vpack.c.bf16 %v862_v12, %v862_v12  ;;  %v860_v35 = vmax.f32 %v796_v25, 0.0  ;;  %v799_v48 = vadd.f32 %v2591_v57, %v509_v53  ;;  %1210 = vst.msk [vmem:[%s2545_s4 + $0xe4] sm:$0xf] %vm1152_vm2, %v1407_v42  ;;  %v629_v49 = vadd.f32 %v2047_v33, %v628_v2 }
 0x112   :  { %v1412_v7 = vpack.c.bf16 %v894_v56, %v894_v56  ;;  %v892_v38 = vmax.f32 %v828_v1, 0.0  ;;  %v831_v36 = vadd.f32 %v2592_v59, %v637_v34  ;;  %v797_v39 = vadd.f32 %v1473_v26, %v501_v10 }
 0x113   :  { %1183 = vst.msk [vmem:[%s2545_s4 + $0x78] sm:$0xf] %vm1152_vm2, %v1380_v21  ;;  %v1378_v16 = vpack.c.bf16 %v860_v35, %v860_v35  ;;  %v863_v15 = vmax.f32 %v799_v48, 0.0  ;;  %v829_v33 = vadd.f32 %v1537_v8, %v629_v49 }
 0x114   :  { %1215 = vst.msk [vmem:[%s2545_s4 + $0xf8] sm:$0xf] %vm1152_vm2, %v1412_v7  ;;  %v1410_v60 = vpack.c.bf16 %v892_v38, %v892_v38  ;;  %v895_v32 = vmax.f32 %v831_v36, 0.0  ;;  %v861_v62 = vmax.f32 %v797_v39, 0.0 }
 0x115   :  { %1181 = vst.msk [vmem:[%s2545_s4 + $0x70] sm:$0xf] %vm1152_vm2, %v1378_v16  ;;  %v1381_v43 = vpack.c.bf16 %v863_v15, %v863_v15  ;;  %v893_v26 = vmax.f32 %v829_v33, 0.0 }
 0x116   :  { %1213 = vst.msk [vmem:[%s2545_s4 + $0xf0] sm:$0xf] %vm1152_vm2, %v1410_v60  ;;  %v1413_v17 = vpack.c.bf16 %v895_v32, %v895_v32  ;;  %v1379_v8 = vpack.c.bf16 %v861_v62, %v861_v62 }
 0x117   :  { %1184 = vst.msk [vmem:[%s2545_s4 + $0x7c] sm:$0xf] %vm1152_vm2, %v1381_v43  ;;  %v1411_v22 = vpack.c.bf16 %v893_v26, %v893_v26 }
 0x118   :  { %1216 = vst.msk [vmem:[%s2545_s4 + $0xfc] sm:$0xf] %vm1152_vm2, %v1413_v17  ;;  %1182 = vst.msk [vmem:[%s2545_s4 + $0x74] sm:$0xf] %vm1152_vm2, %v1379_v8 }
 0x119   :  { %1214 = vst.msk [vmem:[%s2545_s4 + $0xf4] sm:$0xf] %vm1152_vm2, %v1411_v22 }

// kernel: _lambda_.62
= control target key start
LH: loop header
LB: loop body
LE: loop exit
PB: predicated region body
PF: predicated region fallthrough
CT: control target
= control target key end

     0   :  { %vm262_vm0 = vcmask 261120   ;;  %vm968_vm1 = vcmask 60416   ;;  %s1851_s1 = inlined_call_operand.vmem [shape: bf16[1,32,8], index: 1, kind: input, shape index: {}]   ;;  %s1852_s0 = inlined_call_operand.vmem [shape: bf16[1,512,32], index: 0, kind: input, shape index: {}]   ;;  %s1853_s2 = inlined_call_operand.vmem [shape: f32[1,1,8], index: 2, kind: input, shape index: {}]   ;;  %s1854_s3 = inlined_call_operand.vmem [shape: bf16[1,512,8], index: 3, kind: output, shape index: {}]  }
   0x1   :  { %v1338_v0 = vld [vmem:[%s1851_s1 + $0x8] sm:$0xff]   ;;  %v1339_v1 = vld [vmem:[%s1851_s1] sm:$0xff]   ;;  %v1344_v6 = vld [vmem:[%s1852_s0 + $0x10] sm:$0xff]  }
   0x2   :  { %1266 = vmatprep.subr.bf16.mxu0 %v1338_v0  ;;  %1334 = vmatprep.subr.bf16.mxu1 %v1338_v0  ;;  %v1340_v2 = vld [vmem:[%s1852_s0] sm:$0xff]   ;;  %v1342_v4 = vld [vmem:[%s1852_s0 + $0x8] sm:$0xff]   ;;  %v1345_v7 = vld [vmem:[%s1852_s0 + $0x90] sm:$0xff]  }
   0x3   :  { %1267 = vmatpush3.bf16.msra.mxu0 %v1338_v0  ;;  %1336 = vmatpush3.bf16.msra.mxu1 %v1338_v0  ;;  %v1341_v3 = vld [vmem:[%s1852_s0 + $0x80] sm:$0xff]   ;;  %v1343_v5 = vld [vmem:[%s1852_s0 + $0x88] sm:$0xff]   ;;  %v1346_v8 = vld [vmem:[%s1852_s0 + $0x18] sm:$0xff]  }
   0x4   :  { %1268 = vmatprep.subr.bf16.mxu0 %v1339_v1  ;;  %1335 = vmatprep.subr.bf16.mxu1 %v1339_v1  ;;  %v1347_v9 = vld [vmem:[%s1852_s0 + $0x98] sm:$0xff]   ;;  %v1348_v10 = vld [vmem:[%s1852_s0 + $0x20] sm:$0xff]   ;;  %v1350_v12 = vld [vmem:[%s1852_s0 + $0x28] sm:$0xff]  }
   0x5   :  { %1270 = vmatprep.mubr.msk.bf16.mxu0 %vm262_vm0, %v1340_v2  ;;  %1302 = vmatprep.mubr.msk.bf16.mxu1 %vm262_vm0, %v1341_v3  ;;  %v1349_v11 = vld [vmem:[%s1852_s0 + $0xa0] sm:$0xff]   ;;  %v1351_v13 = vld [vmem:[%s1852_s0 + $0xa8] sm:$0xff]   ;;  %v1352_v14 = vld [vmem:[%s1852_s0 + $0x30] sm:$0xff]  }
   0x6   :  { %v1353_v15 = vld [vmem:[%s1852_s0 + $0xb0] sm:$0xff]   ;;  %v1354_v16 = vld [vmem:[%s1852_s0 + $0x38] sm:$0xff]   ;;  %v1356_v18 = vld [vmem:[%s1852_s0 + $0x40] sm:$0xff]  }
   0x7   :  { %1269 = vmatpush3.bf16.msra.mxu0 %v1339_v1  ;;  %1337 = vmatpush3.bf16.msra.mxu1 %v1339_v1  ;;  %v1355_v17 = vld [vmem:[%s1852_s0 + $0xb8] sm:$0xff]   ;;  %v1357_v19 = vld [vmem:[%s1852_s0 + $0xc0] sm:$0xff]   ;;  %v1358_v20 = vld [vmem:[%s1852_s0 + $0x48] sm:$0xff]  }
   0x8   :  { %v1359_v21 = vld [vmem:[%s1852_s0 + $0xc8] sm:$0xff]   ;;  %v1360_v22 = vld [vmem:[%s1852_s0 + $0x50] sm:$0xff]   ;;  %v1362_v24 = vld [vmem:[%s1852_s0 + $0x58] sm:$0xff]  }
   0x9   :  { %v1361_v23 = vld [vmem:[%s1852_s0 + $0xd0] sm:$0xff]   ;;  %v1363_v25 = vld [vmem:[%s1852_s0 + $0xd8] sm:$0xff]   ;;  %v1364_v26 = vld [vmem:[%s1852_s0 + $0x60] sm:$0xff]  }
   0xa   :  { %1271 = vmatmul.mubr.msk.bf16.vlgmr.msra.gmra.mxu0 %vm262_vm0, %v1342_v4  ;;  %1303 = vmatmul.mubr.msk.bf16.vlgmr.msra.gmra.mxu1 %vm262_vm0, %v1343_v5  ;;  %v1365_v27 = vld [vmem:[%s1852_s0 + $0xe0] sm:$0xff]   ;;  %v1366_v28 = vld [vmem:[%s1852_s0 + $0x68] sm:$0xff]   ;;  %v1368_v30 = vld [vmem:[%s1852_s0 + $0x70] sm:$0xff]  }
   0xb   :  { %1274 = vmatprep.mubr.msk.bf16.mxu0 %vm262_vm0, %v1344_v6  ;;  %1306 = vmatprep.mubr.msk.bf16.mxu1 %vm262_vm0, %v1345_v7  ;;  %v1367_v29 = vld [vmem:[%s1852_s0 + $0xe8] sm:$0xff]   ;;  %v1369_v31 = vld [vmem:[%s1852_s0 + $0xf0] sm:$0xff]   ;;  %v1370_v32 = vld [vmem:[%s1852_s0 + $0x78] sm:$0xff]  }
   0xc   :  { %v1371_v33 = vld [vmem:[%s1852_s0 + $0xf8] sm:$0xff]   ;;  %v1529_v34 = vld [vmem:[%s1853_s2] ss:$0 sm:$0xff] }
  0x12   :  { %1275 = vmatmul.mubr.msk.bf16.gmra.mxu0 %vm262_vm0, %v1346_v8  ;;  %1307 = vmatmul.mubr.msk.bf16.gmra.mxu1 %vm262_vm0, %v1347_v9 }
  0x13   :  { %1278 = vmatprep.mubr.msk.bf16.mxu0 %vm262_vm0, %v1348_v10  ;;  %1310 = vmatprep.mubr.msk.bf16.mxu1 %vm262_vm0, %v1349_v11 }
  0x1a   :  { %1279 = vmatmul.mubr.msk.bf16.gmra.mxu0 %vm262_vm0, %v1350_v12  ;;  %1311 = vmatmul.mubr.msk.bf16.gmra.mxu1 %vm262_vm0, %v1351_v13 }
  0x1b   :  { %1282 = vmatprep.mubr.msk.bf16.mxu0 %vm262_vm0, %v1352_v14  ;;  %1314 = vmatprep.mubr.msk.bf16.mxu1 %vm262_vm0, %v1353_v15 }
  0x22   :  { %1283 = vmatmul.mubr.msk.bf16.gmra.mxu0 %vm262_vm0, %v1354_v16  ;;  %1315 = vmatmul.mubr.msk.bf16.gmra.mxu1 %vm262_vm0, %v1355_v17 }
  0x23   :  { %1286 = vmatprep.mubr.msk.bf16.mxu0 %vm262_vm0, %v1356_v18  ;;  %1318 = vmatprep.mubr.msk.bf16.mxu1 %vm262_vm0, %v1357_v19 }
  0x2a   :  { %1287 = vmatmul.mubr.msk.bf16.gmra.mxu0 %vm262_vm0, %v1358_v20  ;;  %1319 = vmatmul.mubr.msk.bf16.gmra.mxu1 %vm262_vm0, %v1359_v21 }
  0x2b   :  { %1290 = vmatprep.mubr.msk.bf16.mxu0 %vm262_vm0, %v1360_v22  ;;  %1322 = vmatprep.mubr.msk.bf16.mxu1 %vm262_vm0, %v1361_v23 }
  0x32   :  { %1291 = vmatmul.mubr.msk.bf16.gmra.mxu0 %vm262_vm0, %v1362_v24  ;;  %1323 = vmatmul.mubr.msk.bf16.gmra.mxu1 %vm262_vm0, %v1363_v25 }
  0x33   :  { %1294 = vmatprep.mubr.msk.bf16.mxu0 %vm262_vm0, %v1364_v26  ;;  %1326 = vmatprep.mubr.msk.bf16.mxu1 %vm262_vm0, %v1365_v27 }
  0x3a   :  { %1295 = vmatmul.mubr.msk.bf16.gmra.mxu0 %vm262_vm0, %v1366_v28  ;;  %1327 = vmatmul.mubr.msk.bf16.gmra.mxu1 %vm262_vm0, %v1367_v29 }
  0x3b   :  { %1298 = vmatprep.mubr.msk.bf16.mxu0 %vm262_vm0, %v1368_v30  ;;  %1330 = vmatprep.mubr.msk.bf16.mxu1 %vm262_vm0, %v1369_v31 }
  0x42   :  { %1299 = vmatmul.mubr.msk.bf16.gmra.mxu0 %vm262_vm0, %v1370_v32  ;;  %1331 = vmatmul.mubr.msk.bf16.gmra.mxu1 %vm262_vm0, %v1371_v33 }
  0xca   :  { %v1272_v35 = vpop.f32.mrf.mxu0  ;;  %v1304_v36 = vpop.f32.mrf.mxu1 }
  0xcb   :  { %v402_v37 = vadd.f32 %v1272_v35, %v1529_v34  ;;  %v530_v38 = vadd.f32 %v1304_v36, %v1529_v34 }
  0xcc   :  { %v393_v39 = vpop.f32.mrf.mxu0  ;;  %v521_v40 = vpop.f32.mrf.mxu1 }
  0xcd   :  { %v650_v41 = vmax.f32 %v402_v37, 0.0  ;;  %v682_v42 = vmax.f32 %v530_v38, 0.0  ;;  %v394_v43 = vadd.f32 %v1529_v34, %v393_v39  ;;  %v522_v44 = vadd.f32 %v1529_v34, %v521_v40 }
  0xce   :  { %v1273_v45 = vpop.f32.mrf.mxu0  ;;  %v1305_v46 = vpop.f32.mrf.mxu1 }
  0xcf   :  { %v1170_v47 = vpack.c.bf16 %v650_v41, %v650_v41  ;;  %v1202_v48 = vpack.c.bf16 %v682_v42, %v682_v42  ;;  %v648_v49 = vmax.f32 %v394_v43, 0.0  ;;  %v680_v50 = vmax.f32 %v522_v44, 0.0 }
  0xd0   :  { %v405_v51 = vadd.f32 %v1273_v45, %v1529_v34  ;;  %v533_v52 = vadd.f32 %v1305_v46, %v1529_v34  ;;  %v396_v53 = vpop.f32.mrf.mxu0  ;;  %v524_v54 = vpop.f32.mrf.mxu1 }
  0xd1   :  { %971 = vst.msk [vmem:[%s1854_s3 + $0x8] sm:$0xf] %vm968_vm1, %v1170_v47  ;;  %1003 = vst.msk [vmem:[%s1854_s3 + $0x88] sm:$0xf] %vm968_vm1, %v1202_v48  ;;  %v1168_v55 = vpack.c.bf16 %v648_v49, %v648_v49  ;;  %v1200_v56 = vpack.c.bf16 %v680_v50, %v680_v50  ;;  %v397_v57 = vadd.f32 %v1529_v34, %v396_v53 }
  0xd2   :  { %v525_v58 = vadd.f32 %v1529_v34, %v524_v54  ;;  %v651_v59 = vmax.f32 %v405_v51, 0.0  ;;  %v683_v60 = vmax.f32 %v533_v52, 0.0  ;;  %v1276_v61 = vpop.f32.mrf.mxu0  ;;  %v1308_v62 = vpop.f32.mrf.mxu1 }
  0xd3   :  { %969 = vst.msk [vmem:[%s1854_s3] sm:$0xf] %vm968_vm1, %v1168_v55  ;;  %1001 = vst.msk [vmem:[%s1854_s3 + $0x80] sm:$0xf] %vm968_vm1, %v1200_v56  ;;  %v649_v63 = vmax.f32 %v397_v57, 0.0  ;;  %v418_v1 = vadd.f32 %v1276_v61, %v1529_v34  ;;  %v546_v2 = vadd.f32 %v1308_v62, %v1529_v34 }
  0xd4   :  { %v681_v0 = vmax.f32 %v525_v58, 0.0  ;;  %v1171_v3 = vpack.c.bf16 %v651_v59, %v651_v59  ;;  %v1203_v4 = vpack.c.bf16 %v683_v60, %v683_v60  ;;  %v409_v5 = vpop.f32.mrf.mxu0  ;;  %v537_v6 = vpop.f32.mrf.mxu1 }
  0xd5   :  { %v1169_v7 = vpack.c.bf16 %v649_v63, %v649_v63  ;;  %v654_v9 = vmax.f32 %v418_v1, 0.0  ;;  %v686_v10 = vmax.f32 %v546_v2, 0.0  ;;  %v410_v11 = vadd.f32 %v1529_v34, %v409_v5 }
  0xd6   :  { %v1201_v8 = vpack.c.bf16 %v681_v0, %v681_v0  ;;  %972 = vst.msk [vmem:[%s1854_s3 + $0xc] sm:$0xf] %vm968_vm1, %v1171_v3  ;;  %1004 = vst.msk [vmem:[%s1854_s3 + $0x8c] sm:$0xf] %vm968_vm1, %v1203_v4  ;;  %v538_v12 = vadd.f32 %v1529_v34, %v537_v6  ;;  %v1277_v13 = vpop.f32.mrf.mxu0  ;;  %v1309_v14 = vpop.f32.mrf.mxu1 }
  0xd7   :  { %970 = vst.msk [vmem:[%s1854_s3 + $0x4] sm:$0xf] %vm968_vm1, %v1169_v7  ;;  %v1174_v15 = vpack.c.bf16 %v654_v9, %v654_v9  ;;  %v1206_v16 = vpack.c.bf16 %v686_v10, %v686_v10  ;;  %v421_v17 = vadd.f32 %v1277_v13, %v1529_v34  ;;  %v549_v18 = vadd.f32 %v1309_v14, %v1529_v34 }
  0xd8   :  { %1002 = vst.msk [vmem:[%s1854_s3 + $0x84] sm:$0xf] %vm968_vm1, %v1201_v8  ;;  %v652_v19 = vmax.f32 %v410_v11, 0.0  ;;  %v684_v20 = vmax.f32 %v538_v12, 0.0  ;;  %v412_v21 = vpop.f32.mrf.mxu0  ;;  %v540_v22 = vpop.f32.mrf.mxu1 }
  0xd9   :  { %975 = vst.msk [vmem:[%s1854_s3 + $0x18] sm:$0xf] %vm968_vm1, %v1174_v15  ;;  %1007 = vst.msk [vmem:[%s1854_s3 + $0x98] sm:$0xf] %vm968_vm1, %v1206_v16  ;;  %v655_v23 = vmax.f32 %v421_v17, 0.0  ;;  %v687_v24 = vmax.f32 %v549_v18, 0.0  ;;  %v413_v25 = vadd.f32 %v1529_v34, %v412_v21  ;;  %v541_v26 = vadd.f32 %v1529_v34, %v540_v22 }
  0xda   :  { %v1172_v27 = vpack.c.bf16 %v652_v19, %v652_v19  ;;  %v1204_v28 = vpack.c.bf16 %v684_v20, %v684_v20  ;;  %v1280_v29 = vpop.f32.mrf.mxu0  ;;  %v1312_v30 = vpop.f32.mrf.mxu1 }
  0xdb   :  { %v1175_v31 = vpack.c.bf16 %v655_v23, %v655_v23  ;;  %v1207_v32 = vpack.c.bf16 %v687_v24, %v687_v24  ;;  %v653_v33 = vmax.f32 %v413_v25, 0.0  ;;  %v685_v35 = vmax.f32 %v541_v26, 0.0 }
  0xdc   :  { %973 = vst.msk [vmem:[%s1854_s3 + $0x10] sm:$0xf] %vm968_vm1, %v1172_v27  ;;  %1005 = vst.msk [vmem:[%s1854_s3 + $0x90] sm:$0xf] %vm968_vm1, %v1204_v28  ;;  %v434_v36 = vadd.f32 %v1280_v29, %v1529_v34  ;;  %v562_v37 = vadd.f32 %v1312_v30, %v1529_v34  ;;  %v425_v38 = vpop.f32.mrf.mxu0  ;;  %v553_v39 = vpop.f32.mrf.mxu1 }
  0xdd   :  { %976 = vst.msk [vmem:[%s1854_s3 + $0x1c] sm:$0xf] %vm968_vm1, %v1175_v31  ;;  %1008 = vst.msk [vmem:[%s1854_s3 + $0x9c] sm:$0xf] %vm968_vm1, %v1207_v32  ;;  %v1173_v40 = vpack.c.bf16 %v653_v33, %v653_v33  ;;  %v1205_v41 = vpack.c.bf16 %v685_v35, %v685_v35  ;;  %v426_v42 = vadd.f32 %v1529_v34, %v425_v38 }
  0xde   :  { %v554_v43 = vadd.f32 %v1529_v34, %v553_v39  ;;  %v658_v44 = vmax.f32 %v434_v36, 0.0  ;;  %v690_v45 = vmax.f32 %v562_v37, 0.0  ;;  %v1281_v46 = vpop.f32.mrf.mxu0  ;;  %v1313_v47 = vpop.f32.mrf.mxu1 }
  0xdf   :  { %974 = vst.msk [vmem:[%s1854_s3 + $0x14] sm:$0xf] %vm968_vm1, %v1173_v40  ;;  %1006 = vst.msk [vmem:[%s1854_s3 + $0x94] sm:$0xf] %vm968_vm1, %v1205_v41  ;;  %v656_v48 = vmax.f32 %v426_v42, 0.0  ;;  %v437_v50 = vadd.f32 %v1281_v46, %v1529_v34  ;;  %v565_v51 = vadd.f32 %v1313_v47, %v1529_v34 }
  0xe0   :  { %v688_v49 = vmax.f32 %v554_v43, 0.0  ;;  %v1178_v52 = vpack.c.bf16 %v658_v44, %v658_v44  ;;  %v1210_v53 = vpack.c.bf16 %v690_v45, %v690_v45  ;;  %v428_v54 = vpop.f32.mrf.mxu0  ;;  %v556_v55 = vpop.f32.mrf.mxu1 }
  0xe1   :  { %v1176_v56 = vpack.c.bf16 %v656_v48, %v656_v48  ;;  %v659_v58 = vmax.f32 %v437_v50, 0.0  ;;  %v691_v59 = vmax.f32 %v565_v51, 0.0  ;;  %v429_v60 = vadd.f32 %v1529_v34, %v428_v54 }
  0xe2   :  { %v1208_v57 = vpack.c.bf16 %v688_v49, %v688_v49  ;;  %979 = vst.msk [vmem:[%s1854_s3 + $0x28] sm:$0xf] %vm968_vm1, %v1178_v52  ;;  %1011 = vst.msk [vmem:[%s1854_s3 + $0xa8] sm:$0xf] %vm968_vm1, %v1210_v53  ;;  %v557_v61 = vadd.f32 %v1529_v34, %v556_v55  ;;  %v1284_v62 = vpop.f32.mrf.mxu0  ;;  %v1316_v63 = vpop.f32.mrf.mxu1 }
  0xe3   :  { %977 = vst.msk [vmem:[%s1854_s3 + $0x20] sm:$0xf] %vm968_vm1, %v1176_v56  ;;  %v1179_v0 = vpack.c.bf16 %v659_v58, %v659_v58  ;;  %v1211_v1 = vpack.c.bf16 %v691_v59, %v691_v59  ;;  %v450_v2 = vadd.f32 %v1284_v62, %v1529_v34  ;;  %v578_v3 = vadd.f32 %v1316_v63, %v1529_v34 }
  0xe4   :  { %1009 = vst.msk [vmem:[%s1854_s3 + $0xa0] sm:$0xf] %vm968_vm1, %v1208_v57  ;;  %v657_v4 = vmax.f32 %v429_v60, 0.0  ;;  %v689_v5 = vmax.f32 %v557_v61, 0.0  ;;  %v441_v6 = vpop.f32.mrf.mxu0  ;;  %v569_v7 = vpop.f32.mrf.mxu1 }
  0xe5   :  { %980 = vst.msk [vmem:[%s1854_s3 + $0x2c] sm:$0xf] %vm968_vm1, %v1179_v0  ;;  %1012 = vst.msk [vmem:[%s1854_s3 + $0xac] sm:$0xf] %vm968_vm1, %v1211_v1  ;;  %v662_v8 = vmax.f32 %v450_v2, 0.0  ;;  %v694_v9 = vmax.f32 %v578_v3, 0.0  ;;  %v442_v10 = vadd.f32 %v1529_v34, %v441_v6  ;;  %v570_v11 = vadd.f32 %v1529_v34, %v569_v7 }
  0xe6   :  { %v1177_v12 = vpack.c.bf16 %v657_v4, %v657_v4  ;;  %v1209_v13 = vpack.c.bf16 %v689_v5, %v689_v5  ;;  %v1285_v14 = vpop.f32.mrf.mxu0  ;;  %v1317_v15 = vpop.f32.mrf.mxu1 }
  0xe7   :  { %v1182_v16 = vpack.c.bf16 %v662_v8, %v662_v8  ;;  %v1214_v17 = vpack.c.bf16 %v694_v9, %v694_v9  ;;  %v660_v18 = vmax.f32 %v442_v10, 0.0  ;;  %v692_v19 = vmax.f32 %v570_v11, 0.0 }
  0xe8   :  { %978 = vst.msk [vmem:[%s1854_s3 + $0x24] sm:$0xf] %vm968_vm1, %v1177_v12  ;;  %1010 = vst.msk [vmem:[%s1854_s3 + $0xa4] sm:$0xf] %vm968_vm1, %v1209_v13  ;;  %v453_v20 = vadd.f32 %v1285_v14, %v1529_v34  ;;  %v581_v21 = vadd.f32 %v1317_v15, %v1529_v34  ;;  %v444_v22 = vpop.f32.mrf.mxu0  ;;  %v572_v23 = vpop.f32.mrf.mxu1 }
  0xe9   :  { %983 = vst.msk [vmem:[%s1854_s3 + $0x38] sm:$0xf] %vm968_vm1, %v1182_v16  ;;  %1015 = vst.msk [vmem:[%s1854_s3 + $0xb8] sm:$0xf] %vm968_vm1, %v1214_v17  ;;  %v1180_v24 = vpack.c.bf16 %v660_v18, %v660_v18  ;;  %v1212_v25 = vpack.c.bf16 %v692_v19, %v692_v19  ;;  %v445_v26 = vadd.f32 %v1529_v34, %v444_v22 }
  0xea   :  { %v573_v27 = vadd.f32 %v1529_v34, %v572_v23  ;;  %v663_v28 = vmax.f32 %v453_v20, 0.0  ;;  %v695_v29 = vmax.f32 %v581_v21, 0.0  ;;  %v1288_v30 = vpop.f32.mrf.mxu0  ;;  %v1320_v31 = vpop.f32.mrf.mxu1 }
  0xeb   :  { %981 = vst.msk [vmem:[%s1854_s3 + $0x30] sm:$0xf] %vm968_vm1, %v1180_v24  ;;  %1013 = vst.msk [vmem:[%s1854_s3 + $0xb0] sm:$0xf] %vm968_vm1, %v1212_v25  ;;  %v661_v32 = vmax.f32 %v445_v26, 0.0  ;;  %v466_v35 = vadd.f32 %v1288_v30, %v1529_v34  ;;  %v594_v36 = vadd.f32 %v1320_v31, %v1529_v34 }
  0xec   :  { %v693_v33 = vmax.f32 %v573_v27, 0.0  ;;  %v1183_v37 = vpack.c.bf16 %v663_v28, %v663_v28  ;;  %v1215_v38 = vpack.c.bf16 %v695_v29, %v695_v29  ;;  %v457_v39 = vpop.f32.mrf.mxu0  ;;  %v585_v40 = vpop.f32.mrf.mxu1 }
  0xed   :  { %v1181_v41 = vpack.c.bf16 %v661_v32, %v661_v32  ;;  %v666_v43 = vmax.f32 %v466_v35, 0.0  ;;  %v698_v44 = vmax.f32 %v594_v36, 0.0  ;;  %v458_v45 = vadd.f32 %v1529_v34, %v457_v39 }
  0xee   :  { %v1213_v42 = vpack.c.bf16 %v693_v33, %v693_v33  ;;  %984 = vst.msk [vmem:[%s1854_s3 + $0x3c] sm:$0xf] %vm968_vm1, %v1183_v37  ;;  %1016 = vst.msk [vmem:[%s1854_s3 + $0xbc] sm:$0xf] %vm968_vm1, %v1215_v38  ;;  %v586_v46 = vadd.f32 %v1529_v34, %v585_v40  ;;  %v1289_v47 = vpop.f32.mrf.mxu0  ;;  %v1321_v48 = vpop.f32.mrf.mxu1 }
  0xef   :  { %982 = vst.msk [vmem:[%s1854_s3 + $0x34] sm:$0xf] %vm968_vm1, %v1181_v41  ;;  %v1186_v49 = vpack.c.bf16 %v666_v43, %v666_v43  ;;  %v1218_v50 = vpack.c.bf16 %v698_v44, %v698_v44  ;;  %v469_v51 = vadd.f32 %v1289_v47, %v1529_v34  ;;  %v597_v52 = vadd.f32 %v1321_v48, %v1529_v34 }
  0xf0   :  { %1014 = vst.msk [vmem:[%s1854_s3 + $0xb4] sm:$0xf] %vm968_vm1, %v1213_v42  ;;  %v664_v53 = vmax.f32 %v458_v45, 0.0  ;;  %v696_v54 = vmax.f32 %v586_v46, 0.0  ;;  %v460_v55 = vpop.f32.mrf.mxu0  ;;  %v588_v56 = vpop.f32.mrf.mxu1 }
  0xf1   :  { %987 = vst.msk [vmem:[%s1854_s3 + $0x48] sm:$0xf] %vm968_vm1, %v1186_v49  ;;  %1019 = vst.msk [vmem:[%s1854_s3 + $0xc8] sm:$0xf] %vm968_vm1, %v1218_v50  ;;  %v667_v57 = vmax.f32 %v469_v51, 0.0  ;;  %v699_v58 = vmax.f32 %v597_v52, 0.0  ;;  %v461_v59 = vadd.f32 %v1529_v34, %v460_v55  ;;  %v589_v60 = vadd.f32 %v1529_v34, %v588_v56 }
  0xf2   :  { %v1184_v61 = vpack.c.bf16 %v664_v53, %v664_v53  ;;  %v1216_v62 = vpack.c.bf16 %v696_v54, %v696_v54  ;;  %v1292_v63 = vpop.f32.mrf.mxu0  ;;  %v1324_v0 = vpop.f32.mrf.mxu1 }
  0xf3   :  { %v1187_v1 = vpack.c.bf16 %v667_v57, %v667_v57  ;;  %v1219_v2 = vpack.c.bf16 %v699_v58, %v699_v58  ;;  %v665_v3 = vmax.f32 %v461_v59, 0.0  ;;  %v697_v4 = vmax.f32 %v589_v60, 0.0 }
  0xf4   :  { %985 = vst.msk [vmem:[%s1854_s3 + $0x40] sm:$0xf] %vm968_vm1, %v1184_v61  ;;  %1017 = vst.msk [vmem:[%s1854_s3 + $0xc0] sm:$0xf] %vm968_vm1, %v1216_v62  ;;  %v482_v5 = vadd.f32 %v1292_v63, %v1529_v34  ;;  %v610_v6 = vadd.f32 %v1324_v0, %v1529_v34  ;;  %v473_v7 = vpop.f32.mrf.mxu0  ;;  %v601_v8 = vpop.f32.mrf.mxu1 }
  0xf5   :  { %988 = vst.msk [vmem:[%s1854_s3 + $0x4c] sm:$0xf] %vm968_vm1, %v1187_v1  ;;  %1020 = vst.msk [vmem:[%s1854_s3 + $0xcc] sm:$0xf] %vm968_vm1, %v1219_v2  ;;  %v1185_v9 = vpack.c.bf16 %v665_v3, %v665_v3  ;;  %v1217_v10 = vpack.c.bf16 %v697_v4, %v697_v4  ;;  %v474_v11 = vadd.f32 %v1529_v34, %v473_v7 }
  0xf6   :  { %v602_v12 = vadd.f32 %v1529_v34, %v601_v8  ;;  %v670_v13 = vmax.f32 %v482_v5, 0.0  ;;  %v702_v14 = vmax.f32 %v610_v6, 0.0  ;;  %v1293_v15 = vpop.f32.mrf.mxu0  ;;  %v1325_v16 = vpop.f32.mrf.mxu1 }
  0xf7   :  { %986 = vst.msk [vmem:[%s1854_s3 + $0x44] sm:$0xf] %vm968_vm1, %v1185_v9  ;;  %1018 = vst.msk [vmem:[%s1854_s3 + $0xc4] sm:$0xf] %vm968_vm1, %v1217_v10  ;;  %v668_v17 = vmax.f32 %v474_v11, 0.0  ;;  %v485_v19 = vadd.f32 %v1293_v15, %v1529_v34  ;;  %v613_v20 = vadd.f32 %v1325_v16, %v1529_v34 }
  0xf8   :  { %v700_v18 = vmax.f32 %v602_v12, 0.0  ;;  %v1190_v21 = vpack.c.bf16 %v670_v13, %v670_v13  ;;  %v1222_v22 = vpack.c.bf16 %v702_v14, %v702_v14  ;;  %v476_v23 = vpop.f32.mrf.mxu0  ;;  %v604_v24 = vpop.f32.mrf.mxu1 }
  0xf9   :  { %v1188_v25 = vpack.c.bf16 %v668_v17, %v668_v17  ;;  %v671_v27 = vmax.f32 %v485_v19, 0.0  ;;  %v703_v28 = vmax.f32 %v613_v20, 0.0  ;;  %v477_v29 = vadd.f32 %v1529_v34, %v476_v23 }
  0xfa   :  { %v1220_v26 = vpack.c.bf16 %v700_v18, %v700_v18  ;;  %991 = vst.msk [vmem:[%s1854_s3 + $0x58] sm:$0xf] %vm968_vm1, %v1190_v21  ;;  %1023 = vst.msk [vmem:[%s1854_s3 + $0xd8] sm:$0xf] %vm968_vm1, %v1222_v22  ;;  %v605_v30 = vadd.f32 %v1529_v34, %v604_v24  ;;  %v1296_v31 = vpop.f32.mrf.mxu0  ;;  %v1328_v32 = vpop.f32.mrf.mxu1 }
  0xfb   :  { %989 = vst.msk [vmem:[%s1854_s3 + $0x50] sm:$0xf] %vm968_vm1, %v1188_v25  ;;  %v1191_v33 = vpack.c.bf16 %v671_v27, %v671_v27  ;;  %v1223_v35 = vpack.c.bf16 %v703_v28, %v703_v28  ;;  %v498_v36 = vadd.f32 %v1296_v31, %v1529_v34  ;;  %v626_v37 = vadd.f32 %v1328_v32, %v1529_v34 }
  0xfc   :  { %1021 = vst.msk [vmem:[%s1854_s3 + $0xd0] sm:$0xf] %vm968_vm1, %v1220_v26  ;;  %v669_v38 = vmax.f32 %v477_v29, 0.0  ;;  %v701_v39 = vmax.f32 %v605_v30, 0.0  ;;  %v489_v40 = vpop.f32.mrf.mxu0  ;;  %v617_v41 = vpop.f32.mrf.mxu1 }
  0xfd   :  { %992 = vst.msk [vmem:[%s1854_s3 + $0x5c] sm:$0xf] %vm968_vm1, %v1191_v33  ;;  %1024 = vst.msk [vmem:[%s1854_s3 + $0xdc] sm:$0xf] %vm968_vm1, %v1223_v35  ;;  %v674_v42 = vmax.f32 %v498_v36, 0.0  ;;  %v706_v43 = vmax.f32 %v626_v37, 0.0  ;;  %v490_v44 = vadd.f32 %v1529_v34, %v489_v40  ;;  %v618_v45 = vadd.f32 %v1529_v34, %v617_v41 }
  0xfe   :  { %v1189_v46 = vpack.c.bf16 %v669_v38, %v669_v38  ;;  %v1221_v47 = vpack.c.bf16 %v701_v39, %v701_v39  ;;  %v1297_v48 = vpop.f32.mrf.mxu0  ;;  %v1329_v49 = vpop.f32.mrf.mxu1 }
  0xff   :  { %v1194_v50 = vpack.c.bf16 %v674_v42, %v674_v42  ;;  %v1226_v51 = vpack.c.bf16 %v706_v43, %v706_v43  ;;  %v672_v52 = vmax.f32 %v490_v44, 0.0  ;;  %v704_v53 = vmax.f32 %v618_v45, 0.0 }
 0x100   :  { %990 = vst.msk [vmem:[%s1854_s3 + $0x54] sm:$0xf] %vm968_vm1, %v1189_v46  ;;  %1022 = vst.msk [vmem:[%s1854_s3 + $0xd4] sm:$0xf] %vm968_vm1, %v1221_v47  ;;  %v501_v54 = vadd.f32 %v1297_v48, %v1529_v34  ;;  %v629_v55 = vadd.f32 %v1329_v49, %v1529_v34  ;;  %v492_v56 = vpop.f32.mrf.mxu0  ;;  %v620_v57 = vpop.f32.mrf.mxu1 }
 0x101   :  { %995 = vst.msk [vmem:[%s1854_s3 + $0x68] sm:$0xf] %vm968_vm1, %v1194_v50  ;;  %1027 = vst.msk [vmem:[%s1854_s3 + $0xe8] sm:$0xf] %vm968_vm1, %v1226_v51  ;;  %v1192_v58 = vpack.c.bf16 %v672_v52, %v672_v52  ;;  %v1224_v59 = vpack.c.bf16 %v704_v53, %v704_v53  ;;  %v493_v60 = vadd.f32 %v1529_v34, %v492_v56 }
 0x102   :  { %v621_v61 = vadd.f32 %v1529_v34, %v620_v57  ;;  %v675_v62 = vmax.f32 %v501_v54, 0.0  ;;  %v707_v63 = vmax.f32 %v629_v55, 0.0  ;;  %v1300_v0 = vpop.f32.mrf.mxu0  ;;  %v1332_v1 = vpop.f32.mrf.mxu1 }
 0x103   :  { %993 = vst.msk [vmem:[%s1854_s3 + $0x60] sm:$0xf] %vm968_vm1, %v1192_v58  ;;  %1025 = vst.msk [vmem:[%s1854_s3 + $0xe0] sm:$0xf] %vm968_vm1, %v1224_v59  ;;  %v673_v2 = vmax.f32 %v493_v60, 0.0  ;;  %v514_v4 = vadd.f32 %v1300_v0, %v1529_v34  ;;  %v642_v5 = vadd.f32 %v1332_v1, %v1529_v34 }
 0x104   :  { %v705_v3 = vmax.f32 %v621_v61, 0.0  ;;  %v1195_v6 = vpack.c.bf16 %v675_v62, %v675_v62  ;;  %v1227_v7 = vpack.c.bf16 %v707_v63, %v707_v63  ;;  %v505_v8 = vpop.f32.mrf.mxu0  ;;  %v633_v9 = vpop.f32.mrf.mxu1 }
 0x105   :  { %v1193_v10 = vpack.c.bf16 %v673_v2, %v673_v2  ;;  %v678_v12 = vmax.f32 %v514_v4, 0.0  ;;  %v710_v13 = vmax.f32 %v642_v5, 0.0  ;;  %v506_v14 = vadd.f32 %v1529_v34, %v505_v8 }
 0x106   :  { %v1225_v11 = vpack.c.bf16 %v705_v3, %v705_v3  ;;  %996 = vst.msk [vmem:[%s1854_s3 + $0x6c] sm:$0xf] %vm968_vm1, %v1195_v6  ;;  %1028 = vst.msk [vmem:[%s1854_s3 + $0xec] sm:$0xf] %vm968_vm1, %v1227_v7  ;;  %v634_v15 = vadd.f32 %v1529_v34, %v633_v9  ;;  %v1301_v16 = vpop.f32.mrf.mxu0  ;;  %v1333_v17 = vpop.f32.mrf.mxu1 }
 0x107   :  { %994 = vst.msk [vmem:[%s1854_s3 + $0x64] sm:$0xf] %vm968_vm1, %v1193_v10  ;;  %v1198_v18 = vpack.c.bf16 %v678_v12, %v678_v12  ;;  %v1230_v19 = vpack.c.bf16 %v710_v13, %v710_v13  ;;  %v517_v20 = vadd.f32 %v1301_v16, %v1529_v34  ;;  %v645_v21 = vadd.f32 %v1333_v17, %v1529_v34 }
 0x108   :  { %1026 = vst.msk [vmem:[%s1854_s3 + $0xe4] sm:$0xf] %vm968_vm1, %v1225_v11  ;;  %v676_v22 = vmax.f32 %v506_v14, 0.0  ;;  %v708_v23 = vmax.f32 %v634_v15, 0.0  ;;  %v508_v24 = vpop.f32.mrf.mxu0  ;;  %v636_v25 = vpop.f32.mrf.mxu1 }
 0x109   :  { %999 = vst.msk [vmem:[%s1854_s3 + $0x78] sm:$0xf] %vm968_vm1, %v1198_v18  ;;  %1031 = vst.msk [vmem:[%s1854_s3 + $0xf8] sm:$0xf] %vm968_vm1, %v1230_v19  ;;  %v679_v26 = vmax.f32 %v517_v20, 0.0  ;;  %v711_v27 = vmax.f32 %v645_v21, 0.0  ;;  %v509_v28 = vadd.f32 %v1529_v34, %v508_v24  ;;  %v637_v29 = vadd.f32 %v1529_v34, %v636_v25 }
 0x10a   :  { %v1196_v30 = vpack.c.bf16 %v676_v22, %v676_v22  ;;  %v1228_v31 = vpack.c.bf16 %v708_v23, %v708_v23 }
 0x10b   :  { %v1199_v32 = vpack.c.bf16 %v679_v26, %v679_v26  ;;  %v1231_v33 = vpack.c.bf16 %v711_v27, %v711_v27  ;;  %v677_v35 = vmax.f32 %v509_v28, 0.0  ;;  %v709_v36 = vmax.f32 %v637_v29, 0.0 }
 0x10c   :  { %997 = vst.msk [vmem:[%s1854_s3 + $0x70] sm:$0xf] %vm968_vm1, %v1196_v30  ;;  %1029 = vst.msk [vmem:[%s1854_s3 + $0xf0] sm:$0xf] %vm968_vm1, %v1228_v31 }
 0x10d   :  { %1000 = vst.msk [vmem:[%s1854_s3 + $0x7c] sm:$0xf] %vm968_vm1, %v1199_v32  ;;  %1032 = vst.msk [vmem:[%s1854_s3 + $0xfc] sm:$0xf] %vm968_vm1, %v1231_v33  ;;  %v1197_v34 = vpack.c.bf16 %v677_v35, %v677_v35  ;;  %v1229_v37 = vpack.c.bf16 %v709_v36, %v709_v36 }
 0x10f   :  { %998 = vst.msk [vmem:[%s1854_s3 + $0x74] sm:$0xf] %vm968_vm1, %v1197_v34  ;;  %1030 = vst.msk [vmem:[%s1854_s3 + $0xf4] sm:$0xf] %vm968_vm1, %v1229_v37 }

// kernel: _lambda_.68
= control target key start
LH: loop header
LB: loop body
LE: loop exit
PB: predicated region body
PF: predicated region fallthrough
CT: control target
= control target key end

     0   :  { %vm262_vm0 = vcmask 261120   ;;  %vm968_vm1 = vcmask 125952   ;;  %s1851_s1 = inlined_call_operand.vmem [shape: bf16[1,32,16], index: 1, kind: input, shape index: {}]   ;;  %s1852_s0 = inlined_call_operand.vmem [shape: bf16[1,512,32], index: 0, kind: input, shape index: {}]   ;;  %s1853_s2 = inlined_call_operand.vmem [shape: f32[1,1,16], index: 2, kind: input, shape index: {}]   ;;  %s1854_s3 = inlined_call_operand.vmem [shape: bf16[1,512,16], index: 3, kind: output, shape index: {}]  }
   0x1   :  { %v1338_v0 = vld [vmem:[%s1851_s1 + $0x8] sm:$0xff]   ;;  %v1339_v1 = vld [vmem:[%s1851_s1] sm:$0xff]   ;;  %v1344_v6 = vld [vmem:[%s1852_s0 + $0x10] sm:$0xff]  }
   0x2   :  { %1266 = vmatprep.subr.bf16.mxu0 %v1338_v0  ;;  %1334 = vmatprep.subr.bf16.mxu1 %v1338_v0  ;;  %v1340_v2 = vld [vmem:[%s1852_s0] sm:$0xff]   ;;  %v1342_v4 = vld [vmem:[%s1852_s0 + $0x8] sm:$0xff]   ;;  %v1345_v7 = vld [vmem:[%s1852_s0 + $0x90] sm:$0xff]  }
   0x3   :  { %1267 = vmatpush3.bf16.msra.mxu0 %v1338_v0  ;;  %1336 = vmatpush3.bf16.msra.mxu1 %v1338_v0  ;;  %v1341_v3 = vld [vmem:[%s1852_s0 + $0x80] sm:$0xff]   ;;  %v1343_v5 = vld [vmem:[%s1852_s0 + $0x88] sm:$0xff]   ;;  %v1346_v8 = vld [vmem:[%s1852_s0 + $0x18] sm:$0xff]  }
   0x4   :  { %1268 = vmatprep.subr.bf16.mxu0 %v1339_v1  ;;  %1335 = vmatprep.subr.bf16.mxu1 %v1339_v1  ;;  %v1347_v9 = vld [vmem:[%s1852_s0 + $0x98] sm:$0xff]   ;;  %v1348_v10 = vld [vmem:[%s1852_s0 + $0x20] sm:$0xff]   ;;  %v1350_v12 = vld [vmem:[%s1852_s0 + $0x28] sm:$0xff]  }
   0x5   :  { %1270 = vmatprep.mubr.msk.bf16.mxu0 %vm262_vm0, %v1340_v2  ;;  %1302 = vmatprep.mubr.msk.bf16.mxu1 %vm262_vm0, %v1341_v3  ;;  %v1349_v11 = vld [vmem:[%s1852_s0 + $0xa0] sm:$0xff]   ;;  %v1351_v13 = vld [vmem:[%s1852_s0 + $0xa8] sm:$0xff]   ;;  %v1352_v14 = vld [vmem:[%s1852_s0 + $0x30] sm:$0xff]  }
   0x6   :  { %v1353_v15 = vld [vmem:[%s1852_s0 + $0xb0] sm:$0xff]   ;;  %v1354_v16 = vld [vmem:[%s1852_s0 + $0x38] sm:$0xff]   ;;  %v1356_v18 = vld [vmem:[%s1852_s0 + $0x40] sm:$0xff]  }
   0x7   :  { %1269 = vmatpush3.bf16.msra.mxu0 %v1339_v1  ;;  %1337 = vmatpush3.bf16.msra.mxu1 %v1339_v1  ;;  %v1355_v17 = vld [vmem:[%s1852_s0 + $0xb8] sm:$0xff]   ;;  %v1357_v19 = vld [vmem:[%s1852_s0 + $0xc0] sm:$0xff]   ;;  %v1358_v20 = vld [vmem:[%s1852_s0 + $0x48] sm:$0xff]  }
   0x8   :  { %v1359_v21 = vld [vmem:[%s1852_s0 + $0xc8] sm:$0xff]   ;;  %v1360_v22 = vld [vmem:[%s1852_s0 + $0x50] sm:$0xff]   ;;  %v1362_v24 = vld [vmem:[%s1852_s0 + $0x58] sm:$0xff]  }
   0x9   :  { %v1361_v23 = vld [vmem:[%s1852_s0 + $0xd0] sm:$0xff]   ;;  %v1363_v25 = vld [vmem:[%s1852_s0 + $0xd8] sm:$0xff]   ;;  %v1364_v26 = vld [vmem:[%s1852_s0 + $0x60] sm:$0xff]  }
   0xa   :  { %1271 = vmatmul.mubr.msk.bf16.vlgmr.msra.gmra.mxu0 %vm262_vm0, %v1342_v4  ;;  %1303 = vmatmul.mubr.msk.bf16.vlgmr.msra.gmra.mxu1 %vm262_vm0, %v1343_v5  ;;  %v1365_v27 = vld [vmem:[%s1852_s0 + $0xe0] sm:$0xff]   ;;  %v1366_v28 = vld [vmem:[%s1852_s0 + $0x68] sm:$0xff]   ;;  %v1368_v30 = vld [vmem:[%s1852_s0 + $0x70] sm:$0xff]  }
   0xb   :  { %1274 = vmatprep.mubr.msk.bf16.mxu0 %vm262_vm0, %v1344_v6  ;;  %1306 = vmatprep.mubr.msk.bf16.mxu1 %vm262_vm0, %v1345_v7  ;;  %v1367_v29 = vld [vmem:[%s1852_s0 + $0xe8] sm:$0xff]   ;;  %v1369_v31 = vld [vmem:[%s1852_s0 + $0xf0] sm:$0xff]   ;;  %v1370_v32 = vld [vmem:[%s1852_s0 + $0x78] sm:$0xff]  }
   0xc   :  { %v1371_v33 = vld [vmem:[%s1852_s0 + $0xf8] sm:$0xff]   ;;  %v1529_v34 = vld [vmem:[%s1853_s2] ss:$0 sm:$0xff] }
  0x12   :  { %1275 = vmatmul.mubr.msk.bf16.gmra.mxu0 %vm262_vm0, %v1346_v8  ;;  %1307 = vmatmul.mubr.msk.bf16.gmra.mxu1 %vm262_vm0, %v1347_v9 }
  0x13   :  { %1278 = vmatprep.mubr.msk.bf16.mxu0 %vm262_vm0, %v1348_v10  ;;  %1310 = vmatprep.mubr.msk.bf16.mxu1 %vm262_vm0, %v1349_v11 }
  0x1a   :  { %1279 = vmatmul.mubr.msk.bf16.gmra.mxu0 %vm262_vm0, %v1350_v12  ;;  %1311 = vmatmul.mubr.msk.bf16.gmra.mxu1 %vm262_vm0, %v1351_v13 }
  0x1b   :  { %1282 = vmatprep.mubr.msk.bf16.mxu0 %vm262_vm0, %v1352_v14  ;;  %1314 = vmatprep.mubr.msk.bf16.mxu1 %vm262_vm0, %v1353_v15 }
  0x22   :  { %1283 = vmatmul.mubr.msk.bf16.gmra.mxu0 %vm262_vm0, %v1354_v16  ;;  %1315 = vmatmul.mubr.msk.bf16.gmra.mxu1 %vm262_vm0, %v1355_v17 }
  0x23   :  { %1286 = vmatprep.mubr.msk.bf16.mxu0 %vm262_vm0, %v1356_v18  ;;  %1318 = vmatprep.mubr.msk.bf16.mxu1 %vm262_vm0, %v1357_v19 }
  0x2a   :  { %1287 = vmatmul.mubr.msk.bf16.gmra.mxu0 %vm262_vm0, %v1358_v20  ;;  %1319 = vmatmul.mubr.msk.bf16.gmra.mxu1 %vm262_vm0, %v1359_v21 }
  0x2b   :  { %1290 = vmatprep.mubr.msk.bf16.mxu0 %vm262_vm0, %v1360_v22  ;;  %1322 = vmatprep.mubr.msk.bf16.mxu1 %vm262_vm0, %v1361_v23 }
  0x32   :  { %1291 = vmatmul.mubr.msk.bf16.gmra.mxu0 %vm262_vm0, %v1362_v24  ;;  %1323 = vmatmul.mubr.msk.bf16.gmra.mxu1 %vm262_vm0, %v1363_v25 }
  0x33   :  { %1294 = vmatprep.mubr.msk.bf16.mxu0 %vm262_vm0, %v1364_v26  ;;  %1326 = vmatprep.mubr.msk.bf16.mxu1 %vm262_vm0, %v1365_v27 }
  0x3a   :  { %1295 = vmatmul.mubr.msk.bf16.gmra.mxu0 %vm262_vm0, %v1366_v28  ;;  %1327 = vmatmul.mubr.msk.bf16.gmra.mxu1 %vm262_vm0, %v1367_v29 }
  0x3b   :  { %1298 = vmatprep.mubr.msk.bf16.mxu0 %vm262_vm0, %v1368_v30  ;;  %1330 = vmatprep.mubr.msk.bf16.mxu1 %vm262_vm0, %v1369_v31 }
  0x42   :  { %1299 = vmatmul.mubr.msk.bf16.gmra.mxu0 %vm262_vm0, %v1370_v32  ;;  %1331 = vmatmul.mubr.msk.bf16.gmra.mxu1 %vm262_vm0, %v1371_v33 }
  0xca   :  { %v1272_v35 = vpop.f32.mrf.mxu0  ;;  %v1304_v36 = vpop.f32.mrf.mxu1 }
  0xcb   :  { %v402_v37 = vadd.f32 %v1272_v35, %v1529_v34  ;;  %v530_v38 = vadd.f32 %v1304_v36, %v1529_v34 }
  0xcc   :  { %v393_v39 = vpop.f32.mrf.mxu0  ;;  %v521_v40 = vpop.f32.mrf.mxu1 }
  0xcd   :  { %v650_v41 = vmax.f32 %v402_v37, 0.0  ;;  %v682_v42 = vmax.f32 %v530_v38, 0.0  ;;  %v394_v43 = vadd.f32 %v1529_v34, %v393_v39  ;;  %v522_v44 = vadd.f32 %v1529_v34, %v521_v40 }
  0xce   :  { %v1273_v45 = vpop.f32.mrf.mxu0  ;;  %v1305_v46 = vpop.f32.mrf.mxu1 }
  0xcf   :  { %v1170_v47 = vpack.c.bf16 %v650_v41, %v650_v41  ;;  %v1202_v48 = vpack.c.bf16 %v682_v42, %v682_v42  ;;  %v648_v49 = vmax.f32 %v394_v43, 0.0  ;;  %v680_v50 = vmax.f32 %v522_v44, 0.0 }
  0xd0   :  { %v405_v51 = vadd.f32 %v1273_v45, %v1529_v34  ;;  %v533_v52 = vadd.f32 %v1305_v46, %v1529_v34  ;;  %v396_v53 = vpop.f32.mrf.mxu0  ;;  %v524_v54 = vpop.f32.mrf.mxu1 }
  0xd1   :  { %971 = vst.msk [vmem:[%s1854_s3 + $0x8] sm:$0xf] %vm968_vm1, %v1170_v47  ;;  %1003 = vst.msk [vmem:[%s1854_s3 + $0x88] sm:$0xf] %vm968_vm1, %v1202_v48  ;;  %v1168_v55 = vpack.c.bf16 %v648_v49, %v648_v49  ;;  %v1200_v56 = vpack.c.bf16 %v680_v50, %v680_v50  ;;  %v397_v57 = vadd.f32 %v1529_v34, %v396_v53 }
  0xd2   :  { %v525_v58 = vadd.f32 %v1529_v34, %v524_v54  ;;  %v651_v59 = vmax.f32 %v405_v51, 0.0  ;;  %v683_v60 = vmax.f32 %v533_v52, 0.0  ;;  %v1276_v61 = vpop.f32.mrf.mxu0  ;;  %v1308_v62 = vpop.f32.mrf.mxu1 }
  0xd3   :  { %969 = vst.msk [vmem:[%s1854_s3] sm:$0xf] %vm968_vm1, %v1168_v55  ;;  %1001 = vst.msk [vmem:[%s1854_s3 + $0x80] sm:$0xf] %vm968_vm1, %v1200_v56  ;;  %v649_v63 = vmax.f32 %v397_v57, 0.0  ;;  %v418_v1 = vadd.f32 %v1276_v61, %v1529_v34  ;;  %v546_v2 = vadd.f32 %v1308_v62, %v1529_v34 }
  0xd4   :  { %v681_v0 = vmax.f32 %v525_v58, 0.0  ;;  %v1171_v3 = vpack.c.bf16 %v651_v59, %v651_v59  ;;  %v1203_v4 = vpack.c.bf16 %v683_v60, %v683_v60  ;;  %v409_v5 = vpop.f32.mrf.mxu0  ;;  %v537_v6 = vpop.f32.mrf.mxu1 }
  0xd5   :  { %v1169_v7 = vpack.c.bf16 %v649_v63, %v649_v63  ;;  %v654_v9 = vmax.f32 %v418_v1, 0.0  ;;  %v686_v10 = vmax.f32 %v546_v2, 0.0  ;;  %v410_v11 = vadd.f32 %v1529_v34, %v409_v5 }
  0xd6   :  { %v1201_v8 = vpack.c.bf16 %v681_v0, %v681_v0  ;;  %972 = vst.msk [vmem:[%s1854_s3 + $0xc] sm:$0xf] %vm968_vm1, %v1171_v3  ;;  %1004 = vst.msk [vmem:[%s1854_s3 + $0x8c] sm:$0xf] %vm968_vm1, %v1203_v4  ;;  %v538_v12 = vadd.f32 %v1529_v34, %v537_v6  ;;  %v1277_v13 = vpop.f32.mrf.mxu0  ;;  %v1309_v14 = vpop.f32.mrf.mxu1 }
  0xd7   :  { %970 = vst.msk [vmem:[%s1854_s3 + $0x4] sm:$0xf] %vm968_vm1, %v1169_v7  ;;  %v1174_v15 = vpack.c.bf16 %v654_v9, %v654_v9  ;;  %v1206_v16 = vpack.c.bf16 %v686_v10, %v686_v10  ;;  %v421_v17 = vadd.f32 %v1277_v13, %v1529_v34  ;;  %v549_v18 = vadd.f32 %v1309_v14, %v1529_v34 }
  0xd8   :  { %1002 = vst.msk [vmem:[%s1854_s3 + $0x84] sm:$0xf] %vm968_vm1, %v1201_v8  ;;  %v652_v19 = vmax.f32 %v410_v11, 0.0  ;;  %v684_v20 = vmax.f32 %v538_v12, 0.0  ;;  %v412_v21 = vpop.f32.mrf.mxu0  ;;  %v540_v22 = vpop.f32.mrf.mxu1 }
  0xd9   :  { %975 = vst.msk [vmem:[%s1854_s3 + $0x18] sm:$0xf] %vm968_vm1, %v1174_v15  ;;  %1007 = vst.msk [vmem:[%s1854_s3 + $0x98] sm:$0xf] %vm968_vm1, %v1206_v16  ;;  %v655_v23 = vmax.f32 %v421_v17, 0.0  ;;  %v687_v24 = vmax.f32 %v549_v18, 0.0  ;;  %v413_v25 = vadd.f32 %v1529_v34, %v412_v21  ;;  %v541_v26 = vadd.f32 %v1529_v34, %v540_v22 }
  0xda   :  { %v1172_v27 = vpack.c.bf16 %v652_v19, %v652_v19  ;;  %v1204_v28 = vpack.c.bf16 %v684_v20, %v684_v20  ;;  %v1280_v29 = vpop.f32.mrf.mxu0  ;;  %v1312_v30 = vpop.f32.mrf.mxu1 }
  0xdb   :  { %v1175_v31 = vpack.c.bf16 %v655_v23, %v655_v23  ;;  %v1207_v32 = vpack.c.bf16 %v687_v24, %v687_v24  ;;  %v653_v33 = vmax.f32 %v413_v25, 0.0  ;;  %v685_v35 = vmax.f32 %v541_v26, 0.0 }
  0xdc   :  { %973 = vst.msk [vmem:[%s1854_s3 + $0x10] sm:$0xf] %vm968_vm1, %v1172_v27  ;;  %1005 = vst.msk [vmem:[%s1854_s3 + $0x90] sm:$0xf] %vm968_vm1, %v1204_v28  ;;  %v434_v36 = vadd.f32 %v1280_v29, %v1529_v34  ;;  %v562_v37 = vadd.f32 %v1312_v30, %v1529_v34  ;;  %v425_v38 = vpop.f32.mrf.mxu0  ;;  %v553_v39 = vpop.f32.mrf.mxu1 }
  0xdd   :  { %976 = vst.msk [vmem:[%s1854_s3 + $0x1c] sm:$0xf] %vm968_vm1, %v1175_v31  ;;  %1008 = vst.msk [vmem:[%s1854_s3 + $0x9c] sm:$0xf] %vm968_vm1, %v1207_v32  ;;  %v1173_v40 = vpack.c.bf16 %v653_v33, %v653_v33  ;;  %v1205_v41 = vpack.c.bf16 %v685_v35, %v685_v35  ;;  %v426_v42 = vadd.f32 %v1529_v34, %v425_v38 }
  0xde   :  { %v554_v43 = vadd.f32 %v1529_v34, %v553_v39  ;;  %v658_v44 = vmax.f32 %v434_v36, 0.0  ;;  %v690_v45 = vmax.f32 %v562_v37, 0.0  ;;  %v1281_v46 = vpop.f32.mrf.mxu0  ;;  %v1313_v47 = vpop.f32.mrf.mxu1 }
  0xdf   :  { %974 = vst.msk [vmem:[%s1854_s3 + $0x14] sm:$0xf] %vm968_vm1, %v1173_v40  ;;  %1006 = vst.msk [vmem:[%s1854_s3 + $0x94] sm:$0xf] %vm968_vm1, %v1205_v41  ;;  %v656_v48 = vmax.f32 %v426_v42, 0.0  ;;  %v437_v50 = vadd.f32 %v1281_v46, %v1529_v34  ;;  %v565_v51 = vadd.f32 %v1313_v47, %v1529_v34 }
  0xe0   :  { %v688_v49 = vmax.f32 %v554_v43, 0.0  ;;  %v1178_v52 = vpack.c.bf16 %v658_v44, %v658_v44  ;;  %v1210_v53 = vpack.c.bf16 %v690_v45, %v690_v45  ;;  %v428_v54 = vpop.f32.mrf.mxu0  ;;  %v556_v55 = vpop.f32.mrf.mxu1 }
  0xe1   :  { %v1176_v56 = vpack.c.bf16 %v656_v48, %v656_v48  ;;  %v659_v58 = vmax.f32 %v437_v50, 0.0  ;;  %v691_v59 = vmax.f32 %v565_v51, 0.0  ;;  %v429_v60 = vadd.f32 %v1529_v34, %v428_v54 }
  0xe2   :  { %v1208_v57 = vpack.c.bf16 %v688_v49, %v688_v49  ;;  %979 = vst.msk [vmem:[%s1854_s3 + $0x28] sm:$0xf] %vm968_vm1, %v1178_v52  ;;  %1011 = vst.msk [vmem:[%s1854_s3 + $0xa8] sm:$0xf] %vm968_vm1, %v1210_v53  ;;  %v557_v61 = vadd.f32 %v1529_v34, %v556_v55  ;;  %v1284_v62 = vpop.f32.mrf.mxu0  ;;  %v1316_v63 = vpop.f32.mrf.mxu1 }
  0xe3   :  { %977 = vst.msk [vmem:[%s1854_s3 + $0x20] sm:$0xf] %vm968_vm1, %v1176_v56  ;;  %v1179_v0 = vpack.c.bf16 %v659_v58, %v659_v58  ;;  %v1211_v1 = vpack.c.bf16 %v691_v59, %v691_v59  ;;  %v450_v2 = vadd.f32 %v1284_v62, %v1529_v34  ;;  %v578_v3 = vadd.f32 %v1316_v63, %v1529_v34 }
  0xe4   :  { %1009 = vst.msk [vmem:[%s1854_s3 + $0xa0] sm:$0xf] %vm968_vm1, %v1208_v57  ;;  %v657_v4 = vmax.f32 %v429_v60, 0.0  ;;  %v689_v5 = vmax.f32 %v557_v61, 0.0  ;;  %v441_v6 = vpop.f32.mrf.mxu0  ;;  %v569_v7 = vpop.f32.mrf.mxu1 }
  0xe5   :  { %980 = vst.msk [vmem:[%s1854_s3 + $0x2c] sm:$0xf] %vm968_vm1, %v1179_v0  ;;  %1012 = vst.msk [vmem:[%s1854_s3 + $0xac] sm:$0xf] %vm968_vm1, %v1211_v1  ;;  %v662_v8 = vmax.f32 %v450_v2, 0.0  ;;  %v694_v9 = vmax.f32 %v578_v3, 0.0  ;;  %v442_v10 = vadd.f32 %v1529_v34, %v441_v6  ;;  %v570_v11 = vadd.f32 %v1529_v34, %v569_v7 }
  0xe6   :  { %v1177_v12 = vpack.c.bf16 %v657_v4, %v657_v4  ;;  %v1209_v13 = vpack.c.bf16 %v689_v5, %v689_v5  ;;  %v1285_v14 = vpop.f32.mrf.mxu0  ;;  %v1317_v15 = vpop.f32.mrf.mxu1 }
  0xe7   :  { %v1182_v16 = vpack.c.bf16 %v662_v8, %v662_v8  ;;  %v1214_v17 = vpack.c.bf16 %v694_v9, %v694_v9  ;;  %v660_v18 = vmax.f32 %v442_v10, 0.0  ;;  %v692_v19 = vmax.f32 %v570_v11, 0.0 }
  0xe8   :  { %978 = vst.msk [vmem:[%s1854_s3 + $0x24] sm:$0xf] %vm968_vm1, %v1177_v12  ;;  %1010 = vst.msk [vmem:[%s1854_s3 + $0xa4] sm:$0xf] %vm968_vm1, %v1209_v13  ;;  %v453_v20 = vadd.f32 %v1285_v14, %v1529_v34  ;;  %v581_v21 = vadd.f32 %v1317_v15, %v1529_v34  ;;  %v444_v22 = vpop.f32.mrf.mxu0  ;;  %v572_v23 = vpop.f32.mrf.mxu1 }
  0xe9   :  { %983 = vst.msk [vmem:[%s1854_s3 + $0x38] sm:$0xf] %vm968_vm1, %v1182_v16  ;;  %1015 = vst.msk [vmem:[%s1854_s3 + $0xb8] sm:$0xf] %vm968_vm1, %v1214_v17  ;;  %v1180_v24 = vpack.c.bf16 %v660_v18, %v660_v18  ;;  %v1212_v25 = vpack.c.bf16 %v692_v19, %v692_v19  ;;  %v445_v26 = vadd.f32 %v1529_v34, %v444_v22 }
  0xea   :  { %v573_v27 = vadd.f32 %v1529_v34, %v572_v23  ;;  %v663_v28 = vmax.f32 %v453_v20, 0.0  ;;  %v695_v29 = vmax.f32 %v581_v21, 0.0  ;;  %v1288_v30 = vpop.f32.mrf.mxu0  ;;  %v1320_v31 = vpop.f32.mrf.mxu1 }
  0xeb   :  { %981 = vst.msk [vmem:[%s1854_s3 + $0x30] sm:$0xf] %vm968_vm1, %v1180_v24  ;;  %1013 = vst.msk [vmem:[%s1854_s3 + $0xb0] sm:$0xf] %vm968_vm1, %v1212_v25  ;;  %v661_v32 = vmax.f32 %v445_v26, 0.0  ;;  %v466_v35 = vadd.f32 %v1288_v30, %v1529_v34  ;;  %v594_v36 = vadd.f32 %v1320_v31, %v1529_v34 }
  0xec   :  { %v693_v33 = vmax.f32 %v573_v27, 0.0  ;;  %v1183_v37 = vpack.c.bf16 %v663_v28, %v663_v28  ;;  %v1215_v38 = vpack.c.bf16 %v695_v29, %v695_v29  ;;  %v457_v39 = vpop.f32.mrf.mxu0  ;;  %v585_v40 = vpop.f32.mrf.mxu1 }
  0xed   :  { %v1181_v41 = vpack.c.bf16 %v661_v32, %v661_v32  ;;  %v666_v43 = vmax.f32 %v466_v35, 0.0  ;;  %v698_v44 = vmax.f32 %v594_v36, 0.0  ;;  %v458_v45 = vadd.f32 %v1529_v34, %v457_v39 }
  0xee   :  { %v1213_v42 = vpack.c.bf16 %v693_v33, %v693_v33  ;;  %984 = vst.msk [vmem:[%s1854_s3 + $0x3c] sm:$0xf] %vm968_vm1, %v1183_v37  ;;  %1016 = vst.msk [vmem:[%s1854_s3 + $0xbc] sm:$0xf] %vm968_vm1, %v1215_v38  ;;  %v586_v46 = vadd.f32 %v1529_v34, %v585_v40  ;;  %v1289_v47 = vpop.f32.mrf.mxu0  ;;  %v1321_v48 = vpop.f32.mrf.mxu1 }
  0xef   :  { %982 = vst.msk [vmem:[%s1854_s3 + $0x34] sm:$0xf] %vm968_vm1, %v1181_v41  ;;  %v1186_v49 = vpack.c.bf16 %v666_v43, %v666_v43  ;;  %v1218_v50 = vpack.c.bf16 %v698_v44, %v698_v44  ;;  %v469_v51 = vadd.f32 %v1289_v47, %v1529_v34  ;;  %v597_v52 = vadd.f32 %v1321_v48, %v1529_v34 }
  0xf0   :  { %1014 = vst.msk [vmem:[%s1854_s3 + $0xb4] sm:$0xf] %vm968_vm1, %v1213_v42  ;;  %v664_v53 = vmax.f32 %v458_v45, 0.0  ;;  %v696_v54 = vmax.f32 %v586_v46, 0.0  ;;  %v460_v55 = vpop.f32.mrf.mxu0  ;;  %v588_v56 = vpop.f32.mrf.mxu1 }
  0xf1   :  { %987 = vst.msk [vmem:[%s1854_s3 + $0x48] sm:$0xf] %vm968_vm1, %v1186_v49  ;;  %1019 = vst.msk [vmem:[%s1854_s3 + $0xc8] sm:$0xf] %vm968_vm1, %v1218_v50  ;;  %v667_v57 = vmax.f32 %v469_v51, 0.0  ;;  %v699_v58 = vmax.f32 %v597_v52, 0.0  ;;  %v461_v59 = vadd.f32 %v1529_v34, %v460_v55  ;;  %v589_v60 = vadd.f32 %v1529_v34, %v588_v56 }
  0xf2   :  { %v1184_v61 = vpack.c.bf16 %v664_v53, %v664_v53  ;;  %v1216_v62 = vpack.c.bf16 %v696_v54, %v696_v54  ;;  %v1292_v63 = vpop.f32.mrf.mxu0  ;;  %v1324_v0 = vpop.f32.mrf.mxu1 }
  0xf3   :  { %v1187_v1 = vpack.c.bf16 %v667_v57, %v667_v57  ;;  %v1219_v2 = vpack.c.bf16 %v699_v58, %v699_v58  ;;  %v665_v3 = vmax.f32 %v461_v59, 0.0  ;;  %v697_v4 = vmax.f32 %v589_v60, 0.0 }
  0xf4   :  { %985 = vst.msk [vmem:[%s1854_s3 + $0x40] sm:$0xf] %vm968_vm1, %v1184_v61  ;;  %1017 = vst.msk [vmem:[%s1854_s3 + $0xc0] sm:$0xf] %vm968_vm1, %v1216_v62  ;;  %v482_v5 = vadd.f32 %v1292_v63, %v1529_v34  ;;  %v610_v6 = vadd.f32 %v1324_v0, %v1529_v34  ;;  %v473_v7 = vpop.f32.mrf.mxu0  ;;  %v601_v8 = vpop.f32.mrf.mxu1 }
  0xf5   :  { %988 = vst.msk [vmem:[%s1854_s3 + $0x4c] sm:$0xf] %vm968_vm1, %v1187_v1  ;;  %1020 = vst.msk [vmem:[%s1854_s3 + $0xcc] sm:$0xf] %vm968_vm1, %v1219_v2  ;;  %v1185_v9 = vpack.c.bf16 %v665_v3, %v665_v3  ;;  %v1217_v10 = vpack.c.bf16 %v697_v4, %v697_v4  ;;  %v474_v11 = vadd.f32 %v1529_v34, %v473_v7 }
  0xf6   :  { %v602_v12 = vadd.f32 %v1529_v34, %v601_v8  ;;  %v670_v13 = vmax.f32 %v482_v5, 0.0  ;;  %v702_v14 = vmax.f32 %v610_v6, 0.0  ;;  %v1293_v15 = vpop.f32.mrf.mxu0  ;;  %v1325_v16 = vpop.f32.mrf.mxu1 }
  0xf7   :  { %986 = vst.msk [vmem:[%s1854_s3 + $0x44] sm:$0xf] %vm968_vm1, %v1185_v9  ;;  %1018 = vst.msk [vmem:[%s1854_s3 + $0xc4] sm:$0xf] %vm968_vm1, %v1217_v10  ;;  %v668_v17 = vmax.f32 %v474_v11, 0.0  ;;  %v485_v19 = vadd.f32 %v1293_v15, %v1529_v34  ;;  %v613_v20 = vadd.f32 %v1325_v16, %v1529_v34 }
  0xf8   :  { %v700_v18 = vmax.f32 %v602_v12, 0.0  ;;  %v1190_v21 = vpack.c.bf16 %v670_v13, %v670_v13  ;;  %v1222_v22 = vpack.c.bf16 %v702_v14, %v702_v14  ;;  %v476_v23 = vpop.f32.mrf.mxu0  ;;  %v604_v24 = vpop.f32.mrf.mxu1 }
  0xf9   :  { %v1188_v25 = vpack.c.bf16 %v668_v17, %v668_v17  ;;  %v671_v27 = vmax.f32 %v485_v19, 0.0  ;;  %v703_v28 = vmax.f32 %v613_v20, 0.0  ;;  %v477_v29 = vadd.f32 %v1529_v34, %v476_v23 }
  0xfa   :  { %v1220_v26 = vpack.c.bf16 %v700_v18, %v700_v18  ;;  %991 = vst.msk [vmem:[%s1854_s3 + $0x58] sm:$0xf] %vm968_vm1, %v1190_v21  ;;  %1023 = vst.msk [vmem:[%s1854_s3 + $0xd8] sm:$0xf] %vm968_vm1, %v1222_v22  ;;  %v605_v30 = vadd.f32 %v1529_v34, %v604_v24  ;;  %v1296_v31 = vpop.f32.mrf.mxu0  ;;  %v1328_v32 = vpop.f32.mrf.mxu1 }
  0xfb   :  { %989 = vst.msk [vmem:[%s1854_s3 + $0x50] sm:$0xf] %vm968_vm1, %v1188_v25  ;;  %v1191_v33 = vpack.c.bf16 %v671_v27, %v671_v27  ;;  %v1223_v35 = vpack.c.bf16 %v703_v28, %v703_v28  ;;  %v498_v36 = vadd.f32 %v1296_v31, %v1529_v34  ;;  %v626_v37 = vadd.f32 %v1328_v32, %v1529_v34 }
  0xfc   :  { %1021 = vst.msk [vmem:[%s1854_s3 + $0xd0] sm:$0xf] %vm968_vm1, %v1220_v26  ;;  %v669_v38 = vmax.f32 %v477_v29, 0.0  ;;  %v701_v39 = vmax.f32 %v605_v30, 0.0  ;;  %v489_v40 = vpop.f32.mrf.mxu0  ;;  %v617_v41 = vpop.f32.mrf.mxu1 }
  0xfd   :  { %992 = vst.msk [vmem:[%s1854_s3 + $0x5c] sm:$0xf] %vm968_vm1, %v1191_v33  ;;  %1024 = vst.msk [vmem:[%s1854_s3 + $0xdc] sm:$0xf] %vm968_vm1, %v1223_v35  ;;  %v674_v42 = vmax.f32 %v498_v36, 0.0  ;;  %v706_v43 = vmax.f32 %v626_v37, 0.0  ;;  %v490_v44 = vadd.f32 %v1529_v34, %v489_v40  ;;  %v618_v45 = vadd.f32 %v1529_v34, %v617_v41 }
  0xfe   :  { %v1189_v46 = vpack.c.bf16 %v669_v38, %v669_v38  ;;  %v1221_v47 = vpack.c.bf16 %v701_v39, %v701_v39  ;;  %v1297_v48 = vpop.f32.mrf.mxu0  ;;  %v1329_v49 = vpop.f32.mrf.mxu1 }
  0xff   :  { %v1194_v50 = vpack.c.bf16 %v674_v42, %v674_v42  ;;  %v1226_v51 = vpack.c.bf16 %v706_v43, %v706_v43  ;;  %v672_v52 = vmax.f32 %v490_v44, 0.0  ;;  %v704_v53 = vmax.f32 %v618_v45, 0.0 }
 0x100   :  { %990 = vst.msk [vmem:[%s1854_s3 + $0x54] sm:$0xf] %vm968_vm1, %v1189_v46  ;;  %1022 = vst.msk [vmem:[%s1854_s3 + $0xd4] sm:$0xf] %vm968_vm1, %v1221_v47  ;;  %v501_v54 = vadd.f32 %v1297_v48, %v1529_v34  ;;  %v629_v55 = vadd.f32 %v1329_v49, %v1529_v34  ;;  %v492_v56 = vpop.f32.mrf.mxu0  ;;  %v620_v57 = vpop.f32.mrf.mxu1 }
 0x101   :  { %995 = vst.msk [vmem:[%s1854_s3 + $0x68] sm:$0xf] %vm968_vm1, %v1194_v50  ;;  %1027 = vst.msk [vmem:[%s1854_s3 + $0xe8] sm:$0xf] %vm968_vm1, %v1226_v51  ;;  %v1192_v58 = vpack.c.bf16 %v672_v52, %v672_v52  ;;  %v1224_v59 = vpack.c.bf16 %v704_v53, %v704_v53  ;;  %v493_v60 = vadd.f32 %v1529_v34, %v492_v56 }
 0x102   :  { %v621_v61 = vadd.f32 %v1529_v34, %v620_v57  ;;  %v675_v62 = vmax.f32 %v501_v54, 0.0  ;;  %v707_v63 = vmax.f32 %v629_v55, 0.0  ;;  %v1300_v0 = vpop.f32.mrf.mxu0  ;;  %v1332_v1 = vpop.f32.mrf.mxu1 }
 0x103   :  { %993 = vst.msk [vmem:[%s1854_s3 + $0x60] sm:$0xf] %vm968_vm1, %v1192_v58  ;;  %1025 = vst.msk [vmem:[%s1854_s3 + $0xe0] sm:$0xf] %vm968_vm1, %v1224_v59  ;;  %v673_v2 = vmax.f32 %v493_v60, 0.0  ;;  %v514_v4 = vadd.f32 %v1300_v0, %v1529_v34  ;;  %v642_v5 = vadd.f32 %v1332_v1, %v1529_v34 }
 0x104   :  { %v705_v3 = vmax.f32 %v621_v61, 0.0  ;;  %v1195_v6 = vpack.c.bf16 %v675_v62, %v675_v62  ;;  %v1227_v7 = vpack.c.bf16 %v707_v63, %v707_v63  ;;  %v505_v8 = vpop.f32.mrf.mxu0  ;;  %v633_v9 = vpop.f32.mrf.mxu1 }
 0x105   :  { %v1193_v10 = vpack.c.bf16 %v673_v2, %v673_v2  ;;  %v678_v12 = vmax.f32 %v514_v4, 0.0  ;;  %v710_v13 = vmax.f32 %v642_v5, 0.0  ;;  %v506_v14 = vadd.f32 %v1529_v34, %v505_v8 }
 0x106   :  { %v1225_v11 = vpack.c.bf16 %v705_v3, %v705_v3  ;;  %996 = vst.msk [vmem:[%s1854_s3 + $0x6c] sm:$0xf] %vm968_vm1, %v1195_v6  ;;  %1028 = vst.msk [vmem:[%s1854_s3 + $0xec] sm:$0xf] %vm968_vm1, %v1227_v7  ;;  %v634_v15 = vadd.f32 %v1529_v34, %v633_v9  ;;  %v1301_v16 = vpop.f32.mrf.mxu0  ;;  %v1333_v17 = vpop.f32.mrf.mxu1 }
 0x107   :  { %994 = vst.msk [vmem:[%s1854_s3 + $0x64] sm:$0xf] %vm968_vm1, %v1193_v10  ;;  %v1198_v18 = vpack.c.bf16 %v678_v12, %v678_v12  ;;  %v1230_v19 = vpack.c.bf16 %v710_v13, %v710_v13  ;;  %v517_v20 = vadd.f32 %v1301_v16, %v1529_v34  ;;  %v645_v21 = vadd.f32 %v1333_v17, %v1529_v34 }
 0x108   :  { %1026 = vst.msk [vmem:[%s1854_s3 + $0xe4] sm:$0xf] %vm968_vm1, %v1225_v11  ;;  %v676_v22 = vmax.f32 %v506_v14, 0.0  ;;  %v708_v23 = vmax.f32 %v634_v15, 0.0  ;;  %v508_v24 = vpop.f32.mrf.mxu0  ;;  %v636_v25 = vpop.f32.mrf.mxu1 }
 0x109   :  { %999 = vst.msk [vmem:[%s1854_s3 + $0x78] sm:$0xf] %vm968_vm1, %v1198_v18  ;;  %1031 = vst.msk [vmem:[%s1854_s3 + $0xf8] sm:$0xf] %vm968_vm1, %v1230_v19  ;;  %v679_v26 = vmax.f32 %v517_v20, 0.0  ;;  %v711_v27 = vmax.f32 %v645_v21, 0.0  ;;  %v509_v28 = vadd.f32 %v1529_v34, %v508_v24  ;;  %v637_v29 = vadd.f32 %v1529_v34, %v636_v25 }
 0x10a   :  { %v1196_v30 = vpack.c.bf16 %v676_v22, %v676_v22  ;;  %v1228_v31 = vpack.c.bf16 %v708_v23, %v708_v23 }
 0x10b   :  { %v1199_v32 = vpack.c.bf16 %v679_v26, %v679_v26  ;;  %v1231_v33 = vpack.c.bf16 %v711_v27, %v711_v27  ;;  %v677_v35 = vmax.f32 %v509_v28, 0.0  ;;  %v709_v36 = vmax.f32 %v637_v29, 0.0 }
 0x10c   :  { %997 = vst.msk [vmem:[%s1854_s3 + $0x70] sm:$0xf] %vm968_vm1, %v1196_v30  ;;  %1029 = vst.msk [vmem:[%s1854_s3 + $0xf0] sm:$0xf] %vm968_vm1, %v1228_v31 }
 0x10d   :  { %1000 = vst.msk [vmem:[%s1854_s3 + $0x7c] sm:$0xf] %vm968_vm1, %v1199_v32  ;;  %1032 = vst.msk [vmem:[%s1854_s3 + $0xfc] sm:$0xf] %vm968_vm1, %v1231_v33  ;;  %v1197_v34 = vpack.c.bf16 %v677_v35, %v677_v35  ;;  %v1229_v37 = vpack.c.bf16 %v709_v36, %v709_v36 }
 0x10f   :  { %998 = vst.msk [vmem:[%s1854_s3 + $0x74] sm:$0xf] %vm968_vm1, %v1197_v34  ;;  %1030 = vst.msk [vmem:[%s1854_s3 + $0xf4] sm:$0xf] %vm968_vm1, %v1229_v37 }

// kernel: _lambda_.69
= control target key start
LH: loop header
LB: loop body
LE: loop exit
PB: predicated region body
PF: predicated region fallthrough
CT: control target
= control target key end

     0   :  { %v523_v0 = vmov 0   ;;  %vm182_vm0 = vcmask 130048   ;;  %vm384_vm1 = vcmask 125952   ;;  %s712_s1 = inlined_call_operand.vmem [shape: bf16[1,144,16], index: 1, kind: input, shape index: {}]   ;;  %s713_s0 = inlined_call_operand.vmem [shape: bf16[1,128,144], index: 0, kind: input, shape index: {}]   ;;  %s714_s2 = inlined_call_operand.vmem [shape: f32[1,1,16], index: 2, kind: input, shape index: {}]   ;;  %s715_s3 = inlined_call_operand.vmem [shape: bf16[1,128,16], index: 3, kind: output, shape index: {}]  }
   0x1   :  { %207 = vmatprep.subr.bf16.mxu0 %v523_v0  ;;  %471 = vmatprep.subr.bf16.mxu1 %v523_v0  ;;  %v490_v1 = vld [vmem:[%s712_s1 + $0x38] sm:$0xff]   ;;  %v491_v2 = vld [vmem:[%s712_s1 + $0x30] sm:$0xff]   ;;  %v492_v3 = vld [vmem:[%s712_s1 + $0x28] sm:$0xff]  }
   0x2   :  { %208 = vmatpush1.bf16.msra.mxu0 %v490_v1  ;;  %480 = vmatpush1.bf16.msra.mxu1 %v490_v1  ;;  %v493_v4 = vld [vmem:[%s712_s1 + $0x20] sm:$0xff]   ;;  %v494_v7 = vld [vmem:[%s712_s1 + $0x18] sm:$0xff]   ;;  %v495_v8 = vld [vmem:[%s712_s1 + $0x10] sm:$0xff]  }
   0x3   :  { %209 = vmatprep.subr.bf16.mxu0 %v523_v0  ;;  %472 = vmatprep.subr.bf16.mxu1 %v523_v0  ;;  %v501_v5 = vld [vmem:[%s713_s0 + $0x4] ss:$8 sps:$4 sm:$0xff]   ;;  %v499_v12 = vld [vmem:[%s713_s0] ss:$8 sps:$4 sm:$0xff]   ;;  %v505_v14 = vld [vmem:[%s713_s0 + $0x14] ss:$8 sps:$4 sm:$0xff]  }
   0x4   :  { %v504_v6 = vld [vmem:[%s713_s0 + $0x44] ss:$8 sps:$4 sm:$0xff]   ;;  %431 = vmatprep.mubr.msk.bf16.mxu0 %vm182_vm0, %v501_v5  ;;  %v502_v13 = vld [vmem:[%s713_s0 + $0x40] ss:$8 sps:$4 sm:$0xff]   ;;  %v507_v15 = vld [vmem:[%s713_s0 + $0x54] ss:$8 sps:$4 sm:$0xff]  }
   0x5   :  { %435 = vmatprep.mubr.msk.bf16.mxu1 %vm182_vm0, %v504_v6  ;;  %v496_v9 = vld [vmem:[%s712_s1 + $0x8] sm:$0xff]   ;;  %v497_v10 = vld [vmem:[%s712_s1] sm:$0xff]   ;;  %v509_v16 = vld [vmem:[%s713_s0 + $0x10] ss:$8 sps:$4 sm:$0xff]  }
   0x6   :  { %210 = vmatpush1.bf16.msra.mxu0 %v491_v2  ;;  %481 = vmatpush1.bf16.msra.mxu1 %v491_v2  ;;  %v498_v11 = vld [vmem:[%s712_s1 + $0x40] sm:$0xff]   ;;  %v510_v17 = vld [vmem:[%s713_s0 + $0x50] ss:$8 sps:$4 sm:$0xff]   ;;  %v517_v22 = vld [vmem:[%s713_s0 + $0x34] ss:$8 sps:$4 sm:$0xff]  }
   0x7   :  { %211 = vmatprep.subr.bf16.mxu0 %v523_v0  ;;  %473 = vmatprep.subr.bf16.mxu1 %v523_v0  ;;  %v511_v18 = vld [vmem:[%s713_s0 + $0x24] ss:$8 sps:$4 sm:$0xff]   ;;  %v515_v20 = vld [vmem:[%s713_s0 + $0x20] ss:$8 sps:$4 sm:$0xff]   ;;  %v519_v23 = vld [vmem:[%s713_s0 + $0x74] ss:$8 sps:$4 sm:$0xff]  }
   0x8   :  { %v513_v19 = vld [vmem:[%s713_s0 + $0x64] ss:$8 sps:$4 sm:$0xff]   ;;  %v516_v21 = vld [vmem:[%s713_s0 + $0x60] ss:$8 sps:$4 sm:$0xff]   ;;  %v521_v24 = vld [vmem:[%s713_s0 + $0x30] ss:$8 sps:$4 sm:$0xff]  }
   0x9   :  { %v522_v25 = vld [vmem:[%s713_s0 + $0x70] ss:$8 sps:$4 sm:$0xff]   ;;  %v630_v26 = vld [vmem:[%s714_s2] ss:$0 sm:$0xff] }
   0xa   :  { %212 = vmatpush1.bf16.msra.mxu0 %v492_v3  ;;  %482 = vmatpush1.bf16.msra.mxu1 %v492_v3 }
   0xb   :  { %213 = vmatprep.subr.bf16.mxu0 %v523_v0  ;;  %474 = vmatprep.subr.bf16.mxu1 %v523_v0 }
   0xe   :  { %214 = vmatpush1.bf16.msra.mxu0 %v493_v4  ;;  %483 = vmatpush1.bf16.msra.mxu1 %v493_v4 }
   0xf   :  { %215 = vmatprep.subr.bf16.mxu0 %v523_v0  ;;  %475 = vmatprep.subr.bf16.mxu1 %v523_v0 }
  0x12   :  { %216 = vmatpush1.bf16.msra.mxu0 %v494_v7  ;;  %484 = vmatpush1.bf16.msra.mxu1 %v494_v7 }
  0x13   :  { %217 = vmatprep.subr.bf16.mxu0 %v523_v0  ;;  %476 = vmatprep.subr.bf16.mxu1 %v523_v0 }
  0x16   :  { %218 = vmatpush1.bf16.msra.mxu0 %v495_v8  ;;  %485 = vmatpush1.bf16.msra.mxu1 %v495_v8 }
  0x17   :  { %219 = vmatprep.subr.bf16.mxu0 %v523_v0  ;;  %477 = vmatprep.subr.bf16.mxu1 %v523_v0 }
  0x1a   :  { %220 = vmatpush1.bf16.msra.mxu0 %v496_v9  ;;  %486 = vmatpush1.bf16.msra.mxu1 %v496_v9 }
  0x1b   :  { %221 = vmatprep.subr.bf16.mxu0 %v523_v0  ;;  %478 = vmatprep.subr.bf16.mxu1 %v523_v0 }
  0x1e   :  { %222 = vmatpush1.bf16.msra.mxu0 %v497_v10  ;;  %487 = vmatpush1.bf16.msra.mxu1 %v497_v10 }
  0x1f   :  { %237 = vmatprep.subr.bf16.mxu0 %v523_v0  ;;  %479 = vmatprep.subr.bf16.mxu1 %v523_v0 }
  0x22   :  { %238 = vmatpush2.bf16.msra.mxu0 %v498_v11  ;;  %488 = vmatpush2.bf16.msra.mxu1 %v498_v11 }
  0x25   :  { %240 = vmatmul.mubr.bf16.vlgmr.msra.gmra.mxu0 %v499_v12  ;;  %272 = vmatmul.mubr.bf16.vlgmr.msra.gmra.mxu1 %v502_v13 }
  0x26   :  { %432 = vmatprep.mubr.msk.bf16.mxu0 %vm182_vm0, %v505_v14  ;;  %436 = vmatprep.mubr.msk.bf16.mxu1 %vm182_vm0, %v507_v15 }
  0x2d   :  { %248 = vmatmul.mubr.bf16.gmra.mxu0 %v509_v16  ;;  %280 = vmatmul.mubr.bf16.gmra.mxu1 %v510_v17 }
  0x2e   :  { %433 = vmatprep.mubr.msk.bf16.mxu0 %vm182_vm0, %v511_v18  ;;  %437 = vmatprep.mubr.msk.bf16.mxu1 %vm182_vm0, %v513_v19 }
  0x35   :  { %256 = vmatmul.mubr.bf16.gmra.mxu0 %v515_v20  ;;  %288 = vmatmul.mubr.bf16.gmra.mxu1 %v516_v21 }
  0x36   :  { %434 = vmatprep.mubr.msk.bf16.mxu0 %vm182_vm0, %v517_v22  ;;  %438 = vmatprep.mubr.msk.bf16.mxu1 %vm182_vm0, %v519_v23 }
  0x3d   :  { %264 = vmatmul.mubr.bf16.gmra.mxu0 %v521_v24  ;;  %296 = vmatmul.mubr.bf16.gmra.mxu1 %v522_v25 }
  0xe5   :  { %v241_v27 = vpop.f32.mrf.mxu0  ;;  %v273_v28 = vpop.f32.mrf.mxu1 }
  0xe6   :  { %v242_v29 = vadd.f32 %v630_v26, %v241_v27  ;;  %v274_v30 = vadd.f32 %v630_v26, %v273_v28 }
  0xe7   :  { %v243_v31 = vpop.f32.mrf.mxu0  ;;  %v275_v32 = vpop.f32.mrf.mxu1 }
  0xe8   :  { %v304_v33 = vmax.f32 %v242_v29, 0.0  ;;  %v312_v34 = vmax.f32 %v274_v30, 0.0 }
  0xe9   :  { %v244_v35 = vpop.f32.mrf.mxu0  ;;  %v276_v36 = vpop.f32.mrf.mxu1 }
  0xea   :  { %v455_v37 = vpack.c.bf16 %v304_v33, %v304_v33  ;;  %v463_v38 = vpack.c.bf16 %v312_v34, %v312_v34  ;;  %v245_v39 = vadd.f32 %v630_v26, %v244_v35  ;;  %v277_v40 = vadd.f32 %v630_v26, %v276_v36 }
  0xeb   :  { %v246_v41 = vpop.f32.mrf.mxu0  ;;  %v278_v42 = vpop.f32.mrf.mxu1 }
  0xec   :  { %385 = vst.msk [vmem:[%s715_s3] sm:$0xf] %vm384_vm1, %v455_v37  ;;  %393 = vst.msk [vmem:[%s715_s3 + $0x20] sm:$0xf] %vm384_vm1, %v463_v38  ;;  %v305_v43 = vmax.f32 %v245_v39, 0.0  ;;  %v313_v44 = vmax.f32 %v277_v40, 0.0 }
  0xed   :  { %v249_v45 = vpop.f32.mrf.mxu0  ;;  %v281_v46 = vpop.f32.mrf.mxu1 }
  0xee   :  { %v456_v47 = vpack.c.bf16 %v305_v43, %v305_v43  ;;  %v464_v48 = vpack.c.bf16 %v313_v44, %v313_v44  ;;  %v250_v49 = vadd.f32 %v630_v26, %v249_v45  ;;  %v282_v50 = vadd.f32 %v630_v26, %v281_v46 }
  0xef   :  { %v251_v51 = vpop.f32.mrf.mxu0  ;;  %v283_v52 = vpop.f32.mrf.mxu1 }
  0xf0   :  { %386 = vst.msk [vmem:[%s715_s3 + $0x4] sm:$0xf] %vm384_vm1, %v456_v47  ;;  %394 = vst.msk [vmem:[%s715_s3 + $0x24] sm:$0xf] %vm384_vm1, %v464_v48  ;;  %v306_v53 = vmax.f32 %v250_v49, 0.0  ;;  %v314_v54 = vmax.f32 %v282_v50, 0.0 }
  0xf1   :  { %v252_v55 = vpop.f32.mrf.mxu0  ;;  %v284_v56 = vpop.f32.mrf.mxu1 }
  0xf2   :  { %v457_v57 = vpack.c.bf16 %v306_v53, %v306_v53  ;;  %v465_v58 = vpack.c.bf16 %v314_v54, %v314_v54  ;;  %v253_v59 = vadd.f32 %v630_v26, %v252_v55  ;;  %v285_v60 = vadd.f32 %v630_v26, %v284_v56 }
  0xf3   :  { %v254_v61 = vpop.f32.mrf.mxu0  ;;  %v286_v62 = vpop.f32.mrf.mxu1 }
  0xf4   :  { %387 = vst.msk [vmem:[%s715_s3 + $0x8] sm:$0xf] %vm384_vm1, %v457_v57  ;;  %395 = vst.msk [vmem:[%s715_s3 + $0x28] sm:$0xf] %vm384_vm1, %v465_v58  ;;  %v307_v63 = vmax.f32 %v253_v59, 0.0  ;;  %v315_v0 = vmax.f32 %v285_v60, 0.0 }
  0xf5   :  { %v257_v1 = vpop.f32.mrf.mxu0  ;;  %v289_v2 = vpop.f32.mrf.mxu1 }
  0xf6   :  { %v458_v3 = vpack.c.bf16 %v307_v63, %v307_v63  ;;  %v466_v4 = vpack.c.bf16 %v315_v0, %v315_v0  ;;  %v258_v5 = vadd.f32 %v630_v26, %v257_v1  ;;  %v290_v6 = vadd.f32 %v630_v26, %v289_v2 }
  0xf7   :  { %v259_v7 = vpop.f32.mrf.mxu0  ;;  %v291_v8 = vpop.f32.mrf.mxu1 }
  0xf8   :  { %388 = vst.msk [vmem:[%s715_s3 + $0xc] sm:$0xf] %vm384_vm1, %v458_v3  ;;  %396 = vst.msk [vmem:[%s715_s3 + $0x2c] sm:$0xf] %vm384_vm1, %v466_v4  ;;  %v308_v9 = vmax.f32 %v258_v5, 0.0  ;;  %v316_v10 = vmax.f32 %v290_v6, 0.0 }
  0xf9   :  { %v260_v11 = vpop.f32.mrf.mxu0  ;;  %v292_v12 = vpop.f32.mrf.mxu1 }
  0xfa   :  { %v459_v13 = vpack.c.bf16 %v308_v9, %v308_v9  ;;  %v467_v14 = vpack.c.bf16 %v316_v10, %v316_v10  ;;  %v261_v15 = vadd.f32 %v630_v26, %v260_v11  ;;  %v293_v16 = vadd.f32 %v630_v26, %v292_v12 }
  0xfb   :  { %v262_v17 = vpop.f32.mrf.mxu0  ;;  %v294_v18 = vpop.f32.mrf.mxu1 }
  0xfc   :  { %389 = vst.msk [vmem:[%s715_s3 + $0x10] sm:$0xf] %vm384_vm1, %v459_v13  ;;  %397 = vst.msk [vmem:[%s715_s3 + $0x30] sm:$0xf] %vm384_vm1, %v467_v14  ;;  %v309_v19 = vmax.f32 %v261_v15, 0.0  ;;  %v317_v20 = vmax.f32 %v293_v16, 0.0 }
  0xfd   :  { %v265_v21 = vpop.f32.mrf.mxu0  ;;  %v297_v22 = vpop.f32.mrf.mxu1 }
  0xfe   :  { %v460_v23 = vpack.c.bf16 %v309_v19, %v309_v19  ;;  %v468_v24 = vpack.c.bf16 %v317_v20, %v317_v20  ;;  %v266_v25 = vadd.f32 %v630_v26, %v265_v21  ;;  %v298_v27 = vadd.f32 %v630_v26, %v297_v22 }
  0xff   :  { %v267_v28 = vpop.f32.mrf.mxu0  ;;  %v299_v29 = vpop.f32.mrf.mxu1 }
 0x100   :  { %390 = vst.msk [vmem:[%s715_s3 + $0x14] sm:$0xf] %vm384_vm1, %v460_v23  ;;  %398 = vst.msk [vmem:[%s715_s3 + $0x34] sm:$0xf] %vm384_vm1, %v468_v24  ;;  %v310_v30 = vmax.f32 %v266_v25, 0.0  ;;  %v318_v31 = vmax.f32 %v298_v27, 0.0 }
 0x101   :  { %v268_v32 = vpop.f32.mrf.mxu0  ;;  %v300_v33 = vpop.f32.mrf.mxu1 }
 0x102   :  { %v461_v34 = vpack.c.bf16 %v310_v30, %v310_v30  ;;  %v469_v35 = vpack.c.bf16 %v318_v31, %v318_v31  ;;  %v269_v36 = vadd.f32 %v630_v26, %v268_v32  ;;  %v301_v37 = vadd.f32 %v630_v26, %v300_v33 }
 0x103   :  { %v270_v38 = vpop.f32.mrf.mxu0  ;;  %v302_v39 = vpop.f32.mrf.mxu1 }
 0x104   :  { %391 = vst.msk [vmem:[%s715_s3 + $0x18] sm:$0xf] %vm384_vm1, %v461_v34  ;;  %399 = vst.msk [vmem:[%s715_s3 + $0x38] sm:$0xf] %vm384_vm1, %v469_v35  ;;  %v311_v40 = vmax.f32 %v269_v36, 0.0  ;;  %v319_v41 = vmax.f32 %v301_v37, 0.0 }
 0x106   :  { %v462_v42 = vpack.c.bf16 %v311_v40, %v311_v40  ;;  %v470_v43 = vpack.c.bf16 %v319_v41, %v319_v41 }
 0x108   :  { %392 = vst.msk [vmem:[%s715_s3 + $0x1c] sm:$0xf] %vm384_vm1, %v462_v42  ;;  %400 = vst.msk [vmem:[%s715_s3 + $0x3c] sm:$0xf] %vm384_vm1, %v470_v43 }

// kernel: _lambda_.70
= control target key start
LH: loop header
LB: loop body
LE: loop exit
PB: predicated region body
PF: predicated region fallthrough
CT: control target
= control target key end

     0   :  { %vm94_vm0 = vcmask 261120   ;;  %vm280_vm1 = vcmask 519168   ;;  %s521_s1 = inlined_call_operand.vmem [shape: bf16[1,32,64], index: 1, kind: input, shape index: {}]   ;;  %s522_s0 = inlined_call_operand.vmem [shape: bf16[1,128,32], index: 0, kind: input, shape index: {}]   ;;  %s523_s2 = inlined_call_operand.vmem [shape: f32[1,1,64], index: 2, kind: input, shape index: {}]   ;;  %s524_s3 = inlined_call_operand.vmem [shape: bf16[1,128,64], index: 3, kind: output, shape index: {}]  }
   0x1   :  { %v386_v0 = vld [vmem:[%s521_s1 + $0x8] sm:$0xff]   ;;  %v387_v1 = vld [vmem:[%s521_s1] sm:$0xff]   ;;  %v392_v6 = vld [vmem:[%s522_s0 + $0x10] sm:$0xff]  }
   0x2   :  { %362 = vmatprep.subr.bf16.mxu0 %v386_v0  ;;  %382 = vmatprep.subr.bf16.mxu1 %v386_v0  ;;  %v388_v2 = vld [vmem:[%s522_s0] sm:$0xff]   ;;  %v390_v4 = vld [vmem:[%s522_s0 + $0x8] sm:$0xff]   ;;  %v393_v7 = vld [vmem:[%s522_s0 + $0x30] sm:$0xff]  }
   0x3   :  { %363 = vmatpush3.bf16.msra.mxu0 %v386_v0  ;;  %384 = vmatpush3.bf16.msra.mxu1 %v386_v0  ;;  %v389_v3 = vld [vmem:[%s522_s0 + $0x20] sm:$0xff]   ;;  %v391_v5 = vld [vmem:[%s522_s0 + $0x28] sm:$0xff]   ;;  %v394_v8 = vld [vmem:[%s522_s0 + $0x18] sm:$0xff]  }
   0x4   :  { %364 = vmatprep.subr.bf16.mxu0 %v387_v1  ;;  %383 = vmatprep.subr.bf16.mxu1 %v387_v1  ;;  %v395_v9 = vld [vmem:[%s522_s0 + $0x38] sm:$0xff]   ;;  %v301_v10 = vld [vmem:[%s523_s2] ss:$0 sm:$0xff] }
   0x5   :  { %366 = vmatprep.mubr.msk.bf16.mxu0 %vm94_vm0, %v388_v2  ;;  %374 = vmatprep.mubr.msk.bf16.mxu1 %vm94_vm0, %v389_v3 }
   0x7   :  { %365 = vmatpush3.bf16.msra.mxu0 %v387_v1  ;;  %385 = vmatpush3.bf16.msra.mxu1 %v387_v1 }
   0xa   :  { %367 = vmatmul.mubr.msk.bf16.vlgmr.msra.gmra.mxu0 %vm94_vm0, %v390_v4  ;;  %375 = vmatmul.mubr.msk.bf16.vlgmr.msra.gmra.mxu1 %vm94_vm0, %v391_v5 }
   0xb   :  { %370 = vmatprep.mubr.msk.bf16.mxu0 %vm94_vm0, %v392_v6  ;;  %378 = vmatprep.mubr.msk.bf16.mxu1 %vm94_vm0, %v393_v7 }
  0x12   :  { %371 = vmatmul.mubr.msk.bf16.gmra.mxu0 %vm94_vm0, %v394_v8  ;;  %379 = vmatmul.mubr.msk.bf16.gmra.mxu1 %vm94_vm0, %v395_v9 }
  0xca   :  { %v368_v11 = vpop.f32.mrf.mxu0  ;;  %v376_v12 = vpop.f32.mrf.mxu1 }
  0xcb   :  { %v162_v13 = vadd.f32 %v368_v11, %v301_v10  ;;  %v194_v14 = vadd.f32 %v376_v12, %v301_v10 }
  0xcc   :  { %v153_v15 = vpop.f32.mrf.mxu0  ;;  %v185_v16 = vpop.f32.mrf.mxu1 }
  0xcd   :  { %v338_v17 = vpack.c.bf16 %v162_v13, %v162_v13  ;;  %v346_v18 = vpack.c.bf16 %v194_v14, %v194_v14  ;;  %v154_v19 = vadd.f32 %v301_v10, %v153_v15  ;;  %v186_v20 = vadd.f32 %v301_v10, %v185_v16 }
  0xce   :  { %v369_v21 = vpop.f32.mrf.mxu0  ;;  %v377_v22 = vpop.f32.mrf.mxu1 }
  0xcf   :  { %283 = vst.msk [vmem:[%s524_s3 + $0x8] sm:$0xf] %vm280_vm1, %v338_v17  ;;  %291 = vst.msk [vmem:[%s524_s3 + $0x28] sm:$0xf] %vm280_vm1, %v346_v18  ;;  %v336_v23 = vpack.c.bf16 %v154_v19, %v154_v19  ;;  %v344_v24 = vpack.c.bf16 %v186_v20, %v186_v20  ;;  %v165_v25 = vadd.f32 %v369_v21, %v301_v10 }
  0xd0   :  { %v197_v26 = vadd.f32 %v377_v22, %v301_v10  ;;  %v156_v27 = vpop.f32.mrf.mxu0  ;;  %v188_v28 = vpop.f32.mrf.mxu1 }
  0xd1   :  { %281 = vst.msk [vmem:[%s524_s3] sm:$0xf] %vm280_vm1, %v336_v23  ;;  %289 = vst.msk [vmem:[%s524_s3 + $0x20] sm:$0xf] %vm280_vm1, %v344_v24  ;;  %v339_v29 = vpack.c.bf16 %v165_v25, %v165_v25  ;;  %v157_v31 = vadd.f32 %v301_v10, %v156_v27  ;;  %v189_v32 = vadd.f32 %v301_v10, %v188_v28 }
  0xd2   :  { %v347_v30 = vpack.c.bf16 %v197_v26, %v197_v26  ;;  %v372_v33 = vpop.f32.mrf.mxu0  ;;  %v380_v34 = vpop.f32.mrf.mxu1 }
  0xd3   :  { %284 = vst.msk [vmem:[%s524_s3 + $0xc] sm:$0xf] %vm280_vm1, %v339_v29  ;;  %v337_v35 = vpack.c.bf16 %v157_v31, %v157_v31  ;;  %v345_v36 = vpack.c.bf16 %v189_v32, %v189_v32  ;;  %v178_v37 = vadd.f32 %v372_v33, %v301_v10  ;;  %v210_v38 = vadd.f32 %v380_v34, %v301_v10 }
  0xd4   :  { %292 = vst.msk [vmem:[%s524_s3 + $0x2c] sm:$0xf] %vm280_vm1, %v347_v30  ;;  %v169_v39 = vpop.f32.mrf.mxu0  ;;  %v201_v40 = vpop.f32.mrf.mxu1 }
  0xd5   :  { %282 = vst.msk [vmem:[%s524_s3 + $0x4] sm:$0xf] %vm280_vm1, %v337_v35  ;;  %290 = vst.msk [vmem:[%s524_s3 + $0x24] sm:$0xf] %vm280_vm1, %v345_v36  ;;  %v342_v41 = vpack.c.bf16 %v178_v37, %v178_v37  ;;  %v350_v42 = vpack.c.bf16 %v210_v38, %v210_v38  ;;  %v170_v43 = vadd.f32 %v301_v10, %v169_v39 }
  0xd6   :  { %v202_v44 = vadd.f32 %v301_v10, %v201_v40  ;;  %v373_v45 = vpop.f32.mrf.mxu0  ;;  %v381_v46 = vpop.f32.mrf.mxu1 }
  0xd7   :  { %287 = vst.msk [vmem:[%s524_s3 + $0x18] sm:$0xf] %vm280_vm1, %v342_v41  ;;  %295 = vst.msk [vmem:[%s524_s3 + $0x38] sm:$0xf] %vm280_vm1, %v350_v42  ;;  %v340_v47 = vpack.c.bf16 %v170_v43, %v170_v43  ;;  %v181_v49 = vadd.f32 %v373_v45, %v301_v10  ;;  %v213_v50 = vadd.f32 %v381_v46, %v301_v10 }
  0xd8   :  { %v348_v48 = vpack.c.bf16 %v202_v44, %v202_v44  ;;  %v172_v51 = vpop.f32.mrf.mxu0  ;;  %v204_v52 = vpop.f32.mrf.mxu1 }
  0xd9   :  { %285 = vst.msk [vmem:[%s524_s3 + $0x10] sm:$0xf] %vm280_vm1, %v340_v47  ;;  %v343_v53 = vpack.c.bf16 %v181_v49, %v181_v49  ;;  %v351_v54 = vpack.c.bf16 %v213_v50, %v213_v50  ;;  %v173_v55 = vadd.f32 %v301_v10, %v172_v51  ;;  %v205_v56 = vadd.f32 %v301_v10, %v204_v52 }
  0xda   :  { %293 = vst.msk [vmem:[%s524_s3 + $0x30] sm:$0xf] %vm280_vm1, %v348_v48 }
  0xdb   :  { %288 = vst.msk [vmem:[%s524_s3 + $0x1c] sm:$0xf] %vm280_vm1, %v343_v53  ;;  %296 = vst.msk [vmem:[%s524_s3 + $0x3c] sm:$0xf] %vm280_vm1, %v351_v54  ;;  %v341_v57 = vpack.c.bf16 %v173_v55, %v173_v55  ;;  %v349_v58 = vpack.c.bf16 %v205_v56, %v205_v56 }
  0xdd   :  { %286 = vst.msk [vmem:[%s524_s3 + $0x14] sm:$0xf] %vm280_vm1, %v341_v57  ;;  %294 = vst.msk [vmem:[%s524_s3 + $0x34] sm:$0xf] %vm280_vm1, %v349_v58 }

// kernel: _lambda_.71
= control target key start
LH: loop header
LB: loop body
LE: loop exit
PB: predicated region body
PF: predicated region fallthrough
CT: control target
= control target key end

     0   :  { %vm89_vm0 = vcmask 130048   ;;  %vm339_vm1 = vcmask 519168   ;;  %s688_s1 = inlined_call_operand.vmem [shape: bf16[1,16,64], index: 1, kind: input, shape index: {}]   ;;  %s689_s0 = inlined_call_operand.vmem [shape: bf16[1,128,16], index: 0, kind: input, shape index: {}]   ;;  %s690_s3 = inlined_call_operand.vmem [shape: bf16[1,128,64], index: 3, kind: input, shape index: {}]   ;;  %s691_s2 = inlined_call_operand.vmem [shape: f32[1,1,64], index: 2, kind: input, shape index: {}]   ;;  %s692_s4 = inlined_call_operand.vmem [shape: bf16[1,128,64], index: 4, kind: output, shape index: {}]  }
   0x1   :  { %v478_v0 = vld [vmem:[%s688_s1] sm:$0xff]   ;;  %v481_v3 = vld [vmem:[%s689_s0 + $0x8] sm:$0xff]   ;;  %v483_v5 = vld [vmem:[%s689_s0 + $0x10] sm:$0xff]  }
   0x2   :  { %v479_v1 = vld [vmem:[%s689_s0] sm:$0xff]   ;;  %458 = vmatprep.subr.bf16.mxu0 %v478_v0  ;;  %476 = vmatprep.subr.bf16.mxu1 %v478_v0  ;;  %v482_v4 = vld [vmem:[%s689_s0 + $0x28] sm:$0xff]   ;;  %v484_v6 = vld [vmem:[%s689_s0 + $0x30] sm:$0xff]  }
   0x3   :  { %v480_v2 = vld [vmem:[%s689_s0 + $0x20] sm:$0xff]   ;;  %459 = vmatpush3.bf16.msra.mxu0 %v478_v0  ;;  %477 = vmatpush3.bf16.msra.mxu1 %v478_v0  ;;  %v485_v7 = vld [vmem:[%s689_s0 + $0x18] sm:$0xff]   ;;  %v442_v9 = vld [vmem:[%s690_s3 + $0x8] sm:$0xff]  }
   0x4   :  { %460 = vmatprep.mubr.msk.bf16.mxu0 %vm89_vm0, %v479_v1  ;;  %468 = vmatprep.mubr.msk.bf16.mxu1 %vm89_vm0, %v480_v2  ;;  %v486_v8 = vld [vmem:[%s689_s0 + $0x38] sm:$0xff]   ;;  %v446_v10 = vld [vmem:[%s690_s3 + $0x28] sm:$0xff]   ;;  %v556_v11 = vld [vmem:[%s690_s3] sm:$0xff]   ;;  %v416_v14 = vunpack.c.l.bf16 %v442_v9  ;;  %v417_v22 = vunpack.c.h.bf16 %v442_v9 }
   0x5   :  { %v561_v12 = vld [vmem:[%s690_s3 + $0x20] sm:$0xff]   ;;  %v432_v15 = vunpack.c.l.bf16 %v446_v10  ;;  %v571_v16 = vld [vmem:[%s690_s3 + $0x18] sm:$0xff]   ;;  %v412_v20 = vunpack.c.l.bf16 %v556_v11  ;;  %v433_v25 = vunpack.c.h.bf16 %v446_v10  ;;  %v585_v26 = vld [vmem:[%s690_s3 + $0x10] sm:$0xff]   ;;  %v413_v30 = vunpack.c.h.bf16 %v556_v11 }
   0x6   :  { %461 = vmatmul.mubr.msk.bf16.vlgmr.msra.gmra.mxu0 %vm89_vm0, %v481_v3  ;;  %469 = vmatmul.mubr.msk.bf16.vlgmr.msra.gmra.mxu1 %vm89_vm0, %v482_v4  ;;  %v566_v13 = vld [vmem:[%s691_s2] ss:$0 sm:$0xff]  ;;  %v576_v17 = vld [vmem:[%s690_s3 + $0x38] sm:$0xff]   ;;  %v428_v21 = vunpack.c.l.bf16 %v561_v12  ;;  %v590_v27 = vld [vmem:[%s690_s3 + $0x30] sm:$0xff]   ;;  %v429_v31 = vunpack.c.h.bf16 %v561_v12  ;;  %v424_v32 = vunpack.c.l.bf16 %v571_v16  ;;  %v420_v40 = vunpack.c.l.bf16 %v585_v26 }
   0x7   :  { %464 = vmatprep.mubr.msk.bf16.mxu0 %vm89_vm0, %v483_v5  ;;  %472 = vmatprep.mubr.msk.bf16.mxu1 %vm89_vm0, %v484_v6  ;;  %v440_v33 = vunpack.c.l.bf16 %v576_v17  ;;  %v436_v41 = vunpack.c.l.bf16 %v590_v27  ;;  %v425_v42 = vunpack.c.h.bf16 %v571_v16  ;;  %v441_v43 = vunpack.c.h.bf16 %v576_v17 }
   0x8   :  { %v421_v52 = vunpack.c.h.bf16 %v585_v26  ;;  %v437_v53 = vunpack.c.h.bf16 %v590_v27 }
   0xe   :  { %465 = vmatmul.mubr.msk.bf16.gmra.mxu0 %vm89_vm0, %v485_v7  ;;  %473 = vmatmul.mubr.msk.bf16.gmra.mxu1 %vm89_vm0, %v486_v8 }
  0xc6   :  { %v462_v18 = vpop.f32.mrf.mxu0  ;;  %v470_v19 = vpop.f32.mrf.mxu1 }
  0xc7   :  { %v157_v23 = vadd.f32 %v462_v18, %v566_v13  ;;  %v189_v24 = vadd.f32 %v470_v19, %v566_v13 }
  0xc8   :  { %v148_v28 = vpop.f32.mrf.mxu0  ;;  %v180_v29 = vpop.f32.mrf.mxu1 }
  0xc9   :  { %v245_v34 = vadd.f32 %v416_v14, %v157_v23  ;;  %v253_v35 = vadd.f32 %v432_v15, %v189_v24  ;;  %v149_v36 = vadd.f32 %v566_v13, %v148_v28  ;;  %v181_v37 = vadd.f32 %v566_v13, %v180_v29 }
  0xca   :  { %v463_v38 = vpop.f32.mrf.mxu0  ;;  %v471_v39 = vpop.f32.mrf.mxu1 }
  0xcb   :  { %v261_v44 = vmax.f32 %v245_v34, 0.0  ;;  %v269_v45 = vmax.f32 %v253_v35, 0.0  ;;  %v243_v46 = vadd.f32 %v412_v20, %v149_v36  ;;  %v251_v47 = vadd.f32 %v428_v21, %v181_v37 }
  0xcc   :  { %v160_v48 = vadd.f32 %v463_v38, %v566_v13  ;;  %v192_v49 = vadd.f32 %v471_v39, %v566_v13  ;;  %v151_v50 = vpop.f32.mrf.mxu0  ;;  %v183_v51 = vpop.f32.mrf.mxu1 }
  0xcd   :  { %v396_v54 = vpack.c.bf16 %v261_v44, %v261_v44  ;;  %v404_v55 = vpack.c.bf16 %v269_v45, %v269_v45  ;;  %v259_v56 = vmax.f32 %v243_v46, 0.0  ;;  %v267_v57 = vmax.f32 %v251_v47, 0.0 }
  0xce   :  { %v246_v58 = vadd.f32 %v417_v22, %v160_v48  ;;  %v254_v59 = vadd.f32 %v433_v25, %v192_v49  ;;  %v152_v60 = vadd.f32 %v566_v13, %v151_v50  ;;  %v184_v61 = vadd.f32 %v566_v13, %v183_v51  ;;  %v466_v62 = vpop.f32.mrf.mxu0  ;;  %v474_v63 = vpop.f32.mrf.mxu1 }
  0xcf   :  { %342 = vst.msk [vmem:[%s692_s4 + $0x8] sm:$0xf] %vm339_vm1, %v396_v54  ;;  %350 = vst.msk [vmem:[%s692_s4 + $0x28] sm:$0xf] %vm339_vm1, %v404_v55  ;;  %v394_v0 = vpack.c.bf16 %v259_v56, %v259_v56  ;;  %v402_v1 = vpack.c.bf16 %v267_v57, %v267_v57  ;;  %v173_v2 = vadd.f32 %v466_v62, %v566_v13 }
  0xd0   :  { %v205_v3 = vadd.f32 %v474_v63, %v566_v13  ;;  %v262_v4 = vmax.f32 %v246_v58, 0.0  ;;  %v270_v5 = vmax.f32 %v254_v59, 0.0  ;;  %v244_v6 = vadd.f32 %v413_v30, %v152_v60  ;;  %v164_v8 = vpop.f32.mrf.mxu0  ;;  %v196_v9 = vpop.f32.mrf.mxu1 }
  0xd1   :  { %v252_v7 = vadd.f32 %v429_v31, %v184_v61  ;;  %340 = vst.msk [vmem:[%s692_s4] sm:$0xf] %vm339_vm1, %v394_v0  ;;  %348 = vst.msk [vmem:[%s692_s4 + $0x20] sm:$0xf] %vm339_vm1, %v402_v1  ;;  %v249_v10 = vadd.f32 %v424_v32, %v173_v2  ;;  %v165_v12 = vadd.f32 %v566_v13, %v164_v8 }
  0xd2   :  { %v257_v11 = vadd.f32 %v440_v33, %v205_v3  ;;  %v197_v14 = vadd.f32 %v566_v13, %v196_v9  ;;  %v397_v15 = vpack.c.bf16 %v262_v4, %v262_v4  ;;  %v405_v18 = vpack.c.bf16 %v270_v5, %v270_v5  ;;  %v467_v21 = vpop.f32.mrf.mxu0  ;;  %v475_v22 = vpop.f32.mrf.mxu1 }
  0xd3   :  { %v260_v19 = vmax.f32 %v244_v6, 0.0  ;;  %v268_v20 = vmax.f32 %v252_v7, 0.0  ;;  %v265_v23 = vmax.f32 %v249_v10, 0.0  ;;  %v247_v25 = vadd.f32 %v420_v40, %v165_v12 }
  0xd4   :  { %v273_v24 = vmax.f32 %v257_v11, 0.0  ;;  %v255_v28 = vadd.f32 %v436_v41, %v197_v14  ;;  %343 = vst.msk [vmem:[%s692_s4 + $0xc] sm:$0xf] %vm339_vm1, %v397_v15  ;;  %351 = vst.msk [vmem:[%s692_s4 + $0x2c] sm:$0xf] %vm339_vm1, %v405_v18  ;;  %v176_v31 = vadd.f32 %v467_v21, %v566_v13  ;;  %v208_v32 = vadd.f32 %v475_v22, %v566_v13  ;;  %v167_v33 = vpop.f32.mrf.mxu0  ;;  %v199_v34 = vpop.f32.mrf.mxu1 }
  0xd5   :  { %v395_v29 = vpack.c.bf16 %v260_v19, %v260_v19  ;;  %v403_v30 = vpack.c.bf16 %v268_v20, %v268_v20  ;;  %v400_v35 = vpack.c.bf16 %v265_v23, %v265_v23  ;;  %v263_v37 = vmax.f32 %v247_v25, 0.0 }
  0xd6   :  { %v408_v36 = vpack.c.bf16 %v273_v24, %v273_v24  ;;  %v271_v38 = vmax.f32 %v255_v28, 0.0  ;;  %v250_v39 = vadd.f32 %v425_v42, %v176_v31  ;;  %v258_v40 = vadd.f32 %v441_v43, %v208_v32 }
  0xd7   :  { %341 = vst.msk [vmem:[%s692_s4 + $0x4] sm:$0xf] %vm339_vm1, %v395_v29  ;;  %349 = vst.msk [vmem:[%s692_s4 + $0x24] sm:$0xf] %vm339_vm1, %v403_v30  ;;  %v168_v41 = vadd.f32 %v566_v13, %v167_v33  ;;  %v200_v44 = vadd.f32 %v566_v13, %v199_v34  ;;  %v398_v45 = vpack.c.bf16 %v263_v37, %v263_v37 }
  0xd8   :  { %346 = vst.msk [vmem:[%s692_s4 + $0x18] sm:$0xf] %vm339_vm1, %v400_v35  ;;  %354 = vst.msk [vmem:[%s692_s4 + $0x38] sm:$0xf] %vm339_vm1, %v408_v36  ;;  %v406_v16 = vpack.c.bf16 %v271_v38, %v271_v38  ;;  %v266_v42 = vmax.f32 %v250_v39, 0.0  ;;  %v274_v46 = vmax.f32 %v258_v40, 0.0 }
  0xd9   :  { %v248_v17 = vadd.f32 %v421_v52, %v168_v41  ;;  %v256_v13 = vadd.f32 %v437_v53, %v200_v44  ;;  %344 = vst.msk [vmem:[%s692_s4 + $0x10] sm:$0xf] %vm339_vm1, %v398_v45 }
  0xda   :  { %352 = vst.msk [vmem:[%s692_s4 + $0x30] sm:$0xf] %vm339_vm1, %v406_v16  ;;  %v401_v43 = vpack.c.bf16 %v266_v42, %v266_v42  ;;  %v409_v47 = vpack.c.bf16 %v274_v46, %v274_v46 }
  0xdb   :  { %v264_v48 = vmax.f32 %v248_v17, 0.0  ;;  %v272_v49 = vmax.f32 %v256_v13, 0.0 }
  0xdc   :  { %347 = vst.msk [vmem:[%s692_s4 + $0x1c] sm:$0xf] %vm339_vm1, %v401_v43  ;;  %355 = vst.msk [vmem:[%s692_s4 + $0x3c] sm:$0xf] %vm339_vm1, %v409_v47 }
  0xdd   :  { %v399_v26 = vpack.c.bf16 %v264_v48, %v264_v48  ;;  %v407_v27 = vpack.c.bf16 %v272_v49, %v272_v49 }
  0xdf   :  { %345 = vst.msk [vmem:[%s692_s4 + $0x14] sm:$0xf] %vm339_vm1, %v399_v26  ;;  %353 = vst.msk [vmem:[%s692_s4 + $0x34] sm:$0xf] %vm339_vm1, %v407_v27 }

// kernel: _lambda_.72
= control target key start
LH: loop header
LB: loop body
LE: loop exit
PB: predicated region body
PF: predicated region fallthrough
CT: control target
= control target key end

     0   :  { %vm110_vm0 = vcmask 523264   ;;  %vm312_vm1 = vcmask 125952   ;;  %s591_s1 = inlined_call_operand.vmem [shape: bf16[1,64,16], index: 1, kind: input, shape index: {}]   ;;  %s592_s0 = inlined_call_operand.vmem [shape: bf16[1,128,64], index: 0, kind: input, shape index: {}]   ;;  %s593_s2 = inlined_call_operand.vmem [shape: f32[1,1,16], index: 2, kind: input, shape index: {}]   ;;  %s594_s3 = inlined_call_operand.vmem [shape: bf16[1,128,16], index: 3, kind: output, shape index: {}]  }
   0x1   :  { %v430_v0 = vld [vmem:[%s591_s1 + $0x18] sm:$0xff]   ;;  %v431_v1 = vld [vmem:[%s591_s1 + $0x10] sm:$0xff]   ;;  %v432_v2 = vld [vmem:[%s591_s1 + $0x8] sm:$0xff]  }
   0x2   :  { %398 = vmatprep.subr.bf16.mxu0 %v430_v0  ;;  %422 = vmatprep.subr.bf16.mxu1 %v430_v0  ;;  %v434_v3 = vld [vmem:[%s592_s0] sm:$0xff]   ;;  %v436_v6 = vld [vmem:[%s592_s0 + $0x8] sm:$0xff]   ;;  %v438_v8 = vld [vmem:[%s592_s0 + $0x10] sm:$0xff]  }
   0x3   :  { %399 = vmatpush3.bf16.msra.mxu0 %v430_v0  ;;  %426 = vmatpush3.bf16.msra.mxu1 %v430_v0  ;;  %v435_v4 = vld [vmem:[%s592_s0 + $0x20] sm:$0xff]   ;;  %v437_v7 = vld [vmem:[%s592_s0 + $0x28] sm:$0xff]   ;;  %v439_v9 = vld [vmem:[%s592_s0 + $0x30] sm:$0xff]  }
   0x4   :  { %400 = vmatprep.subr.bf16.mxu0 %v431_v1  ;;  %423 = vmatprep.subr.bf16.mxu1 %v431_v1  ;;  %v433_v5 = vld [vmem:[%s591_s1] sm:$0xff]   ;;  %v440_v10 = vld [vmem:[%s592_s0 + $0x18] sm:$0xff]  }
   0x5   :  { %406 = vmatprep.mubr.msk.bf16.mxu0 %vm110_vm0, %v434_v3  ;;  %414 = vmatprep.mubr.msk.bf16.mxu1 %vm110_vm0, %v435_v4  ;;  %v441_v11 = vld [vmem:[%s592_s0 + $0x38] sm:$0xff]   ;;  %v509_v12 = vld [vmem:[%s593_s2] ss:$0 sm:$0xff] }
   0x7   :  { %401 = vmatpush3.bf16.msra.mxu0 %v431_v1  ;;  %427 = vmatpush3.bf16.msra.mxu1 %v431_v1 }
   0x8   :  { %402 = vmatprep.subr.bf16.mxu0 %v432_v2  ;;  %424 = vmatprep.subr.bf16.mxu1 %v432_v2 }
   0xb   :  { %403 = vmatpush3.bf16.msra.mxu0 %v432_v2  ;;  %428 = vmatpush3.bf16.msra.mxu1 %v432_v2 }
   0xc   :  { %404 = vmatprep.subr.bf16.mxu0 %v433_v5  ;;  %425 = vmatprep.subr.bf16.mxu1 %v433_v5 }
   0xf   :  { %405 = vmatpush3.bf16.msra.mxu0 %v433_v5  ;;  %429 = vmatpush3.bf16.msra.mxu1 %v433_v5 }
  0x12   :  { %407 = vmatmul.mubr.msk.bf16.vlgmr.msra.gmra.mxu0 %vm110_vm0, %v436_v6  ;;  %415 = vmatmul.mubr.msk.bf16.vlgmr.msra.gmra.mxu1 %vm110_vm0, %v437_v7 }
  0x13   :  { %410 = vmatprep.mubr.msk.bf16.mxu0 %vm110_vm0, %v438_v8  ;;  %418 = vmatprep.mubr.msk.bf16.mxu1 %vm110_vm0, %v439_v9 }
  0x1a   :  { %411 = vmatmul.mubr.msk.bf16.gmra.mxu0 %vm110_vm0, %v440_v10  ;;  %419 = vmatmul.mubr.msk.bf16.gmra.mxu1 %vm110_vm0, %v441_v11 }
  0xd2   :  { %v408_v13 = vpop.f32.mrf.mxu0  ;;  %v416_v14 = vpop.f32.mrf.mxu1 }
  0xd3   :  { %v178_v15 = vadd.f32 %v408_v13, %v509_v12  ;;  %v210_v16 = vadd.f32 %v416_v14, %v509_v12 }
  0xd4   :  { %v169_v17 = vpop.f32.mrf.mxu0  ;;  %v201_v18 = vpop.f32.mrf.mxu1 }
  0xd5   :  { %v234_v19 = vmax.f32 %v178_v15, 0.0  ;;  %v242_v20 = vmax.f32 %v210_v16, 0.0  ;;  %v170_v21 = vadd.f32 %v509_v12, %v169_v17  ;;  %v202_v22 = vadd.f32 %v509_v12, %v201_v18 }
  0xd6   :  { %v409_v23 = vpop.f32.mrf.mxu0  ;;  %v417_v24 = vpop.f32.mrf.mxu1 }
  0xd7   :  { %v372_v25 = vpack.c.bf16 %v234_v19, %v234_v19  ;;  %v380_v26 = vpack.c.bf16 %v242_v20, %v242_v20  ;;  %v232_v27 = vmax.f32 %v170_v21, 0.0  ;;  %v240_v28 = vmax.f32 %v202_v22, 0.0 }
  0xd8   :  { %v181_v29 = vadd.f32 %v409_v23, %v509_v12  ;;  %v213_v30 = vadd.f32 %v417_v24, %v509_v12  ;;  %v172_v31 = vpop.f32.mrf.mxu0  ;;  %v204_v32 = vpop.f32.mrf.mxu1 }
  0xd9   :  { %315 = vst.msk [vmem:[%s594_s3 + $0x8] sm:$0xf] %vm312_vm1, %v372_v25  ;;  %323 = vst.msk [vmem:[%s594_s3 + $0x28] sm:$0xf] %vm312_vm1, %v380_v26  ;;  %v370_v33 = vpack.c.bf16 %v232_v27, %v232_v27  ;;  %v378_v34 = vpack.c.bf16 %v240_v28, %v240_v28  ;;  %v173_v35 = vadd.f32 %v509_v12, %v172_v31 }
  0xda   :  { %v205_v36 = vadd.f32 %v509_v12, %v204_v32  ;;  %v235_v37 = vmax.f32 %v181_v29, 0.0  ;;  %v243_v38 = vmax.f32 %v213_v30, 0.0  ;;  %v412_v39 = vpop.f32.mrf.mxu0  ;;  %v420_v40 = vpop.f32.mrf.mxu1 }
  0xdb   :  { %313 = vst.msk [vmem:[%s594_s3] sm:$0xf] %vm312_vm1, %v370_v33  ;;  %321 = vst.msk [vmem:[%s594_s3 + $0x20] sm:$0xf] %vm312_vm1, %v378_v34  ;;  %v233_v41 = vmax.f32 %v173_v35, 0.0  ;;  %v194_v43 = vadd.f32 %v412_v39, %v509_v12  ;;  %v226_v44 = vadd.f32 %v420_v40, %v509_v12 }
  0xdc   :  { %v241_v42 = vmax.f32 %v205_v36, 0.0  ;;  %v373_v45 = vpack.c.bf16 %v235_v37, %v235_v37  ;;  %v381_v46 = vpack.c.bf16 %v243_v38, %v243_v38  ;;  %v185_v47 = vpop.f32.mrf.mxu0  ;;  %v217_v48 = vpop.f32.mrf.mxu1 }
  0xdd   :  { %v371_v49 = vpack.c.bf16 %v233_v41, %v233_v41  ;;  %v238_v51 = vmax.f32 %v194_v43, 0.0  ;;  %v246_v52 = vmax.f32 %v226_v44, 0.0  ;;  %v186_v53 = vadd.f32 %v509_v12, %v185_v47 }
  0xde   :  { %v379_v50 = vpack.c.bf16 %v241_v42, %v241_v42  ;;  %316 = vst.msk [vmem:[%s594_s3 + $0xc] sm:$0xf] %vm312_vm1, %v373_v45  ;;  %324 = vst.msk [vmem:[%s594_s3 + $0x2c] sm:$0xf] %vm312_vm1, %v381_v46  ;;  %v218_v54 = vadd.f32 %v509_v12, %v217_v48  ;;  %v413_v55 = vpop.f32.mrf.mxu0  ;;  %v421_v56 = vpop.f32.mrf.mxu1 }
  0xdf   :  { %314 = vst.msk [vmem:[%s594_s3 + $0x4] sm:$0xf] %vm312_vm1, %v371_v49  ;;  %v376_v57 = vpack.c.bf16 %v238_v51, %v238_v51  ;;  %v384_v58 = vpack.c.bf16 %v246_v52, %v246_v52  ;;  %v197_v59 = vadd.f32 %v413_v55, %v509_v12  ;;  %v229_v60 = vadd.f32 %v421_v56, %v509_v12 }
  0xe0   :  { %322 = vst.msk [vmem:[%s594_s3 + $0x24] sm:$0xf] %vm312_vm1, %v379_v50  ;;  %v236_v61 = vmax.f32 %v186_v53, 0.0  ;;  %v244_v62 = vmax.f32 %v218_v54, 0.0  ;;  %v188_v63 = vpop.f32.mrf.mxu0  ;;  %v220_v0 = vpop.f32.mrf.mxu1 }
  0xe1   :  { %319 = vst.msk [vmem:[%s594_s3 + $0x18] sm:$0xf] %vm312_vm1, %v376_v57  ;;  %327 = vst.msk [vmem:[%s594_s3 + $0x38] sm:$0xf] %vm312_vm1, %v384_v58  ;;  %v239_v1 = vmax.f32 %v197_v59, 0.0  ;;  %v247_v2 = vmax.f32 %v229_v60, 0.0  ;;  %v189_v3 = vadd.f32 %v509_v12, %v188_v63  ;;  %v221_v4 = vadd.f32 %v509_v12, %v220_v0 }
  0xe2   :  { %v374_v5 = vpack.c.bf16 %v236_v61, %v236_v61  ;;  %v382_v6 = vpack.c.bf16 %v244_v62, %v244_v62 }
  0xe3   :  { %v377_v7 = vpack.c.bf16 %v239_v1, %v239_v1  ;;  %v385_v8 = vpack.c.bf16 %v247_v2, %v247_v2  ;;  %v237_v9 = vmax.f32 %v189_v3, 0.0  ;;  %v245_v10 = vmax.f32 %v221_v4, 0.0 }
  0xe4   :  { %317 = vst.msk [vmem:[%s594_s3 + $0x10] sm:$0xf] %vm312_vm1, %v374_v5  ;;  %325 = vst.msk [vmem:[%s594_s3 + $0x30] sm:$0xf] %vm312_vm1, %v382_v6 }
  0xe5   :  { %320 = vst.msk [vmem:[%s594_s3 + $0x1c] sm:$0xf] %vm312_vm1, %v377_v7  ;;  %328 = vst.msk [vmem:[%s594_s3 + $0x3c] sm:$0xf] %vm312_vm1, %v385_v8  ;;  %v375_v11 = vpack.c.bf16 %v237_v9, %v237_v9  ;;  %v383_v12 = vpack.c.bf16 %v245_v10, %v245_v10 }
  0xe7   :  { %318 = vst.msk [vmem:[%s594_s3 + $0x14] sm:$0xf] %vm312_vm1, %v375_v11  ;;  %326 = vst.msk [vmem:[%s594_s3 + $0x34] sm:$0xf] %vm312_vm1, %v383_v12 }

// kernel: _lambda_.77
= control target key start
LH: loop header
LB: loop body
LE: loop exit
PB: predicated region body
PF: predicated region fallthrough
CT: control target
= control target key end

     0   :  { %9 = vsyncpa [#allocation3], 0  ;;  %s527_s15 = smov [#allocation2]   ;;  %s731_s0 = inlined_call_operand.vmem [shape: bf16[1,128,16], index: 0, kind: input, shape index: {}]   ;;  %s732_s1 = inlined_call_operand.hbm [shape: bf16[1,16,64], index: 1, kind: input, shape index: {}]   ;;  %s733_s2 = inlined_call_operand.vmem [shape: f32[1,1,64], index: 2, kind: input, shape index: {}]   ;;  %s734_s3 = inlined_call_operand.vmem [shape: bf16[1,128,64], index: 3, kind: input, shape index: {}]   ;;  %s735_s4 = inlined_call_operand.vmem [shape: bf16[1,128,64], index: 4, kind: output, shape index: {}]  }
   0x1   :  { %s17_s16 = sshll.u32 %s527_s15, 4  ;;  %s18_s16 = int_to_ptr.vmem [resolvable:$true] %s17_s16 }
   0x2   :  { %s513_s17 = scalar_lea.vmem %s18_s16, 128  ;;  %p518_p1 = scmp.lt.s32.totalorder %s18_s16, %s18_s16 }
   0x3   :  { %p514_p0 = scmp.ne.s32.totalorder %s18_s16, %s513_s17  ;;  %p519_p2 = scmp.lt.s32.totalorder %s513_s17, %s513_s17 }
   0x5   :  { %p520_p3 = por %p519_p2, %p518_p1 }
   0x7   :  { %p521_p4 = pnand %p520_p3, %p514_p0 }
   0x9   :  { %524 = shalt.err (!%p521_p4)
}
   0xa   :  { %s528_s18 = smov 64   ;;  %s529_s19 = smov 4  }
   0xb   :  { %23 = dma.hbm_to_vmem [thread:$0]  %s732_s1, 128, %s18_s16, [#allocation3], %s528_s18, %s528_s18, %s529_s19  }
   0xc   :  { %525 = dma.done.wait [#allocation3], 128  }
   0xd   :  { %526 = vsyncadd [#allocation3], 4294967168  ;;  %v496_v0 = vld [vmem:[#allocation2] sm:$0xff]   ;;  %vm103_vm0 = vcmask 130048   ;;  %v499_v3 = vld [vmem:[%s731_s0 + $0x8] sm:$0xff]   ;;  %vm353_vm1 = vcmask 519168  }
   0xe   :  { %v497_v1 = vld [vmem:[%s731_s0] sm:$0xff]   ;;  %473 = vmatprep.subr.bf16.mxu0 %v496_v0  ;;  %491 = vmatprep.subr.bf16.mxu1 %v496_v0  ;;  %v500_v4 = vld [vmem:[%s731_s0 + $0x28] sm:$0xff]   ;;  %v501_v5 = vld [vmem:[%s731_s0 + $0x10] sm:$0xff]  }
   0xf   :  { %v498_v2 = vld [vmem:[%s731_s0 + $0x20] sm:$0xff]   ;;  %474 = vmatpush3.bf16.msra.mxu0 %v496_v0  ;;  %492 = vmatpush3.bf16.msra.mxu1 %v496_v0  ;;  %v502_v6 = vld [vmem:[%s731_s0 + $0x30] sm:$0xff]   ;;  %v503_v7 = vld [vmem:[%s731_s0 + $0x18] sm:$0xff]  }
  0x10   :  { %475 = vmatprep.mubr.msk.bf16.mxu0 %vm103_vm0, %v497_v1  ;;  %483 = vmatprep.mubr.msk.bf16.mxu1 %vm103_vm0, %v498_v2  ;;  %v504_v8 = vld [vmem:[%s731_s0 + $0x38] sm:$0xff]   ;;  %v457_v9 = vld [vmem:[%s734_s3 + $0x8] sm:$0xff]   ;;  %v599_v11 = vld [vmem:[%s734_s3] sm:$0xff]  }
  0x11   :  { %v461_v10 = vld [vmem:[%s734_s3 + $0x28] sm:$0xff]   ;;  %v604_v12 = vld [vmem:[%s734_s3 + $0x20] sm:$0xff]   ;;  %v431_v14 = vunpack.c.l.bf16 %v457_v9  ;;  %v614_v16 = vld [vmem:[%s734_s3 + $0x18] sm:$0xff]   ;;  %v427_v20 = vunpack.c.l.bf16 %v599_v11  ;;  %v432_v22 = vunpack.c.h.bf16 %v457_v9  ;;  %v428_v30 = vunpack.c.h.bf16 %v599_v11 }
  0x12   :  { %476 = vmatmul.mubr.msk.bf16.vlgmr.msra.gmra.mxu0 %vm103_vm0, %v499_v3  ;;  %484 = vmatmul.mubr.msk.bf16.vlgmr.msra.gmra.mxu1 %vm103_vm0, %v500_v4  ;;  %v609_v13 = vld [vmem:[%s733_s2] ss:$0 sm:$0xff]  ;;  %v447_v15 = vunpack.c.l.bf16 %v461_v10  ;;  %v619_v17 = vld [vmem:[%s734_s3 + $0x38] sm:$0xff]   ;;  %v443_v21 = vunpack.c.l.bf16 %v604_v12  ;;  %v448_v25 = vunpack.c.h.bf16 %v461_v10  ;;  %v628_v26 = vld [vmem:[%s734_s3 + $0x10] sm:$0xff]   ;;  %v444_v31 = vunpack.c.h.bf16 %v604_v12 }
  0x13   :  { %479 = vmatprep.mubr.msk.bf16.mxu0 %vm103_vm0, %v501_v5  ;;  %487 = vmatprep.mubr.msk.bf16.mxu1 %vm103_vm0, %v502_v6  ;;  %v633_v27 = vld [vmem:[%s734_s3 + $0x30] sm:$0xff]   ;;  %v439_v32 = vunpack.c.l.bf16 %v614_v16  ;;  %v455_v33 = vunpack.c.l.bf16 %v619_v17  ;;  %v435_v40 = vunpack.c.l.bf16 %v628_v26  ;;  %v440_v42 = vunpack.c.h.bf16 %v614_v16 }
  0x14   :  { %v451_v41 = vunpack.c.l.bf16 %v633_v27  ;;  %v456_v43 = vunpack.c.h.bf16 %v619_v17  ;;  %v436_v52 = vunpack.c.h.bf16 %v628_v26  ;;  %v452_v53 = vunpack.c.h.bf16 %v633_v27 }
  0x1a   :  { %480 = vmatmul.mubr.msk.bf16.gmra.mxu0 %vm103_vm0, %v503_v7  ;;  %488 = vmatmul.mubr.msk.bf16.gmra.mxu1 %vm103_vm0, %v504_v8 }
  0xd2   :  { %v477_v18 = vpop.f32.mrf.mxu0  ;;  %v485_v19 = vpop.f32.mrf.mxu1 }
  0xd3   :  { %v171_v23 = vadd.f32 %v477_v18, %v609_v13  ;;  %v203_v24 = vadd.f32 %v485_v19, %v609_v13 }
  0xd4   :  { %v162_v28 = vpop.f32.mrf.mxu0  ;;  %v194_v29 = vpop.f32.mrf.mxu1 }
  0xd5   :  { %v259_v34 = vadd.f32 %v431_v14, %v171_v23  ;;  %v267_v35 = vadd.f32 %v447_v15, %v203_v24  ;;  %v163_v36 = vadd.f32 %v609_v13, %v162_v28  ;;  %v195_v37 = vadd.f32 %v609_v13, %v194_v29 }
  0xd6   :  { %v478_v38 = vpop.f32.mrf.mxu0  ;;  %v486_v39 = vpop.f32.mrf.mxu1 }
  0xd7   :  { %v275_v44 = vmax.f32 %v259_v34, 0.0  ;;  %v283_v45 = vmax.f32 %v267_v35, 0.0  ;;  %v257_v46 = vadd.f32 %v427_v20, %v163_v36  ;;  %v265_v47 = vadd.f32 %v443_v21, %v195_v37 }
  0xd8   :  { %v174_v48 = vadd.f32 %v478_v38, %v609_v13  ;;  %v206_v49 = vadd.f32 %v486_v39, %v609_v13  ;;  %v165_v50 = vpop.f32.mrf.mxu0  ;;  %v197_v51 = vpop.f32.mrf.mxu1 }
  0xd9   :  { %v411_v54 = vpack.c.bf16 %v275_v44, %v275_v44  ;;  %v419_v55 = vpack.c.bf16 %v283_v45, %v283_v45  ;;  %v273_v56 = vmax.f32 %v257_v46, 0.0  ;;  %v281_v57 = vmax.f32 %v265_v47, 0.0 }
  0xda   :  { %v260_v58 = vadd.f32 %v432_v22, %v174_v48  ;;  %v268_v59 = vadd.f32 %v448_v25, %v206_v49  ;;  %v166_v60 = vadd.f32 %v609_v13, %v165_v50  ;;  %v198_v61 = vadd.f32 %v609_v13, %v197_v51  ;;  %v481_v62 = vpop.f32.mrf.mxu0  ;;  %v489_v63 = vpop.f32.mrf.mxu1 }
  0xdb   :  { %356 = vst.msk [vmem:[%s735_s4 + $0x8] sm:$0xf] %vm353_vm1, %v411_v54  ;;  %364 = vst.msk [vmem:[%s735_s4 + $0x28] sm:$0xf] %vm353_vm1, %v419_v55  ;;  %v409_v0 = vpack.c.bf16 %v273_v56, %v273_v56  ;;  %v417_v1 = vpack.c.bf16 %v281_v57, %v281_v57  ;;  %v187_v2 = vadd.f32 %v481_v62, %v609_v13 }
  0xdc   :  { %v219_v3 = vadd.f32 %v489_v63, %v609_v13  ;;  %v276_v4 = vmax.f32 %v260_v58, 0.0  ;;  %v284_v5 = vmax.f32 %v268_v59, 0.0  ;;  %v258_v6 = vadd.f32 %v428_v30, %v166_v60  ;;  %v178_v8 = vpop.f32.mrf.mxu0  ;;  %v210_v9 = vpop.f32.mrf.mxu1 }
  0xdd   :  { %v266_v7 = vadd.f32 %v444_v31, %v198_v61  ;;  %354 = vst.msk [vmem:[%s735_s4] sm:$0xf] %vm353_vm1, %v409_v0  ;;  %362 = vst.msk [vmem:[%s735_s4 + $0x20] sm:$0xf] %vm353_vm1, %v417_v1  ;;  %v263_v10 = vadd.f32 %v439_v32, %v187_v2  ;;  %v179_v12 = vadd.f32 %v609_v13, %v178_v8 }
  0xde   :  { %v271_v11 = vadd.f32 %v455_v33, %v219_v3  ;;  %v211_v14 = vadd.f32 %v609_v13, %v210_v9  ;;  %v412_v15 = vpack.c.bf16 %v276_v4, %v276_v4  ;;  %v420_v18 = vpack.c.bf16 %v284_v5, %v284_v5  ;;  %v482_v21 = vpop.f32.mrf.mxu0  ;;  %v490_v22 = vpop.f32.mrf.mxu1 }
  0xdf   :  { %v274_v19 = vmax.f32 %v258_v6, 0.0  ;;  %v282_v20 = vmax.f32 %v266_v7, 0.0  ;;  %v279_v23 = vmax.f32 %v263_v10, 0.0  ;;  %v261_v25 = vadd.f32 %v435_v40, %v179_v12 }
  0xe0   :  { %v287_v24 = vmax.f32 %v271_v11, 0.0  ;;  %v269_v28 = vadd.f32 %v451_v41, %v211_v14  ;;  %357 = vst.msk [vmem:[%s735_s4 + $0xc] sm:$0xf] %vm353_vm1, %v412_v15  ;;  %365 = vst.msk [vmem:[%s735_s4 + $0x2c] sm:$0xf] %vm353_vm1, %v420_v18  ;;  %v190_v31 = vadd.f32 %v482_v21, %v609_v13  ;;  %v222_v32 = vadd.f32 %v490_v22, %v609_v13  ;;  %v181_v33 = vpop.f32.mrf.mxu0  ;;  %v213_v34 = vpop.f32.mrf.mxu1 }
  0xe1   :  { %v410_v29 = vpack.c.bf16 %v274_v19, %v274_v19  ;;  %v418_v30 = vpack.c.bf16 %v282_v20, %v282_v20  ;;  %v415_v35 = vpack.c.bf16 %v279_v23, %v279_v23  ;;  %v277_v37 = vmax.f32 %v261_v25, 0.0 }
  0xe2   :  { %v423_v36 = vpack.c.bf16 %v287_v24, %v287_v24  ;;  %v285_v38 = vmax.f32 %v269_v28, 0.0  ;;  %v264_v39 = vadd.f32 %v440_v42, %v190_v31  ;;  %v272_v40 = vadd.f32 %v456_v43, %v222_v32 }
  0xe3   :  { %355 = vst.msk [vmem:[%s735_s4 + $0x4] sm:$0xf] %vm353_vm1, %v410_v29  ;;  %363 = vst.msk [vmem:[%s735_s4 + $0x24] sm:$0xf] %vm353_vm1, %v418_v30  ;;  %v182_v41 = vadd.f32 %v609_v13, %v181_v33  ;;  %v214_v44 = vadd.f32 %v609_v13, %v213_v34  ;;  %v413_v45 = vpack.c.bf16 %v277_v37, %v277_v37 }
  0xe4   :  { %360 = vst.msk [vmem:[%s735_s4 + $0x18] sm:$0xf] %vm353_vm1, %v415_v35  ;;  %368 = vst.msk [vmem:[%s735_s4 + $0x38] sm:$0xf] %vm353_vm1, %v423_v36  ;;  %v421_v16 = vpack.c.bf16 %v285_v38, %v285_v38  ;;  %v280_v42 = vmax.f32 %v264_v39, 0.0  ;;  %v288_v46 = vmax.f32 %v272_v40, 0.0 }
  0xe5   :  { %v262_v17 = vadd.f32 %v436_v52, %v182_v41  ;;  %v270_v13 = vadd.f32 %v452_v53, %v214_v44  ;;  %358 = vst.msk [vmem:[%s735_s4 + $0x10] sm:$0xf] %vm353_vm1, %v413_v45 }
  0xe6   :  { %366 = vst.msk [vmem:[%s735_s4 + $0x30] sm:$0xf] %vm353_vm1, %v421_v16  ;;  %v416_v43 = vpack.c.bf16 %v280_v42, %v280_v42  ;;  %v424_v47 = vpack.c.bf16 %v288_v46, %v288_v46 }
  0xe7   :  { %v278_v48 = vmax.f32 %v262_v17, 0.0  ;;  %v286_v49 = vmax.f32 %v270_v13, 0.0 }
  0xe8   :  { %361 = vst.msk [vmem:[%s735_s4 + $0x1c] sm:$0xf] %vm353_vm1, %v416_v43  ;;  %369 = vst.msk [vmem:[%s735_s4 + $0x3c] sm:$0xf] %vm353_vm1, %v424_v47 }
  0xe9   :  { %v414_v26 = vpack.c.bf16 %v278_v48, %v278_v48  ;;  %v422_v27 = vpack.c.bf16 %v286_v49, %v286_v49 }
  0xeb   :  { %359 = vst.msk [vmem:[%s735_s4 + $0x14] sm:$0xf] %vm353_vm1, %v414_v26  ;;  %367 = vst.msk [vmem:[%s735_s4 + $0x34] sm:$0xf] %vm353_vm1, %v422_v27 }
  0xec   :  { %374 = vsyncpa [#allocation3], 1 }

// kernel: _lambda_.81
= control target key start
LH: loop header
LB: loop body
LE: loop exit
PB: predicated region body
PF: predicated region fallthrough
CT: control target
= control target key end

     0   :  { %vm110_vm0 = vcmask 523264   ;;  %vm312_vm1 = vcmask 257024   ;;  %s591_s1 = inlined_call_operand.vmem [shape: bf16[1,64,32], index: 1, kind: input, shape index: {}]   ;;  %s592_s0 = inlined_call_operand.vmem [shape: bf16[1,128,64], index: 0, kind: input, shape index: {}]   ;;  %s593_s2 = inlined_call_operand.vmem [shape: f32[1,1,32], index: 2, kind: input, shape index: {}]   ;;  %s594_s3 = inlined_call_operand.vmem [shape: bf16[1,128,32], index: 3, kind: output, shape index: {}]  }
   0x1   :  { %v430_v0 = vld [vmem:[%s591_s1 + $0x18] sm:$0xff]   ;;  %v431_v1 = vld [vmem:[%s591_s1 + $0x10] sm:$0xff]   ;;  %v432_v2 = vld [vmem:[%s591_s1 + $0x8] sm:$0xff]  }
   0x2   :  { %398 = vmatprep.subr.bf16.mxu0 %v430_v0  ;;  %422 = vmatprep.subr.bf16.mxu1 %v430_v0  ;;  %v434_v3 = vld [vmem:[%s592_s0] sm:$0xff]   ;;  %v436_v6 = vld [vmem:[%s592_s0 + $0x8] sm:$0xff]   ;;  %v438_v8 = vld [vmem:[%s592_s0 + $0x10] sm:$0xff]  }
   0x3   :  { %399 = vmatpush3.bf16.msra.mxu0 %v430_v0  ;;  %426 = vmatpush3.bf16.msra.mxu1 %v430_v0  ;;  %v435_v4 = vld [vmem:[%s592_s0 + $0x20] sm:$0xff]   ;;  %v437_v7 = vld [vmem:[%s592_s0 + $0x28] sm:$0xff]   ;;  %v439_v9 = vld [vmem:[%s592_s0 + $0x30] sm:$0xff]  }
   0x4   :  { %400 = vmatprep.subr.bf16.mxu0 %v431_v1  ;;  %423 = vmatprep.subr.bf16.mxu1 %v431_v1  ;;  %v433_v5 = vld [vmem:[%s591_s1] sm:$0xff]   ;;  %v440_v10 = vld [vmem:[%s592_s0 + $0x18] sm:$0xff]  }
   0x5   :  { %406 = vmatprep.mubr.msk.bf16.mxu0 %vm110_vm0, %v434_v3  ;;  %414 = vmatprep.mubr.msk.bf16.mxu1 %vm110_vm0, %v435_v4  ;;  %v441_v11 = vld [vmem:[%s592_s0 + $0x38] sm:$0xff]   ;;  %v509_v12 = vld [vmem:[%s593_s2] ss:$0 sm:$0xff] }
   0x7   :  { %401 = vmatpush3.bf16.msra.mxu0 %v431_v1  ;;  %427 = vmatpush3.bf16.msra.mxu1 %v431_v1 }
   0x8   :  { %402 = vmatprep.subr.bf16.mxu0 %v432_v2  ;;  %424 = vmatprep.subr.bf16.mxu1 %v432_v2 }
   0xb   :  { %403 = vmatpush3.bf16.msra.mxu0 %v432_v2  ;;  %428 = vmatpush3.bf16.msra.mxu1 %v432_v2 }
   0xc   :  { %404 = vmatprep.subr.bf16.mxu0 %v433_v5  ;;  %425 = vmatprep.subr.bf16.mxu1 %v433_v5 }
   0xf   :  { %405 = vmatpush3.bf16.msra.mxu0 %v433_v5  ;;  %429 = vmatpush3.bf16.msra.mxu1 %v433_v5 }
  0x12   :  { %407 = vmatmul.mubr.msk.bf16.vlgmr.msra.gmra.mxu0 %vm110_vm0, %v436_v6  ;;  %415 = vmatmul.mubr.msk.bf16.vlgmr.msra.gmra.mxu1 %vm110_vm0, %v437_v7 }
  0x13   :  { %410 = vmatprep.mubr.msk.bf16.mxu0 %vm110_vm0, %v438_v8  ;;  %418 = vmatprep.mubr.msk.bf16.mxu1 %vm110_vm0, %v439_v9 }
  0x1a   :  { %411 = vmatmul.mubr.msk.bf16.gmra.mxu0 %vm110_vm0, %v440_v10  ;;  %419 = vmatmul.mubr.msk.bf16.gmra.mxu1 %vm110_vm0, %v441_v11 }
  0xd2   :  { %v408_v13 = vpop.f32.mrf.mxu0  ;;  %v416_v14 = vpop.f32.mrf.mxu1 }
  0xd3   :  { %v178_v15 = vadd.f32 %v408_v13, %v509_v12  ;;  %v210_v16 = vadd.f32 %v416_v14, %v509_v12 }
  0xd4   :  { %v169_v17 = vpop.f32.mrf.mxu0  ;;  %v201_v18 = vpop.f32.mrf.mxu1 }
  0xd5   :  { %v234_v19 = vmax.f32 %v178_v15, 0.0  ;;  %v242_v20 = vmax.f32 %v210_v16, 0.0  ;;  %v170_v21 = vadd.f32 %v509_v12, %v169_v17  ;;  %v202_v22 = vadd.f32 %v509_v12, %v201_v18 }
  0xd6   :  { %v409_v23 = vpop.f32.mrf.mxu0  ;;  %v417_v24 = vpop.f32.mrf.mxu1 }
  0xd7   :  { %v372_v25 = vpack.c.bf16 %v234_v19, %v234_v19  ;;  %v380_v26 = vpack.c.bf16 %v242_v20, %v242_v20  ;;  %v232_v27 = vmax.f32 %v170_v21, 0.0  ;;  %v240_v28 = vmax.f32 %v202_v22, 0.0 }
  0xd8   :  { %v181_v29 = vadd.f32 %v409_v23, %v509_v12  ;;  %v213_v30 = vadd.f32 %v417_v24, %v509_v12  ;;  %v172_v31 = vpop.f32.mrf.mxu0  ;;  %v204_v32 = vpop.f32.mrf.mxu1 }
  0xd9   :  { %315 = vst.msk [vmem:[%s594_s3 + $0x8] sm:$0xf] %vm312_vm1, %v372_v25  ;;  %323 = vst.msk [vmem:[%s594_s3 + $0x28] sm:$0xf] %vm312_vm1, %v380_v26  ;;  %v370_v33 = vpack.c.bf16 %v232_v27, %v232_v27  ;;  %v378_v34 = vpack.c.bf16 %v240_v28, %v240_v28  ;;  %v173_v35 = vadd.f32 %v509_v12, %v172_v31 }
  0xda   :  { %v205_v36 = vadd.f32 %v509_v12, %v204_v32  ;;  %v235_v37 = vmax.f32 %v181_v29, 0.0  ;;  %v243_v38 = vmax.f32 %v213_v30, 0.0  ;;  %v412_v39 = vpop.f32.mrf.mxu0  ;;  %v420_v40 = vpop.f32.mrf.mxu1 }
  0xdb   :  { %313 = vst.msk [vmem:[%s594_s3] sm:$0xf] %vm312_vm1, %v370_v33  ;;  %321 = vst.msk [vmem:[%s594_s3 + $0x20] sm:$0xf] %vm312_vm1, %v378_v34  ;;  %v233_v41 = vmax.f32 %v173_v35, 0.0  ;;  %v194_v43 = vadd.f32 %v412_v39, %v509_v12  ;;  %v226_v44 = vadd.f32 %v420_v40, %v509_v12 }
  0xdc   :  { %v241_v42 = vmax.f32 %v205_v36, 0.0  ;;  %v373_v45 = vpack.c.bf16 %v235_v37, %v235_v37  ;;  %v381_v46 = vpack.c.bf16 %v243_v38, %v243_v38  ;;  %v185_v47 = vpop.f32.mrf.mxu0  ;;  %v217_v48 = vpop.f32.mrf.mxu1 }
  0xdd   :  { %v371_v49 = vpack.c.bf16 %v233_v41, %v233_v41  ;;  %v238_v51 = vmax.f32 %v194_v43, 0.0  ;;  %v246_v52 = vmax.f32 %v226_v44, 0.0  ;;  %v186_v53 = vadd.f32 %v509_v12, %v185_v47 }
  0xde   :  { %v379_v50 = vpack.c.bf16 %v241_v42, %v241_v42  ;;  %316 = vst.msk [vmem:[%s594_s3 + $0xc] sm:$0xf] %vm312_vm1, %v373_v45  ;;  %324 = vst.msk [vmem:[%s594_s3 + $0x2c] sm:$0xf] %vm312_vm1, %v381_v46  ;;  %v218_v54 = vadd.f32 %v509_v12, %v217_v48  ;;  %v413_v55 = vpop.f32.mrf.mxu0  ;;  %v421_v56 = vpop.f32.mrf.mxu1 }
  0xdf   :  { %314 = vst.msk [vmem:[%s594_s3 + $0x4] sm:$0xf] %vm312_vm1, %v371_v49  ;;  %v376_v57 = vpack.c.bf16 %v238_v51, %v238_v51  ;;  %v384_v58 = vpack.c.bf16 %v246_v52, %v246_v52  ;;  %v197_v59 = vadd.f32 %v413_v55, %v509_v12  ;;  %v229_v60 = vadd.f32 %v421_v56, %v509_v12 }
  0xe0   :  { %322 = vst.msk [vmem:[%s594_s3 + $0x24] sm:$0xf] %vm312_vm1, %v379_v50  ;;  %v236_v61 = vmax.f32 %v186_v53, 0.0  ;;  %v244_v62 = vmax.f32 %v218_v54, 0.0  ;;  %v188_v63 = vpop.f32.mrf.mxu0  ;;  %v220_v0 = vpop.f32.mrf.mxu1 }
  0xe1   :  { %319 = vst.msk [vmem:[%s594_s3 + $0x18] sm:$0xf] %vm312_vm1, %v376_v57  ;;  %327 = vst.msk [vmem:[%s594_s3 + $0x38] sm:$0xf] %vm312_vm1, %v384_v58  ;;  %v239_v1 = vmax.f32 %v197_v59, 0.0  ;;  %v247_v2 = vmax.f32 %v229_v60, 0.0  ;;  %v189_v3 = vadd.f32 %v509_v12, %v188_v63  ;;  %v221_v4 = vadd.f32 %v509_v12, %v220_v0 }
  0xe2   :  { %v374_v5 = vpack.c.bf16 %v236_v61, %v236_v61  ;;  %v382_v6 = vpack.c.bf16 %v244_v62, %v244_v62 }
  0xe3   :  { %v377_v7 = vpack.c.bf16 %v239_v1, %v239_v1  ;;  %v385_v8 = vpack.c.bf16 %v247_v2, %v247_v2  ;;  %v237_v9 = vmax.f32 %v189_v3, 0.0  ;;  %v245_v10 = vmax.f32 %v221_v4, 0.0 }
  0xe4   :  { %317 = vst.msk [vmem:[%s594_s3 + $0x10] sm:$0xf] %vm312_vm1, %v374_v5  ;;  %325 = vst.msk [vmem:[%s594_s3 + $0x30] sm:$0xf] %vm312_vm1, %v382_v6 }
  0xe5   :  { %320 = vst.msk [vmem:[%s594_s3 + $0x1c] sm:$0xf] %vm312_vm1, %v377_v7  ;;  %328 = vst.msk [vmem:[%s594_s3 + $0x3c] sm:$0xf] %vm312_vm1, %v385_v8  ;;  %v375_v11 = vpack.c.bf16 %v237_v9, %v237_v9  ;;  %v383_v12 = vpack.c.bf16 %v245_v10, %v245_v10 }
  0xe7   :  { %318 = vst.msk [vmem:[%s594_s3 + $0x14] sm:$0xf] %vm312_vm1, %v375_v11  ;;  %326 = vst.msk [vmem:[%s594_s3 + $0x34] sm:$0xf] %vm312_vm1, %v383_v12 }

// kernel: _lambda_.82
= control target key start
LH: loop header
LB: loop body
LE: loop exit
PB: predicated region body
PF: predicated region fallthrough
CT: control target
= control target key end

     0   :  { %vm204_vm0 = vcmask 261120   ;;  %vm329_vm1 = vcmask 257024   ;;  %s550_s1 = inlined_call_operand.vmem [shape: bf16[1,288,32], index: 1, kind: input, shape index: {}]   ;;  %s551_s0 = inlined_call_operand.vmem [shape: bf16[1,32,288], index: 0, kind: input, shape index: {}]   ;;  %s552_s2 = inlined_call_operand.vmem [shape: f32[1,1,32], index: 2, kind: input, shape index: {}]   ;;  %s553_s3 = inlined_call_operand.vmem [shape: bf16[1,32,32], index: 3, kind: output, shape index: {}]  }
   0x1   :  { %v413_v0 = vld [vmem:[%s550_s1 + $0x78] sm:$0xff]   ;;  %v415_v2 = vld [vmem:[%s550_s1 + $0x70] sm:$0xff]   ;;  %v417_v4 = vld [vmem:[%s550_s1 + $0x68] sm:$0xff]  }
   0x2   :  { %v414_v1 = vld [vmem:[%s550_s1 + $0x38] sm:$0xff]   ;;  %373 = vmatprep.subr.bf16.mxu0 %v413_v0  ;;  %v416_v3 = vld [vmem:[%s550_s1 + $0x30] sm:$0xff]   ;;  %v418_v5 = vld [vmem:[%s550_s1 + $0x28] sm:$0xff]  }
   0x3   :  { %374 = vmatpush3.bf16.msra.mxu0 %v414_v1  ;;  %v419_v6 = vld [vmem:[%s550_s1 + $0x60] sm:$0xff]   ;;  %v421_v8 = vld [vmem:[%s550_s1 + $0x58] sm:$0xff]   ;;  %v428_v10 = vld [vmem:[%s550_s1 + $0x88] sm:$0xff]  }
   0x4   :  { %375 = vmatprep.subr.bf16.mxu0 %v415_v2  ;;  %v420_v7 = vld [vmem:[%s550_s1 + $0x20] sm:$0xff]   ;;  %v422_v9 = vld [vmem:[%s550_s1 + $0x18] sm:$0xff]   ;;  %v423_v11 = vld [vmem:[%s550_s1 + $0x50] sm:$0xff]   ;;  %405 = vmatprep.subr.bf16.mxu1 %v428_v10 }
   0x5   :  { %v424_v12 = vld [vmem:[%s550_s1 + $0x10] sm:$0xff]   ;;  %v425_v13 = vld [vmem:[%s550_s1 + $0x48] sm:$0xff]   ;;  %406 = vmatpush3.bf16.msra.mxu1 %v428_v10  ;;  %v433_v15 = vld [vmem:[%s550_s1 + $0x80] sm:$0xff]  }
   0x6   :  { %v432_v14 = vld [vmem:[%s551_s0 + $0x4] ss:$12 sps:$4 sm:$0xff]   ;;  %v434_v16 = vld [vmem:[%s551_s0 + $0x8] ss:$12 sps:$4 sm:$0xff]   ;;  %407 = vmatprep.subr.bf16.mxu1 %v433_v15  ;;  %v435_v17 = vld [vmem:[%s551_s0 + $0x20] ss:$12 sps:$4 sm:$0xff]  }
   0x7   :  { %376 = vmatpush3.bf16.msra.mxu0 %v416_v3  ;;  %243 = vmatprep.mubr.bf16.mxu0 %v432_v14  ;;  %v426_v18 = vld [vmem:[%s550_s1 + $0x8] sm:$0xff]   ;;  %v427_v19 = vld [vmem:[%s550_s1 + $0x40] sm:$0xff]  }
   0x8   :  { %377 = vmatprep.subr.bf16.mxu0 %v417_v4  ;;  %409 = vmatprep.mubr.msk.bf16.mxu1 %vm204_vm0, %v434_v16  ;;  %v429_v20 = vld [vmem:[%s550_s1] sm:$0xff]   ;;  %v436_v22 = vld [vmem:[%s551_s0 + $0x1c] ss:$12 sps:$4 sm:$0xff]  }
   0x9   :  { %408 = vmatpush3.bf16.msra.mxu1 %v433_v15  ;;  %v430_v21 = vld [vmem:[%s551_s0] ss:$12 sps:$4 sm:$0xff]   ;;  %v438_v23 = vld [vmem:[%s551_s0 + $0x18] ss:$12 sps:$4 sm:$0xff]  }
   0xa   :  { %v338_v28 = vld [vmem:[%s552_s2] ss:$0 sm:$0xff] }
   0xb   :  { %378 = vmatpush3.bf16.msra.mxu0 %v418_v5 }
   0xc   :  { %379 = vmatprep.subr.bf16.mxu0 %v419_v6  ;;  %410 = vmatmul.mubr.msk.bf16.vlgmr.msra.gmra.mxu1 %vm204_vm0, %v435_v17 }
   0xf   :  { %380 = vmatpush3.bf16.msra.mxu0 %v420_v7 }
  0x10   :  { %381 = vmatprep.subr.bf16.mxu0 %v421_v8 }
  0x13   :  { %382 = vmatpush3.bf16.msra.mxu0 %v422_v9 }
  0x14   :  { %383 = vmatprep.subr.bf16.mxu0 %v423_v11 }
  0x17   :  { %384 = vmatpush3.bf16.msra.mxu0 %v424_v12 }
  0x18   :  { %385 = vmatprep.subr.bf16.mxu0 %v425_v13 }
  0x1b   :  { %386 = vmatpush3.bf16.msra.mxu0 %v426_v18 }
  0x1c   :  { %387 = vmatprep.subr.bf16.mxu0 %v427_v19 }
  0x1f   :  { %388 = vmatpush3.bf16.msra.mxu0 %v429_v20 }
  0x22   :  { %244 = vmatmul.mubr.bf16.vlgmr.msra.gmra.mxu0 %v430_v21 }
  0x23   :  { %251 = vmatprep.mubr.bf16.mxu0 %v436_v22 }
  0x2a   :  { %252 = vmatmul.mubr.bf16.gmra.mxu0 %v438_v23 }
  0xcc   :  { %v411_v24 = vpop.f32.mrf.mxu1 }
  0xce   :  { %v294_v26 = vpop.f32.mrf.mxu1 }
  0xd0   :  { %v412_v31 = vpop.f32.mrf.mxu1 }
  0xd2   :  { %v297_v37 = vpop.f32.mrf.mxu1 }
  0xe2   :  { %v389_v25 = vpop.f32.mrf.mxu0 }
  0xe4   :  { %v390_v27 = vpop.f32.mrf.mxu0 }
  0xe5   :  { %v391_v29 = vadd.f32 %v390_v27, %v389_v25 }
  0xe6   :  { %v392_v30 = vpop.f32.mrf.mxu0 }
  0xe7   :  { %v246_v32 = vadd.f32 %v391_v29, %v338_v28 }
  0xe8   :  { %v393_v33 = vpop.f32.mrf.mxu0 }
  0xe9   :  { %v394_v34 = vadd.f32 %v393_v33, %v392_v30  ;;  %v295_v35 = vadd.f32 %v294_v26, %v246_v32 }
  0xea   :  { %v395_v36 = vpop.f32.mrf.mxu0 }
  0xeb   :  { %v309_v38 = vmax.f32 %v295_v35, 0.0  ;;  %v249_v39 = vadd.f32 %v394_v34, %v338_v28 }
  0xec   :  { %v396_v40 = vpop.f32.mrf.mxu0 }
  0xed   :  { %v369_v41 = vpack.c.bf16 %v309_v38, %v309_v38  ;;  %v397_v42 = vadd.f32 %v396_v40, %v395_v36  ;;  %v298_v43 = vadd.f32 %v297_v37, %v249_v39 }
  0xee   :  { %v398_v44 = vpop.f32.mrf.mxu0 }
  0xef   :  { %330 = vst.msk [vmem:[%s553_s3] sm:$0xf] %vm329_vm1, %v369_v41  ;;  %v254_v45 = vadd.f32 %v397_v42, %v338_v28  ;;  %v310_v46 = vmax.f32 %v298_v43, 0.0 }
  0xf0   :  { %v399_v47 = vpop.f32.mrf.mxu0 }
  0xf1   :  { %v303_v48 = vadd.f32 %v411_v24, %v254_v45  ;;  %v370_v49 = vpack.c.bf16 %v310_v46, %v310_v46  ;;  %v400_v50 = vadd.f32 %v399_v47, %v398_v44 }
  0xf3   :  { %v311_v51 = vmax.f32 %v303_v48, 0.0  ;;  %331 = vst.msk [vmem:[%s553_s3 + $0x4] sm:$0xf] %vm329_vm1, %v370_v49  ;;  %v257_v52 = vadd.f32 %v400_v50, %v338_v28 }
  0xf5   :  { %v371_v53 = vpack.c.bf16 %v311_v51, %v311_v51  ;;  %v306_v54 = vadd.f32 %v412_v31, %v257_v52 }
  0xf7   :  { %332 = vst.msk [vmem:[%s553_s3 + $0x8] sm:$0xf] %vm329_vm1, %v371_v53  ;;  %v312_v55 = vmax.f32 %v306_v54, 0.0 }
  0xf9   :  { %v372_v56 = vpack.c.bf16 %v312_v55, %v312_v55 }
  0xfb   :  { %333 = vst.msk [vmem:[%s553_s3 + $0xc] sm:$0xf] %vm329_vm1, %v372_v56 }

// kernel: _lambda_.83
= control target key start
LH: loop header
LB: loop body
LE: loop exit
PB: predicated region body
PF: predicated region fallthrough
CT: control target
= control target key end

     0   :  { %vm68_vm0 = vcmask 523264   ;;  %s247_s1 = inlined_call_operand.vmem [shape: bf16[1,64,128], index: 1, kind: input, shape index: {}]   ;;  %s248_s0 = inlined_call_operand.vmem [shape: bf16[1,32,64], index: 0, kind: input, shape index: {}]   ;;  %s249_s2 = inlined_call_operand.vmem [shape: f32[1,1,128], index: 2, kind: input, shape index: {}]   ;;  %s250_s3 = inlined_call_operand.vmem [shape: bf16[1,32,128], index: 3, kind: output, shape index: {}]  }
   0x1   :  { %v194_v0 = vld [vmem:[%s247_s1 + $0x18] sm:$0xff]   ;;  %v195_v1 = vld [vmem:[%s247_s1 + $0x10] sm:$0xff]   ;;  %v196_v2 = vld [vmem:[%s247_s1 + $0x8] sm:$0xff]  }
   0x2   :  { %182 = vmatprep.subr.bf16.mxu0 %v194_v0  ;;  %v198_v3 = vld [vmem:[%s248_s0] sm:$0xff]   ;;  %v199_v5 = vld [vmem:[%s248_s0 + $0x8] sm:$0xff]  }
   0x3   :  { %183 = vmatpush3.bf16.msra.mxu0 %v194_v0  ;;  %190 = vmatprep.mubr.msk.bf16.mxu0 %vm68_vm0, %v198_v3  ;;  %v197_v4 = vld [vmem:[%s247_s1] sm:$0xff]  }
   0x4   :  { %184 = vmatprep.subr.bf16.mxu0 %v195_v1  ;;  %v148_v7 = vld [vmem:[%s249_s2] ss:$0 sm:$0xff] }
   0x7   :  { %185 = vmatpush3.bf16.msra.mxu0 %v195_v1 }
   0x8   :  { %186 = vmatprep.subr.bf16.mxu0 %v196_v2 }
   0xb   :  { %187 = vmatpush3.bf16.msra.mxu0 %v196_v2 }
   0xc   :  { %188 = vmatprep.subr.bf16.mxu0 %v197_v4 }
   0xf   :  { %189 = vmatpush3.bf16.msra.mxu0 %v197_v4 }
  0x12   :  { %191 = vmatmul.mubr.msk.bf16.vlgmr.msra.gmra.mxu0 %vm68_vm0, %v199_v5 }
  0xd2   :  { %v192_v6 = vpop.f32.mrf.mxu0 }
  0xd3   :  { %v118_v10 = vadd.f32 %v192_v6, %v148_v7 }
  0xd4   :  { %v109_v8 = vpop.f32.mrf.mxu0 }
  0xd5   :  { %v110_v13 = vadd.f32 %v148_v7, %v109_v8 }
  0xd6   :  { %v193_v9 = vpop.f32.mrf.mxu0 }
  0xd7   :  { %v121_v11 = vadd.f32 %v193_v9, %v148_v7 }
  0xd8   :  { %v112_v12 = vpop.f32.mrf.mxu0 }
  0xd9   :  { %v173_v14 = vpack.c.bf16 %v121_v11, %v118_v10  ;;  %v113_v15 = vadd.f32 %v148_v7, %v112_v12 }
  0xdb   :  { %175 = vst [vmem:[%s250_s3 + $0x8] sm:$0xff] %v173_v14   ;;  %v168_v16 = vpack.c.bf16 %v113_v15, %v110_v13 }
  0xdd   :  { %169 = vst [vmem:[%s250_s3] sm:$0xff] %v168_v16  }

// kernel: _lambda_.84
= control target key start
LH: loop header
LB: loop body
LE: loop exit
PB: predicated region body
PF: predicated region fallthrough
CT: control target
= control target key end

     0   :  { %vm55_vm0 = vcmask 261120   ;;  %s254_s1 = inlined_call_operand.vmem [shape: bf16[1,32,128], index: 1, kind: input, shape index: {}]   ;;  %s255_s0 = inlined_call_operand.vmem [shape: bf16[1,32,32], index: 0, kind: input, shape index: {}]   ;;  %s256_s2 = inlined_call_operand.vmem [shape: f32[1,1,128], index: 2, kind: input, shape index: {}]   ;;  %s257_s3 = inlined_call_operand.vmem [shape: bf16[1,32,128], index: 3, kind: input, shape index: {}]   ;;  %s258_s4 = inlined_call_operand.vmem [shape: bf16[1,32,128], index: 4, kind: output, shape index: {}]  }
   0x1   :  { %v198_v0 = vld [vmem:[%s254_s1 + $0x8] sm:$0xff]   ;;  %v199_v1 = vld [vmem:[%s254_s1] sm:$0xff]  }
   0x2   :  { %190 = vmatprep.subr.bf16.mxu0 %v198_v0  ;;  %v200_v2 = vld [vmem:[%s255_s0] sm:$0xff]   ;;  %v201_v3 = vld [vmem:[%s255_s0 + $0x8] sm:$0xff]  }
   0x3   :  { %191 = vmatpush3.bf16.msra.mxu0 %v198_v0  ;;  %194 = vmatprep.mubr.msk.bf16.mxu0 %vm55_vm0, %v200_v2  ;;  %v151_v4 = vld [vmem:[%s256_s2] ss:$0 sm:$0xff]  ;;  %v184_v5 = vld [vmem:[%s257_s3 + $0x8] sm:$0xff]  }
   0x4   :  { %192 = vmatprep.subr.bf16.mxu0 %v199_v1  ;;  %v167_v7 = vld [vmem:[%s257_s3] sm:$0xff]   ;;  %v172_v9 = vunpack.c.l.bf16 %v184_v5  ;;  %v173_v13 = vunpack.c.h.bf16 %v184_v5 }
   0x5   :  { %v168_v12 = vunpack.c.l.bf16 %v167_v7  ;;  %v169_v17 = vunpack.c.h.bf16 %v167_v7 }
   0x7   :  { %193 = vmatpush3.bf16.msra.mxu0 %v199_v1 }
   0xa   :  { %195 = vmatmul.mubr.msk.bf16.vlgmr.msra.gmra.mxu0 %vm55_vm0, %v201_v3 }
  0xca   :  { %v196_v6 = vpop.f32.mrf.mxu0 }
  0xcb   :  { %v105_v8 = vadd.f32 %v196_v6, %v151_v4 }
  0xcc   :  { %v96_v10 = vpop.f32.mrf.mxu0 }
  0xcd   :  { %v97_v11 = vadd.f32 %v151_v4, %v96_v10  ;;  %v121_v15 = vadd.f32 %v172_v9, %v105_v8 }
  0xce   :  { %v197_v14 = vpop.f32.mrf.mxu0 }
  0xcf   :  { %v108_v16 = vadd.f32 %v197_v14, %v151_v4  ;;  %v119_v19 = vadd.f32 %v168_v12, %v97_v11  ;;  %v125_v22 = vmax.f32 %v121_v15, 0.0 }
  0xd0   :  { %v99_v18 = vpop.f32.mrf.mxu0 }
  0xd1   :  { %v122_v20 = vadd.f32 %v173_v13, %v108_v16  ;;  %v100_v21 = vadd.f32 %v151_v4, %v99_v18  ;;  %v123_v25 = vmax.f32 %v119_v19, 0.0 }
  0xd3   :  { %v126_v23 = vmax.f32 %v122_v20, 0.0  ;;  %v120_v24 = vadd.f32 %v169_v17, %v100_v21 }
  0xd5   :  { %v182_v26 = vpack.c.bf16 %v126_v23, %v125_v22  ;;  %v124_v27 = vmax.f32 %v120_v24, 0.0 }
  0xd7   :  { %185 = vst [vmem:[%s258_s4 + $0x8] sm:$0xff] %v182_v26   ;;  %v177_v28 = vpack.c.bf16 %v124_v27, %v123_v25 }
  0xd9   :  { %178 = vst [vmem:[%s258_s4] sm:$0xff] %v177_v28  }

// kernel: _lambda_.85
= control target key start
LH: loop header
LB: loop body
LE: loop exit
PB: predicated region body
PF: predicated region fallthrough
CT: control target
= control target key end

     0   :  { %vm171_vm0 = vcmask 257024   ;;  %s304_s1 = inlined_call_operand.vmem [shape: bf16[1,128,32], index: 1, kind: input, shape index: {}]   ;;  %s305_s0 = inlined_call_operand.vmem [shape: bf16[1,32,128], index: 0, kind: input, shape index: {}]   ;;  %s306_s2 = inlined_call_operand.vmem [shape: f32[1,1,32], index: 2, kind: input, shape index: {}]   ;;  %s307_s3 = inlined_call_operand.vmem [shape: bf16[1,32,32], index: 3, kind: output, shape index: {}]  }
   0x1   :  { %v229_v0 = vld [vmem:[%s304_s1 + $0x38] sm:$0xff]   ;;  %v230_v1 = vld [vmem:[%s304_s1 + $0x30] sm:$0xff]   ;;  %v231_v2 = vld [vmem:[%s304_s1 + $0x28] sm:$0xff]  }
   0x2   :  { %209 = vmatprep.subr.bf16.mxu0 %v229_v0  ;;  %v232_v3 = vld [vmem:[%s304_s1 + $0x20] sm:$0xff]   ;;  %v233_v5 = vld [vmem:[%s304_s1 + $0x18] sm:$0xff]   ;;  %v234_v6 = vld [vmem:[%s304_s1 + $0x10] sm:$0xff]  }
   0x3   :  { %210 = vmatpush3.bf16.msra.mxu0 %v229_v0  ;;  %v237_v4 = vld [vmem:[%s305_s0] sm:$0xff]   ;;  %v235_v7 = vld [vmem:[%s304_s1 + $0x8] sm:$0xff]  }
   0x4   :  { %211 = vmatprep.subr.bf16.mxu0 %v230_v1  ;;  %225 = vmatprep.mubr.bf16.mxu0 %v237_v4  ;;  %v236_v8 = vld [vmem:[%s304_s1] sm:$0xff]   ;;  %v238_v9 = vld [vmem:[%s305_s0 + $0x8] sm:$0xff]  }
   0x5   :  { %v180_v10 = vld [vmem:[%s306_s2] ss:$0 sm:$0xff] }
   0x7   :  { %212 = vmatpush3.bf16.msra.mxu0 %v230_v1 }
   0x8   :  { %213 = vmatprep.subr.bf16.mxu0 %v231_v2 }
   0xb   :  { %214 = vmatpush3.bf16.msra.mxu0 %v231_v2 }
   0xc   :  { %215 = vmatprep.subr.bf16.mxu0 %v232_v3 }
   0xf   :  { %216 = vmatpush3.bf16.msra.mxu0 %v232_v3 }
  0x10   :  { %217 = vmatprep.subr.bf16.mxu0 %v233_v5 }
  0x13   :  { %218 = vmatpush3.bf16.msra.mxu0 %v233_v5 }
  0x14   :  { %219 = vmatprep.subr.bf16.mxu0 %v234_v6 }
  0x17   :  { %220 = vmatpush3.bf16.msra.mxu0 %v234_v6 }
  0x18   :  { %221 = vmatprep.subr.bf16.mxu0 %v235_v7 }
  0x1b   :  { %222 = vmatpush3.bf16.msra.mxu0 %v235_v7 }
  0x1c   :  { %223 = vmatprep.subr.bf16.mxu0 %v236_v8 }
  0x1f   :  { %224 = vmatpush3.bf16.msra.mxu0 %v236_v8 }
  0x22   :  { %226 = vmatmul.mubr.bf16.vlgmr.msra.gmra.mxu0 %v238_v9 }
  0xe2   :  { %v227_v11 = vpop.f32.mrf.mxu0 }
  0xe3   :  { %v145_v12 = vadd.f32 %v227_v11, %v180_v10 }
  0xe4   :  { %v136_v13 = vpop.f32.mrf.mxu0 }
  0xe5   :  { %v153_v14 = vmax.f32 %v145_v12, 0.0  ;;  %v137_v15 = vadd.f32 %v180_v10, %v136_v13 }
  0xe6   :  { %v228_v16 = vpop.f32.mrf.mxu0 }
  0xe7   :  { %v197_v17 = vpack.c.bf16 %v153_v14, %v153_v14  ;;  %v151_v18 = vmax.f32 %v137_v15, 0.0  ;;  %v148_v19 = vadd.f32 %v228_v16, %v180_v10 }
  0xe8   :  { %v139_v20 = vpop.f32.mrf.mxu0 }
  0xe9   :  { %174 = vst.msk [vmem:[%s307_s3 + $0x8] sm:$0xf] %vm171_vm0, %v197_v17  ;;  %v195_v21 = vpack.c.bf16 %v151_v18, %v151_v18  ;;  %v154_v22 = vmax.f32 %v148_v19, 0.0  ;;  %v140_v23 = vadd.f32 %v180_v10, %v139_v20 }
  0xeb   :  { %172 = vst.msk [vmem:[%s307_s3] sm:$0xf] %vm171_vm0, %v195_v21  ;;  %v198_v24 = vpack.c.bf16 %v154_v22, %v154_v22  ;;  %v152_v25 = vmax.f32 %v140_v23, 0.0 }
  0xed   :  { %175 = vst.msk [vmem:[%s307_s3 + $0xc] sm:$0xf] %vm171_vm0, %v198_v24  ;;  %v196_v26 = vpack.c.bf16 %v152_v25, %v152_v25 }
  0xef   :  { %173 = vst.msk [vmem:[%s307_s3 + $0x4] sm:$0xf] %vm171_vm0, %v196_v26 }

// kernel: _lambda_.100
= control target key start
LH: loop header
LB: loop body
LE: loop exit
PB: predicated region body
PF: predicated region fallthrough
CT: control target
= control target key end

     0   :  { %vm171_vm0 = vcmask 519168   ;;  %s304_s1 = inlined_call_operand.vmem [shape: bf16[1,128,64], index: 1, kind: input, shape index: {}]   ;;  %s305_s0 = inlined_call_operand.vmem [shape: bf16[1,32,128], index: 0, kind: input, shape index: {}]   ;;  %s306_s2 = inlined_call_operand.vmem [shape: f32[1,1,64], index: 2, kind: input, shape index: {}]   ;;  %s307_s3 = inlined_call_operand.vmem [shape: bf16[1,32,64], index: 3, kind: output, shape index: {}]  }
   0x1   :  { %v229_v0 = vld [vmem:[%s304_s1 + $0x38] sm:$0xff]   ;;  %v230_v1 = vld [vmem:[%s304_s1 + $0x30] sm:$0xff]   ;;  %v231_v2 = vld [vmem:[%s304_s1 + $0x28] sm:$0xff]  }
   0x2   :  { %209 = vmatprep.subr.bf16.mxu0 %v229_v0  ;;  %v232_v3 = vld [vmem:[%s304_s1 + $0x20] sm:$0xff]   ;;  %v233_v5 = vld [vmem:[%s304_s1 + $0x18] sm:$0xff]   ;;  %v234_v6 = vld [vmem:[%s304_s1 + $0x10] sm:$0xff]  }
   0x3   :  { %210 = vmatpush3.bf16.msra.mxu0 %v229_v0  ;;  %v237_v4 = vld [vmem:[%s305_s0] sm:$0xff]   ;;  %v235_v7 = vld [vmem:[%s304_s1 + $0x8] sm:$0xff]  }
   0x4   :  { %211 = vmatprep.subr.bf16.mxu0 %v230_v1  ;;  %225 = vmatprep.mubr.bf16.mxu0 %v237_v4  ;;  %v236_v8 = vld [vmem:[%s304_s1] sm:$0xff]   ;;  %v238_v9 = vld [vmem:[%s305_s0 + $0x8] sm:$0xff]  }
   0x5   :  { %v180_v10 = vld [vmem:[%s306_s2] ss:$0 sm:$0xff] }
   0x7   :  { %212 = vmatpush3.bf16.msra.mxu0 %v230_v1 }
   0x8   :  { %213 = vmatprep.subr.bf16.mxu0 %v231_v2 }
   0xb   :  { %214 = vmatpush3.bf16.msra.mxu0 %v231_v2 }
   0xc   :  { %215 = vmatprep.subr.bf16.mxu0 %v232_v3 }
   0xf   :  { %216 = vmatpush3.bf16.msra.mxu0 %v232_v3 }
  0x10   :  { %217 = vmatprep.subr.bf16.mxu0 %v233_v5 }
  0x13   :  { %218 = vmatpush3.bf16.msra.mxu0 %v233_v5 }
  0x14   :  { %219 = vmatprep.subr.bf16.mxu0 %v234_v6 }
  0x17   :  { %220 = vmatpush3.bf16.msra.mxu0 %v234_v6 }
  0x18   :  { %221 = vmatprep.subr.bf16.mxu0 %v235_v7 }
  0x1b   :  { %222 = vmatpush3.bf16.msra.mxu0 %v235_v7 }
  0x1c   :  { %223 = vmatprep.subr.bf16.mxu0 %v236_v8 }
  0x1f   :  { %224 = vmatpush3.bf16.msra.mxu0 %v236_v8 }
  0x22   :  { %226 = vmatmul.mubr.bf16.vlgmr.msra.gmra.mxu0 %v238_v9 }
  0xe2   :  { %v227_v11 = vpop.f32.mrf.mxu0 }
  0xe3   :  { %v145_v12 = vadd.f32 %v227_v11, %v180_v10 }
  0xe4   :  { %v136_v13 = vpop.f32.mrf.mxu0 }
  0xe5   :  { %v153_v14 = vmax.f32 %v145_v12, 0.0  ;;  %v137_v15 = vadd.f32 %v180_v10, %v136_v13 }
  0xe6   :  { %v228_v16 = vpop.f32.mrf.mxu0 }
  0xe7   :  { %v197_v17 = vpack.c.bf16 %v153_v14, %v153_v14  ;;  %v151_v18 = vmax.f32 %v137_v15, 0.0  ;;  %v148_v19 = vadd.f32 %v228_v16, %v180_v10 }
  0xe8   :  { %v139_v20 = vpop.f32.mrf.mxu0 }
  0xe9   :  { %174 = vst.msk [vmem:[%s307_s3 + $0x8] sm:$0xf] %vm171_vm0, %v197_v17  ;;  %v195_v21 = vpack.c.bf16 %v151_v18, %v151_v18  ;;  %v154_v22 = vmax.f32 %v148_v19, 0.0  ;;  %v140_v23 = vadd.f32 %v180_v10, %v139_v20 }
  0xeb   :  { %172 = vst.msk [vmem:[%s307_s3] sm:$0xf] %vm171_vm0, %v195_v21  ;;  %v198_v24 = vpack.c.bf16 %v154_v22, %v154_v22  ;;  %v152_v25 = vmax.f32 %v140_v23, 0.0 }
  0xed   :  { %175 = vst.msk [vmem:[%s307_s3 + $0xc] sm:$0xf] %vm171_vm0, %v198_v24  ;;  %v196_v26 = vpack.c.bf16 %v152_v25, %v152_v25 }
  0xef   :  { %173 = vst.msk [vmem:[%s307_s3 + $0x4] sm:$0xf] %vm171_vm0, %v196_v26 }

// kernel: _lambda_.102
= control target key start
LH: loop header
LB: loop body
LE: loop exit
PB: predicated region body
PF: predicated region fallthrough
CT: control target
= control target key end

     0   :  { %v221_v1 = vmov 0   ;;  %v34_v18 = vlaneseq  ;;  %s299_s1 = inlined_call_operand.vmem [shape: bf16[1,128,256], index: 1, kind: input, shape index: {}]   ;;  %s300_s0 = inlined_call_operand.vmem [shape: bf16[1,8,128], index: 0, kind: input, shape index: {}]   ;;  %s301_s2 = inlined_call_operand.vmem [shape: f32[1,1,256], index: 2, kind: input, shape index: {}]   ;;  %s302_s3 = inlined_call_operand.vmem [shape: bf16[1,8,256], index: 3, kind: output, shape index: {}]  }
   0x1   :  { %v197_v0 = vld [vmem:[%s299_s1 + $0x74] ss:$8 sps:$4 sm:$0xff]   ;;  %156 = vmatprep.mubr.bf16.mxu0 %v221_v1  ;;  %v199_v2 = vld [vmem:[%s299_s1 + $0x70] ss:$8 sps:$4 sm:$0xff]   ;;  %v200_v3 = vld [vmem:[%s299_s1 + $0x64] ss:$8 sps:$4 sm:$0xff]  }
   0x2   :  { %124 = vmatprep.subr.bf16.mxu0 %v197_v0  ;;  %v202_v4 = vld [vmem:[%s299_s1 + $0x60] ss:$8 sps:$4 sm:$0xff]   ;;  %v203_v5 = vld [vmem:[%s299_s1 + $0x54] ss:$8 sps:$4 sm:$0xff]   ;;  %v205_v6 = vld [vmem:[%s299_s1 + $0x50] ss:$8 sps:$4 sm:$0xff]  }
   0x3   :  { %125 = vmatpush1.bf16.msra.mxu0 %v199_v2  ;;  %v206_v7 = vld [vmem:[%s299_s1 + $0x44] ss:$8 sps:$4 sm:$0xff]   ;;  %v208_v8 = vld [vmem:[%s299_s1 + $0x40] ss:$8 sps:$4 sm:$0xff]   ;;  %v209_v9 = vld [vmem:[%s299_s1 + $0x34] ss:$8 sps:$4 sm:$0xff]  }
   0x4   :  { %126 = vmatprep.subr.bf16.mxu0 %v200_v3  ;;  %v211_v10 = vld [vmem:[%s299_s1 + $0x30] ss:$8 sps:$4 sm:$0xff]   ;;  %v212_v11 = vld [vmem:[%s299_s1 + $0x24] ss:$8 sps:$4 sm:$0xff]   ;;  %v214_v12 = vld [vmem:[%s299_s1 + $0x20] ss:$8 sps:$4 sm:$0xff]  }
   0x5   :  { %v215_v13 = vld [vmem:[%s299_s1 + $0x14] ss:$8 sps:$4 sm:$0xff]   ;;  %v217_v14 = vld [vmem:[%s299_s1 + $0x10] ss:$8 sps:$4 sm:$0xff]   ;;  %v218_v15 = vld [vmem:[%s299_s1 + $0x4] ss:$8 sps:$4 sm:$0xff]  }
   0x6   :  { %v220_v16 = vld [vmem:[%s299_s1] ss:$8 sps:$4 sm:$0xff]   ;;  %v35_v19 = vshrl.u32 %v34_v18, 7 }
   0x7   :  { %127 = vmatpush1.bf16.msra.mxu0 %v202_v4  ;;  %v15_v17 = vld [vmem:[%s300_s0] sm:$0xf] }
   0x8   :  { %128 = vmatprep.subr.bf16.mxu0 %v203_v5  ;;  %v36_v20 = vsub.s32 0, %v35_v19  ;;  %v40_v21 = vsub.s32 1, %v35_v19  ;;  %v32_v22 = vld [vmem:[%s301_s2] sm:$0x3] }
   0xa   :  { %v37_v23 = vrot.slane %v32_v22, %v36_v20  ;;  %v41_v24 = vrot.slane %v32_v22, %v40_v21 }
   0xb   :  { %129 = vmatpush1.bf16.msra.mxu0 %v205_v6 }
   0xc   :  { %130 = vmatprep.subr.bf16.mxu0 %v206_v7 }
   0xf   :  { %131 = vmatpush1.bf16.msra.mxu0 %v208_v8 }
  0x10   :  { %132 = vmatprep.subr.bf16.mxu0 %v209_v9 }
  0x13   :  { %133 = vmatpush1.bf16.msra.mxu0 %v211_v10 }
  0x14   :  { %134 = vmatprep.subr.bf16.mxu0 %v212_v11 }
  0x17   :  { %135 = vmatpush1.bf16.msra.mxu0 %v214_v12 }
  0x18   :  { %136 = vmatprep.subr.bf16.mxu0 %v215_v13 }
  0x1b   :  { %137 = vmatpush1.bf16.msra.mxu0 %v217_v14 }
  0x1c   :  { %138 = vmatprep.subr.bf16.mxu0 %v218_v15 }
  0x1f   :  { %139 = vmatpush1.bf16.msra.mxu0 %v220_v16 }
  0x22   :  { %157 = vmatmul.mubr.bf16.vlgmr.msra.gmra.mxu0 %v15_v17 }
  0xe2   :  { %v158_v25 = vpop.f32.mrf.mxu0 }
  0xe3   :  { %v159_v27 = vadd.f32 %v158_v25, %v37_v23 }
  0xe4   :  { %v160_v26 = vpop.f32.mrf.mxu0 }
  0xe5   :  { %v161_v28 = vadd.f32 %v160_v26, %v41_v24 }
  0xe6   :  { %v162_v29 = vpop.f32.mrf.mxu0 }
  0xe7   :  { %v195_v30 = vpack.c.bf16 %v161_v28, %v159_v27 }
  0xe8   :  { %v163_v31 = vpop.f32.mrf.mxu0 }
  0xe9   :  { %173 = vst [vmem:[%s302_s3] sm:$0xff] %v195_v30 }

// kernel: _lambda_.101
= control target key start
LH: loop header
LB: loop body
LE: loop exit
PB: predicated region body
PF: predicated region fallthrough
CT: control target
= control target key end

     0   :  { %v609_v35 = vmov 0.0   ;;  %vm610_vm0 = vmmov 0   ;;  %vm330_vm1 = vcmask 523264   ;;  %vm456_vm2 = vcmask 519168   ;;  %s754_s1 = inlined_call_operand.vmem [shape: bf16[1,576,64], index: 1, kind: input, shape index: {}]   ;;  %s755_s0 = inlined_call_operand.vmem [shape: bf16[1,8,576], index: 0, kind: input, shape index: {}]   ;;  %s756_s2 = inlined_call_operand.vmem [shape: f32[1,1,64], index: 2, kind: input, shape index: {}]   ;;  %s757_s3 = inlined_call_operand.vmem [shape: bf16[1,8,64], index: 3, kind: output, shape index: {}]  }
   0x1   :  { %v568_v0 = vld [vmem:[%s754_s1 + $0x78] sm:$0xff]   ;;  %v572_v4 = vld [vmem:[%s754_s1 + $0x70] sm:$0xff]   ;;  %v576_v8 = vld [vmem:[%s754_s1 + $0x68] sm:$0xff]  }
   0x2   :  { %v569_v1 = vld [vmem:[%s754_s1 + $0x38] sm:$0xff]   ;;  %505 = vmatprep.subr.bf16.mxu0 %v568_v0  ;;  %v573_v5 = vld [vmem:[%s754_s1 + $0x30] sm:$0xff]   ;;  %v577_v9 = vld [vmem:[%s754_s1 + $0x28] sm:$0xff]  }
   0x3   :  { %v570_v2 = vld [vmem:[%s754_s1 + $0xf8] sm:$0xff]   ;;  %506 = vmatpush3.bf16.msra.mxu0 %v569_v1  ;;  %v574_v6 = vld [vmem:[%s754_s1 + $0xf0] sm:$0xff]   ;;  %v578_v10 = vld [vmem:[%s754_s1 + $0xe8] sm:$0xff]  }
   0x4   :  { %v571_v3 = vld [vmem:[%s754_s1 + $0xb8] sm:$0xff]   ;;  %527 = vmatprep.subr.bf16.mxu1 %v570_v2  ;;  %507 = vmatprep.subr.bf16.mxu0 %v572_v4  ;;  %v575_v7 = vld [vmem:[%s754_s1 + $0xb0] sm:$0xff]   ;;  %v579_v11 = vld [vmem:[%s754_s1 + $0xa8] sm:$0xff]  }
   0x5   :  { %528 = vmatpush3.bf16.msra.mxu1 %v571_v3  ;;  %v580_v12 = vld [vmem:[%s754_s1 + $0x60] sm:$0xff]   ;;  %v584_v16 = vld [vmem:[%s754_s1 + $0x58] sm:$0xff]   ;;  %v588_v20 = vld [vmem:[%s754_s1 + $0x50] sm:$0xff]  }
   0x6   :  { %529 = vmatprep.subr.bf16.mxu1 %v574_v6  ;;  %v581_v13 = vld [vmem:[%s754_s1 + $0x20] sm:$0xff]   ;;  %v585_v17 = vld [vmem:[%s754_s1 + $0x18] sm:$0xff]   ;;  %v589_v21 = vld [vmem:[%s754_s1 + $0x10] sm:$0xff]  }
   0x7   :  { %508 = vmatpush3.bf16.msra.mxu0 %v573_v5  ;;  %v582_v14 = vld [vmem:[%s754_s1 + $0xe0] sm:$0xff]   ;;  %v586_v18 = vld [vmem:[%s754_s1 + $0xd8] sm:$0xff]   ;;  %v590_v22 = vld [vmem:[%s754_s1 + $0xd0] sm:$0xff]  }
   0x8   :  { %509 = vmatprep.subr.bf16.mxu0 %v576_v8  ;;  %v583_v15 = vld [vmem:[%s754_s1 + $0xa0] sm:$0xff]   ;;  %v587_v19 = vld [vmem:[%s754_s1 + $0x98] sm:$0xff]   ;;  %v591_v23 = vld [vmem:[%s754_s1 + $0x90] sm:$0xff]  }
   0x9   :  { %530 = vmatpush3.bf16.msra.mxu1 %v575_v7  ;;  %v592_v24 = vld [vmem:[%s754_s1 + $0x48] sm:$0xff]   ;;  %v596_v28 = vld [vmem:[%s754_s1 + $0x40] sm:$0xff]   ;;  %v605_v39 = vld [vmem:[%s754_s1 + $0x118] sm:$0xff]  }
   0xa   :  { %531 = vmatprep.subr.bf16.mxu1 %v578_v10  ;;  %v593_v25 = vld [vmem:[%s754_s1 + $0x8] sm:$0xff]   ;;  %v597_v29 = vld [vmem:[%s754_s1] sm:$0xff]   ;;  %v606_v40 = vld [vmem:[%s754_s1 + $0x110] sm:$0xff]  }
   0xb   :  { %510 = vmatpush3.bf16.msra.mxu0 %v577_v9  ;;  %v594_v26 = vld [vmem:[%s754_s1 + $0xc8] sm:$0xff]   ;;  %v598_v30 = vld [vmem:[%s754_s1 + $0xc0] sm:$0xff]   ;;  %v601_v43 = vld [vmem:[%s755_s0 + $0x10] ss:$0 sps:$4 sm:$0xff]  }
   0xc   :  { %511 = vmatprep.subr.bf16.mxu0 %v580_v12  ;;  %v595_v27 = vld [vmem:[%s754_s1 + $0x88] sm:$0xff]   ;;  %v15_v31 = vld [vmem:[%s755_s0] sm:$0xff] }
   0xd   :  { %532 = vmatpush3.bf16.msra.mxu1 %v579_v11  ;;  %v463_v32 = vcombine.low %v15_v31, %v15_v31  ;;  %v464_v33 = vcombine.high %v15_v31, %v15_v31  ;;  %v602_v34 = vld [vmem:[%s754_s1 + $0x80] sm:$0xff]   ;;  %v16_v36 = vld [vmem:[%s755_s0 + $0x8] sm:$0xff] }
   0xe   :  { %533 = vmatprep.subr.bf16.mxu1 %v582_v14  ;;  %v465_v37 = vcombine.low %v16_v36, %v16_v36  ;;  %v466_v38 = vcombine.high %v16_v36, %v16_v36  ;;  %v607_v41 = vld [vmem:[%s754_s1 + $0x108] sm:$0xff]   ;;  %v608_v42 = vld [vmem:[%s754_s1 + $0x100] sm:$0xff]  }
   0xf   :  { %512 = vmatpush3.bf16.msra.mxu0 %v581_v13  ;;  %366 = vmatprep.mubr.bf16.mxu0 %v464_v33  ;;  %v462_v52 = vld [vmem:[%s756_s2] ss:$0 sm:$0xff] }
  0x10   :  { %513 = vmatprep.subr.bf16.mxu0 %v584_v16  ;;  %406 = vmatprep.mubr.bf16.mxu1 %v466_v38 }
  0x11   :  { %534 = vmatpush3.bf16.msra.mxu1 %v583_v15 }
  0x12   :  { %535 = vmatprep.subr.bf16.mxu1 %v586_v18 }
  0x13   :  { %514 = vmatpush3.bf16.msra.mxu0 %v585_v17 }
  0x14   :  { %515 = vmatprep.subr.bf16.mxu0 %v588_v20 }
  0x15   :  { %536 = vmatpush3.bf16.msra.mxu1 %v587_v19 }
  0x16   :  { %537 = vmatprep.subr.bf16.mxu1 %v590_v22 }
  0x17   :  { %516 = vmatpush3.bf16.msra.mxu0 %v589_v21 }
  0x18   :  { %517 = vmatprep.subr.bf16.mxu0 %v592_v24 }
  0x19   :  { %538 = vmatpush3.bf16.msra.mxu1 %v591_v23 }
  0x1a   :  { %539 = vmatprep.subr.bf16.mxu1 %v594_v26 }
  0x1b   :  { %518 = vmatpush3.bf16.msra.mxu0 %v593_v25 }
  0x1c   :  { %519 = vmatprep.subr.bf16.mxu0 %v596_v28 }
  0x1d   :  { %540 = vmatpush3.bf16.msra.mxu1 %v595_v27 }
  0x1e   :  { %541 = vmatprep.subr.bf16.mxu1 %v598_v30 }
  0x1f   :  { %520 = vmatpush3.bf16.msra.mxu0 %v597_v29 }
  0x20   :  { %554 = vmatprep.subr.bf16.mxu0 %v609_v35 }
  0x21   :  { %542 = vmatpush3.bf16.msra.mxu1 %v602_v34 }
  0x22   :  { %367 = vmatmul.mubr.bf16.vlgmr.msra.gmra.mxu0 %v463_v32 }
  0x23   :  { %555 = vmatpush3.bf16.msra.mxu0 %v605_v39  ;;  %562 = vmatprep.mubr.msk.bf16.mxu0 %vm610_vm0, %v609_v35 }
  0x24   :  { %407 = vmatmul.mubr.bf16.vlgmr.msra.gmra.mxu1 %v465_v37  ;;  %556 = vmatprep.subr.bf16.mxu0 %v609_v35 }
  0x27   :  { %557 = vmatpush3.bf16.msra.mxu0 %v606_v40 }
  0x28   :  { %558 = vmatprep.subr.bf16.mxu0 %v609_v35 }
  0x2b   :  { %559 = vmatpush3.bf16.msra.mxu0 %v607_v41 }
  0x2c   :  { %560 = vmatprep.subr.bf16.mxu0 %v609_v35 }
  0x2f   :  { %561 = vmatpush3.bf16.msra.mxu0 %v608_v42 }
  0x32   :  { %563 = vmatmul.mubr.msk.bf16.vlgmr.msra.gmra.mxu0 %vm330_vm1, %v601_v43 }
  0xe2   :  { %v521_v44 = vpop.f32.mrf.mxu0 }
  0xe4   :  { %v522_v45 = vpop.f32.mrf.mxu0  ;;  %v543_v46 = vpop.f32.mrf.mxu1 }
  0xe5   :  { %v523_v51 = vadd.f32 %v522_v45, %v521_v44 }
  0xe6   :  { %v524_v47 = vpop.f32.mrf.mxu0  ;;  %v544_v48 = vpop.f32.mrf.mxu1 }
  0xe7   :  { %v369_v54 = vadd.f32 %v523_v51, %v462_v52  ;;  %v545_v55 = vadd.f32 %v544_v48, %v543_v46 }
  0xe8   :  { %v525_v49 = vpop.f32.mrf.mxu0  ;;  %v546_v50 = vpop.f32.mrf.mxu1 }
  0xe9   :  { %v409_v56 = vadd.f32 %v545_v55, %v369_v54 }
  0xea   :  { %v547_v53 = vpop.f32.mrf.mxu1 }
  0xf2   :  { %v448_v57 = vpop.f32.mrf.mxu0 }
  0xf3   :  { %v449_v58 = vadd.f32 %v448_v57, %v409_v56 }
  0xf4   :  { %v564_v59 = vpop.f32.mrf.mxu0 }
  0xf5   :  { %v454_v60 = vmax.f32 %v449_v58, 0.0 }
  0xf6   :  { %v451_v61 = vpop.f32.mrf.mxu0 }
  0xf7   :  { %v455_v62 = vpack.c.bf16 %v454_v60, %v454_v60 }
  0xf8   :  { %v565_v63 = vpop.f32.mrf.mxu0 }
  0xf9   :  { %457 = vst.msk [vmem:[%s757_s3] sm:$0xf] %vm456_vm2, %v455_v62 }

// kernel: _lambda_.103
= control target key start
LH: loop header
LB: loop body
LE: loop exit
PB: predicated region body
PF: predicated region fallthrough
CT: control target
= control target key end

     0   :  { %v168_v1 = vmov 0   ;;  %vm79_vm0 = vcmask 523264   ;;  %v29_v10 = vlaneseq  ;;  %s230_s1 = inlined_call_operand.vmem [shape: bf16[1,64,256], index: 1, kind: input, shape index: {}]   ;;  %s231_s0 = inlined_call_operand.vmem [shape: bf16[1,8,64], index: 0, kind: input, shape index: {}]   ;;  %s232_s2 = inlined_call_operand.vmem [shape: f32[1,1,256], index: 2, kind: input, shape index: {}]   ;;  %s233_s3 = inlined_call_operand.vmem [shape: bf16[1,8,256], index: 3, kind: input, shape index: {}]   ;;  %s234_s4 = inlined_call_operand.vmem [shape: bf16[1,8,256], index: 4, kind: output, shape index: {}]  }
   0x1   :  { %v156_v0 = vld [vmem:[%s230_s1 + $0x34] ss:$8 sps:$4 sm:$0xff]   ;;  %115 = vmatprep.mubr.bf16.mxu0 %v168_v1  ;;  %v158_v2 = vld [vmem:[%s230_s1 + $0x30] ss:$8 sps:$4 sm:$0xff]   ;;  %v159_v3 = vld [vmem:[%s230_s1 + $0x24] ss:$8 sps:$4 sm:$0xff]  }
   0x2   :  { %91 = vmatprep.subr.bf16.mxu0 %v156_v0  ;;  %v161_v4 = vld [vmem:[%s230_s1 + $0x20] ss:$8 sps:$4 sm:$0xff]   ;;  %v162_v5 = vld [vmem:[%s230_s1 + $0x14] ss:$8 sps:$4 sm:$0xff]   ;;  %v164_v6 = vld [vmem:[%s230_s1 + $0x10] ss:$8 sps:$4 sm:$0xff]  }
   0x3   :  { %92 = vmatpush1.bf16.msra.mxu0 %v158_v2  ;;  %v165_v7 = vld [vmem:[%s230_s1 + $0x4] ss:$8 sps:$4 sm:$0xff]   ;;  %v167_v8 = vld [vmem:[%s230_s1] ss:$8 sps:$4 sm:$0xff]   ;;  %v30_v11 = vshrl.u32 %v29_v10, 7 }
   0x4   :  { %93 = vmatprep.subr.bf16.mxu0 %v159_v3  ;;  %v18_v9 = vld [vmem:[%s231_s0] sm:$0xf] }
   0x5   :  { %v31_v12 = vsub.s32 0, %v30_v11  ;;  %v27_v13 = vld [vmem:[%s232_s2] sm:$0x3]  ;;  %v35_v14 = vsub.s32 1, %v30_v11 }
   0x6   :  { %v124_v15 = vld [vmem:[%s233_s3] sm:$0xff] }
   0x7   :  { %94 = vmatpush1.bf16.msra.mxu0 %v161_v4  ;;  %v32_v16 = vrot.slane %v27_v13, %v31_v12  ;;  %v125_v17 = vunpack.c.l.bf16 %v124_v15  ;;  %v36_v18 = vrot.slane %v27_v13, %v35_v14  ;;  %v126_v21 = vunpack.c.h.bf16 %v124_v15 }
   0x8   :  { %95 = vmatprep.subr.bf16.mxu0 %v162_v5 }
   0xb   :  { %96 = vmatpush1.bf16.msra.mxu0 %v164_v6 }
   0xc   :  { %97 = vmatprep.subr.bf16.mxu0 %v165_v7 }
   0xf   :  { %98 = vmatpush1.bf16.msra.mxu0 %v167_v8 }
  0x12   :  { %152 = vmatmul.mubr.msk.bf16.vlgmr.msra.gmra.mxu0 %vm79_vm0, %v18_v9 }
  0xd2   :  { %v117_v19 = vpop.f32.mrf.mxu0 }
  0xd3   :  { %v118_v20 = vadd.f32 %v117_v19, %v32_v16 }
  0xd4   :  { %v119_v22 = vpop.f32.mrf.mxu0 }
  0xd5   :  { %v127_v23 = vadd.f32 %v125_v17, %v118_v20  ;;  %v120_v24 = vadd.f32 %v119_v22, %v36_v18 }
  0xd6   :  { %v121_v25 = vpop.f32.mrf.mxu0 }
  0xd7   :  { %v128_v26 = vadd.f32 %v126_v21, %v120_v24  ;;  %v129_v28 = vmax.f32 %v127_v23, 0.0 }
  0xd8   :  { %v122_v27 = vpop.f32.mrf.mxu0 }
  0xd9   :  { %v130_v29 = vmax.f32 %v128_v26, 0.0 }
  0xdb   :  { %v154_v30 = vpack.c.bf16 %v130_v29, %v129_v28 }
  0xdd   :  { %139 = vst [vmem:[%s234_s4] sm:$0xff] %v154_v30 }

// kernel: _lambda_.104
= control target key start
LH: loop header
LB: loop body
LE: loop exit
PB: predicated region body
PF: predicated region fallthrough
CT: control target
= control target key end

     0   :  { %vm200_vm0 = vcmask 519168   ;;  %s342_s1 = inlined_call_operand.vmem [shape: bf16[1,256,64], index: 1, kind: input, shape index: {}]   ;;  %s343_s0 = inlined_call_operand.vmem [shape: bf16[1,8,256], index: 0, kind: input, shape index: {}]   ;;  %s344_s2 = inlined_call_operand.vmem [shape: f32[1,1,64], index: 2, kind: input, shape index: {}]   ;;  %s345_s3 = inlined_call_operand.vmem [shape: bf16[1,8,64], index: 3, kind: output, shape index: {}]  }
   0x1   :  { %v247_v0 = vld [vmem:[%s342_s1 + $0x78] sm:$0xff]   ;;  %v249_v2 = vld [vmem:[%s342_s1 + $0x70] sm:$0xff]   ;;  %v251_v4 = vld [vmem:[%s342_s1 + $0x68] sm:$0xff]  }
   0x2   :  { %v248_v1 = vld [vmem:[%s342_s1 + $0x38] sm:$0xff]   ;;  %225 = vmatprep.subr.bf16.mxu0 %v247_v0  ;;  %v250_v3 = vld [vmem:[%s342_s1 + $0x30] sm:$0xff]   ;;  %v252_v5 = vld [vmem:[%s342_s1 + $0x28] sm:$0xff]  }
   0x3   :  { %226 = vmatpush3.bf16.msra.mxu0 %v248_v1  ;;  %v253_v6 = vld [vmem:[%s342_s1 + $0x60] sm:$0xff]   ;;  %v255_v8 = vld [vmem:[%s342_s1 + $0x58] sm:$0xff]   ;;  %v257_v10 = vld [vmem:[%s342_s1 + $0x50] sm:$0xff]  }
   0x4   :  { %227 = vmatprep.subr.bf16.mxu0 %v249_v2  ;;  %v254_v7 = vld [vmem:[%s342_s1 + $0x20] sm:$0xff]   ;;  %v256_v9 = vld [vmem:[%s342_s1 + $0x18] sm:$0xff]   ;;  %v258_v13 = vld [vmem:[%s342_s1 + $0x10] sm:$0xff]  }
   0x5   :  { %v15_v11 = vld [vmem:[%s343_s0] sm:$0xff]  ;;  %v259_v14 = vld [vmem:[%s342_s1 + $0x48] sm:$0xff]  }
   0x6   :  { %v208_v12 = vcombine.high %v15_v11, %v15_v11  ;;  %v260_v15 = vld [vmem:[%s342_s1 + $0x8] sm:$0xff]   ;;  %v261_v16 = vld [vmem:[%s342_s1 + $0x40] sm:$0xff]   ;;  %v207_v18 = vcombine.low %v15_v11, %v15_v11 }
   0x7   :  { %228 = vmatpush3.bf16.msra.mxu0 %v250_v3  ;;  %v262_v17 = vld [vmem:[%s342_s1] sm:$0xff]  }
   0x8   :  { %229 = vmatprep.subr.bf16.mxu0 %v251_v4  ;;  %190 = vmatprep.mubr.bf16.mxu0 %v208_v12  ;;  %v206_v20 = vld [vmem:[%s344_s2] ss:$0 sm:$0xff] }
   0xb   :  { %230 = vmatpush3.bf16.msra.mxu0 %v252_v5 }
   0xc   :  { %231 = vmatprep.subr.bf16.mxu0 %v253_v6 }
   0xf   :  { %232 = vmatpush3.bf16.msra.mxu0 %v254_v7 }
  0x10   :  { %233 = vmatprep.subr.bf16.mxu0 %v255_v8 }
  0x13   :  { %234 = vmatpush3.bf16.msra.mxu0 %v256_v9 }
  0x14   :  { %235 = vmatprep.subr.bf16.mxu0 %v257_v10 }
  0x17   :  { %236 = vmatpush3.bf16.msra.mxu0 %v258_v13 }
  0x18   :  { %237 = vmatprep.subr.bf16.mxu0 %v259_v14 }
  0x1b   :  { %238 = vmatpush3.bf16.msra.mxu0 %v260_v15 }
  0x1c   :  { %239 = vmatprep.subr.bf16.mxu0 %v261_v16 }
  0x1f   :  { %240 = vmatpush3.bf16.msra.mxu0 %v262_v17 }
  0x22   :  { %191 = vmatmul.mubr.bf16.vlgmr.msra.gmra.mxu0 %v207_v18 }
  0xe2   :  { %v241_v19 = vpop.f32.mrf.mxu0 }
  0xe4   :  { %v242_v21 = vpop.f32.mrf.mxu0 }
  0xe5   :  { %v243_v22 = vadd.f32 %v242_v21, %v241_v19 }
  0xe6   :  { %v244_v23 = vpop.f32.mrf.mxu0 }
  0xe7   :  { %v193_v24 = vadd.f32 %v243_v22, %v206_v20 }
  0xe8   :  { %v245_v25 = vpop.f32.mrf.mxu0 }
  0xe9   :  { %v198_v26 = vmax.f32 %v193_v24, 0.0 }
  0xeb   :  { %v199_v27 = vpack.c.bf16 %v198_v26, %v198_v26 }
  0xed   :  { %201 = vst.msk [vmem:[%s345_s3] sm:$0xf] %vm200_vm0, %v199_v27 }

// kernel: _lambda_.110
= control target key start
LH: loop header
LB: loop body
LE: loop exit
PB: predicated region body
PF: predicated region fallthrough
CT: control target
= control target key end

     0   :  { %v267_v6 = vmov 1983009808   ;;  %v21_v8 = vlaneseq  ;;  %vm205_vm0 = vcmask 25600   ;;  %s345_s1 = inlined_call_operand.vmem [shape: bf16[256,4], index: 1, kind: input, shape index: {}]   ;;  %s346_s0 = inlined_call_operand.vmem [shape: f32[2,256], index: 0, kind: input, shape index: {}]   ;;  %s347_s2 = inlined_call_operand.vmem [shape: f32[1,4], index: 2, kind: input, shape index: {}]   ;;  %s348_s3 = inlined_call_operand.vmem [shape: f32[2,4], index: 3, kind: output, shape index: {}]  }
   0x1   :  { %v251_v0 = vld [vmem:[%s345_s1 + $0x78] sm:$0xff]   ;;  %v253_v2 = vld [vmem:[%s345_s1 + $0x70] sm:$0xff]   ;;  %v255_v4 = vld [vmem:[%s345_s1 + $0x68] sm:$0xff]   ;;  %v19_v7 = vunpack.c.l.s4 %v267_v6 }
   0x2   :  { %v252_v1 = vld [vmem:[%s345_s1 + $0x38] sm:$0xff]   ;;  %228 = vmatprep.subr.bf16.mxu0 %v251_v0  ;;  %v254_v3 = vld [vmem:[%s345_s1 + $0x30] sm:$0xff]   ;;  %v256_v5 = vld [vmem:[%s345_s1 + $0x28] sm:$0xff]   ;;  %v22_v12 = vshrl.u32 %v21_v8, 7 }
   0x3   :  { %229 = vmatpush3.bf16.msra.mxu0 %v252_v1  ;;  %v257_v9 = vld [vmem:[%s345_s1 + $0x60] sm:$0xff]   ;;  %v20_v11 = vunpack.c.0.s8 %v19_v7  ;;  %v259_v13 = vld [vmem:[%s345_s1 + $0x58] sm:$0xff]   ;;  %v261_v16 = vld [vmem:[%s345_s1 + $0x50] sm:$0xff]  }
   0x4   :  { %230 = vmatprep.subr.bf16.mxu0 %v253_v2  ;;  %v258_v10 = vld [vmem:[%s345_s1 + $0x20] sm:$0xff]   ;;  %v260_v14 = vld [vmem:[%s345_s1 + $0x18] sm:$0xff]   ;;  %v262_v19 = vld [vmem:[%s345_s1 + $0x10] sm:$0xff]  }
   0x5   :  { %v23_v15 = vsub.s32 %v20_v11, %v22_v12  ;;  %v15_v17 = vld [vmem:[%s346_s0] sm:$0xf]  ;;  %v263_v21 = vld [vmem:[%s345_s1 + $0x48] sm:$0xff]  }
   0x6   :  { %v16_v18 = vmul.f32 0.25, %v15_v17  ;;  %v264_v23 = vld [vmem:[%s345_s1 + $0x8] sm:$0xff]   ;;  %v265_v25 = vld [vmem:[%s345_s1 + $0x40] sm:$0xff]  }
   0x7   :  { %231 = vmatpush3.bf16.msra.mxu0 %v254_v3  ;;  %v266_v26 = vld [vmem:[%s345_s1] sm:$0xff]  }
   0x8   :  { %232 = vmatprep.subr.bf16.mxu0 %v255_v4  ;;  %v24_v20 = vrot.slane %v16_v18, %v23_v15  ;;  %v211_v29 = vld [vmem:[%s347_s2] ss:$0 sm:$0xff] }
   0xa   :  { %v25_v22 = vcombine.high %v24_v20, %v24_v20  ;;  %v28_v27 = vpack.c.bf16 %v24_v20, %v24_v20 }
   0xb   :  { %233 = vmatpush3.bf16.msra.mxu0 %v256_v5 }
   0xc   :  { %234 = vmatprep.subr.bf16.mxu0 %v257_v9  ;;  %v29_v24 = vpack.c.bf16 %v25_v22, %v25_v22 }
   0xe   :  { %197 = vmatprep.mubr.bf16.mxu0 %v29_v24 }
   0xf   :  { %235 = vmatpush3.bf16.msra.mxu0 %v258_v10 }
  0x10   :  { %236 = vmatprep.subr.bf16.mxu0 %v259_v13 }
  0x13   :  { %237 = vmatpush3.bf16.msra.mxu0 %v260_v14 }
  0x14   :  { %238 = vmatprep.subr.bf16.mxu0 %v261_v16 }
  0x17   :  { %239 = vmatpush3.bf16.msra.mxu0 %v262_v19 }
  0x18   :  { %240 = vmatprep.subr.bf16.mxu0 %v263_v21 }
  0x1b   :  { %241 = vmatpush3.bf16.msra.mxu0 %v264_v23 }
  0x1c   :  { %242 = vmatprep.subr.bf16.mxu0 %v265_v25 }
  0x1f   :  { %243 = vmatpush3.bf16.msra.mxu0 %v266_v26 }
  0x22   :  { %198 = vmatmul.mubr.bf16.vlgmr.msra.gmra.mxu0 %v28_v27 }
  0xe2   :  { %v244_v28 = vpop.f32.mrf.mxu0 }
  0xe4   :  { %v245_v30 = vpop.f32.mrf.mxu0 }
  0xe5   :  { %v246_v31 = vadd.f32 %v245_v30, %v244_v28 }
  0xe6   :  { %v247_v32 = vpop.f32.mrf.mxu0 }
  0xe7   :  { %v200_v33 = vadd.f32 %v246_v31, %v211_v29 }
  0xe8   :  { %v248_v34 = vpop.f32.mrf.mxu0 }
  0xe9   :  { %206 = vst.msk [vmem:[%s348_s3] sm:$0x3] %vm205_vm0, %v200_v33 }

// kernel: _lambda_.109
= control target key start
LH: loop header
LB: loop body
LE: loop exit
PB: predicated region body
PF: predicated region fallthrough
CT: control target
= control target key end

     0   :  { %v234_v1 = vmov 0   ;;  %vm79_vm0 = vcmask 523264   ;;  %v29_v10 = vlaneseq  ;;  %vm141_vm1 = vcmask 1043456   ;;  %s297_s1 = inlined_call_operand.vmem [shape: bf16[1,64,256], index: 1, kind: input, shape index: {}]   ;;  %s298_s0 = inlined_call_operand.vmem [shape: bf16[1,8,64], index: 0, kind: input, shape index: {}]   ;;  %s299_s2 = inlined_call_operand.vmem [shape: f32[1,1,256], index: 2, kind: input, shape index: {}]   ;;  %s300_s3 = inlined_call_operand.vmem [shape: bf16[1,8,256], index: 3, kind: input, shape index: {}]   ;;  %s301_s4 = inlined_call_operand.vmem [shape: f32[1,2,256], index: 4, kind: output, shape index: {}]  }
   0x1   :  { %v222_v0 = vld [vmem:[%s297_s1 + $0x34] ss:$8 sps:$4 sm:$0xff]   ;;  %115 = vmatprep.mubr.bf16.mxu0 %v234_v1  ;;  %v224_v2 = vld [vmem:[%s297_s1 + $0x30] ss:$8 sps:$4 sm:$0xff]   ;;  %v225_v3 = vld [vmem:[%s297_s1 + $0x24] ss:$8 sps:$4 sm:$0xff]  }
   0x2   :  { %91 = vmatprep.subr.bf16.mxu0 %v222_v0  ;;  %v227_v4 = vld [vmem:[%s297_s1 + $0x20] ss:$8 sps:$4 sm:$0xff]   ;;  %v228_v5 = vld [vmem:[%s297_s1 + $0x14] ss:$8 sps:$4 sm:$0xff]   ;;  %v230_v6 = vld [vmem:[%s297_s1 + $0x10] ss:$8 sps:$4 sm:$0xff]  }
   0x3   :  { %92 = vmatpush1.bf16.msra.mxu0 %v224_v2  ;;  %v231_v7 = vld [vmem:[%s297_s1 + $0x4] ss:$8 sps:$4 sm:$0xff]   ;;  %v233_v8 = vld [vmem:[%s297_s1] ss:$8 sps:$4 sm:$0xff]   ;;  %v30_v11 = vshrl.u32 %v29_v10, 7  ;;  %vm195_vm2 = vcmask 1041409  }
   0x4   :  { %93 = vmatprep.subr.bf16.mxu0 %v225_v3  ;;  %v18_v9 = vld [vmem:[%s298_s0] sm:$0xf]  ;;  %v235_v42 = vmov 1983009808   ;;  %vm197_vm3 = vcmask 1043459   ;;  %vm199_vm4 = vcmask 1045509  }
   0x5   :  { %v31_v12 = vsub.s32 0, %v30_v11  ;;  %v27_v13 = vld [vmem:[%s299_s2] sm:$0x3]  ;;  %v35_v14 = vsub.s32 1, %v30_v11  ;;  %v176_v43 = vunpack.c.l.s4 %v235_v42  ;;  %vm201_vm5 = vcmask 1047559  }
   0x6   :  { %v124_v15 = vld [vmem:[%s300_s3] sm:$0xff] }
   0x7   :  { %94 = vmatpush1.bf16.msra.mxu0 %v227_v4  ;;  %v32_v16 = vrot.slane %v27_v13, %v31_v12  ;;  %v125_v17 = vunpack.c.l.bf16 %v124_v15  ;;  %v36_v18 = vrot.slane %v27_v13, %v35_v14  ;;  %v126_v21 = vunpack.c.h.bf16 %v124_v15 }
   0x8   :  { %95 = vmatprep.subr.bf16.mxu0 %v228_v5  ;;  %v177_v52 = vunpack.c.0.s8 %v176_v43 }
   0xa   :  { %v180_v61 = vsub.s32 %v177_v52, %v30_v11 }
   0xb   :  { %96 = vmatpush1.bf16.msra.mxu0 %v230_v6 }
   0xc   :  { %97 = vmatprep.subr.bf16.mxu0 %v231_v7 }
   0xf   :  { %98 = vmatpush1.bf16.msra.mxu0 %v233_v8 }
  0x12   :  { %217 = vmatmul.mubr.msk.bf16.vlgmr.msra.gmra.mxu0 %vm79_vm0, %v18_v9 }
  0xd2   :  { %v117_v19 = vpop.f32.mrf.mxu0 }
  0xd3   :  { %v118_v20 = vadd.f32 %v117_v19, %v32_v16 }
  0xd4   :  { %v119_v22 = vpop.f32.mrf.mxu0 }
  0xd5   :  { %v127_v23 = vadd.f32 %v125_v17, %v118_v20  ;;  %v120_v24 = vadd.f32 %v119_v22, %v36_v18 }
  0xd6   :  { %v121_v25 = vpop.f32.mrf.mxu0 }
  0xd7   :  { %v128_v26 = vadd.f32 %v126_v21, %v120_v24  ;;  %v129_v28 = vmax.f32 %v127_v23, 0.0 }
  0xd8   :  { %v122_v27 = vpop.f32.mrf.mxu0 }
  0xd9   :  { %v130_v29 = vmax.f32 %v128_v26, 0.0 }
  0xdb   :  { %v133_v30 = vcombine.low %v129_v28, %v130_v29  ;;  %v134_v31 = vcombine.high %v129_v28, %v130_v29  ;;  %v218_v32 = vcombine.low %v130_v29, %v130_v29  ;;  %v219_v33 = vcombine.high %v130_v29, %v130_v29 }
  0xdd   :  { %v142_v34 = vsel %vm141_vm1, %v133_v30, 0.0  ;;  %v149_v35 = vsel %vm141_vm1, %v218_v32, 0.0  ;;  %v156_v36 = vsel %vm141_vm1, %v134_v31, 0.0  ;;  %v163_v37 = vsel %vm141_vm1, %v219_v33, 0.0 }
  0xde   :  { %v143_v38 = vrot.slane %v142_v34, 4  ;;  %v150_v39 = vrot.slane %v149_v35, 4  ;;  %v157_v40 = vrot.slane %v156_v36, 4  ;;  %v164_v41 = vrot.slane %v163_v37, 4 }
  0xe0   :  { %v144_v44 = vadd.f32 %v143_v38, %v142_v34  ;;  %v151_v45 = vadd.f32 %v150_v39, %v149_v35  ;;  %v158_v46 = vadd.f32 %v157_v40, %v156_v36  ;;  %v165_v47 = vadd.f32 %v164_v41, %v163_v37 }
  0xe2   :  { %v145_v48 = vrot.slane %v144_v44, 2  ;;  %v152_v49 = vrot.slane %v151_v45, 2  ;;  %v159_v50 = vrot.slane %v158_v46, 2  ;;  %v166_v51 = vrot.slane %v165_v47, 2 }
  0xe4   :  { %v146_v53 = vadd.f32 %v145_v48, %v144_v44  ;;  %v153_v54 = vadd.f32 %v152_v49, %v151_v45  ;;  %v160_v55 = vadd.f32 %v159_v50, %v158_v46  ;;  %v167_v56 = vadd.f32 %v166_v51, %v165_v47 }
  0xe6   :  { %v147_v57 = vrot.slane %v146_v53, 1  ;;  %v154_v58 = vrot.slane %v153_v54, 1  ;;  %v161_v59 = vrot.slane %v160_v55, 1  ;;  %v168_v60 = vrot.slane %v167_v56, 1 }
  0xe8   :  { %v148_v62 = vadd.f32 %v147_v57, %v146_v53  ;;  %v155_v63 = vadd.f32 %v154_v58, %v153_v54  ;;  %v162_v0 = vadd.f32 %v161_v59, %v160_v55  ;;  %v169_v1 = vadd.f32 %v168_v60, %v167_v56 }
  0xea   :  { %v174_v2 = vcombine.low %v148_v62, %v155_v63  ;;  %v182_v3 = vcombine.low %v162_v0, %v169_v1 }
  0xec   :  { %v189_v4 = vrot.slane %v182_v3, %v180_v61  ;;  %v181_v5 = vrot.slane %v174_v2, %v180_v61 }
  0xee   :  { %v194_v6 = vrot.slane %v189_v4, 7 }
  0xf0   :  { %v196_v7 = vsel %vm195_vm2, %v194_v6, %v181_v5 }
  0xf1   :  { %v198_v8 = vsel %vm197_vm3, %v194_v6, %v196_v7 }
  0xf2   :  { %v200_v9 = vsel %vm199_vm4, %v194_v6, %v198_v8 }
  0xf3   :  { %v202_v10 = vsel %vm201_vm5, %v194_v6, %v200_v9 }
  0xf4   :  { %204 = vst [vmem:[%s301_s4] sm:$0xf] %v202_v10 }

// kernel: _lambda_.111
= control target key start
LH: loop header
LB: loop body
LE: loop exit
PB: predicated region body
PF: predicated region fallthrough
CT: control target
= control target key end

     0   :  { %vm31_vm0 = vcmask 25600   ;;  %vm70_vm1 = vcmask 1041408   ;;  %v640_v8 = vmov 0   ;;  %vm66_vm2 = vcmask 31744   ;;  %s804_s0 = inlined_call_operand.vmem [shape: f32[2,4], index: 0, kind: input, shape index: {}]   ;;  %s805_s3 = inlined_call_operand.vmem [shape: bf16[4,256], index: 3, kind: input, shape index: {}]   ;;  %s806_s6 = inlined_call_operand.vmem [shape: bf16[256,6], index: 6, kind: input, shape index: {}]   ;;  %s807_s5 = inlined_call_operand.vmem [shape: bf16[256,6], index: 5, kind: input, shape index: {}]   ;;  %s808_s2 = inlined_call_operand.vmem [shape: f32[2,256], index: 2, kind: input, shape index: {}, may-alias: {1,2}]   ;;  %s809_s4 = inlined_call_operand.vmem [shape: f32[1,256], index: 4, kind: input, shape index: {}]   ;;  %s810_s1 = inlined_call_operand.vmem [shape: f32[2,256], index: 1, kind: input, shape index: {}, may-alias: {1,2}]   ;;  %s811_s7 = inlined_call_operand.vmem [shape: f32[1,6], index: 7, kind: input, shape index: {}]   ;;  %s812_s8 = inlined_call_operand.vmem [shape: f32[2,6], index: 8, kind: output, shape index: {}]  }
   0x1   :  { %v30_v0 = vld [vmem:[%s804_s0] sm:$0x3]  ;;  %109 = vmatprep.mubr.bf16.mxu0 %v640_v8  ;;  %v596_v15 = vld [vmem:[%s806_s6 + $0x78] sm:$0xff]   ;;  %v598_v17 = vld [vmem:[%s806_s6 + $0x70] sm:$0xff]   ;;  %v47_v37 = vlaneseq  ;;  %v641_v39 = vmov 1983009808  }
   0x2   :  { %v32_v1 = vsel %vm31_vm0, %v30_v0, -inf  ;;  %v511_v7 = vld.sshfl [vmem:[%s805_s3] sm:$0x33 pattern:$0x76325410]  ;;  %v597_v16 = vld [vmem:[%s806_s6 + $0x38] sm:$0xff]   ;;  %550 = vmatprep.subr.bf16.mxu1 %v596_v15  ;;  %v150_v40 = vunpack.c.l.s4 %v641_v39 }
   0x3   :  { %33 = vmax.xlane.f32.xlu0 %v32_v1  ;;  %v65_v9 = vcombine.high %v511_v7, %v511_v7  ;;  %v72_v10 = vsel %vm70_vm1, %v511_v7, 0  ;;  %551 = vmatpush3.bf16.msra.mxu1 %v597_v16  ;;  %v599_v18 = vld [vmem:[%s806_s6 + $0x30] sm:$0xff]   ;;  %v600_v19 = vld [vmem:[%s807_s5 + $0x78] sm:$0xff]   ;;  %v602_v21 = vld [vmem:[%s806_s6 + $0x68] sm:$0xff]   ;;  %v48_v45 = vshrl.u32 %v47_v37, 7  ;;  %vm505_vm3 = vcmask 41984  }
   0x4   :  { %552 = vmatprep.subr.bf16.mxu1 %v598_v17  ;;  %v601_v20 = vld [vmem:[%s807_s5 + $0x38] sm:$0xff]   ;;  %v603_v22 = vld [vmem:[%s806_s6 + $0x28] sm:$0xff]   ;;  %v604_v23 = vld [vmem:[%s807_s5 + $0x70] sm:$0xff]   ;;  %v151_v43 = vunpack.c.0.s8 %v150_v40 }
   0x5   :  { %512 = vmatprep.subr.msk.bf16.mxu0 %vm70_vm1, %v65_v9  ;;  %v605_v24 = vld [vmem:[%s807_s5 + $0x30] sm:$0xff]   ;;  %v606_v25 = vld [vmem:[%s806_s6 + $0x60] sm:$0xff]   ;;  %v608_v27 = vld [vmem:[%s807_s5 + $0x68] sm:$0xff]   ;;  %v49_v59 = vsub.s32 0, %v48_v45  ;;  %v53_v61 = vsub.s32 1, %v48_v45 }
   0x6   :  { %92 = vmatpush1.bf16.msra.mxu0 %v72_v10  ;;  %v607_v26 = vld [vmem:[%s806_s6 + $0x20] sm:$0xff]   ;;  %v609_v28 = vld [vmem:[%s807_s5 + $0x28] sm:$0xff]   ;;  %v610_v29 = vld [vmem:[%s806_s6 + $0x58] sm:$0xff]   ;;  %v154_v49 = vsub.s32 %v151_v43, %v48_v45 }
   0x7   :  { %553 = vmatpush3.bf16.msra.mxu1 %v599_v18  ;;  %572 = vmatprep.subr.bf16.mxu0 %v600_v19  ;;  %v611_v30 = vld [vmem:[%s806_s6 + $0x18] sm:$0xff]   ;;  %v612_v31 = vld [vmem:[%s807_s5 + $0x60] sm:$0xff]   ;;  %v614_v33 = vld [vmem:[%s806_s6 + $0x50] sm:$0xff]  }
   0x8   :  { %554 = vmatprep.subr.bf16.mxu1 %v602_v21  ;;  %v613_v32 = vld [vmem:[%s807_s5 + $0x20] sm:$0xff]   ;;  %v615_v34 = vld [vmem:[%s806_s6 + $0x10] sm:$0xff]   ;;  %v616_v35 = vld [vmem:[%s807_s5 + $0x58] sm:$0xff]  }
   0x9   :  { %v617_v36 = vld [vmem:[%s807_s5 + $0x18] sm:$0xff]   ;;  %v618_v38 = vld [vmem:[%s806_s6 + $0x48] sm:$0xff]   ;;  %v620_v42 = vld [vmem:[%s807_s5 + $0x50] sm:$0xff]  }
   0xa   :  { %v619_v41 = vld [vmem:[%s806_s6 + $0x8] sm:$0xff]   ;;  %v621_v44 = vld [vmem:[%s807_s5 + $0x10] sm:$0xff]   ;;  %v622_v46 = vld [vmem:[%s806_s6 + $0x40] sm:$0xff]  }
   0xb   :  { %555 = vmatpush3.bf16.msra.mxu1 %v603_v22  ;;  %v623_v47 = vld [vmem:[%s806_s6] sm:$0xff]   ;;  %v624_v48 = vld [vmem:[%s807_s5 + $0x48] sm:$0xff]  }
   0xc   :  { %556 = vmatprep.subr.bf16.mxu1 %v606_v25  ;;  %v146_v50 = vld [vmem:[%s808_s2] sm:$0xf]  ;;  %v625_v52 = vld [vmem:[%s807_s5 + $0x8] sm:$0xff]  }
   0xd   :  { %v147_v51 = vmul.f32 0.25, %v146_v50  ;;  %v626_v53 = vld [vmem:[%s807_s5 + $0x40] sm:$0xff]  }
   0xe   :  { %v627_v55 = vld [vmem:[%s807_s5] sm:$0xff]  }
   0xf   :  { %557 = vmatpush3.bf16.msra.mxu1 %v607_v26  ;;  %v155_v54 = vrot.slane %v147_v51, %v154_v49  ;;  %v45_v60 = vld [vmem:[%s809_s4] sm:$0x3] }
  0x10   :  { %558 = vmatprep.subr.bf16.mxu1 %v610_v29  ;;  %v50_v62 = vrot.slane %v45_v60, %v49_v59  ;;  %v54_v63 = vrot.slane %v45_v60, %v53_v61 }
  0x11   :  { %v156_v56 = vcombine.high %v155_v54, %v155_v54  ;;  %v159_v57 = vpack.c.bf16 %v155_v54, %v155_v54 }
  0x13   :  { %559 = vmatpush3.bf16.msra.mxu1 %v611_v30  ;;  %v160_v58 = vpack.c.bf16 %v156_v56, %v156_v56 }
  0x14   :  { %560 = vmatprep.subr.bf16.mxu1 %v614_v33 }
  0x15   :  { %353 = vmatprep.mubr.bf16.mxu1 %v160_v58 }
  0x17   :  { %561 = vmatpush3.bf16.msra.mxu1 %v615_v34 }
  0x18   :  { %562 = vmatprep.subr.bf16.mxu1 %v618_v38 }
  0x1b   :  { %563 = vmatpush3.bf16.msra.mxu1 %v619_v41 }
  0x1c   :  { %564 = vmatprep.subr.bf16.mxu1 %v622_v46 }
  0x1f   :  { %565 = vmatpush3.bf16.msra.mxu1 %v623_v47 }
  0x22   :  { %354 = vmatmul.mubr.bf16.vlgmr.msra.gmra.mxu1 %v159_v57 }
  0x8c   :  { %v34_v2 = vpop.xlane.xlu0 %33 }
  0x8d   :  { %v35_v3 = vsub.f32 %v30_v0, %v34_v2 }
  0x8f   :  { %v36_v4 = vmul.f32 1.442695, %v35_v3 }
  0x91   :  { %628 = vpow2.f32 %v36_v4 }
  0x9e   :  { %v629_v5 = vpop.eup %628 }
  0x9f   :  { %v38_v6 = vsel %vm31_vm0, %v629_v5, 0.0 }
  0xa0   :  { %39 = vadd.xlane.f32.xlu0 %v38_v6 }
 0x129   :  { %v40_v11 = vpop.xlane.xlu0 %39 }
 0x12a   :  { %630 = vrcp.f32 %v40_v11 }
 0x137   :  { %v631_v12 = vpop.eup %630 }
 0x138   :  { %v42_v13 = vmul.f32 %v631_v12, %v629_v5  ;;  %v516_v12 = vld.sshfl [vmem:[%s810_s1] sm:$0x33 pattern:$0x76325410] }
 0x13a   :  { %v43_v14 = vpack.c.bf16 %v42_v13, %v42_v13  ;;  %v139_v13 = vcombine.high %v516_v12, %v516_v12 }
 0x13c   :  { %513 = vmatmul.mubr.msk.bf16.vlgmr.msra.gmra.mxu0 %vm66_vm2, %v43_v14 }
 0x13d   :  { %573 = vmatpush3.bf16.msra.mxu0 %v601_v20  ;;  %v566_v20 = vpop.f32.mrf.mxu1 }
 0x13e   :  { %574 = vmatprep.subr.bf16.mxu0 %v604_v23 }
 0x13f   :  { %v567_v21 = vpop.f32.mrf.mxu1 }
 0x140   :  { %v568_v22 = vadd.f32 %v567_v21, %v566_v20 }
 0x141   :  { %575 = vmatpush3.bf16.msra.mxu0 %v605_v24  ;;  %v569_v23 = vpop.f32.mrf.mxu1 }
 0x142   :  { %576 = vmatprep.subr.bf16.mxu0 %v608_v27 }
 0x143   :  { %v570_v24 = vpop.f32.mrf.mxu1 }
 0x145   :  { %577 = vmatpush3.bf16.msra.mxu0 %v609_v28  ;;  %v549_v28 = vld [vmem:[%s811_s7] ss:$0 sm:$0xff] }
 0x146   :  { %578 = vmatprep.subr.bf16.mxu0 %v612_v31 }
 0x149   :  { %579 = vmatpush3.bf16.msra.mxu0 %v613_v32 }
 0x14a   :  { %580 = vmatprep.subr.bf16.mxu0 %v616_v35 }
 0x14d   :  { %581 = vmatpush3.bf16.msra.mxu0 %v617_v36 }
 0x14e   :  { %582 = vmatprep.subr.bf16.mxu0 %v620_v42 }
 0x151   :  { %583 = vmatpush3.bf16.msra.mxu0 %v621_v44 }
 0x152   :  { %584 = vmatprep.subr.bf16.mxu0 %v624_v48 }
 0x155   :  { %585 = vmatpush3.bf16.msra.mxu0 %v625_v52 }
 0x156   :  { %586 = vmatprep.subr.bf16.mxu0 %v626_v53 }
 0x159   :  { %587 = vmatpush3.bf16.msra.mxu0 %v627_v55 }
 0x1fc   :  { %v111_v0 = vpop.f32.mrf.mxu0 }
 0x1fd   :  { %v112_v1 = vadd.f32 %v111_v0, %v50_v62 }
 0x1fe   :  { %v113_v2 = vpop.f32.mrf.mxu0 }
 0x1ff   :  { %v514_v3 = vmul.f32 -1.442695, %v112_v1  ;;  %v114_v4 = vadd.f32 %v113_v2, %v54_v63 }
 0x200   :  { %v115_v5 = vpop.f32.mrf.mxu0 }
 0x201   :  { %632 = vpow2.f32 %v514_v3  ;;  %v515_v6 = vmul.f32 -1.442695, %v114_v4 }
 0x202   :  { %v116_v7 = vpop.f32.mrf.mxu0 }
 0x203   :  { %634 = vpow2.f32 %v515_v6 }
 0x20e   :  { %v633_v8 = vpop.eup %632 }
 0x20f   :  { %v124_v9 = vadd.f32 1.0, %v633_v8 }
 0x210   :  { %v635_v10 = vpop.eup %634 }
 0x211   :  { %636 = vrcp.f32 %v124_v9  ;;  %v125_v11 = vadd.f32 1.0, %v635_v10 }
 0x213   :  { %638 = vrcp.f32 %v125_v11 }
 0x21e   :  { %v637_v14 = vpop.eup %636 }
 0x21f   :  { %v142_v16 = vmul.f32 %v637_v14, %v516_v12 }
 0x220   :  { %v639_v15 = vpop.eup %638 }
 0x221   :  { %v143_v17 = vmul.f32 %v639_v15, %v139_v13  ;;  %v144_v19 = vpack.c.bf16 %v142_v16, %v142_v16 }
 0x223   :  { %v145_v18 = vpack.c.bf16 %v143_v17, %v143_v17 }
 0x225   :  { %489 = vmatprep.mubr.bf16.mxu0 %v145_v18 }
 0x226   :  { %490 = vmatmul.mubr.bf16.vlgmr.msra.gmra.mxu0 %v144_v19 }
 0x2e6   :  { %v588_v25 = vpop.f32.mrf.mxu0 }
 0x2e8   :  { %v589_v26 = vpop.f32.mrf.mxu0 }
 0x2e9   :  { %v590_v27 = vadd.f32 %v589_v26, %v588_v25 }
 0x2ea   :  { %v591_v29 = vpop.f32.mrf.mxu0 }
 0x2eb   :  { %v492_v30 = vadd.f32 %v590_v27, %v568_v22 }
 0x2ec   :  { %v592_v31 = vpop.f32.mrf.mxu0 }
 0x2ed   :  { %v504_v32 = vadd.f32 %v549_v28, %v492_v30 }
 0x2ef   :  { %506 = vst.msk [vmem:[%s812_s8] sm:$0x3] %vm505_vm3, %v504_v32 }

// kernel: _lambda_.112
= control target key start
LH: loop header
LB: loop body
LE: loop exit
PB: predicated region body
PF: predicated region fallthrough
CT: control target
= control target key end

     0   :  { %vm31_vm0 = vcmask 41984   ;;  %vm66_vm1 = vcmask 1042432   ;;  %v639_v8 = vmov 0   ;;  %vm62_vm2 = vcmask 48128   ;;  %s803_s0 = inlined_call_operand.vmem [shape: f32[2,6], index: 0, kind: input, shape index: {}]   ;;  %s804_s3 = inlined_call_operand.vmem [shape: bf16[6,256], index: 3, kind: input, shape index: {}]   ;;  %s805_s6 = inlined_call_operand.vmem [shape: bf16[256,8], index: 6, kind: input, shape index: {}]   ;;  %s806_s5 = inlined_call_operand.vmem [shape: bf16[256,8], index: 5, kind: input, shape index: {}]   ;;  %s807_s2 = inlined_call_operand.vmem [shape: f32[2,256], index: 2, kind: input, shape index: {}, may-alias: {1,2}]   ;;  %s808_s4 = inlined_call_operand.vmem [shape: f32[1,256], index: 4, kind: input, shape index: {}]   ;;  %s809_s1 = inlined_call_operand.vmem [shape: f32[2,256], index: 1, kind: input, shape index: {}, may-alias: {1,2}]   ;;  %s810_s7 = inlined_call_operand.vmem [shape: f32[1,8], index: 7, kind: input, shape index: {}]   ;;  %s811_s8 = inlined_call_operand.vmem [shape: f32[2,8], index: 8, kind: output, shape index: {}]  }
   0x1   :  { %v30_v0 = vld [vmem:[%s803_s0] sm:$0x3]  ;;  %105 = vmatprep.mubr.bf16.mxu0 %v639_v8  ;;  %v595_v16 = vld [vmem:[%s805_s6 + $0x78] sm:$0xff]   ;;  %v597_v18 = vld [vmem:[%s805_s6 + $0x70] sm:$0xff]   ;;  %v47_v38 = vlaneseq  ;;  %v640_v40 = vmov 1983009808  }
   0x2   :  { %v32_v1 = vsel %vm31_vm0, %v30_v0, -inf  ;;  %v44_v7 = vld [vmem:[%s804_s3] sm:$0x77]  ;;  %v596_v17 = vld [vmem:[%s805_s6 + $0x38] sm:$0xff]   ;;  %547 = vmatprep.subr.bf16.mxu1 %v595_v16  ;;  %v598_v19 = vld [vmem:[%s805_s6 + $0x30] sm:$0xff]   ;;  %v146_v41 = vunpack.c.l.s4 %v640_v40  ;;  %vm501_vm3 = vcmask 58368  }
   0x3   :  { %33 = vmax.xlane.f32.xlu0 %v32_v1  ;;  %v508_v9 = vcombine.high %v44_v7, %v44_v7  ;;  %v507_v10 = vcombine.low %v44_v7, %v44_v7  ;;  %548 = vmatpush3.bf16.msra.mxu1 %v596_v17  ;;  %v599_v20 = vld [vmem:[%s806_s5 + $0x78] sm:$0xff]   ;;  %v601_v22 = vld [vmem:[%s805_s6 + $0x68] sm:$0xff]   ;;  %v603_v24 = vld [vmem:[%s806_s5 + $0x70] sm:$0xff]   ;;  %v48_v46 = vshrl.u32 %v47_v38, 7 }
   0x4   :  { %549 = vmatprep.subr.bf16.mxu1 %v597_v18  ;;  %v600_v21 = vld [vmem:[%s806_s5 + $0x38] sm:$0xff]   ;;  %v602_v23 = vld [vmem:[%s805_s6 + $0x28] sm:$0xff]   ;;  %v604_v25 = vld [vmem:[%s806_s5 + $0x30] sm:$0xff]   ;;  %v147_v44 = vunpack.c.0.s8 %v146_v41 }
   0x5   :  { %509 = vmatprep.subr.msk.bf16.mxu0 %vm66_vm1, %v508_v9  ;;  %v68_v11 = vsel %vm66_vm1, %v507_v10, 0  ;;  %v605_v26 = vld [vmem:[%s805_s6 + $0x60] sm:$0xff]   ;;  %v607_v28 = vld [vmem:[%s806_s5 + $0x68] sm:$0xff]   ;;  %v609_v30 = vld [vmem:[%s805_s6 + $0x58] sm:$0xff]   ;;  %v49_v60 = vsub.s32 0, %v48_v46  ;;  %v53_v62 = vsub.s32 1, %v48_v46 }
   0x6   :  { %88 = vmatpush1.bf16.msra.mxu0 %v68_v11  ;;  %v606_v27 = vld [vmem:[%s805_s6 + $0x20] sm:$0xff]   ;;  %v608_v29 = vld [vmem:[%s806_s5 + $0x28] sm:$0xff]   ;;  %v610_v31 = vld [vmem:[%s805_s6 + $0x18] sm:$0xff]   ;;  %v150_v50 = vsub.s32 %v147_v44, %v48_v46 }
   0x7   :  { %550 = vmatpush3.bf16.msra.mxu1 %v598_v19  ;;  %569 = vmatprep.subr.bf16.mxu0 %v599_v20  ;;  %v611_v32 = vld [vmem:[%s806_s5 + $0x60] sm:$0xff]   ;;  %v613_v34 = vld [vmem:[%s805_s6 + $0x50] sm:$0xff]   ;;  %v615_v36 = vld [vmem:[%s806_s5 + $0x58] sm:$0xff]  }
   0x8   :  { %551 = vmatprep.subr.bf16.mxu1 %v601_v22  ;;  %v612_v33 = vld [vmem:[%s806_s5 + $0x20] sm:$0xff]   ;;  %v614_v35 = vld [vmem:[%s805_s6 + $0x10] sm:$0xff]   ;;  %v616_v37 = vld [vmem:[%s806_s5 + $0x18] sm:$0xff]  }
   0x9   :  { %v617_v39 = vld [vmem:[%s805_s6 + $0x48] sm:$0xff]   ;;  %v619_v43 = vld [vmem:[%s806_s5 + $0x50] sm:$0xff]   ;;  %v621_v47 = vld [vmem:[%s805_s6 + $0x40] sm:$0xff]  }
   0xa   :  { %v618_v42 = vld [vmem:[%s805_s6 + $0x8] sm:$0xff]   ;;  %v620_v45 = vld [vmem:[%s806_s5 + $0x10] sm:$0xff]   ;;  %v622_v48 = vld [vmem:[%s805_s6] sm:$0xff]  }
   0xb   :  { %552 = vmatpush3.bf16.msra.mxu1 %v602_v23  ;;  %v623_v49 = vld [vmem:[%s806_s5 + $0x48] sm:$0xff]   ;;  %v142_v51 = vld [vmem:[%s807_s2] sm:$0xf] }
   0xc   :  { %553 = vmatprep.subr.bf16.mxu1 %v605_v26  ;;  %v143_v52 = vmul.f32 0.25, %v142_v51  ;;  %v624_v53 = vld [vmem:[%s806_s5 + $0x8] sm:$0xff]   ;;  %v625_v54 = vld [vmem:[%s806_s5 + $0x40] sm:$0xff]  }
   0xd   :  { %v626_v56 = vld [vmem:[%s806_s5] sm:$0xff]  }
   0xe   :  { %v151_v55 = vrot.slane %v143_v52, %v150_v50  ;;  %v45_v61 = vld [vmem:[%s808_s4] sm:$0x3] }
   0xf   :  { %554 = vmatpush3.bf16.msra.mxu1 %v606_v27  ;;  %v50_v63 = vrot.slane %v45_v61, %v49_v60 }
  0x10   :  { %555 = vmatprep.subr.bf16.mxu1 %v609_v30  ;;  %v152_v57 = vcombine.high %v151_v55, %v151_v55  ;;  %v155_v58 = vpack.c.bf16 %v151_v55, %v151_v55 }
  0x12   :  { %v156_v59 = vpack.c.bf16 %v152_v57, %v152_v57 }
  0x13   :  { %556 = vmatpush3.bf16.msra.mxu1 %v610_v31 }
  0x14   :  { %557 = vmatprep.subr.bf16.mxu1 %v613_v34  ;;  %349 = vmatprep.mubr.bf16.mxu1 %v156_v59 }
  0x17   :  { %558 = vmatpush3.bf16.msra.mxu1 %v614_v35 }
  0x18   :  { %559 = vmatprep.subr.bf16.mxu1 %v617_v39 }
  0x1b   :  { %560 = vmatpush3.bf16.msra.mxu1 %v618_v42 }
  0x1c   :  { %561 = vmatprep.subr.bf16.mxu1 %v621_v47 }
  0x1f   :  { %562 = vmatpush3.bf16.msra.mxu1 %v622_v48 }
  0x22   :  { %350 = vmatmul.mubr.bf16.vlgmr.msra.gmra.mxu1 %v155_v58 }
  0x8c   :  { %v34_v2 = vpop.xlane.xlu0 %33 }
  0x8d   :  { %v35_v3 = vsub.f32 %v30_v0, %v34_v2  ;;  %v54_v0 = vrot.slane %v45_v61, %v53_v62 }
  0x8f   :  { %v36_v4 = vmul.f32 1.442695, %v35_v3 }
  0x91   :  { %627 = vpow2.f32 %v36_v4 }
  0x9e   :  { %v628_v5 = vpop.eup %627 }
  0x9f   :  { %v38_v6 = vsel %vm31_vm0, %v628_v5, 0.0 }
  0xa0   :  { %39 = vadd.xlane.f32.xlu0 %v38_v6 }
 0x129   :  { %v40_v12 = vpop.xlane.xlu0 %39 }
 0x12a   :  { %629 = vrcp.f32 %v40_v12 }
 0x137   :  { %v630_v13 = vpop.eup %629 }
 0x138   :  { %v42_v14 = vmul.f32 %v630_v13, %v628_v5  ;;  %v513_v13 = vld.sshfl [vmem:[%s809_s1] sm:$0x33 pattern:$0x76325410] }
 0x13a   :  { %v43_v15 = vpack.c.bf16 %v42_v14, %v42_v14  ;;  %v135_v14 = vcombine.high %v513_v13, %v513_v13 }
 0x13c   :  { %510 = vmatmul.mubr.msk.bf16.vlgmr.msra.gmra.mxu0 %vm62_vm2, %v43_v15 }
 0x13d   :  { %570 = vmatpush3.bf16.msra.mxu0 %v600_v21  ;;  %v563_v21 = vpop.f32.mrf.mxu1 }
 0x13e   :  { %571 = vmatprep.subr.bf16.mxu0 %v603_v24 }
 0x13f   :  { %v564_v22 = vpop.f32.mrf.mxu1 }
 0x140   :  { %v565_v23 = vadd.f32 %v564_v22, %v563_v21 }
 0x141   :  { %572 = vmatpush3.bf16.msra.mxu0 %v604_v25  ;;  %v566_v24 = vpop.f32.mrf.mxu1 }
 0x142   :  { %573 = vmatprep.subr.bf16.mxu0 %v607_v28 }
 0x143   :  { %v567_v25 = vpop.f32.mrf.mxu1 }
 0x145   :  { %574 = vmatpush3.bf16.msra.mxu0 %v608_v29  ;;  %v546_v29 = vld [vmem:[%s810_s7] ss:$0 sm:$0xff] }
 0x146   :  { %575 = vmatprep.subr.bf16.mxu0 %v611_v32 }
 0x149   :  { %576 = vmatpush3.bf16.msra.mxu0 %v612_v33 }
 0x14a   :  { %577 = vmatprep.subr.bf16.mxu0 %v615_v36 }
 0x14d   :  { %578 = vmatpush3.bf16.msra.mxu0 %v616_v37 }
 0x14e   :  { %579 = vmatprep.subr.bf16.mxu0 %v619_v43 }
 0x151   :  { %580 = vmatpush3.bf16.msra.mxu0 %v620_v45 }
 0x152   :  { %581 = vmatprep.subr.bf16.mxu0 %v623_v49 }
 0x155   :  { %582 = vmatpush3.bf16.msra.mxu0 %v624_v53 }
 0x156   :  { %583 = vmatprep.subr.bf16.mxu0 %v625_v54 }
 0x159   :  { %584 = vmatpush3.bf16.msra.mxu0 %v626_v56 }
 0x1fc   :  { %v107_v1 = vpop.f32.mrf.mxu0 }
 0x1fd   :  { %v108_v2 = vadd.f32 %v107_v1, %v50_v63 }
 0x1fe   :  { %v109_v3 = vpop.f32.mrf.mxu0 }
 0x1ff   :  { %v511_v4 = vmul.f32 -1.442695, %v108_v2  ;;  %v110_v5 = vadd.f32 %v109_v3, %v54_v0 }
 0x200   :  { %v111_v6 = vpop.f32.mrf.mxu0 }
 0x201   :  { %631 = vpow2.f32 %v511_v4  ;;  %v512_v7 = vmul.f32 -1.442695, %v110_v5 }
 0x202   :  { %v112_v8 = vpop.f32.mrf.mxu0 }
 0x203   :  { %633 = vpow2.f32 %v512_v7 }
 0x20e   :  { %v632_v9 = vpop.eup %631 }
 0x20f   :  { %v120_v10 = vadd.f32 1.0, %v632_v9 }
 0x210   :  { %v634_v11 = vpop.eup %633 }
 0x211   :  { %635 = vrcp.f32 %v120_v10  ;;  %v121_v12 = vadd.f32 1.0, %v634_v11 }
 0x213   :  { %637 = vrcp.f32 %v121_v12 }
 0x21e   :  { %v636_v15 = vpop.eup %635 }
 0x21f   :  { %v138_v17 = vmul.f32 %v636_v15, %v513_v13 }
 0x220   :  { %v638_v16 = vpop.eup %637 }
 0x221   :  { %v139_v18 = vmul.f32 %v638_v16, %v135_v14  ;;  %v140_v20 = vpack.c.bf16 %v138_v17, %v138_v17 }
 0x223   :  { %v141_v19 = vpack.c.bf16 %v139_v18, %v139_v18 }
 0x225   :  { %485 = vmatprep.mubr.bf16.mxu0 %v141_v19 }
 0x226   :  { %486 = vmatmul.mubr.bf16.vlgmr.msra.gmra.mxu0 %v140_v20 }
 0x2e6   :  { %v585_v26 = vpop.f32.mrf.mxu0 }
 0x2e8   :  { %v586_v27 = vpop.f32.mrf.mxu0 }
 0x2e9   :  { %v587_v28 = vadd.f32 %v586_v27, %v585_v26 }
 0x2ea   :  { %v588_v30 = vpop.f32.mrf.mxu0 }
 0x2eb   :  { %v488_v31 = vadd.f32 %v587_v28, %v565_v23 }
 0x2ec   :  { %v589_v32 = vpop.f32.mrf.mxu0 }
 0x2ed   :  { %v500_v33 = vadd.f32 %v546_v29, %v488_v31 }
 0x2ef   :  { %502 = vst.msk [vmem:[%s811_s8] sm:$0x3] %vm501_vm3, %v500_v33 }

// kernel: _lambda_.113
= control target key start
LH: loop header
LB: loop body
LE: loop exit
PB: predicated region body
PF: predicated region fallthrough
CT: control target
= control target key end

     0   :  { %vm32_vm0 = vcmask 58368   ;;  %s838_s0 = inlined_call_operand.vmem [shape: f32[2,8], index: 0, kind: input, shape index: {}]   ;;  %s839_s1 = inlined_call_operand.vmem [shape: f32[2,256], index: 1, kind: input, shape index: {}, may-alias: {1,2}]   ;;  %s840_s2 = inlined_call_operand.vmem [shape: f32[2,256], index: 2, kind: input, shape index: {}, may-alias: {1,2}]   ;;  %s841_s3 = inlined_call_operand.vmem [shape: bf16[8,256], index: 3, kind: input, shape index: {}]   ;;  %s842_s4 = inlined_call_operand.vmem [shape: f32[1,256], index: 4, kind: input, shape index: {}]   ;;  %s843_s5 = inlined_call_operand.vmem [shape: bf16[256,10], index: 5, kind: input, shape index: {}]   ;;  %s844_s6 = inlined_call_operand.vmem [shape: bf16[256,10], index: 6, kind: input, shape index: {}]   ;;  %s845_s7 = inlined_call_operand.vmem [shape: f32[1,10], index: 7, kind: input, shape index: {}]   ;;  %s846_s8 = inlined_call_operand.hbm [shape: f32[2,10], index: 8, kind: output, shape index: {}]  }
   0x1   :  { %v31_v0 = vld [vmem:[%s838_s0] sm:$0x3] }
   0x2   :  { %v33_v1 = vsel %vm32_vm0, %v31_v0, -inf }
   0x3   :  { %34 = vmax.xlane.f32.xlu0 %v33_v1 }
   0x4   :  { %13 = vsyncpa [#allocation3], 0  ;;  %v45_v7 = vld [vmem:[%s841_s3] sm:$0xff]  ;;  %vm67_vm1 = vcmask 1043456   ;;  %v673_v10 = vmov 0   ;;  %vm63_vm2 = vcmask 64512   ;;  %v48_v33 = vlaneseq }
   0x5   :  { %v519_v8 = vcombine.high %v45_v7, %v45_v7  ;;  %v518_v9 = vcombine.low %v45_v7, %v45_v7  ;;  %106 = vmatprep.mubr.bf16.mxu0 %v673_v10  ;;  %v607_v16 = vld [vmem:[%s844_s6 + $0x78] sm:$0xff]   ;;  %v609_v18 = vld [vmem:[%s844_s6 + $0x70] sm:$0xff]   ;;  %v613_v22 = vld [vmem:[%s844_s6 + $0x68] sm:$0xff]   ;;  %v674_v39 = vmov 1983009808   ;;  %s675_s26 = smov [#allocation2]  }
   0x6   :  { %v608_v17 = vld [vmem:[%s844_s6 + $0x38] sm:$0xff]   ;;  %558 = vmatprep.subr.bf16.mxu1 %v607_v16  ;;  %v610_v19 = vld [vmem:[%s844_s6 + $0x30] sm:$0xff]   ;;  %v614_v23 = vld [vmem:[%s844_s6 + $0x28] sm:$0xff]   ;;  %v147_v40 = vunpack.c.l.s4 %v674_v39  ;;  %v49_v43 = vshrl.u32 %v48_v33, 7  ;;  %s510_s27 = sshll.u32 %s675_s26, 4  ;;  %vm502_vm3 = vcmask 74752   ;;  %s511_s27 = int_to_ptr.vmem [resolvable:$true] %s510_s27 }
   0x7   :  { %520 = vmatprep.subr.msk.bf16.mxu0 %vm67_vm1, %v519_v8  ;;  %v69_v11 = vsel %vm67_vm1, %v518_v9, 0  ;;  %559 = vmatpush3.bf16.msra.mxu1 %v608_v17  ;;  %v611_v20 = vld [vmem:[%s843_s5 + $0x78] sm:$0xff]   ;;  %v615_v24 = vld [vmem:[%s843_s5 + $0x70] sm:$0xff]   ;;  %v617_v26 = vld [vmem:[%s844_s6 + $0x60] sm:$0xff]   ;;  %s651_s28 = scalar_lea.vmem %s511_s27, 32  ;;  %p656_p1 = scmp.lt.s32.totalorder %s511_s27, %s511_s27 }
   0x8   :  { %89 = vmatpush1.bf16.msra.mxu0 %v69_v11  ;;  %560 = vmatprep.subr.bf16.mxu1 %v609_v18  ;;  %v612_v21 = vld [vmem:[%s843_s5 + $0x38] sm:$0xff]   ;;  %v616_v25 = vld [vmem:[%s843_s5 + $0x30] sm:$0xff]   ;;  %v618_v27 = vld [vmem:[%s844_s6 + $0x20] sm:$0xff]   ;;  %v148_v45 = vunpack.c.0.s8 %v147_v40  ;;  %v50_v60 = vsub.s32 0, %v49_v43  ;;  %v54_v62 = vsub.s32 1, %v49_v43  ;;  %p652_p0 = scmp.ne.s32.totalorder %s511_s27, %s651_s28  ;;  %p657_p2 = scmp.lt.s32.totalorder %s651_s28, %s651_s28 }
   0x9   :  { %580 = vmatprep.subr.bf16.mxu0 %v611_v20  ;;  %v619_v28 = vld [vmem:[%s843_s5 + $0x68] sm:$0xff]   ;;  %v621_v30 = vld [vmem:[%s844_s6 + $0x58] sm:$0xff]   ;;  %v623_v32 = vld [vmem:[%s843_s5 + $0x60] sm:$0xff]  }
   0xa   :  { %v620_v29 = vld [vmem:[%s843_s5 + $0x28] sm:$0xff]   ;;  %v622_v31 = vld [vmem:[%s844_s6 + $0x18] sm:$0xff]   ;;  %v624_v34 = vld [vmem:[%s843_s5 + $0x20] sm:$0xff]   ;;  %v151_v50 = vsub.s32 %v148_v45, %v49_v43  ;;  %p658_p3 = por %p657_p2, %p656_p1 }
   0xb   :  { %561 = vmatpush3.bf16.msra.mxu1 %v610_v19  ;;  %v625_v35 = vld [vmem:[%s844_s6 + $0x50] sm:$0xff]   ;;  %v627_v37 = vld [vmem:[%s843_s5 + $0x58] sm:$0xff]   ;;  %v629_v41 = vld [vmem:[%s844_s6 + $0x48] sm:$0xff]  }
   0xc   :  { %562 = vmatprep.subr.bf16.mxu1 %v613_v22  ;;  %v626_v36 = vld [vmem:[%s844_s6 + $0x10] sm:$0xff]   ;;  %v628_v38 = vld [vmem:[%s843_s5 + $0x18] sm:$0xff]   ;;  %v630_v44 = vld [vmem:[%s844_s6 + $0x8] sm:$0xff]   ;;  %p659_p4 = pnand %p658_p3, %p652_p0 }
   0xd   :  { %v631_v42 = vld [vmem:[%s843_s5 + $0x50] sm:$0xff]   ;;  %v633_v46 = vld [vmem:[%s844_s6 + $0x40] sm:$0xff]   ;;  %v635_v51 = vld [vmem:[%s843_s5 + $0x48] sm:$0xff]  }
   0xe   :  { %v143_v47 = vld [vmem:[%s840_s2] sm:$0xf]  ;;  %v632_v48 = vld [vmem:[%s843_s5 + $0x10] sm:$0xff]   ;;  %v636_v55 = vld [vmem:[%s843_s5 + $0x8] sm:$0xff]  }
   0xf   :  { %563 = vmatpush3.bf16.msra.mxu1 %v614_v23  ;;  %v144_v49 = vmul.f32 0.25, %v143_v47  ;;  %v634_v52 = vld [vmem:[%s844_s6] sm:$0xff]  }
  0x10   :  { %564 = vmatprep.subr.bf16.mxu1 %v617_v26  ;;  %v637_v57 = vld [vmem:[%s843_s5 + $0x40] sm:$0xff]  }
  0x11   :  { %v152_v53 = vrot.slane %v144_v49, %v151_v50  ;;  %v638_v59 = vld [vmem:[%s843_s5] sm:$0xff]  }
  0x12   :  { %v46_v61 = vld [vmem:[%s842_s4] sm:$0x3] }
  0x13   :  { %565 = vmatpush3.bf16.msra.mxu1 %v618_v27  ;;  %v153_v54 = vcombine.high %v152_v53, %v152_v53  ;;  %v156_v56 = vpack.c.bf16 %v152_v53, %v152_v53  ;;  %v51_v63 = vrot.slane %v46_v61, %v50_v60 }
  0x14   :  { %566 = vmatprep.subr.bf16.mxu1 %v621_v30  ;;  %v557_v30 = vld [vmem:[%s845_s7] ss:$0 sm:$0xff] }
  0x15   :  { %v157_v58 = vpack.c.bf16 %v153_v54, %v153_v54 }
  0x17   :  { %567 = vmatpush3.bf16.msra.mxu1 %v622_v31  ;;  %350 = vmatprep.mubr.bf16.mxu1 %v157_v58 }
  0x18   :  { %568 = vmatprep.subr.bf16.mxu1 %v625_v35 }
  0x1b   :  { %569 = vmatpush3.bf16.msra.mxu1 %v626_v36 }
  0x1c   :  { %570 = vmatprep.subr.bf16.mxu1 %v629_v41 }
  0x1f   :  { %571 = vmatpush3.bf16.msra.mxu1 %v630_v44 }
  0x20   :  { %572 = vmatprep.subr.bf16.mxu1 %v633_v46 }
  0x23   :  { %573 = vmatpush3.bf16.msra.mxu1 %v634_v52 }
  0x26   :  { %351 = vmatmul.mubr.bf16.vlgmr.msra.gmra.mxu1 %v156_v56 }
  0x8c   :  { %v35_v2 = vpop.xlane.xlu0 %34 }
  0x8d   :  { %v36_v3 = vsub.f32 %v31_v0, %v35_v2  ;;  %v55_v0 = vrot.slane %v46_v61, %v54_v62 }
  0x8f   :  { %v37_v4 = vmul.f32 1.442695, %v36_v3 }
  0x91   :  { %639 = vpow2.f32 %v37_v4 }
  0x9e   :  { %v640_v5 = vpop.eup %639 }
  0x9f   :  { %v39_v6 = vsel %vm32_vm0, %v640_v5, 0.0 }
  0xa0   :  { %40 = vadd.xlane.f32.xlu0 %v39_v6 }
 0x129   :  { %v41_v12 = vpop.xlane.xlu0 %40 }
 0x12a   :  { %641 = vrcp.f32 %v41_v12 }
 0x137   :  { %v642_v13 = vpop.eup %641 }
 0x138   :  { %v43_v14 = vmul.f32 %v642_v13, %v640_v5  ;;  %v524_v13 = vld.sshfl [vmem:[%s839_s1] sm:$0x33 pattern:$0x76325410] }
 0x13a   :  { %v44_v15 = vpack.c.bf16 %v43_v14, %v43_v14  ;;  %v136_v14 = vcombine.high %v524_v13, %v524_v13 }
 0x13c   :  { %521 = vmatmul.mubr.msk.bf16.vlgmr.msra.gmra.mxu0 %vm63_vm2, %v44_v15 }
 0x13d   :  { %581 = vmatpush3.bf16.msra.mxu0 %v612_v21  ;;  %v574_v21 = vpop.f32.mrf.mxu1 }
 0x13e   :  { %582 = vmatprep.subr.bf16.mxu0 %v615_v24 }
 0x13f   :  { %v575_v22 = vpop.f32.mrf.mxu1 }
 0x140   :  { %v576_v23 = vadd.f32 %v575_v22, %v574_v21 }
 0x141   :  { %583 = vmatpush3.bf16.msra.mxu0 %v616_v25  ;;  %v577_v24 = vpop.f32.mrf.mxu1 }
 0x142   :  { %584 = vmatprep.subr.bf16.mxu0 %v619_v28 }
 0x143   :  { %v578_v25 = vpop.f32.mrf.mxu1 }
 0x145   :  { %585 = vmatpush3.bf16.msra.mxu0 %v620_v29 }
 0x146   :  { %586 = vmatprep.subr.bf16.mxu0 %v623_v32 }
 0x149   :  { %587 = vmatpush3.bf16.msra.mxu0 %v624_v34 }
 0x14a   :  { %588 = vmatprep.subr.bf16.mxu0 %v627_v37 }
 0x14d   :  { %589 = vmatpush3.bf16.msra.mxu0 %v628_v38 }
 0x14e   :  { %590 = vmatprep.subr.bf16.mxu0 %v631_v42 }
 0x151   :  { %591 = vmatpush3.bf16.msra.mxu0 %v632_v48 }
 0x152   :  { %592 = vmatprep.subr.bf16.mxu0 %v635_v51 }
 0x155   :  { %593 = vmatpush3.bf16.msra.mxu0 %v636_v55 }
 0x156   :  { %594 = vmatprep.subr.bf16.mxu0 %v637_v57 }
 0x159   :  { %595 = vmatpush3.bf16.msra.mxu0 %v638_v59 }
 0x1fc   :  { %v108_v1 = vpop.f32.mrf.mxu0 }
 0x1fd   :  { %v109_v2 = vadd.f32 %v108_v1, %v51_v63 }
 0x1fe   :  { %v110_v3 = vpop.f32.mrf.mxu0 }
 0x1ff   :  { %v522_v4 = vmul.f32 -1.442695, %v109_v2  ;;  %v111_v5 = vadd.f32 %v110_v3, %v55_v0 }
 0x200   :  { %v112_v6 = vpop.f32.mrf.mxu0 }
 0x201   :  { %643 = vpow2.f32 %v522_v4  ;;  %v523_v7 = vmul.f32 -1.442695, %v111_v5 }
 0x202   :  { %v113_v8 = vpop.f32.mrf.mxu0 }
 0x203   :  { %645 = vpow2.f32 %v523_v7 }
 0x20e   :  { %v644_v9 = vpop.eup %643 }
 0x20f   :  { %v121_v10 = vadd.f32 1.0, %v644_v9 }
 0x210   :  { %v646_v11 = vpop.eup %645 }
 0x211   :  { %647 = vrcp.f32 %v121_v10  ;;  %v122_v12 = vadd.f32 1.0, %v646_v11 }
 0x213   :  { %649 = vrcp.f32 %v122_v12 }
 0x21e   :  { %v648_v15 = vpop.eup %647 }
 0x21f   :  { %v139_v17 = vmul.f32 %v648_v15, %v524_v13 }
 0x220   :  { %v650_v16 = vpop.eup %649 }
 0x221   :  { %v140_v18 = vmul.f32 %v650_v16, %v136_v14  ;;  %v141_v20 = vpack.c.bf16 %v139_v17, %v139_v17 }
 0x223   :  { %v142_v19 = vpack.c.bf16 %v140_v18, %v140_v18 }
 0x225   :  { %486 = vmatprep.mubr.bf16.mxu0 %v142_v19 }
 0x226   :  { %487 = vmatmul.mubr.bf16.vlgmr.msra.gmra.mxu0 %v141_v20 }
 0x2e6   :  { %v596_v26 = vpop.f32.mrf.mxu0 }
 0x2e8   :  { %v597_v27 = vpop.f32.mrf.mxu0 }
 0x2e9   :  { %v598_v28 = vadd.f32 %v597_v27, %v596_v26 }
 0x2ea   :  { %v599_v29 = vpop.f32.mrf.mxu0 }
 0x2eb   :  { %v489_v31 = vadd.f32 %v598_v28, %v576_v23 }
 0x2ec   :  { %v600_v32 = vpop.f32.mrf.mxu0 }
 0x2ed   :  { %v501_v33 = vadd.f32 %v557_v30, %v489_v31 }
 0x2ef   :  { %503 = vst.msk [vmem:[#allocation2] sm:$0x3] %vm502_vm3, %v501_v33 }
 0x2f0   :  { %662 = shalt.err (!%p659_p4)
}
 0x2f1   :  { %513 = dma.vmem_to_hbm [thread:$0]  %s511_s27, 32, %s846_s8, [#allocation3]  }
 0x2f2   :  { %671 = dma.done.wait [#allocation3], 32  }
 0x2f3   :  { %672 = vsyncadd [#allocation3], 4294967264 }
 0x2f4   :  { %517 = vsyncpa [#allocation3], 1 }

</bundles_post_ra>
